<compile_context>
chip_gen: v7x
topology: tpu7x:2x2x1
jax: 0.10.0
libtpu: 0.0.40
codegen_flags: <defaults>
</compile_context>

<pallas_src>
import functools

import jax
import jax.numpy as jnp
from jax.experimental import pallas as pl
from jax.experimental.pallas import tpu as pltpu

EPS = 1e-5
LANE = 128


def _basic_block_kernel(x_ref, w1_ref, w2_ref, g1_ref, b1_ref, g2_ref, b2_ref,
                        o_ref,
                        y1_ref, y2_ref, ypad_ref,
                        s1s_ref, s1q_ref, s2s_ref, s2q_ref,
                        *, H, W, Cp, inv_M):
    p = pl.program_id(0)          # pass: 0 = conv1, 1 = conv2, 2 = finalize
    n = pl.program_id(1)          # batch sample
    HW = H * W

    def conv3x3(load_window, w_ref):
        # 3x3 conv (stride 1, pad 1) as 9 accumulated shifted matmuls (MXU, bf16 in, f32 acc).
        acc = jnp.zeros((HW, Cp), jnp.float32)
        for k in range(9):
            ky, kx = k // 3, k % 3
            lhs = load_window(ky, kx).reshape(HW, Cp).astype(jnp.bfloat16)
            acc = acc + jnp.dot(lhs, w_ref[k], preferred_element_type=jnp.float32)
        return acc

    def bn_affine(ss_ref, sq_ref, g_ref, b_ref):
        # Training-mode BatchNorm folded to y*scale + shift (one-pass biased variance).
        mean = ss_ref[...] * inv_M
        var = sq_ref[...] * inv_M - mean * mean
        scale = g_ref[...] * jax.lax.rsqrt(var + EPS)
        shift = b_ref[...] - mean * scale
        return scale, shift

    # ---------------- pass 0: conv1 (raw) + batch statistics ----------------
    @pl.when(p == 0)
    def _pass0():
        @pl.when(n == 0)
        def _init():
            s1s_ref[...] = jnp.zeros_like(s1s_ref)
            s1q_ref[...] = jnp.zeros_like(s1q_ref)

        acc = conv3x3(lambda ky, kx: x_ref[0, ky:ky + H, kx:kx + W, :], w1_ref)
        y1_ref[n] = acc
        s1s_ref[...] += jnp.sum(acc, axis=0, keepdims=True)
        s1q_ref[...] += jnp.sum(acc * acc, axis=0, keepdims=True)

    # -------- pass 1: bn1 + relu + conv2 (raw) + batch statistics -----------
    @pl.when(p == 1)
    def _pass1():
        @pl.when(n == 0)
        def _init():
            s2s_ref[...] = jnp.zeros_like(s2s_ref)
            s2q_ref[...] = jnp.zeros_like(s2q_ref)

        scale1, shift1 = bn_affine(s1s_ref, s1q_ref, g1_ref, b1_ref)
        a1 = jnp.maximum(y1_ref[n] * scale1 + shift1, 0.0)          # (HW, Cp) f32

        # zero-padded (H+2, W+2, Cp) activation so conv2's halo stays in VMEM
        ypad_ref[...] = jnp.zeros_like(ypad_ref)
        ypad_ref[1:1 + H, 1:1 + W, :] = a1.reshape(H, W, Cp)

        acc = conv3x3(lambda ky, kx: ypad_ref[ky:ky + H, kx:kx + W, :], w2_ref)
        y2_ref[n] = acc
        s2s_ref[...] += jnp.sum(acc, axis=0, keepdims=True)
        s2q_ref[...] += jnp.sum(acc * acc, axis=0, keepdims=True)

    # ------------- pass 2: bn2 + residual add + relu -> output --------------
    @pl.when(p == 2)
    def _pass2():
        scale2, shift2 = bn_affine(s2s_ref, s2q_ref, g2_ref, b2_ref)
        identity = x_ref[0, 1:1 + H, 1:1 + W, :].reshape(HW, Cp).astype(jnp.float32)
        out = jnp.maximum(y2_ref[n] * scale2 + shift2 + identity, 0.0)
        o_ref[...] = out.reshape(1, H, W, Cp).astype(o_ref.dtype)


def _round_up(x, m):
    return (x + m - 1) // m * m


def basic_block_forward(x_nchw, params):
    """BasicBlock forward (stride=1, downsample=None), training-mode BatchNorm."""
    N, C, H, W = x_nchw.shape
    planes = params["w1"].shape[-1]
    assert C == planes, "stride=1 / downsample=None requires inplanes == planes"
    Cp = _round_up(max(C, LANE), LANE)   # lane-dense channel dimension

    # ---- layout glue: NCHW -> NHWC, channel pad to lane width, spatial pad for 3x3 ----
    x_nhwc = jnp.transpose(x_nchw, (0, 2, 3, 1)).astype(jnp.bfloat16)
    x_nhwc = jnp.pad(x_nhwc, ((0, 0), (0, 0), (0, 0), (0, Cp - C)))
    x_pad = jnp.pad(x_nhwc, ((0, 0), (1, 1), (1, 1), (0, 0)))

    def pad_w(w):  # (3, 3, Cin, Cout) -> (9, Cp, Cp) bf16
        cin, cout = w.shape[2], w.shape[3]
        w = jnp.pad(w, ((0, 0), (0, 0), (0, Cp - cin), (0, Cp - cout)))
        return w.reshape(9, Cp, Cp).astype(jnp.bfloat16)

    def pad_v(v):  # (C,) -> (1, Cp) f32
        return jnp.pad(v.astype(jnp.float32), (0, Cp - v.shape[0])).reshape(1, Cp)

    w1, w2 = pad_w(params["w1"]), pad_w(params["w2"])
    g1, b1 = pad_v(params["g1"]), pad_v(params["b1"])
    g2, b2 = pad_v(params["g2"]), pad_v(params["b2"])

    kernel = functools.partial(_basic_block_kernel, H=H, W=W, Cp=Cp,
                               inv_M=1.0 / float(N * H * W))

    const = lambda shape: pl.BlockSpec(shape, lambda p, n: (0,) * len(shape))

    out = pl.pallas_call(
        kernel,
        out_shape=jax.ShapeDtypeStruct((N, H, W, Cp), jnp.float32),
        grid=(3, N),
        in_specs=[
            pl.BlockSpec((1, H + 2, W + 2, Cp), lambda p, n: (n, 0, 0, 0)),  # x (padded)
            const((9, Cp, Cp)),            # w1 — constant index map: stays VMEM-resident
            const((9, Cp, Cp)),            # w2
            const((1, Cp)), const((1, Cp)),  # gamma1 / beta1
            const((1, Cp)), const((1, Cp)),  # gamma2 / beta2
        ],
        out_specs=pl.BlockSpec((1, H, W, Cp), lambda p, n: (n, 0, 0, 0)),
        scratch_shapes=[
            pltpu.VMEM((N, H * W, Cp), jnp.float32),       # raw conv1 output (all samples)
            pltpu.VMEM((N, H * W, Cp), jnp.float32),       # raw conv2 output (all samples)
            pltpu.VMEM((H + 2, W + 2, Cp), jnp.float32),   # zero-padded bn1 activation
            pltpu.VMEM((1, Cp), jnp.float32),              # sum    (conv1)
            pltpu.VMEM((1, Cp), jnp.float32),              # sum sq (conv1)
            pltpu.VMEM((1, Cp), jnp.float32),              # sum    (conv2)
            pltpu.VMEM((1, Cp), jnp.float32),              # sum sq (conv2)
        ],
        compiler_params=pltpu.CompilerParams(
            # batch-statistics BN serializes the pass axis and the batch reduction,
            # so both axes must be "arbitrary" (no megacore split of the stats).
            dimension_semantics=("arbitrary", "arbitrary")),
    )(x_pad, w1, w2, g1, b1, g2, b2)

    out = out[..., :planes]                       # drop lane padding
    return jnp.transpose(out, (0, 3, 1, 2))       # back to NCHW (f32)


def _reference_forward(x_nchw, params):
    # Pure-JAX reference mirroring the kernel's precision choices
    # (bf16 matmul inputs, f32 accumulation, batch-stats BN with biased variance).
    x = jnp.transpose(x_nchw, (0, 2, 3, 1)).astype(jnp.bfloat16)   # NHWC

    def conv(a, w):
        return jax.lax.conv_general_dilated(
            a, w.astype(jnp.bfloat16), window_strides=(1, 1), padding="SAME",
            dimension_numbers=("NHWC", "HWIO", "NHWC"),
            preferred_element_type=jnp.float32)

    def bn(y, g, b):
        mean = jnp.mean(y, axis=(0, 1, 2), keepdims=True)
        var = jnp.mean(y * y, axis=(0, 1, 2), keepdims=True) - mean * mean
        return (y - mean) * jax.lax.rsqrt(var + EPS) * g + b

    y1 = jnp.maximum(bn(conv(x, params["w1"]), params["g1"], params["b1"]), 0.0)
    y2 = bn(conv(y1.astype(jnp.bfloat16), params["w2"]), params["g2"], params["b2"])
    out = jnp.maximum(y2 + x.astype(jnp.float32), 0.0)
    return jnp.transpose(out, (0, 3, 1, 2))


def init_params(key, inplanes, planes):
    k1, k2 = jax.random.split(key)
    w1 = jax.random.normal(k1, (3, 3, inplanes, planes), jnp.float32) * (2.0 / (9 * inplanes)) ** 0.5
    w2 = jax.random.normal(k2, (3, 3, planes, planes), jnp.float32) * (2.0 / (9 * planes)) ** 0.5
    ones = lambda c: jnp.ones((c,), jnp.float32)
    zeros = lambda c: jnp.zeros((c,), jnp.float32)
    return dict(w1=w1, g1=ones(planes), b1=zeros(planes),
                w2=w2, g2=ones(planes), b2=zeros(planes))


if __name__ == "__main__":
    key = jax.random.PRNGKey(0)
    kx, kp = jax.random.split(key)

    # inplanes == planes (stride=1, downsample=None) so the residual add is valid.
    N, C, H, W = 2, 4, 16, 16
    x = jax.random.normal(kx, (N, C, H, W), jnp.float32)
    params = init_params(kp, C, C)

    fwd = jax.jit(basic_block_forward)
    out = jax.block_until_ready(fwd(x, params))
    assert out.shape == (N, C, H, W), out.shape

    ref = jax.block_until_ready(_reference_forward(x, params))
    err = float(jnp.max(jnp.abs(out - ref)))
    assert err < 5e-2, f"max abs error vs reference: {err}"

    # TODO(synk): BatchNorm2d running_mean/running_var buffer updates (a training-mode
    # side effect) are not reproduced; they do not affect the forward output.
    print("KERNEL_OK")
</pallas_src>

<mosaic_0001>
module attributes {stable_mosaic.version = 11 : i64} {
  func.func @_basic_block_kernel(%arg0: i32, %arg1: i32, %arg2: memref<1x18x18x128xbf16, #tpu.memory_space<vmem>>, %arg3: memref<9x128x128xbf16, #tpu.memory_space<vmem>>, %arg4: memref<9x128x128xbf16, #tpu.memory_space<vmem>>, %arg5: memref<1x128xf32, #tpu.memory_space<vmem>>, %arg6: memref<1x128xf32, #tpu.memory_space<vmem>>, %arg7: memref<1x128xf32, #tpu.memory_space<vmem>>, %arg8: memref<1x128xf32, #tpu.memory_space<vmem>>, %arg9: memref<1x16x16x128xf32, #tpu.memory_space<vmem>>, %arg10: memref<2x256x128xf32, #tpu.memory_space<vmem>>, %arg11: memref<2x256x128xf32, #tpu.memory_space<vmem>>, %arg12: memref<18x18x128xf32, #tpu.memory_space<vmem>>, %arg13: memref<1x128xf32, #tpu.memory_space<vmem>>, %arg14: memref<1x128xf32, #tpu.memory_space<vmem>>, %arg15: memref<1x128xf32, #tpu.memory_space<vmem>>, %arg16: memref<1x128xf32, #tpu.memory_space<vmem>>) attributes {dimension_semantics = [#tpu.dimension_semantics<arbitrary>, #tpu.dimension_semantics<arbitrary>], iteration_bounds = array<i64: 3, 2>, scalar_prefetch = 0 : i64, scratch_operands = 7 : i64, tpu.core_type = #tpu.core_type<tc>, window_params = [{transform_indices = @transform_0, window_bounds = array<i64: 1, 18, 18, 128>}, {pipeline_mode = #tpu.pipeline_mode<synchronous>, transform_indices = @transform_1, window_bounds = array<i64: 9, 128, 128>}, {pipeline_mode = #tpu.pipeline_mode<synchronous>, transform_indices = @transform_2, window_bounds = array<i64: 9, 128, 128>}, {pipeline_mode = #tpu.pipeline_mode<synchronous>, transform_indices = @transform_3, window_bounds = array<i64: 1, 128>}, {pipeline_mode = #tpu.pipeline_mode<synchronous>, transform_indices = @transform_4, window_bounds = array<i64: 1, 128>}, {pipeline_mode = #tpu.pipeline_mode<synchronous>, transform_indices = @transform_5, window_bounds = array<i64: 1, 128>}, {pipeline_mode = #tpu.pipeline_mode<synchronous>, transform_indices = @transform_6, window_bounds = array<i64: 1, 128>}, {transform_indices = @transform_7, window_bounds = array<i64: 1, 16, 16, 128>}]} {
    %c0_i32 = arith.constant 0 : i32
    %0 = arith.cmpi eq, %arg0, %c0_i32 : i32
    %1 = arith.extui %0 : i1 to i32
    %c0_i32_0 = arith.constant 0 : i32
    %2 = arith.cmpi ne, %1, %c0_i32_0 : i32
    scf.if %2 {
      %c0_i32_3 = arith.constant 0 : i32
      %9 = arith.cmpi eq, %arg1, %c0_i32_3 : i32
      %10 = arith.extui %9 : i1 to i32
      %c0_i32_4 = arith.constant 0 : i32
      %11 = arith.cmpi ne, %10, %c0_i32_4 : i32
      scf.if %11 {
        %cst_80 = arith.constant 0.000000e+00 : f32
        %91 = vector.broadcast %cst_80 : f32 to vector<1x128xf32>
        %c0_81 = arith.constant 0 : index
        %c0_82 = arith.constant 0 : index
        %92 = vector.load %arg13[%c0_81, %c0_82] : memref<1x128xf32, #tpu.memory_space<vmem>>, vector<1x128xf32>
        tpu.vector_store %arg13[%c0_81, %c0_82], %91 {strides = array<i32>} : memref<1x128xf32, #tpu.memory_space<vmem>>, vector<1x128xf32>,
        %cst_83 = arith.constant 0.000000e+00 : f32
        %93 = vector.broadcast %cst_83 : f32 to vector<1x128xf32>
        %c0_84 = arith.constant 0 : index
        %c0_85 = arith.constant 0 : index
        %94 = vector.load %arg14[%c0_84, %c0_85] : memref<1x128xf32, #tpu.memory_space<vmem>>, vector<1x128xf32>
        tpu.vector_store %arg14[%c0_84, %c0_85], %93 {strides = array<i32>} : memref<1x128xf32, #tpu.memory_space<vmem>>, vector<1x128xf32>,
      } else {
      }
      %cst = arith.constant 0.000000e+00 : f32
      %12 = vector.broadcast %cst : f32 to vector<256x128xf32>
      %c0 = arith.constant 0 : index
      %c0_5 = arith.constant 0 : index
      %c0_6 = arith.constant 0 : index
      %c0_7 = arith.constant 0 : index
      %13 = vector.load %arg2[%c0, %c0_5, %c0_6, %c0_7] : memref<1x18x18x128xbf16, #tpu.memory_space<vmem>>, vector<1x16x16x128xbf16>
      %14 = vector.shape_cast %13 : vector<1x16x16x128xbf16> to vector<16x16x128xbf16>
      %15 = vector.shape_cast %14 : vector<16x16x128xbf16> to vector<256x128xbf16>
      %c0_8 = arith.constant 0 : index
      %c0_9 = arith.constant 0 : index
      %c0_10 = arith.constant 0 : index
      %16 = vector.load %arg3[%c0_8, %c0_9, %c0_10] : memref<9x128x128xbf16, #tpu.memory_space<vmem>>, vector<1x128x128xbf16>
      %17 = vector.shape_cast %16 : vector<1x128x128xbf16> to vector<128x128xbf16>
      %cst_11 = arith.constant dense<0.000000e+00> : vector<256x128xf32>
      %18 = tpu.matmul %15, %17, %cst_11 {dimension_numbers = #tpu.dot_dimension_numbers<[1], [0], [0], [1], [0, 0, 1, 1], [], []>} : vector<256x128xbf16>, vector<128x128xbf16>, vector<256x128xf32> -> vector<256x128xf32>
      %19 = arith.addf %12, %18 : vector<256x128xf32>
      %c0_12 = arith.constant 0 : index
      %c0_13 = arith.constant 0 : index
      %c1 = arith.constant 1 : index
      %c0_14 = arith.constant 0 : index
      %20 = vector.load %arg2[%c0_12, %c0_13, %c1, %c0_14] : memref<1x18x18x128xbf16, #tpu.memory_space<vmem>>, vector<1x16x16x128xbf16>
      %21 = vector.shape_cast %20 : vector<1x16x16x128xbf16> to vector<16x16x128xbf16>
      %22 = vector.shape_cast %21 : vector<16x16x128xbf16> to vector<256x128xbf16>
      %c1_15 = arith.constant 1 : index
      %c0_16 = arith.constant 0 : index
      %c0_17 = arith.constant 0 : index
      %23 = vector.load %arg3[%c1_15, %c0_16, %c0_17] : memref<9x128x128xbf16, #tpu.memory_space<vmem>>, vector<1x128x128xbf16>
      %24 = vector.shape_cast %23 : vector<1x128x128xbf16> to vector<128x128xbf16>
      %cst_18 = arith.constant dense<0.000000e+00> : vector<256x128xf32>
      %25 = tpu.matmul %22, %24, %cst_18 {dimension_numbers = #tpu.dot_dimension_numbers<[1], [0], [0], [1], [0, 0, 1, 1], [], []>} : vector<256x128xbf16>, vector<128x128xbf16>, vector<256x128xf32> -> vector<256x128xf32>
      %26 = arith.addf %19, %25 : vector<256x128xf32>
      %c0_19 = arith.constant 0 : index
      %c0_20 = arith.constant 0 : index
      %c2 = arith.constant 2 : index
      %c0_21 = arith.constant 0 : index
      %27 = vector.load %arg2[%c0_19, %c0_20, %c2, %c0_21] : memref<1x18x18x128xbf16, #tpu.memory_space<vmem>>, vector<1x16x16x128xbf16>
      %28 = vector.shape_cast %27 : vector<1x16x16x128xbf16> to vector<16x16x128xbf16>
      %29 = vector.shape_cast %28 : vector<16x16x128xbf16> to vector<256x128xbf16>
      %c2_22 = arith.constant 2 : index
      %c0_23 = arith.constant 0 : index
      %c0_24 = arith.constant 0 : index
      %30 = vector.load %arg3[%c2_22, %c0_23, %c0_24] : memref<9x128x128xbf16, #tpu.memory_space<vmem>>, vector<1x128x128xbf16>
      %31 = vector.shape_cast %30 : vector<1x128x128xbf16> to vector<128x128xbf16>
      %cst_25 = arith.constant dense<0.000000e+00> : vector<256x128xf32>
      %32 = tpu.matmul %29, %31, %cst_25 {dimension_numbers = #tpu.dot_dimension_numbers<[1], [0], [0], [1], [0, 0, 1, 1], [], []>} : vector<256x128xbf16>, vector<128x128xbf16>, vector<256x128xf32> -> vector<256x128xf32>
      %33 = arith.addf %26, %32 : vector<256x128xf32>
      %c0_26 = arith.constant 0 : index
      %c1_27 = arith.constant 1 : index
      %c0_28 = arith.constant 0 : index
      %c0_29 = arith.constant 0 : index
      %34 = vector.load %arg2[%c0_26, %c1_27, %c0_28, %c0_29] : memref<1x18x18x128xbf16, #tpu.memory_space<vmem>>, vector<1x16x16x128xbf16>
      %35 = vector.shape_cast %34 : vector<1x16x16x128xbf16> to vector<16x16x128xbf16>
      %36 = vector.shape_cast %35 : vector<16x16x128xbf16> to vector<256x128xbf16>
      %c3 = arith.constant 3 : index
      %c0_30 = arith.constant 0 : index
      %c0_31 = arith.constant 0 : index
      %37 = vector.load %arg3[%c3, %c0_30, %c0_31] : memref<9x128x128xbf16, #tpu.memory_space<vmem>>, vector<1x128x128xbf16>
      %38 = vector.shape_cast %37 : vector<1x128x128xbf16> to vector<128x128xbf16>
      %cst_32 = arith.constant dense<0.000000e+00> : vector<256x128xf32>
      %39 = tpu.matmul %36, %38, %cst_32 {dimension_numbers = #tpu.dot_dimension_numbers<[1], [0], [0], [1], [0, 0, 1, 1], [], []>} : vector<256x128xbf16>, vector<128x128xbf16>, vector<256x128xf32> -> vector<256x128xf32>
      %40 = arith.addf %33, %39 : vector<256x128xf32>
      %c0_33 = arith.constant 0 : index
      %c1_34 = arith.constant 1 : index
      %c1_35 = arith.constant 1 : index
      %c0_36 = arith.constant 0 : index
      %41 = vector.load %arg2[%c0_33, %c1_34, %c1_35, %c0_36] : memref<1x18x18x128xbf16, #tpu.memory_space<vmem>>, vector<1x16x16x128xbf16>
      %42 = vector.shape_cast %41 : vector<1x16x16x128xbf16> to vector<16x16x128xbf16>
      %43 = vector.shape_cast %42 : vector<16x16x128xbf16> to vector<256x128xbf16>
      %c4 = arith.constant 4 : index
      %c0_37 = arith.constant 0 : index
      %c0_38 = arith.constant 0 : index
      %44 = vector.load %arg3[%c4, %c0_37, %c0_38] : memref<9x128x128xbf16, #tpu.memory_space<vmem>>, vector<1x128x128xbf16>
      %45 = vector.shape_cast %44 : vector<1x128x128xbf16> to vector<128x128xbf16>
      %cst_39 = arith.constant dense<0.000000e+00> : vector<256x128xf32>
      %46 = tpu.matmul %43, %45, %cst_39 {dimension_numbers = #tpu.dot_dimension_numbers<[1], [0], [0], [1], [0, 0, 1, 1], [], []>} : vector<256x128xbf16>, vector<128x128xbf16>, vector<256x128xf32> -> vector<256x128xf32>
      %47 = arith.addf %40, %46 : vector<256x128xf32>
      %c0_40 = arith.constant 0 : index
      %c1_41 = arith.constant 1 : index
      %c2_42 = arith.constant 2 : index
      %c0_43 = arith.constant 0 : index
      %48 = vector.load %arg2[%c0_40, %c1_41, %c2_42, %c0_43] : memref<1x18x18x128xbf16, #tpu.memory_space<vmem>>, vector<1x16x16x128xbf16>
      %49 = vector.shape_cast %48 : vector<1x16x16x128xbf16> to vector<16x16x128xbf16>
      %50 = vector.shape_cast %49 : vector<16x16x128xbf16> to vector<256x128xbf16>
      %c5 = arith.constant 5 : index
      %c0_44 = arith.constant 0 : index
      %c0_45 = arith.constant 0 : index
      %51 = vector.load %arg3[%c5, %c0_44, %c0_45] : memref<9x128x128xbf16, #tpu.memory_space<vmem>>, vector<1x128x128xbf16>
      %52 = vector.shape_cast %51 : vector<1x128x128xbf16> to vector<128x128xbf16>
      %cst_46 = arith.constant dense<0.000000e+00> : vector<256x128xf32>
      %53 = tpu.matmul %50, %52, %cst_46 {dimension_numbers = #tpu.dot_dimension_numbers<[1], [0], [0], [1], [0, 0, 1, 1], [], []>} : vector<256x128xbf16>, vector<128x128xbf16>, vector<256x128xf32> -> vector<256x128xf32>
      %54 = arith.addf %47, %53 : vector<256x128xf32>
      %c0_47 = arith.constant 0 : index
      %c2_48 = arith.constant 2 : index
      %c0_49 = arith.constant 0 : index
      %c0_50 = arith.constant 0 : index
      %55 = vector.load %arg2[%c0_47, %c2_48, %c0_49, %c0_50] : memref<1x18x18x128xbf16, #tpu.memory_space<vmem>>, vector<1x16x16x128xbf16>
      %56 = vector.shape_cast %55 : vector<1x16x16x128xbf16> to vector<16x16x128xbf16>
      %57 = vector.shape_cast %56 : vector<16x16x128xbf16> to vector<256x128xbf16>
      %c6 = arith.constant 6 : index
      %c0_51 = arith.constant 0 : index
      %c0_52 = arith.constant 0 : index
      %58 = vector.load %arg3[%c6, %c0_51, %c0_52] : memref<9x128x128xbf16, #tpu.memory_space<vmem>>, vector<1x128x128xbf16>
      %59 = vector.shape_cast %58 : vector<1x128x128xbf16> to vector<128x128xbf16>
      %cst_53 = arith.constant dense<0.000000e+00> : vector<256x128xf32>
      %60 = tpu.matmul %57, %59, %cst_53 {dimension_numbers = #tpu.dot_dimension_numbers<[1], [0], [0], [1], [0, 0, 1, 1], [], []>} : vector<256x128xbf16>, vector<128x128xbf16>, vector<256x128xf32> -> vector<256x128xf32>
      %61 = arith.addf %54, %60 : vector<256x128xf32>
      %c0_54 = arith.constant 0 : index
      %c2_55 = arith.constant 2 : index
      %c1_56 = arith.constant 1 : index
      %c0_57 = arith.constant 0 : index
      %62 = vector.load %arg2[%c0_54, %c2_55, %c1_56, %c0_57] : memref<1x18x18x128xbf16, #tpu.memory_space<vmem>>, vector<1x16x16x128xbf16>
      %63 = vector.shape_cast %62 : vector<1x16x16x128xbf16> to vector<16x16x128xbf16>
      %64 = vector.shape_cast %63 : vector<16x16x128xbf16> to vector<256x128xbf16>
      %c7 = arith.constant 7 : index
      %c0_58 = arith.constant 0 : index
      %c0_59 = arith.constant 0 : index
      %65 = vector.load %arg3[%c7, %c0_58, %c0_59] : memref<9x128x128xbf16, #tpu.memory_space<vmem>>, vector<1x128x128xbf16>
      %66 = vector.shape_cast %65 : vector<1x128x128xbf16> to vector<128x128xbf16>
      %cst_60 = arith.constant dense<0.000000e+00> : vector<256x128xf32>
      %67 = tpu.matmul %64, %66, %cst_60 {dimension_numbers = #tpu.dot_dimension_numbers<[1], [0], [0], [1], [0, 0, 1, 1], [], []>} : vector<256x128xbf16>, vector<128x128xbf16>, vector<256x128xf32> -> vector<256x128xf32>
      %68 = arith.addf %61, %67 : vector<256x128xf32>
      %c0_61 = arith.constant 0 : index
      %c2_62 = arith.constant 2 : index
      %c2_63 = arith.constant 2 : index
      %c0_64 = arith.constant 0 : index
      %69 = vector.load %arg2[%c0_61, %c2_62, %c2_63, %c0_64] : memref<1x18x18x128xbf16, #tpu.memory_space<vmem>>, vector<1x16x16x128xbf16>
      %70 = vector.shape_cast %69 : vector<1x16x16x128xbf16> to vector<16x16x128xbf16>
      %71 = vector.shape_cast %70 : vector<16x16x128xbf16> to vector<256x128xbf16>
      %c8 = arith.constant 8 : index
      %c0_65 = arith.constant 0 : index
      %c0_66 = arith.constant 0 : index
      %72 = vector.load %arg3[%c8, %c0_65, %c0_66] : memref<9x128x128xbf16, #tpu.memory_space<vmem>>, vector<1x128x128xbf16>
      %73 = vector.shape_cast %72 : vector<1x128x128xbf16> to vector<128x128xbf16>
      %cst_67 = arith.constant dense<0.000000e+00> : vector<256x128xf32>
      %74 = tpu.matmul %71, %73, %cst_67 {dimension_numbers = #tpu.dot_dimension_numbers<[1], [0], [0], [1], [0, 0, 1, 1], [], []>} : vector<256x128xbf16>, vector<128x128xbf16>, vector<256x128xf32> -> vector<256x128xf32>
      %75 = arith.addf %68, %74 : vector<256x128xf32>
      %76 = arith.index_cast %arg1 : i32 to index
      %c0_68 = arith.constant 0 : index
      %c0_69 = arith.constant 0 : index
      %77 = vector.load %arg10[%76, %c0_68, %c0_69] : memref<2x256x128xf32, #tpu.memory_space<vmem>>, vector<1x256x128xf32>
      %78 = vector.shape_cast %77 : vector<1x256x128xf32> to vector<256x128xf32>
      %79 = vector.shape_cast %75 : vector<256x128xf32> to vector<1x256x128xf32>
      tpu.vector_store %arg10[%76, %c0_68, %c0_69], %79 {strides = array<i32>} : memref<2x256x128xf32, #tpu.memory_space<vmem>>, vector<1x256x128xf32>,
      %c0_70 = arith.constant 0 : index
      %c0_71 = arith.constant 0 : index
      %80 = vector.load %arg13[%c0_70, %c0_71] : memref<1x128xf32, #tpu.memory_space<vmem>>, vector<1x128xf32>
      %cst_72 = arith.constant dense<0.000000e+00> : vector<128xf32>
      %81 = vector.multi_reduction <add>, %75, %cst_72 [0] : vector<256x128xf32> to vector<128xf32>
      %82 = vector.shape_cast %81 : vector<128xf32> to vector<1x128xf32>
      %83 = arith.addf %80, %82 : vector<1x128xf32>
      %c0_73 = arith.constant 0 : index
      %c0_74 = arith.constant 0 : index
      %84 = vector.load %arg13[%c0_73, %c0_74] : memref<1x128xf32, #tpu.memory_space<vmem>>, vector<1x128xf32>
      tpu.vector_store %arg13[%c0_73, %c0_74], %83 {strides = array<i32>} : memref<1x128xf32, #tpu.memory_space<vmem>>, vector<1x128xf32>,
      %c0_75 = arith.constant 0 : index
      %c0_76 = arith.constant 0 : index
      %85 = vector.load %arg14[%c0_75, %c0_76] : memref<1x128xf32, #tpu.memory_space<vmem>>, vector<1x128xf32>
      %86 = arith.mulf %75, %75 : vector<256x128xf32>
      %cst_77 = arith.constant dense<0.000000e+00> : vector<128xf32>
      %87 = vector.multi_reduction <add>, %86, %cst_77 [0] : vector<256x128xf32> to vector<128xf32>
      %88 = vector.shape_cast %87 : vector<128xf32> to vector<1x128xf32>
      %89 = arith.addf %85, %88 : vector<1x128xf32>
      %c0_78 = arith.constant 0 : index
      %c0_79 = arith.constant 0 : index
      %90 = vector.load %arg14[%c0_78, %c0_79] : memref<1x128xf32, #tpu.memory_space<vmem>>, vector<1x128xf32>
      tpu.vector_store %arg14[%c0_78, %c0_79], %89 {strides = array<i32>} : memref<1x128xf32, #tpu.memory_space<vmem>>, vector<1x128xf32>,
    } else {
    }
    %c1_i32 = arith.constant 1 : i32
    %3 = arith.cmpi eq, %arg0, %c1_i32 : i32
    %4 = arith.extui %3 : i1 to i32
    %c0_i32_1 = arith.constant 0 : i32
    %5 = arith.cmpi ne, %4, %c0_i32_1 : i32
    scf.if %5 {
      %c0_i32_3 = arith.constant 0 : i32
      %9 = arith.cmpi eq, %arg1, %c0_i32_3 : i32
      %10 = arith.extui %9 : i1 to i32
      %c0_i32_4 = arith.constant 0 : i32
      %11 = arith.cmpi ne, %10, %c0_i32_4 : i32
      scf.if %11 {
        %cst_92 = arith.constant 0.000000e+00 : f32
        %120 = vector.broadcast %cst_92 : f32 to vector<1x128xf32>
        %c0_93 = arith.constant 0 : index
        %c0_94 = arith.constant 0 : index
        %121 = vector.load %arg15[%c0_93, %c0_94] : memref<1x128xf32, #tpu.memory_space<vmem>>, vector<1x128xf32>
        tpu.vector_store %arg15[%c0_93, %c0_94], %120 {strides = array<i32>} : memref<1x128xf32, #tpu.memory_space<vmem>>, vector<1x128xf32>,
        %cst_95 = arith.constant 0.000000e+00 : f32
        %122 = vector.broadcast %cst_95 : f32 to vector<1x128xf32>
        %c0_96 = arith.constant 0 : index
        %c0_97 = arith.constant 0 : index
        %123 = vector.load %arg16[%c0_96, %c0_97] : memref<1x128xf32, #tpu.memory_space<vmem>>, vector<1x128xf32>
        tpu.vector_store %arg16[%c0_96, %c0_97], %122 {strides = array<i32>} : memref<1x128xf32, #tpu.memory_space<vmem>>, vector<1x128xf32>,
      } else {
      }
      %c0 = arith.constant 0 : index
      %c0_5 = arith.constant 0 : index
      %12 = vector.load %arg13[%c0, %c0_5] : memref<1x128xf32, #tpu.memory_space<vmem>>, vector<1x128xf32>
      %cst = arith.constant 0.001953125 : f32
      %13 = vector.broadcast %cst : f32 to vector<1x128xf32>
      %14 = arith.mulf %12, %13 : vector<1x128xf32>
      %c0_6 = arith.constant 0 : index
      %c0_7 = arith.constant 0 : index
      %15 = vector.load %arg14[%c0_6, %c0_7] : memref<1x128xf32, #tpu.memory_space<vmem>>, vector<1x128xf32>
      %cst_8 = arith.constant 0.001953125 : f32
      %16 = vector.broadcast %cst_8 : f32 to vector<1x128xf32>
      %17 = arith.mulf %15, %16 : vector<1x128xf32>
      %18 = arith.mulf %14, %14 : vector<1x128xf32>
      %19 = arith.subf %17, %18 : vector<1x128xf32>
      %c0_9 = arith.constant 0 : index
      %c0_10 = arith.constant 0 : index
      %20 = vector.load %arg5[%c0_9, %c0_10] : memref<1x128xf32, #tpu.memory_space<vmem>>, vector<1x128xf32>
      %cst_11 = arith.constant 9.99999974E-6 : f32
      %21 = vector.broadcast %cst_11 : f32 to vector<1x128xf32>
      %22 = arith.addf %19, %21 : vector<1x128xf32>
      %23 = math.rsqrt %22 : vector<1x128xf32>
      %24 = arith.mulf %20, %23 : vector<1x128xf32>
      %c0_12 = arith.constant 0 : index
      %c0_13 = arith.constant 0 : index
      %25 = vector.load %arg6[%c0_12, %c0_13] : memref<1x128xf32, #tpu.memory_space<vmem>>, vector<1x128xf32>
      %26 = arith.mulf %14, %24 : vector<1x128xf32>
      %27 = arith.subf %25, %26 : vector<1x128xf32>
      %28 = arith.index_cast %arg1 : i32 to index
      %c0_14 = arith.constant 0 : index
      %c0_15 = arith.constant 0 : index
      %29 = vector.load %arg10[%28, %c0_14, %c0_15] : memref<2x256x128xf32, #tpu.memory_space<vmem>>, vector<1x256x128xf32>
      %30 = vector.shape_cast %29 : vector<1x256x128xf32> to vector<256x128xf32>
      %31 = vector.broadcast %24 : vector<1x128xf32> to vector<256x128xf32>
      %32 = arith.mulf %30, %31 : vector<256x128xf32>
      %33 = vector.broadcast %27 : vector<1x128xf32> to vector<256x128xf32>
      %34 = arith.addf %32, %33 : vector<256x128xf32>
      %cst_16 = arith.constant 0.000000e+00 : f32
      %35 = vector.broadcast %cst_16 : f32 to vector<256x128xf32>
      %36 = arith.maximumf %34, %35 : vector<256x128xf32>
      %cst_17 = arith.constant 0.000000e+00 : f32
      %37 = vector.broadcast %cst_17 : f32 to vector<18x18x128xf32>
      %c0_18 = arith.constant 0 : index
      %c0_19 = arith.constant 0 : index
      %c0_20 = arith.constant 0 : index
      %38 = vector.load %arg12[%c0_18, %c0_19, %c0_20] : memref<18x18x128xf32, #tpu.memory_space<vmem>>, vector<18x18x128xf32>
      tpu.vector_store %arg12[%c0_18, %c0_19, %c0_20], %37 {strides = array<i32>} : memref<18x18x128xf32, #tpu.memory_space<vmem>>, vector<18x18x128xf32>,
      %39 = vector.shape_cast %36 : vector<256x128xf32> to vector<16x16x128xf32>
      %c1 = arith.constant 1 : index
      %c1_21 = arith.constant 1 : index
      %c0_22 = arith.constant 0 : index
      %40 = vector.load %arg12[%c1, %c1_21, %c0_22] : memref<18x18x128xf32, #tpu.memory_space<vmem>>, vector<16x16x128xf32>
      tpu.vector_store %arg12[%c1, %c1_21, %c0_22], %39 {strides = array<i32>} : memref<18x18x128xf32, #tpu.memory_space<vmem>>, vector<16x16x128xf32>,
      %cst_23 = arith.constant 0.000000e+00 : f32
      %41 = vector.broadcast %cst_23 : f32 to vector<256x128xf32>
      %c0_24 = arith.constant 0 : index
      %c0_25 = arith.constant 0 : index
      %c0_26 = arith.constant 0 : index
      %42 = vector.load %arg12[%c0_24, %c0_25, %c0_26] : memref<18x18x128xf32, #tpu.memory_space<vmem>>, vector<16x16x128xf32>
      %43 = vector.shape_cast %42 : vector<16x16x128xf32> to vector<256x128xf32>
      %44 = arith.truncf %43 : vector<256x128xf32> to vector<256x128xbf16>
      %c0_27 = arith.constant 0 : index
      %c0_28 = arith.constant 0 : index
      %c0_29 = arith.constant 0 : index
      %45 = vector.load %arg4[%c0_27, %c0_28, %c0_29] : memref<9x128x128xbf16, #tpu.memory_space<vmem>>, vector<1x128x128xbf16>
      %46 = vector.shape_cast %45 : vector<1x128x128xbf16> to vector<128x128xbf16>
      %cst_30 = arith.constant dense<0.000000e+00> : vector<256x128xf32>
      %47 = tpu.matmul %44, %46, %cst_30 {dimension_numbers = #tpu.dot_dimension_numbers<[1], [0], [0], [1], [0, 0, 1, 1], [], []>} : vector<256x128xbf16>, vector<128x128xbf16>, vector<256x128xf32> -> vector<256x128xf32>
      %48 = arith.addf %41, %47 : vector<256x128xf32>
      %c0_31 = arith.constant 0 : index
      %c1_32 = arith.constant 1 : index
      %c0_33 = arith.constant 0 : index
      %49 = vector.load %arg12[%c0_31, %c1_32, %c0_33] : memref<18x18x128xf32, #tpu.memory_space<vmem>>, vector<16x16x128xf32>
      %50 = vector.shape_cast %49 : vector<16x16x128xf32> to vector<256x128xf32>
      %51 = arith.truncf %50 : vector<256x128xf32> to vector<256x128xbf16>
      %c1_34 = arith.constant 1 : index
      %c0_35 = arith.constant 0 : index
      %c0_36 = arith.constant 0 : index
      %52 = vector.load %arg4[%c1_34, %c0_35, %c0_36] : memref<9x128x128xbf16, #tpu.memory_space<vmem>>, vector<1x128x128xbf16>
      %53 = vector.shape_cast %52 : vector<1x128x128xbf16> to vector<128x128xbf16>
      %cst_37 = arith.constant dense<0.000000e+00> : vector<256x128xf32>
      %54 = tpu.matmul %51, %53, %cst_37 {dimension_numbers = #tpu.dot_dimension_numbers<[1], [0], [0], [1], [0, 0, 1, 1], [], []>} : vector<256x128xbf16>, vector<128x128xbf16>, vector<256x128xf32> -> vector<256x128xf32>
      %55 = arith.addf %48, %54 : vector<256x128xf32>
      %c0_38 = arith.constant 0 : index
      %c2 = arith.constant 2 : index
      %c0_39 = arith.constant 0 : index
      %56 = vector.load %arg12[%c0_38, %c2, %c0_39] : memref<18x18x128xf32, #tpu.memory_space<vmem>>, vector<16x16x128xf32>
      %57 = vector.shape_cast %56 : vector<16x16x128xf32> to vector<256x128xf32>
      %58 = arith.truncf %57 : vector<256x128xf32> to vector<256x128xbf16>
      %c2_40 = arith.constant 2 : index
      %c0_41 = arith.constant 0 : index
      %c0_42 = arith.constant 0 : index
      %59 = vector.load %arg4[%c2_40, %c0_41, %c0_42] : memref<9x128x128xbf16, #tpu.memory_space<vmem>>, vector<1x128x128xbf16>
      %60 = vector.shape_cast %59 : vector<1x128x128xbf16> to vector<128x128xbf16>
      %cst_43 = arith.constant dense<0.000000e+00> : vector<256x128xf32>
      %61 = tpu.matmul %58, %60, %cst_43 {dimension_numbers = #tpu.dot_dimension_numbers<[1], [0], [0], [1], [0, 0, 1, 1], [], []>} : vector<256x128xbf16>, vector<128x128xbf16>, vector<256x128xf32> -> vector<256x128xf32>
      %62 = arith.addf %55, %61 : vector<256x128xf32>
      %c1_44 = arith.constant 1 : index
      %c0_45 = arith.constant 0 : index
      %c0_46 = arith.constant 0 : index
      %63 = vector.load %arg12[%c1_44, %c0_45, %c0_46] : memref<18x18x128xf32, #tpu.memory_space<vmem>>, vector<16x16x128xf32>
      %64 = vector.shape_cast %63 : vector<16x16x128xf32> to vector<256x128xf32>
      %65 = arith.truncf %64 : vector<256x128xf32> to vector<256x128xbf16>
      %c3 = arith.constant 3 : index
      %c0_47 = arith.constant 0 : index
      %c0_48 = arith.constant 0 : index
      %66 = vector.load %arg4[%c3, %c0_47, %c0_48] : memref<9x128x128xbf16, #tpu.memory_space<vmem>>, vector<1x128x128xbf16>
      %67 = vector.shape_cast %66 : vector<1x128x128xbf16> to vector<128x128xbf16>
      %cst_49 = arith.constant dense<0.000000e+00> : vector<256x128xf32>
      %68 = tpu.matmul %65, %67, %cst_49 {dimension_numbers = #tpu.dot_dimension_numbers<[1], [0], [0], [1], [0, 0, 1, 1], [], []>} : vector<256x128xbf16>, vector<128x128xbf16>, vector<256x128xf32> -> vector<256x128xf32>
      %69 = arith.addf %62, %68 : vector<256x128xf32>
      %c1_50 = arith.constant 1 : index
      %c1_51 = arith.constant 1 : index
      %c0_52 = arith.constant 0 : index
      %70 = vector.load %arg12[%c1_50, %c1_51, %c0_52] : memref<18x18x128xf32, #tpu.memory_space<vmem>>, vector<16x16x128xf32>
      %71 = vector.shape_cast %70 : vector<16x16x128xf32> to vector<256x128xf32>
      %72 = arith.truncf %71 : vector<256x128xf32> to vector<256x128xbf16>
      %c4 = arith.constant 4 : index
      %c0_53 = arith.constant 0 : index
      %c0_54 = arith.constant 0 : index
      %73 = vector.load %arg4[%c4, %c0_53, %c0_54] : memref<9x128x128xbf16, #tpu.memory_space<vmem>>, vector<1x128x128xbf16>
      %74 = vector.shape_cast %73 : vector<1x128x128xbf16> to vector<128x128xbf16>
      %cst_55 = arith.constant dense<0.000000e+00> : vector<256x128xf32>
      %75 = tpu.matmul %72, %74, %cst_55 {dimension_numbers = #tpu.dot_dimension_numbers<[1], [0], [0], [1], [0, 0, 1, 1], [], []>} : vector<256x128xbf16>, vector<128x128xbf16>, vector<256x128xf32> -> vector<256x128xf32>
      %76 = arith.addf %69, %75 : vector<256x128xf32>
      %c1_56 = arith.constant 1 : index
      %c2_57 = arith.constant 2 : index
      %c0_58 = arith.constant 0 : index
      %77 = vector.load %arg12[%c1_56, %c2_57, %c0_58] : memref<18x18x128xf32, #tpu.memory_space<vmem>>, vector<16x16x128xf32>
      %78 = vector.shape_cast %77 : vector<16x16x128xf32> to vector<256x128xf32>
      %79 = arith.truncf %78 : vector<256x128xf32> to vector<256x128xbf16>
      %c5 = arith.constant 5 : index
      %c0_59 = arith.constant 0 : index
      %c0_60 = arith.constant 0 : index
      %80 = vector.load %arg4[%c5, %c0_59, %c0_60] : memref<9x128x128xbf16, #tpu.memory_space<vmem>>, vector<1x128x128xbf16>
      %81 = vector.shape_cast %80 : vector<1x128x128xbf16> to vector<128x128xbf16>
      %cst_61 = arith.constant dense<0.000000e+00> : vector<256x128xf32>
      %82 = tpu.matmul %79, %81, %cst_61 {dimension_numbers = #tpu.dot_dimension_numbers<[1], [0], [0], [1], [0, 0, 1, 1], [], []>} : vector<256x128xbf16>, vector<128x128xbf16>, vector<256x128xf32> -> vector<256x128xf32>
      %83 = arith.addf %76, %82 : vector<256x128xf32>
      %c2_62 = arith.constant 2 : index
      %c0_63 = arith.constant 0 : index
      %c0_64 = arith.constant 0 : index
      %84 = vector.load %arg12[%c2_62, %c0_63, %c0_64] : memref<18x18x128xf32, #tpu.memory_space<vmem>>, vector<16x16x128xf32>
      %85 = vector.shape_cast %84 : vector<16x16x128xf32> to vector<256x128xf32>
      %86 = arith.truncf %85 : vector<256x128xf32> to vector<256x128xbf16>
      %c6 = arith.constant 6 : index
      %c0_65 = arith.constant 0 : index
      %c0_66 = arith.constant 0 : index
      %87 = vector.load %arg4[%c6, %c0_65, %c0_66] : memref<9x128x128xbf16, #tpu.memory_space<vmem>>, vector<1x128x128xbf16>
      %88 = vector.shape_cast %87 : vector<1x128x128xbf16> to vector<128x128xbf16>
      %cst_67 = arith.constant dense<0.000000e+00> : vector<256x128xf32>
      %89 = tpu.matmul %86, %88, %cst_67 {dimension_numbers = #tpu.dot_dimension_numbers<[1], [0], [0], [1], [0, 0, 1, 1], [], []>} : vector<256x128xbf16>, vector<128x128xbf16>, vector<256x128xf32> -> vector<256x128xf32>
      %90 = arith.addf %83, %89 : vector<256x128xf32>
      %c2_68 = arith.constant 2 : index
      %c1_69 = arith.constant 1 : index
      %c0_70 = arith.constant 0 : index
      %91 = vector.load %arg12[%c2_68, %c1_69, %c0_70] : memref<18x18x128xf32, #tpu.memory_space<vmem>>, vector<16x16x128xf32>
      %92 = vector.shape_cast %91 : vector<16x16x128xf32> to vector<256x128xf32>
      %93 = arith.truncf %92 : vector<256x128xf32> to vector<256x128xbf16>
      %c7 = arith.constant 7 : index
      %c0_71 = arith.constant 0 : index
      %c0_72 = arith.constant 0 : index
      %94 = vector.load %arg4[%c7, %c0_71, %c0_72] : memref<9x128x128xbf16, #tpu.memory_space<vmem>>, vector<1x128x128xbf16>
      %95 = vector.shape_cast %94 : vector<1x128x128xbf16> to vector<128x128xbf16>
      %cst_73 = arith.constant dense<0.000000e+00> : vector<256x128xf32>
      %96 = tpu.matmul %93, %95, %cst_73 {dimension_numbers = #tpu.dot_dimension_numbers<[1], [0], [0], [1], [0, 0, 1, 1], [], []>} : vector<256x128xbf16>, vector<128x128xbf16>, vector<256x128xf32> -> vector<256x128xf32>
      %97 = arith.addf %90, %96 : vector<256x128xf32>
      %c2_74 = arith.constant 2 : index
      %c2_75 = arith.constant 2 : index
      %c0_76 = arith.constant 0 : index
      %98 = vector.load %arg12[%c2_74, %c2_75, %c0_76] : memref<18x18x128xf32, #tpu.memory_space<vmem>>, vector<16x16x128xf32>
      %99 = vector.shape_cast %98 : vector<16x16x128xf32> to vector<256x128xf32>
      %100 = arith.truncf %99 : vector<256x128xf32> to vector<256x128xbf16>
      %c8 = arith.constant 8 : index
      %c0_77 = arith.constant 0 : index
      %c0_78 = arith.constant 0 : index
      %101 = vector.load %arg4[%c8, %c0_77, %c0_78] : memref<9x128x128xbf16, #tpu.memory_space<vmem>>, vector<1x128x128xbf16>
      %102 = vector.shape_cast %101 : vector<1x128x128xbf16> to vector<128x128xbf16>
      %cst_79 = arith.constant dense<0.000000e+00> : vector<256x128xf32>
      %103 = tpu.matmul %100, %102, %cst_79 {dimension_numbers = #tpu.dot_dimension_numbers<[1], [0], [0], [1], [0, 0, 1, 1], [], []>} : vector<256x128xbf16>, vector<128x128xbf16>, vector<256x128xf32> -> vector<256x128xf32>
      %104 = arith.addf %97, %103 : vector<256x128xf32>
      %105 = arith.index_cast %arg1 : i32 to index
      %c0_80 = arith.constant 0 : index
      %c0_81 = arith.constant 0 : index
      %106 = vector.load %arg11[%105, %c0_80, %c0_81] : memref<2x256x128xf32, #tpu.memory_space<vmem>>, vector<1x256x128xf32>
      %107 = vector.shape_cast %106 : vector<1x256x128xf32> to vector<256x128xf32>
      %108 = vector.shape_cast %104 : vector<256x128xf32> to vector<1x256x128xf32>
      tpu.vector_store %arg11[%105, %c0_80, %c0_81], %108 {strides = array<i32>} : memref<2x256x128xf32, #tpu.memory_space<vmem>>, vector<1x256x128xf32>,
      %c0_82 = arith.constant 0 : index
      %c0_83 = arith.constant 0 : index
      %109 = vector.load %arg15[%c0_82, %c0_83] : memref<1x128xf32, #tpu.memory_space<vmem>>, vector<1x128xf32>
      %cst_84 = arith.constant dense<0.000000e+00> : vector<128xf32>
      %110 = vector.multi_reduction <add>, %104, %cst_84 [0] : vector<256x128xf32> to vector<128xf32>
      %111 = vector.shape_cast %110 : vector<128xf32> to vector<1x128xf32>
      %112 = arith.addf %109, %111 : vector<1x128xf32>
      %c0_85 = arith.constant 0 : index
      %c0_86 = arith.constant 0 : index
      %113 = vector.load %arg15[%c0_85, %c0_86] : memref<1x128xf32, #tpu.memory_space<vmem>>, vector<1x128xf32>
      tpu.vector_store %arg15[%c0_85, %c0_86], %112 {strides = array<i32>} : memref<1x128xf32, #tpu.memory_space<vmem>>, vector<1x128xf32>,
      %c0_87 = arith.constant 0 : index
      %c0_88 = arith.constant 0 : index
      %114 = vector.load %arg16[%c0_87, %c0_88] : memref<1x128xf32, #tpu.memory_space<vmem>>, vector<1x128xf32>
      %115 = arith.mulf %104, %104 : vector<256x128xf32>
      %cst_89 = arith.constant dense<0.000000e+00> : vector<128xf32>
      %116 = vector.multi_reduction <add>, %115, %cst_89 [0] : vector<256x128xf32> to vector<128xf32>
      %117 = vector.shape_cast %116 : vector<128xf32> to vector<1x128xf32>
      %118 = arith.addf %114, %117 : vector<1x128xf32>
      %c0_90 = arith.constant 0 : index
      %c0_91 = arith.constant 0 : index
      %119 = vector.load %arg16[%c0_90, %c0_91] : memref<1x128xf32, #tpu.memory_space<vmem>>, vector<1x128xf32>
      tpu.vector_store %arg16[%c0_90, %c0_91], %118 {strides = array<i32>} : memref<1x128xf32, #tpu.memory_space<vmem>>, vector<1x128xf32>,
    } else {
    }
    %c2_i32 = arith.constant 2 : i32
    %6 = arith.cmpi eq, %arg0, %c2_i32 : i32
    %7 = arith.extui %6 : i1 to i32
    %c0_i32_2 = arith.constant 0 : i32
    %8 = arith.cmpi ne, %7, %c0_i32_2 : i32
    scf.if %8 {
      %c0 = arith.constant 0 : index
      %c0_3 = arith.constant 0 : index
      %9 = vector.load %arg15[%c0, %c0_3] : memref<1x128xf32, #tpu.memory_space<vmem>>, vector<1x128xf32>
      %cst = arith.constant 0.001953125 : f32
      %10 = vector.broadcast %cst : f32 to vector<1x128xf32>
      %11 = arith.mulf %9, %10 : vector<1x128xf32>
      %c0_4 = arith.constant 0 : index
      %c0_5 = arith.constant 0 : index
      %12 = vector.load %arg16[%c0_4, %c0_5] : memref<1x128xf32, #tpu.memory_space<vmem>>, vector<1x128xf32>
      %cst_6 = arith.constant 0.001953125 : f32
      %13 = vector.broadcast %cst_6 : f32 to vector<1x128xf32>
      %14 = arith.mulf %12, %13 : vector<1x128xf32>
      %15 = arith.mulf %11, %11 : vector<1x128xf32>
      %16 = arith.subf %14, %15 : vector<1x128xf32>
      %c0_7 = arith.constant 0 : index
      %c0_8 = arith.constant 0 : index
      %17 = vector.load %arg7[%c0_7, %c0_8] : memref<1x128xf32, #tpu.memory_space<vmem>>, vector<1x128xf32>
      %cst_9 = arith.constant 9.99999974E-6 : f32
      %18 = vector.broadcast %cst_9 : f32 to vector<1x128xf32>
      %19 = arith.addf %16, %18 : vector<1x128xf32>
      %20 = math.rsqrt %19 : vector<1x128xf32>
      %21 = arith.mulf %17, %20 : vector<1x128xf32>
      %c0_10 = arith.constant 0 : index
      %c0_11 = arith.constant 0 : index
      %22 = vector.load %arg8[%c0_10, %c0_11] : memref<1x128xf32, #tpu.memory_space<vmem>>, vector<1x128xf32>
      %23 = arith.mulf %11, %21 : vector<1x128xf32>
      %24 = arith.subf %22, %23 : vector<1x128xf32>
      %c0_12 = arith.constant 0 : index
      %c1 = arith.constant 1 : index
      %c1_13 = arith.constant 1 : index
      %c0_14 = arith.constant 0 : index
      %25 = vector.load %arg2[%c0_12, %c1, %c1_13, %c0_14] : memref<1x18x18x128xbf16, #tpu.memory_space<vmem>>, vector<1x16x16x128xbf16>
      %26 = vector.shape_cast %25 : vector<1x16x16x128xbf16> to vector<16x16x128xbf16>
      %27 = vector.shape_cast %26 : vector<16x16x128xbf16> to vector<256x128xbf16>
      %28 = arith.extf %27 : vector<256x128xbf16> to vector<256x128xf32>
      %29 = arith.index_cast %arg1 : i32 to index
      %c0_15 = arith.constant 0 : index
      %c0_16 = arith.constant 0 : index
      %30 = vector.load %arg11[%29, %c0_15, %c0_16] : memref<2x256x128xf32, #tpu.memory_space<vmem>>, vector<1x256x128xf32>
      %31 = vector.shape_cast %30 : vector<1x256x128xf32> to vector<256x128xf32>
      %32 = vector.broadcast %21 : vector<1x128xf32> to vector<256x128xf32>
      %33 = arith.mulf %31, %32 : vector<256x128xf32>
      %34 = vector.broadcast %24 : vector<1x128xf32> to vector<256x128xf32>
      %35 = arith.addf %33, %34 : vector<256x128xf32>
      %36 = arith.addf %35, %28 : vector<256x128xf32>
      %cst_17 = arith.constant 0.000000e+00 : f32
      %37 = vector.broadcast %cst_17 : f32 to vector<256x128xf32>
      %38 = arith.maximumf %36, %37 : vector<256x128xf32>
      %39 = vector.shape_cast %38 : vector<256x128xf32> to vector<1x16x16x128xf32>
      %c0_18 = arith.constant 0 : index
      %c0_19 = arith.constant 0 : index
      %c0_20 = arith.constant 0 : index
      %c0_21 = arith.constant 0 : index
      %40 = vector.load %arg9[%c0_18, %c0_19, %c0_20, %c0_21] : memref<1x16x16x128xf32, #tpu.memory_space<vmem>>, vector<1x16x16x128xf32>
      tpu.vector_store %arg9[%c0_18, %c0_19, %c0_20, %c0_21], %39 {strides = array<i32>} : memref<1x16x16x128xf32, #tpu.memory_space<vmem>>, vector<1x16x16x128xf32>,
    } else {
    }
    return
  }
  func.func @transform_0(%arg0: i32, %arg1: i32) -> (i32, i32, i32, i32) {
    %c0_i32 = arith.constant 0 : i32
    %c0_i32_0 = arith.constant 0 : i32
    %c0_i32_1 = arith.constant 0 : i32
    %c0_i32_2 = arith.constant 0 : i32
    return %arg1, %c0_i32, %c0_i32_0, %c0_i32_1 : i32, i32, i32, i32
  }
  func.func @transform_1(%arg0: i32, %arg1: i32) -> (i32, i32, i32) {
    %c0_i32 = arith.constant 0 : i32
    %c0_i32_0 = arith.constant 0 : i32
    %c0_i32_1 = arith.constant 0 : i32
    %c0_i32_2 = arith.constant 0 : i32
    return %c0_i32, %c0_i32_0, %c0_i32_1 : i32, i32, i32
  }
  func.func @transform_2(%arg0: i32, %arg1: i32) -> (i32, i32, i32) {
    %c0_i32 = arith.constant 0 : i32
    %c0_i32_0 = arith.constant 0 : i32
    %c0_i32_1 = arith.constant 0 : i32
    %c0_i32_2 = arith.constant 0 : i32
    return %c0_i32, %c0_i32_0, %c0_i32_1 : i32, i32, i32
  }
  func.func @transform_3(%arg0: i32, %arg1: i32) -> (i32, i32) {
    %c0_i32 = arith.constant 0 : i32
    %c0_i32_0 = arith.constant 0 : i32
    %c0_i32_1 = arith.constant 0 : i32
    return %c0_i32, %c0_i32_0 : i32, i32
  }
  func.func @transform_4(%arg0: i32, %arg1: i32) -> (i32, i32) {
    %c0_i32 = arith.constant 0 : i32
    %c0_i32_0 = arith.constant 0 : i32
    %c0_i32_1 = arith.constant 0 : i32
    return %c0_i32, %c0_i32_0 : i32, i32
  }
  func.func @transform_5(%arg0: i32, %arg1: i32) -> (i32, i32) {
    %c0_i32 = arith.constant 0 : i32
    %c0_i32_0 = arith.constant 0 : i32
    %c0_i32_1 = arith.constant 0 : i32
    return %c0_i32, %c0_i32_0 : i32, i32
  }
  func.func @transform_6(%arg0: i32, %arg1: i32) -> (i32, i32) {
    %c0_i32 = arith.constant 0 : i32
    %c0_i32_0 = arith.constant 0 : i32
    %c0_i32_1 = arith.constant 0 : i32
    return %c0_i32, %c0_i32_0 : i32, i32
  }
  func.func @transform_7(%arg0: i32, %arg1: i32) -> (i32, i32, i32, i32) {
    %c0_i32 = arith.constant 0 : i32
    %c0_i32_0 = arith.constant 0 : i32
    %c0_i32_1 = arith.constant 0 : i32
    %c0_i32_2 = arith.constant 0 : i32
    return %arg1, %c0_i32, %c0_i32_0, %c0_i32_1 : i32, i32, i32, i32
  }
}

</mosaic_0001>

<bundles_post_ra>
// kernel: basic_block_forward.1
= control target key start
LH: loop header
LB: loop body
LE: loop exit
PB: predicated region body
PF: predicated region fallthrough
CT: control target
= control target key end

     0   :  { %s12234_s24 = smov 0   ;;  %s12236_s25 = smov 0   ;;  %s15167_s0 = inlined_call_operand.vmem [shape: bf16[2,18,18,128], index: 0, kind: input, shape index: {}]   ;;  %s15168_s1 = inlined_call_operand.vmem [shape: bf16[9,128,128], index: 1, kind: input, shape index: {}]   ;;  %s15169_s2 = inlined_call_operand.vmem [shape: bf16[9,128,128], index: 2, kind: input, shape index: {}]   ;;  %s15170_s3 = inlined_call_operand.vmem [shape: f32[1,128], index: 3, kind: input, shape index: {}]   ;;  %s15171_s4 = inlined_call_operand.vmem [shape: f32[1,128], index: 4, kind: input, shape index: {}]   ;;  %s15172_s5 = inlined_call_operand.vmem [shape: f32[1,128], index: 5, kind: input, shape index: {}]   ;;  %s15173_s6 = inlined_call_operand.vmem [shape: f32[1,128], index: 6, kind: input, shape index: {}]   ;;  %s15174_s7 = inlined_call_operand.vmem [shape: f32[2,16,16,128], index: 7, kind: output, shape index: {}]  }
   0x1   :  { %s12238_s26 = smov 0   ;;  %s12240_s27 = smov 0  }
   0x2   :  { %s12242_s28 = smov 0  }
   0x3 LB: > { %s26_s29 = sadd.s32 1, %s12181_s26  ;;  %s29_s30 = sadd.s32 1, %s12185_s27  ;;  %s12189_s28 = sphi %s12242_s28, %s17_s28   ;;  %s12185_s27 = sphi %s12240_s27, %s15246_s27   ;;  %s12181_s26 = sphi %s12238_s26, %s15245_s26   ;;  %s12177_s25 = sphi %s12236_s25, %s15244_s25   ;;  %s12173_s24 = sphi %s12234_s24, %s15243_s24  }
   0x4   : > { %p27_p0 = scmp.ge.s32.totalorder %s26_s29, 2  ;;  %p9145_p1 = scmp.ge.s32.totalorder %s12189_s28, 1 }
   0x5   : > { %p249_p2 = scmp.lt.s32.totalorder %s12189_s28, 7 }
   0x6   : > { %s15248_s29 = smov (%p27_p0, %s26_s29), 0  ;;  %s15250_s30 = smov (!%p27_p0, %s29_s30), %s12185_s27 }
   0x7   : > { %p250_p3 = pnand %p9145_p1, %p249_p2  ;;  %p31_p4 = scmp.ge.s32.totalorder %s15250_s30, 3 }
   0x8   : > { %p281_p5 = scmp.lt.s32.totalorder (!%p250_p3), %s12173_s24, 1  ;;  %p9149_p6 = scmp.ne.s32.totalorder (!%p250_p3), %s12177_s25, 0 }
   0x9   : > { %s15252_s30 = smov (%p31_p4, %s15250_s30), 0  ;;  %253 = sbr.rel (%p250_p3) target bundleno = 1320 (0x528), region = 48 }
  0x10   : > { %s282_s8 = scalar_select %p281_p5, %s12173_s24, 1 }
  0x11   : > { %295 = sbr.rel (%p9149_p6) target bundleno = 624 (0x270), region = 52 }
  0x12   : > { %s11832_s9 = smul.u32 216, %s282_s8  ;;  %s9991_s10 = sshll.u32 %s282_s8, 8 }
  0x13   : > { %s12273_s13 = scalar_lea.vmem %s15174_s7, %s9991_s10 }
  0x14   : > { %s12278_s16 = scalar_lea.vmem %s15167_s0, %s11832_s9 }
  0x18   : > { %p9150_p7 = scmp.ne.s32.totalorder %s12173_s24, 0 }
  0x19   : > { %v12191_v0 = vmov (!%p9150_p7), 0.0  }
  0x1a   : > { %299 = sbr.rel (%p9150_p7) target bundleno = 33 (0x21), region = 56  ;;  %300 = vst [vmem:[#allocation5] sm:$0x1] (!%p9150_p7), %v12191_v0  ;;  %301 = vst [vmem:[#allocation6] sm:$0x1] (!%p9150_p7), %v12191_v0 }
  0x21 PF: > { %v11876_v1 = vld [vmem:[%s15168_s1 + $0x40] sm:$0xff]   ;;  %v11878_v3 = vld [vmem:[%s15168_s1 + $0x48] sm:$0xff]   ;;  %v11880_v5 = vld [vmem:[%s15168_s1 + $0x50] sm:$0xff]   ;;  %vm366_vm0 = vsmask.f32 3328  ;;  %vm1396_vm3 = vcmask 1042432  }
  0x22   : > { %v11877_v2 = vld [vmem:[%s15168_s1 + $0x100] sm:$0xff]   ;;  %10424 = vmatprep.subr.bf16.mxu1 %v11876_v1  ;;  %v11879_v4 = vld [vmem:[%s15168_s1 + $0x108] sm:$0xff]   ;;  %v11881_v6 = vld [vmem:[%s15168_s1 + $0x110] sm:$0xff]   ;;  %vm367_vm1 = vsmask.f32 7440  ;;  %vm1397_vm4 = vcmask 1046532  }
  0x23   : > { %10616 = vmatprep.subr.bf16.mxu0 %v11877_v2  ;;  %10425 = vmatpush3.bf16.msra.mxu1 %v11876_v1  ;;  %v11882_v7 = vld [vmem:[%s15168_s1 + $0x58] sm:$0xff]   ;;  %v11884_v9 = vld [vmem:[%s15168_s1 + $0x60] sm:$0xff]   ;;  %v11886_v11 = vld [vmem:[%s15168_s1 + $0x68] sm:$0xff]   ;;  %s9735_s23 = sshll.u32 %s12173_s24, 8 }
  0x24   : > { %10617 = vmatpush3.bf16.msra.mxu0 %v11877_v2  ;;  %10426 = vmatprep.subr.bf16.mxu1 %v11878_v3  ;;  %v11883_v8 = vld [vmem:[%s15168_s1 + $0x118] sm:$0xff]   ;;  %v11885_v10 = vld [vmem:[%s15168_s1 + $0x120] sm:$0xff]   ;;  %v11887_v12 = vld [vmem:[%s15168_s1 + $0x128] sm:$0xff]   ;;  %s14049_s8 = scalar_lea.vmem [#allocation2], %s9735_s23 }
  0x25   : > { %10618 = vmatprep.subr.bf16.mxu0 %v11879_v4  ;;  %v302_v13 = vld [vmem:[%s12278_s16] sm:$0xf]  ;;  %v303_v14 = vld [vmem:[%s12278_s16 + $0x4] sm:$0xf]  ;;  %v350_v15 = vld [vmem:[%s12278_s16 + $0x8] sm:$0x1] }
  0x26   : > { %v370_v16 = vshrl.u32 %v302_v13, 16  ;;  %v373_v17 = vshll.u32 %v302_v13, 16  ;;  %v379_v18 = vshll.u32 %v303_v14, 16  ;;  %v383_v19 = vshrl.u32 %v303_v14, 16  ;;  %v9343_v21 = vld [vmem:[%s12278_s16 + $0xc] sm:$0xf]  ;;  %vm12342_vm2 = vmor %vm366_vm0, %vm367_vm1 }
  0x27   : > { %10427 = vmatpush3.bf16.msra.mxu1 %v11878_v3  ;;  %v389_v20 = vshll.u32 %v350_v15, 16  ;;  %v12323_v24 = vld [vmem:[%s12278_s16 + $0x10] sm:$0xf]  ;;  %v12326_v25 = vld [vmem:[%s12278_s16 + $0x14] sm:$0x1]  ;;  %v2269_v30 = vshrl.u32 %v9343_v21, 16  ;;  %vm12588_vm5 = vmor %vm1396_vm3, %vm1397_vm4 }
  0x28   : > { %10619 = vmatpush3.bf16.msra.mxu0 %v11879_v4  ;;  %10428 = vmatprep.subr.bf16.mxu1 %v11880_v5  ;;  %v372_v22 = vrot.slane %v370_v16, 4  ;;  %v375_v23 = vrot.slane %v373_v17, 5  ;;  %v11888_v26 = vld [vmem:[%s15168_s1 + $0x70] sm:$0xff]   ;;  %v381_v27 = vrot.slane %v379_v18, 5  ;;  %v385_v28 = vrot.slane %v383_v19, 4  ;;  %v11890_v37 = vld [vmem:[%s15168_s1 + $0x78] sm:$0xff]  }
  0x29   : > { %10620 = vmatprep.subr.bf16.mxu0 %v11881_v6  ;;  %v391_v29 = vrot.slane %v389_v20, 5  ;;  %v11889_v31 = vld [vmem:[%s15168_s1 + $0x130] sm:$0xff]   ;;  %v2272_v33 = vshll.u32 %v9343_v21, 16  ;;  %v2278_v34 = vshll.u32 %v12323_v24, 16  ;;  %v2282_v35 = vshrl.u32 %v12323_v24, 16  ;;  %v11891_v52 = vld [vmem:[%s15168_s1 + $0x138] sm:$0xff]  }
  0x2a   : > { %v376_v32 = vor.u32 %v375_v23, %v372_v22  ;;  %v304_v36 = vld [vmem:[%s12278_s16 + $0xc] sm:$0xf]  ;;  %v386_v39 = vor.u32 %v385_v28, %v381_v27  ;;  %v2271_v40 = vrot.slane %v2269_v30, 4  ;;  %v2288_v41 = vshll.u32 %v12326_v25, 16  ;;  %v305_v43 = vld [vmem:[%s12278_s16 + $0x10] sm:$0xf] }
  0x2b   : > { %10429 = vmatpush3.bf16.msra.mxu1 %v11880_v5  ;;  %v3043_v42 = vrot.slane %v12326_v25, 5  ;;  %v2274_v45 = vrot.slane %v2272_v33, 5  ;;  %v2280_v46 = vrot.slane %v2278_v34, 5  ;;  %v2284_v47 = vrot.slane %v2282_v35, 4  ;;  %v351_v56 = vld [vmem:[%s12278_s16 + $0x14] sm:$0x1] }
  0x2c   : > { %10621 = vmatpush3.bf16.msra.mxu0 %v11881_v6  ;;  %10430 = vmatprep.subr.bf16.mxu1 %v11882_v7  ;;  %v377_v44 = vrot.slane %v376_v32, 4  ;;  %v387_v48 = vrot.slane %v386_v39, 4  ;;  %v2290_v49 = vrot.slane %v2288_v41, 5  ;;  %v394_v50 = vshrl.u32 %v304_v36, 16  ;;  %v9346_v58 = vld [vmem:[%s12278_s16 + $0x18] sm:$0xf] }
  0x2d   : > { %10622 = vmatprep.subr.bf16.mxu0 %v11883_v8  ;;  %v397_v51 = vshll.u32 %v304_v36, 16  ;;  %v2275_v54 = vor.u32 %v2274_v45, %v2271_v40  ;;  %v2285_v55 = vor.u32 %v2284_v47, %v2280_v46  ;;  %v403_v57 = vshll.u32 %v305_v43, 16  ;;  %v12359_v63 = vld [vmem:[%s12278_s16 + $0x1c] sm:$0xf]  ;;  %v11892_v4 = vld [vmem:[%s15168_s1] sm:$0xff]   ;;  %v11895_v47 = vld [vmem:[%s15168_s1 + $0x8] sm:$0xff]  }
  0x2e   : > { %v382_v53 = vsel %vm12342_vm2, %v377_v44, %v381_v27  ;;  %v392_v59 = vsel %vm12342_vm2, %v387_v48, %v391_v29  ;;  %v396_v60 = vrot.slane %v394_v50, 4  ;;  %v407_v62 = vshrl.u32 %v305_v43, 16  ;;  %v12367_v5 = vld [vmem:[%s15168_s1 + $0x140] sm:$0xff]   ;;  %v306_v22 = vld [vmem:[%s12278_s16 + $0x18] sm:$0xf] }
  0x2f   : > { %10431 = vmatpush3.bf16.msra.mxu1 %v11882_v7  ;;  %v399_v61 = vrot.slane %v397_v51, 5  ;;  %v9167_v0 = vcombine.low %v382_v53, %v392_v59  ;;  %v2276_v1 = vrot.slane %v2275_v54, 4  ;;  %v2286_v2 = vrot.slane %v2285_v55, 4  ;;  %v307_v29 = vld [vmem:[%s12278_s16 + $0x1c] sm:$0xf] }
  0x30   : > { %10623 = vmatpush3.bf16.msra.mxu0 %v11883_v8  ;;  %10432 = vmatprep.subr.bf16.mxu1 %v11884_v9  ;;  %v405_v3 = vrot.slane %v403_v57, 5  ;;  %v409_v7 = vrot.slane %v407_v62, 4  ;;  %v413_v8 = vshll.u32 %v351_v56, 16  ;;  %v2296_v13 = vshll.u32 %v9346_v58, 16  ;;  %v352_v34 = vld [vmem:[%s12278_s16 + $0x20] sm:$0x1] }
  0x31   : > { %10624 = vmatprep.subr.bf16.mxu0 %v11885_v10  ;;  %v400_v6 = vor.u32 %v399_v61, %v396_v60  ;;  %10440 = vmatprep.mubr.bf16.mxu1 %v9167_v0  ;;  %v2302_v20 = vshll.u32 %v12359_v63, 16  ;;  %v2306_v21 = vshrl.u32 %v12359_v63, 16  ;;  %v3047_v28 = vrot.slane %v12359_v63, 5  ;;  %v9349_v40 = vld [vmem:[%s12278_s16 + $0x24] sm:$0xf]  ;;  %v11894_v0 = vld [vmem:[%s15168_s1 + $0x148] sm:$0xff]  }
  0x32   : > { %v410_v16 = vor.u32 %v409_v7, %v405_v3  ;;  %v415_v17 = vrot.slane %v413_v8, 5  ;;  %v2298_v19 = vrot.slane %v2296_v13, 5  ;;  %v418_v39 = vshrl.u32 %v306_v22, 16  ;;  %v308_v53 = vld [vmem:[%s12278_s16 + $0x24] sm:$0xf] }
  0x33   : > { %10433 = vmatpush3.bf16.msra.mxu1 %v11884_v9  ;;  %v12370_v9 = vld [vmem:[%s12278_s16 + $0x20] sm:$0x1]  ;;  %v401_v15 = vrot.slane %v400_v6, 4  ;;  %v2308_v32 = vrot.slane %v2306_v21, 4  ;;  %v421_v45 = vshll.u32 %v306_v22, 16  ;;  %v431_v50 = vshrl.u32 %v307_v29, 16 }
  0x34   : > { %10625 = vmatpush3.bf16.msra.mxu0 %v11885_v10  ;;  %10434 = vmatprep.subr.bf16.mxu1 %v11886_v11  ;;  %v2281_v10 = vsel %vm12342_vm2, %v2276_v1, %v2280_v46  ;;  %v2312_v27 = vshll.u32 %v12370_v9, 16  ;;  %v3050_v33 = vrot.slane %v12370_v9, 5  ;;  %v12395_v46 = vld [vmem:[%s12278_s16 + $0x28] sm:$0xf]  ;;  %v420_v48 = vrot.slane %v418_v39, 4 }
  0x35   : > { %10626 = vmatprep.subr.bf16.mxu0 %v11887_v12  ;;  %v406_v23 = vsel %vm12342_vm2, %v401_v15, %v405_v3  ;;  %v437_v51 = vshll.u32 %v352_v34, 16  ;;  %v423_v56 = vrot.slane %v421_v45, 5  ;;  %v2317_v57 = vshrl.u32 %v9349_v40, 16  ;;  %v309_v6 = vld [vmem:[%s12278_s16 + $0x28] sm:$0xf] }
  0x36   : > { %v2314_v36 = vrot.slane %v2312_v27, 5  ;;  %v433_v59 = vrot.slane %v431_v50, 4  ;;  %v2320_v61 = vshll.u32 %v9349_v40, 16  ;;  %v2326_v3 = vshll.u32 %v12395_v46, 16  ;;  %v12426_v34 = vld [vmem:[%s12278_s16 + $0x34] sm:$0xf] }
  0x37   : > { %10435 = vmatpush3.bf16.msra.mxu1 %v11886_v11  ;;  %v2291_v11 = vsel %vm12342_vm2, %v2286_v2, %v2290_v49  ;;  %v427_v49 = vshll.u32 %v307_v29, 16  ;;  %v439_v60 = vrot.slane %v437_v51, 5  ;;  %v424_v1 = vor.u32 %v423_v56, %v420_v48 }
  0x38   : > { %10627 = vmatpush3.bf16.msra.mxu0 %v11887_v12  ;;  %10436 = vmatprep.subr.bf16.mxu1 %v11888_v26  ;;  %v2293_v12 = vshrl.u32 %v9346_v58, 16  ;;  %v9407_v14 = vcombine.low %v2281_v10, %v2291_v11  ;;  %v2319_v2 = vrot.slane %v2317_v57, 4  ;;  %v2322_v10 = vrot.slane %v2320_v61, 5  ;;  %v11904_v61 = vld [vmem:[%s15168_s1 + $0x20] sm:$0xff]  }
  0x39   : > { %10628 = vmatprep.subr.bf16.mxu0 %v11889_v31  ;;  %v429_v58 = vrot.slane %v427_v49, 5  ;;  %v2330_v11 = vshrl.u32 %v12395_v46, 16  ;;  %v425_v13 = vrot.slane %v424_v1, 4  ;;  %v445_v21 = vshll.u32 %v308_v53, 16  ;;  %v11897_v49 = vld [vmem:[%s15168_s1 + $0x158] sm:$0xff]  }
  0x3a   : > { %v2295_v18 = vrot.slane %v2293_v12, 4  ;;  %10632 = vmatprep.mubr.bf16.mxu0 %v9407_v14  ;;  %v353_v12 = vld [vmem:[%s12278_s16 + $0x2c] sm:$0x1]  ;;  %v2328_v14 = vrot.slane %v2326_v3, 5  ;;  %v451_v27 = vshll.u32 %v309_v6, 16  ;;  %v455_v40 = vshrl.u32 %v309_v6, 16 }
  0x3b   : > { %10437 = vmatpush3.bf16.msra.mxu1 %v11888_v26  ;;  %v411_v26 = vrot.slane %v410_v16, 4  ;;  %v434_v8 = vor.u32 %v433_v59, %v429_v58  ;;  %v442_v16 = vshrl.u32 %v308_v53, 16  ;;  %v430_v22 = vsel %vm12342_vm2, %v425_v13, %v429_v58  ;;  %v354_v3 = vld [vmem:[%s12278_s16 + $0x38] sm:$0x1] }
  0x3c   : > { %10629 = vmatpush3.bf16.msra.mxu0 %v11889_v31  ;;  %10438 = vmatprep.subr.bf16.mxu1 %v11890_v37  ;;  %v2299_v30 = vor.u32 %v2298_v19, %v2295_v18  ;;  %v2304_v31 = vrot.slane %v2302_v20, 5  ;;  %v2323_v19 = vor.u32 %v2322_v10, %v2319_v2  ;;  %v2332_v20 = vrot.slane %v2330_v11, 4  ;;  %v9355_v10 = vld [vmem:[%s12278_s16 + $0x3c] sm:$0xf] }
  0x3d   : > { %10630 = vmatprep.subr.bf16.mxu0 %v11891_v52  ;;  %v416_v35 = vsel %vm12342_vm2, %v411_v26, %v415_v17  ;;  %v9352_v17 = vld [vmem:[%s12278_s16 + $0x30] sm:$0xf]  ;;  %v435_v18 = vrot.slane %v434_v8, 4  ;;  %v444_v26 = vrot.slane %v442_v16, 4  ;;  %v453_v39 = vrot.slane %v451_v27, 5 }
  0x3e   : > { %v9168_v41 = vcombine.low %v406_v23, %v416_v35  ;;  %v2300_v43 = vrot.slane %v2299_v30, 4  ;;  %v2309_v44 = vor.u32 %v2308_v32, %v2304_v31  ;;  %v2324_v30 = vrot.slane %v2323_v19, 4  ;;  %v11901_v35 = vld [vmem:[%s15168_s1 + $0x18] sm:$0xff]  }
  0x3f   : > { %10439 = vmatpush3.bf16.msra.mxu1 %v11890_v37  ;;  %v12391_v37 = vrot.slane %v3047_v28, 4  ;;  %v440_v29 = vsel %vm12342_vm2, %v435_v18, %v439_v60  ;;  %v447_v32 = vrot.slane %v445_v21, 5  ;;  %v2341_v48 = vshrl.u32 %v9352_v17, 16  ;;  %v311_v60 = vld [vmem:[%s12278_s16 + $0x34] sm:$0xf]  ;;  %v11899_v21 = vld [vmem:[%s15168_s1 + $0x160] sm:$0xff]  }
  0x40   : > { %10631 = vmatpush3.bf16.msra.mxu0 %v11891_v52  ;;  %10472 = vmatprep.subr.bf16.mxu1 %v11892_v4  ;;  %v12401_v52 = vld [vmem:[%s12278_s16 + $0x2c] sm:$0x1]  ;;  %v2305_v54 = vsel %vm12342_vm2, %v2300_v43, %v2304_v31  ;;  %v2310_v55 = vrot.slane %v2309_v44, 4  ;;  %v2333_v31 = vor.u32 %v2332_v20, %v2328_v14  ;;  %v2329_v43 = vsel %vm12342_vm2, %v2324_v30, %v2328_v14  ;;  %v12460_v20 = vld [vmem:[%s12278_s16 + $0x40] sm:$0xf] }
  0x41   : > { %10664 = vmatprep.subr.bf16.mxu0 %v12367_v5  ;;  %v2336_v15 = vshll.u32 %v12401_v52, 16  ;;  %v448_v45 = vor.u32 %v447_v32, %v444_v26  ;;  %v457_v50 = vrot.slane %v455_v40, 4  ;;  %v2344_v53 = vshll.u32 %v9352_v17, 16 }
  0x42   : > { %10441 = vmatmul.mubr.bf16.vlgmr.msra.gmra.mrb[0].mxu1 %v9168_v41  ;;  %v2315_v62 = vsel %vm12342_vm2, %v2310_v55, %v2314_v36  ;;  %v9169_v36 = vcombine.low %v430_v22, %v440_v29  ;;  %v461_v41 = vshll.u32 %v353_v12, 16  ;;  %v2334_v44 = vrot.slane %v2333_v31, 4  ;;  %v310_v55 = vld [vmem:[%s12278_s16 + $0x30] sm:$0xf]  ;;  %v12468_v29 = vld [vmem:[%s12278_s16 + $0x44] sm:$0x1] }
  0x43   : > { %10473 = vmatpush3.bf16.msra.mxu1 %v11892_v4  ;;  %v11898_v4 = vld [vmem:[%s15168_s1 + $0x10] sm:$0xff]   ;;  %v9408_v7 = vcombine.low %v2305_v54, %v2315_v62  ;;  %v2338_v23 = vrot.slane %v2336_v15, 5  ;;  %v2350_v54 = vshll.u32 %v12426_v34, 16  ;;  %v449_v57 = vrot.slane %v448_v45, 4  ;;  %v11906_v15 = vld [vmem:[%s15168_s1 + $0x28] sm:$0xff]  }
  0x44   : > { %10474 = vmatprep.subr.bf16.mxu1 %v11895_v47  ;;  %10444 = vmatprep.mubr.bf16.mxu1 %v9169_v36  ;;  %v463_v51 = vrot.slane %v461_v41, 5  ;;  %v2343_v58 = vrot.slane %v2341_v48, 4  ;;  %v2354_v59 = vshrl.u32 %v12426_v34, 16  ;;  %v2346_v1 = vrot.slane %v2344_v53, 5  ;;  %v11908_v36 = vld [vmem:[%s15168_s1 + $0x30] sm:$0xff]  }
  0x45   : > { %10633 = vmatmul.mubr.bf16.vlgmr.msra.gmra.mrb[0].mxu0 %v9408_v7  ;;  %v2339_v56 = vsel %vm12342_vm2, %v2334_v44, %v2338_v23  ;;  %v2352_v2 = vrot.slane %v2350_v54, 5  ;;  %v454_v6 = vsel %vm12342_vm2, %v449_v57, %v453_v39  ;;  %v466_v8 = vshrl.u32 %v310_v55, 16 }
  0x46   : > { %10665 = vmatpush3.bf16.msra.mxu0 %v12367_v5  ;;  %v11896_v5 = vld [vmem:[%s15168_s1 + $0x150] sm:$0xff]   ;;  %v9409_v62 = vcombine.low %v2329_v43, %v2339_v56  ;;  %v2347_v12 = vor.u32 %v2346_v1, %v2343_v58  ;;  %v469_v13 = vshll.u32 %v310_v55, 16  ;;  %v475_v14 = vshll.u32 %v311_v60, 16  ;;  %v313_v56 = vld [vmem:[%s12278_s16 + $0x40] sm:$0xf] }
  0x47   : > { %10475 = vmatpush3.bf16.msra.mxu1 %v11895_v47  ;;  %10666 = vmatprep.subr.bf16.mxu0 %v11894_v0  ;;  %v12437_v47 = vld [vmem:[%s12278_s16 + $0x38] sm:$0x1]  ;;  %v468_v18 = vrot.slane %v466_v8, 4  ;;  %v479_v19 = vshrl.u32 %v311_v60, 16  ;;  %v2365_v41 = vshrl.u32 %v9355_v10, 16  ;;  %v2368_v43 = vshll.u32 %v9355_v10, 16 }
  0x48   : > { %10476 = vmatprep.subr.bf16.mxu1 %v11898_v4  ;;  %v2360_v7 = vshll.u32 %v12437_v47, 16  ;;  %10636 = vmatprep.mubr.bf16.mxu0 %v9409_v62  ;;  %v2348_v23 = vrot.slane %v2347_v12, 4  ;;  %v471_v26 = vrot.slane %v469_v13, 5  ;;  %v477_v27 = vrot.slane %v475_v14, 5  ;;  %v9358_v10 = vld [vmem:[%s12278_s16 + $0x48] sm:$0xf] }
  0x49   : > { %v481_v32 = vrot.slane %v479_v19, 4  ;;  %v2367_v54 = vrot.slane %v2365_v41, 4  ;;  %v2370_v55 = vrot.slane %v2368_v43, 5  ;;  %v2384_v60 = vshll.u32 %v12468_v29, 16 }
  0x4a   : > { %10667 = vmatpush3.bf16.msra.mxu0 %v11894_v0  ;;  %v458_v0 = vor.u32 %v457_v50, %v453_v39  ;;  %v2362_v17 = vrot.slane %v2360_v7, 5  ;;  %v2353_v39 = vsel %vm12342_vm2, %v2348_v23, %v2352_v2  ;;  %v472_v40 = vor.u32 %v471_v26, %v468_v18  ;;  %v12501_v23 = vld [vmem:[%s12278_s16 + $0x50] sm:$0x1] }
  0x4b   : > { %10477 = vmatpush3.bf16.msra.mxu1 %v11898_v4  ;;  %10668 = vmatprep.subr.bf16.mxu0 %v11896_v5  ;;  %v2356_v4 = vrot.slane %v2354_v59, 4  ;;  %v482_v45 = vor.u32 %v481_v32, %v477_v27  ;;  %v2374_v50 = vshll.u32 %v12460_v20, 16  ;;  %v2378_v59 = vshrl.u32 %v12460_v20, 16  ;;  %v11903_v32 = vld [vmem:[%s15168_s1 + $0x178] sm:$0xff]  }
  0x4c   : > { %10478 = vmatprep.subr.bf16.mxu1 %v11901_v35  ;;  %v459_v11 = vrot.slane %v458_v0, 4  ;;  %v473_v53 = vrot.slane %v472_v40, 4  ;;  %v2371_v62 = vor.u32 %v2370_v55, %v2367_v54  ;;  %v355_v0 = vld [vmem:[%s12278_s16 + $0x44] sm:$0x1]  ;;  %v2386_v7 = vrot.slane %v2384_v60, 5 }
  0x4d   : > { %v2357_v16 = vor.u32 %v2356_v4, %v2352_v2  ;;  %v483_v57 = vrot.slane %v482_v45, 4  ;;  %v2376_v58 = vrot.slane %v2374_v50, 5  ;;  %v2380_v4 = vrot.slane %v2378_v59, 4  ;;  %v315_v54 = vld [vmem:[%s12278_s16 + $0x4c] sm:$0xf] }
  0x4e   : > { %10669 = vmatpush3.bf16.msra.mxu0 %v11896_v5  ;;  %v464_v22 = vsel %vm12342_vm2, %v459_v11, %v463_v51  ;;  %v485_v5 = vshll.u32 %v354_v3, 16  ;;  %v11910_v3 = vld [vmem:[%s15168_s1 + $0x38] sm:$0xff]   ;;  %v499_v8 = vshll.u32 %v313_v56, 16  ;;  %v2372_v12 = vrot.slane %v2371_v62, 4  ;;  %v356_v55 = vld [vmem:[%s12278_s16 + $0x50] sm:$0x1] }
  0x4f   : > { %10479 = vmatpush3.bf16.msra.mxu1 %v11901_v35  ;;  %10670 = vmatprep.subr.bf16.mxu0 %v11897_v49  ;;  %v9170_v30 = vcombine.low %v454_v6, %v464_v22  ;;  %v2358_v31 = vrot.slane %v2357_v16, 4  ;;  %v312_v35 = vld [vmem:[%s12278_s16 + $0x3c] sm:$0xf]  ;;  %v11902_v16 = vld [vmem:[%s15168_s1 + $0x170] sm:$0xff]   ;;  %v503_v19 = vshrl.u32 %v313_v56, 16  ;;  %v509_v22 = vshll.u32 %v355_v0, 16 }
  0x50   : > { %10480 = vmatprep.subr.bf16.mxu1 %v11904_v61  ;;  %v487_v48 = vrot.slane %v485_v5, 5  ;;  %v490_v1 = vshrl.u32 %v312_v35, 16  ;;  %v493_v2 = vshll.u32 %v312_v35, 16  ;;  %v501_v18 = vrot.slane %v499_v8, 5  ;;  %v12512_v5 = vld [vmem:[%s15168_s1 + $0x80] sm:$0xff]  }
  0x51   : > { %10445 = vmatmul.mubr.bf16.gmra.mrb[4].mxu1 %v9170_v30  ;;  %v2363_v44 = vsel %vm12342_vm2, %v2358_v31, %v2362_v17  ;;  %v2381_v17 = vor.u32 %v2380_v4, %v2376_v58  ;;  %v2392_v30 = vshll.u32 %v9358_v10, 16  ;;  %v314_v31 = vld [vmem:[%s12278_s16 + $0x48] sm:$0xf]  ;;  %v9361_v59 = vld [vmem:[%s12278_s16 + $0x54] sm:$0xf]  ;;  %v527_v4 = vshrl.u32 %v315_v54, 16 }
  0x52   : > { %10671 = vmatpush3.bf16.msra.mxu0 %v11897_v49  ;;  %v9410_v51 = vcombine.low %v2353_v39, %v2363_v44  ;;  %v11900_v49 = vld [vmem:[%s15168_s1 + $0x168] sm:$0xff]   ;;  %v488_v6 = vsel %vm12342_vm2, %v483_v57, %v487_v48  ;;  %v492_v13 = vrot.slane %v490_v1, 4  ;;  %v495_v14 = vrot.slane %v493_v2, 5  ;;  %v12526_v1 = vld [vmem:[%s12278_s16 + $0x58] sm:$0xf] }
  0x53   : > { %10481 = vmatpush3.bf16.msra.mxu1 %v11904_v61  ;;  %10672 = vmatprep.subr.bf16.mxu0 %v11899_v21  ;;  %v478_v61 = vsel %vm12342_vm2, %v473_v53, %v477_v27  ;;  %v2389_v27 = vshrl.u32 %v9358_v10, 16  ;;  %v2382_v35 = vrot.slane %v2381_v17, 4  ;;  %v511_v39 = vrot.slane %v509_v22, 5 }
  0x54   : > { %10482 = vmatprep.subr.bf16.mxu1 %v11906_v15  ;;  %10637 = vmatmul.mubr.bf16.gmra.mrb[4].mxu0 %v9410_v51  ;;  %v9171_v11 = vcombine.low %v478_v61, %v488_v6  ;;  %v496_v26 = vor.u32 %v495_v14, %v492_v13  ;;  %v2394_v44 = vrot.slane %v2392_v30, 5  ;;  %v2408_v53 = vshll.u32 %v12501_v23, 16 }
  0x55   : > { %v2391_v43 = vrot.slane %v2389_v27, 4  ;;  %v2387_v48 = vsel %vm12342_vm2, %v2382_v35, %v2386_v7  ;;  %v514_v62 = vshrl.u32 %v314_v31, 16  ;;  %v517_v0 = vshll.u32 %v314_v31, 16  ;;  %v12531_v7 = vld [vmem:[%s15168_s1 + $0x180] sm:$0xff]  }
  0x56   : > { %10673 = vmatpush3.bf16.msra.mxu0 %v11899_v21  ;;  %10448 = vmatprep.mubr.bf16.mxu1 %v9171_v11  ;;  %v2377_v21 = vsel %vm12342_vm2, %v2372_v12, %v2376_v58  ;;  %v497_v41 = vrot.slane %v496_v26, 4  ;;  %v2410_v61 = vrot.slane %v2408_v53, 5  ;;  %v533_v12 = vshll.u32 %v356_v55, 16  ;;  %v9364_v53 = vld [vmem:[%s12278_s16 + $0x60] sm:$0xf] }
  0x57   : > { %10483 = vmatpush3.bf16.msra.mxu1 %v11906_v15  ;;  %v12495_v15 = vld [vmem:[%s12278_s16 + $0x4c] sm:$0xf]  ;;  %10674 = vmatprep.subr.bf16.mxu0 %v11900_v49  ;;  %v9411_v56 = vcombine.low %v2377_v21, %v2387_v48  ;;  %v2395_v57 = vor.u32 %v2394_v44, %v2391_v43  ;;  %v516_v10 = vrot.slane %v514_v62, 4  ;;  %v519_v11 = vrot.slane %v517_v0, 5  ;;  %v12538_v21 = vld [vmem:[%s12278_s16 + $0x5c] sm:$0x1] }
  0x58   : > { %10484 = vmatprep.subr.bf16.mxu1 %v11908_v36  ;;  %v2398_v40 = vshll.u32 %v12495_v15, 16  ;;  %v2402_v45 = vshrl.u32 %v12495_v15, 16  ;;  %v535_v22 = vrot.slane %v533_v12, 5  ;;  %v2413_v26 = vshrl.u32 %v9361_v59, 16  ;;  %v317_v44 = vld [vmem:[%s12278_s16 + $0x58] sm:$0xf] }
  0x59   : > { %10640 = vmatprep.mubr.bf16.mxu0 %v9411_v56  ;;  %v2396_v2 = vrot.slane %v2395_v57, 4  ;;  %v2416_v30 = vshll.u32 %v9361_v59, 16  ;;  %v2422_v31 = vshll.u32 %v12526_v1, 16  ;;  %v2426_v35 = vshrl.u32 %v12526_v1, 16 }
  0x5a   : > { %10675 = vmatpush3.bf16.msra.mxu0 %v11900_v49  ;;  %v2400_v51 = vrot.slane %v2398_v40, 5  ;;  %v502_v49 = vsel %vm12342_vm2, %v497_v41, %v501_v18  ;;  %v2404_v58 = vrot.slane %v2402_v45, 4  ;;  %v2415_v43 = vrot.slane %v2413_v26, 4  ;;  %v12566_v26 = vld [vmem:[%s12278_s16 + $0x60] sm:$0xf] }
  0x5b   : > { %10485 = vmatpush3.bf16.msra.mxu1 %v11908_v36  ;;  %v505_v36 = vrot.slane %v503_v19, 4  ;;  %10676 = vmatprep.subr.bf16.mxu0 %v11902_v16  ;;  %v529_v19 = vrot.slane %v527_v4, 4  ;;  %v2424_v45 = vrot.slane %v2422_v31, 5  ;;  %v2428_v48 = vrot.slane %v2426_v35, 4 }
  0x5c   : > { %10486 = vmatprep.subr.bf16.mxu1 %v11910_v3  ;;  %v2405_v6 = vor.u32 %v2404_v58, %v2400_v51  ;;  %v2401_v14 = vsel %vm12342_vm2, %v2396_v2, %v2400_v51  ;;  %v357_v51 = vld [vmem:[%s12278_s16 + $0x5c] sm:$0x1] }
  0x5d   : > { %v506_v50 = vor.u32 %v505_v36, %v501_v18  ;;  %v520_v18 = vor.u32 %v519_v11, %v516_v10  ;;  %v316_v36 = vld [vmem:[%s12278_s16 + $0x54] sm:$0xf]  ;;  %v2429_v58 = vor.u32 %v2428_v48, %v2424_v45 }
  0x5e   : > { %10677 = vmatpush3.bf16.msra.mxu0 %v11902_v16  ;;  %v2406_v16 = vrot.slane %v2405_v6, 4  ;;  %v538_v56 = vshrl.u32 %v316_v36, 16  ;;  %v551_v6 = vshrl.u32 %v317_v44, 16 }
  0x5f   : > { %10487 = vmatpush3.bf16.msra.mxu1 %v11910_v3  ;;  %v507_v60 = vrot.slane %v506_v50, 4  ;;  %v523_v3 = vshll.u32 %v315_v54, 16  ;;  %10678 = vmatprep.subr.bf16.mxu0 %v11903_v32  ;;  %v521_v40 = vrot.slane %v520_v18, 4  ;;  %v2432_v50 = vshll.u32 %v12538_v21, 16  ;;  %v12562_v18 = vld [vmem:[%s12278_s16 + $0x68] sm:$0x1] }
  0x60   : > { %10520 = vmatprep.subr.bf16.mxu1 %v12512_v5  ;;  %v2411_v27 = vsel %vm12342_vm2, %v2406_v16, %v2410_v61  ;;  %v12553_v61 = vld [vmem:[%s12278_s16 + $0x64] sm:$0xf]  ;;  %v540_v0 = vrot.slane %v538_v56, 4  ;;  %v553_v12 = vrot.slane %v551_v6, 4  ;;  %v2456_v48 = vshll.u32 %v12562_v18, 16 }
  0x61   : > { %v512_v8 = vsel %vm12342_vm2, %v507_v60, %v511_v39  ;;  %v525_v17 = vrot.slane %v523_v3, 5  ;;  %v9412_v39 = vcombine.low %v2401_v14, %v2411_v27  ;;  %v2434_v59 = vrot.slane %v2432_v50, 5  ;;  %v12584_v6 = vld [vmem:[%s12278_s16 + $0x6c] sm:$0xf] }
  0x62   : > { %v9172_v13 = vcombine.low %v502_v49, %v512_v8  ;;  %10679 = vmatpush3.bf16.msra.mxu0 %v11903_v32  ;;  %v2418_v32 = vrot.slane %v2416_v30, 5  ;;  %v541_v49 = vshll.u32 %v316_v36, 16  ;;  %v547_v60 = vshll.u32 %v317_v44, 16  ;;  %v12569_v36 = vld [vmem:[%s12278_s16 + $0x64] sm:$0xf] }
  0x63   : > { %10712 = vmatprep.subr.bf16.mxu0 %v12531_v7  ;;  %v530_v41 = vor.u32 %v529_v19, %v525_v17  ;;  %10641 = vmatmul.mubr.bf16.gmra.mrb[8].mxu0 %v9412_v39  ;;  %v526_v54 = vsel %vm12342_vm2, %v521_v40, %v525_v17  ;;  %v2430_v8 = vrot.slane %v2429_v58, 4  ;;  %v2437_v14 = vshrl.u32 %v9364_v53, 16  ;;  %v358_v44 = vld [vmem:[%s12278_s16 + $0x68] sm:$0x1] }
  0x64   : > { %10449 = vmatmul.mubr.bf16.gmra.mrb[8].mxu1 %v9172_v13  ;;  %v2419_v57 = vor.u32 %v2418_v32, %v2415_v43  ;;  %v543_v2 = vrot.slane %v541_v49, 5  ;;  %v549_v10 = vrot.slane %v547_v60, 5  ;;  %v557_v13 = vshll.u32 %v357_v51, 16  ;;  %v9431_v51 = vld [vmem:[%s12278_s16 + $0xc] sm:$0xe] }
  0x65   : > { %v531_v55 = vrot.slane %v530_v41, 4  ;;  %v2435_v17 = vsel %vm12342_vm2, %v2430_v8, %v2434_v59  ;;  %v2440_v19 = vshll.u32 %v9364_v53, 16  ;;  %v2439_v39 = vrot.slane %v2437_v14, 4 }
  0x66   : > { %v2420_v4 = vrot.slane %v2419_v57, 4  ;;  %v544_v11 = vor.u32 %v543_v2, %v540_v0  ;;  %v554_v31 = vor.u32 %v553_v12, %v549_v10  ;;  %v559_v35 = vrot.slane %v557_v13, 5 }
  0x67   : > { %v536_v62 = vsel %vm12342_vm2, %v531_v55, %v535_v22  ;;  %v2446_v22 = vshll.u32 %v12553_v61, 16  ;;  %v2442_v40 = vrot.slane %v2440_v19, 5  ;;  %v2450_v43 = vshrl.u32 %v12553_v61, 16 }
  0x68   : > { %v9173_v3 = vcombine.low %v526_v54, %v536_v62  ;;  %v2425_v16 = vsel %vm12342_vm2, %v2420_v4, %v2424_v45  ;;  %v545_v30 = vrot.slane %v544_v11, 4  ;;  %v555_v45 = vrot.slane %v554_v31, 4 }
  0x69   : > { %v9413_v27 = vcombine.low %v2425_v16, %v2435_v17  ;;  %v2448_v41 = vrot.slane %v2446_v22, 5  ;;  %v562_v50 = vshrl.u32 %v12566_v26, 16  ;;  %v2443_v53 = vor.u32 %v2442_v40, %v2439_v39  ;;  %v12596_v22 = vld [vmem:[%s12278_s16 + $0x70] sm:$0xf] }
  0x6a   : > { %10452 = vmatprep.mubr.bf16.mxu1 %v9173_v3  ;;  %v550_v32 = vsel %vm12342_vm2, %v545_v30, %v549_v10  ;;  %v2452_v54 = vrot.slane %v2450_v43, 4  ;;  %v565_v55 = vshll.u32 %v12566_v26, 16  ;;  %v571_v56 = vshll.u32 %v12569_v36, 16  ;;  %v11994_v10 = vld [vmem:[%s12278_s16 + $0xb4] sm:$0xff]  }
  0x6b   : > { %10644 = vmatprep.mubr.bf16.mxu0 %v9413_v27  ;;  %v560_v49 = vsel %vm12342_vm2, %v555_v45, %v559_v35  ;;  %v2458_v57 = vrot.slane %v2456_v48, 5  ;;  %v564_v58 = vrot.slane %v562_v50, 4  ;;  %v575_v59 = vshrl.u32 %v12569_v36, 16  ;;  %v12607_v48 = vld [vmem:[%s12278_s16 + $0x78] sm:$0xf] }
  0x6c   : > { %v9174_v60 = vcombine.low %v550_v32, %v560_v49  ;;  %v2444_v62 = vrot.slane %v2443_v53, 4  ;;  %v2453_v0 = vor.u32 %v2452_v54, %v2448_v41  ;;  %v567_v2 = vrot.slane %v565_v55, 5  ;;  %v12618_v55 = vld [vmem:[%s12278_s16 + $0x7c] sm:$0xf] }
  0x6d   : > { %v573_v3 = vrot.slane %v571_v56, 5  ;;  %v577_v4 = vrot.slane %v575_v59, 4  ;;  %v581_v8 = vshll.u32 %v358_v44, 16  ;;  %v9447_v11 = vrot.slane %v9431_v51, 9  ;;  %v360_v59 = vld [vmem:[%s12278_s16 + $0x80] sm:$0x1] }
  0x6e   : > { %10453 = vmatmul.mubr.bf16.gmra.mrb[12].mxu1 %v9174_v60  ;;  %v2449_v12 = vsel %vm12342_vm2, %v2444_v62, %v2448_v41  ;;  %v2454_v13 = vrot.slane %v2453_v0, 4  ;;  %v568_v14 = vor.u32 %v567_v2, %v564_v58  ;;  %v3040_v16 = vrot.slane %v12323_v24, 5  ;;  %v359_v41 = vld [vmem:[%s12278_s16 + $0x74] sm:$0x1]  ;;  %v9432_v24 = vld [vmem:[%s12278_s16 + $0x18] sm:$0xe] }
  0x6f   : > { %v578_v17 = vor.u32 %v577_v4, %v573_v3  ;;  %v583_v19 = vrot.slane %v581_v8, 5  ;;  %v586_v27 = vshrl.u32 %v12584_v6, 16  ;;  %v589_v30 = vshll.u32 %v12584_v6, 16 }
  0x70   : > { %v2459_v31 = vsel %vm12342_vm2, %v2454_v13, %v2458_v57  ;;  %v569_v35 = vrot.slane %v568_v14, 4  ;;  %v3041_v39 = vsel %vm12588_vm5, %v9447_v11, %v3040_v16  ;;  %v3042_v40 = vrot.slane %v3040_v16, 4  ;;  %v9433_v14 = vld [vmem:[%s12278_s16 + $0x24] sm:$0xe] }
  0x71   : > { %v9414_v43 = vcombine.low %v2449_v12, %v2459_v31  ;;  %v579_v44 = vrot.slane %v578_v17, 4  ;;  %v588_v32 = vrot.slane %v586_v27, 4  ;;  %v591_v45 = vrot.slane %v589_v30, 5  ;;  %v12640_v17 = vld [vmem:[%s12278_s16 + $0x84] sm:$0xf]  ;;  %v11907_v30 = vld [vmem:[%s15168_s1 + $0x188] sm:$0xff]  }
  0x72   : > { %v574_v50 = vsel %vm12342_vm2, %v569_v35, %v573_v3  ;;  %v3044_v51 = vsel %vm12588_vm5, %v3042_v40, %v3043_v42  ;;  %v595_v53 = vshll.u32 %v12596_v22, 16  ;;  %v599_v54 = vshrl.u32 %v12596_v22, 16 }
  0x73   : > { %10645 = vmatmul.mubr.bf16.gmra.mrb[12].mxu0 %v9414_v43  ;;  %v584_v56 = vsel %vm12342_vm2, %v579_v44, %v583_v19  ;;  %v9479_v49 = vcombine.low %v3041_v39, %v3044_v51  ;;  %v592_v57 = vor.u32 %v591_v45, %v588_v32  ;;  %v605_v58 = vshll.u32 %v359_v41, 16  ;;  %v12648_v41 = vld [vmem:[%s12278_s16 + $0x88] sm:$0xf]  ;;  %v361_v32 = vld [vmem:[%s12278_s16 + $0x8c] sm:$0x1] }
  0x74   : > { %v9175_v60 = vcombine.low %v574_v50, %v584_v56  ;;  %v597_v25 = vrot.slane %v595_v53, 5  ;;  %v601_v62 = vrot.slane %v599_v54, 4  ;;  %v9448_v0 = vrot.slane %v9432_v24, 9 }
  0x75   : > { %10680 = vmatprep.mubr.bf16.mxu0 %v9479_v49  ;;  %v593_v42 = vrot.slane %v592_v57, 4  ;;  %v607_v2 = vrot.slane %v605_v58, 5  ;;  %v3051_v3 = vsel %vm12588_vm5, %v12391_v37, %v3050_v33  ;;  %v610_v4 = vshrl.u32 %v12607_v48, 16 }
  0x76   : > { %10456 = vmatprep.mubr.bf16.mxu1 %v9175_v60  ;;  %v602_v8 = vor.u32 %v601_v62, %v597_v25  ;;  %v3048_v11 = vsel %vm12588_vm5, %v9448_v0, %v3047_v28  ;;  %v613_v12 = vshll.u32 %v12607_v48, 16  ;;  %v619_v13 = vshll.u32 %v12618_v55, 16 }
  0x77   : > { %v598_v9 = vsel %vm12342_vm2, %v593_v42, %v597_v25  ;;  %v9480_v16 = vcombine.low %v3048_v11, %v3051_v3  ;;  %v612_v33 = vrot.slane %v610_v4, 4  ;;  %v623_v37 = vshrl.u32 %v12618_v55, 16  ;;  %v12669_v3 = vld [vmem:[%s12278_s16 + $0x90] sm:$0xf]  ;;  %v12672_v4 = vld [vmem:[%s12278_s16 + $0x94] sm:$0xf] }
  0x78   : > { %v603_v63 = vrot.slane %v602_v8, 4  ;;  %v615_v19 = vrot.slane %v613_v12, 5  ;;  %v621_v27 = vrot.slane %v619_v13, 5  ;;  %v629_v28 = vshll.u32 %v360_v59, 16 }
  0x79   : > { %v625_v31 = vrot.slane %v623_v37, 4  ;;  %v9449_v35 = vrot.slane %v9433_v14, 9  ;;  %v3054_v39 = vrot.slane %v12395_v46, 5  ;;  %v3057_v40 = vrot.slane %v12401_v52, 5  ;;  %v9434_v46 = vld [vmem:[%s12278_s16 + $0x30] sm:$0xe] }
  0x7a   : > { %v608_v24 = vsel %vm12342_vm2, %v603_v63, %v607_v2  ;;  %v616_v43 = vor.u32 %v615_v19, %v612_v33  ;;  %v631_v44 = vrot.slane %v629_v28, 5  ;;  %v634_v45 = vshrl.u32 %v12640_v17, 16  ;;  %v362_v63 = vld [vmem:[%s12278_s16 + $0x98] sm:$0x1] }
  0x7b   : > { %v9176_v50 = vcombine.low %v598_v9, %v608_v24  ;;  %10681 = vmatmul.mubr.bf16.vlgmr.msra.gmra.mrb[0].mxu0 %v9480_v16  ;;  %v626_v51 = vor.u32 %v625_v31, %v621_v27  ;;  %v3055_v53 = vsel %vm12588_vm5, %v9449_v35, %v3054_v39  ;;  %v3056_v54 = vrot.slane %v3054_v39, 4  ;;  %v11911_v31 = vld [vmem:[%s15168_s1 + $0x198] sm:$0xff]  }
  0x7c   : > { %10713 = vmatpush3.bf16.msra.mxu0 %v12531_v7  ;;  %v617_v52 = vrot.slane %v616_v43, 4  ;;  %v636_v56 = vrot.slane %v634_v45, 4  ;;  %v637_v49 = vshll.u32 %v12640_v17, 16  ;;  %v643_v57 = vshll.u32 %v12648_v41, 16  ;;  %v11909_v7 = vld [vmem:[%s15168_s1 + $0x190] sm:$0xff]  }
  0x7d   : > { %10457 = vmatmul.mubr.bf16.gmra.mrb[16].mxu1 %v9176_v50  ;;  %v627_v58 = vrot.slane %v626_v51, 4  ;;  %v3058_v59 = vsel %vm12588_vm5, %v3056_v54, %v3057_v40  ;;  %v647_v60 = vshrl.u32 %v12648_v41, 16  ;;  %v653_v25 = vshll.u32 %v361_v32, 16  ;;  %10714 = vmatprep.subr.bf16.mxu0 %v11907_v30  ;;  %v9435_v39 = vld [vmem:[%s12278_s16 + $0x3c] sm:$0xe] }
  0x7e   : > { %v622_v62 = vsel %vm12342_vm2, %v617_v52, %v621_v27  ;;  %v9481_v0 = vcombine.low %v3055_v53, %v3058_v59  ;;  %v639_v42 = vrot.slane %v637_v49, 5  ;;  %v645_v2 = vrot.slane %v643_v57, 5  ;;  %v12690_v32 = vld [vmem:[%s12278_s16 + $0x9c] sm:$0xf]  ;;  %v12699_v49 = vld [vmem:[%s12278_s16 + $0xa0] sm:$0xf] }
  0x7f   : > { %v632_v8 = vsel %vm12342_vm2, %v627_v58, %v631_v44  ;;  %v649_v11 = vrot.slane %v647_v60, 4  ;;  %v655_v12 = vrot.slane %v653_v25, 5  ;;  %v9450_v13 = vrot.slane %v9434_v46, 9  ;;  %v11915_v57 = vld [vmem:[%s15168_s1 + $0x1a0] sm:$0xff]  }
  0x80   : > { %v9177_v14 = vcombine.low %v622_v62, %v632_v8  ;;  %10684 = vmatprep.mubr.bf16.mxu0 %v9481_v0  ;;  %v640_v9 = vor.u32 %v639_v42, %v636_v56  ;;  %v3061_v16 = vrot.slane %v12426_v34, 5  ;;  %v3064_v33 = vrot.slane %v12437_v47, 5  ;;  %10715 = vmatpush3.bf16.msra.mxu0 %v11907_v30  ;;  %v363_v62 = vld [vmem:[%s12278_s16 + $0xa4] sm:$0x1] }
  0x81   : > { %v650_v37 = vor.u32 %v649_v11, %v645_v2  ;;  %v658_v19 = vshrl.u32 %v12669_v3, 16  ;;  %v661_v27 = vshll.u32 %v12669_v3, 16  ;;  %v667_v28 = vshll.u32 %v12672_v4, 16  ;;  %10716 = vmatprep.subr.bf16.mxu0 %v11909_v7 }
  0x82   : > { %10460 = vmatprep.mubr.bf16.mxu1 %v9177_v14  ;;  %v641_v35 = vrot.slane %v640_v9, 4  ;;  %v3062_v34 = vsel %vm12588_vm5, %v9450_v13, %v3061_v16  ;;  %v3063_v47 = vrot.slane %v3061_v16, 4  ;;  %v671_v30 = vshrl.u32 %v12672_v4, 16  ;;  %v9436_v16 = vld [vmem:[%s12278_s16 + $0x48] sm:$0xe] }
  0x83   : > { %v651_v40 = vrot.slane %v650_v37, 4  ;;  %v660_v24 = vrot.slane %v658_v19, 4  ;;  %v663_v43 = vrot.slane %v661_v27, 5  ;;  %v669_v44 = vrot.slane %v667_v28, 5  ;;  %v12724_v28 = vld [vmem:[%s12278_s16 + $0xa8] sm:$0xf] }
  0x84   : > { %v646_v45 = vsel %vm12342_vm2, %v641_v35, %v645_v2  ;;  %v3065_v50 = vsel %vm12588_vm5, %v3063_v47, %v3064_v33  ;;  %v673_v51 = vrot.slane %v671_v30, 4  ;;  %v677_v53 = vshll.u32 %v362_v63, 16  ;;  %10717 = vmatpush3.bf16.msra.mxu0 %v11909_v7  ;;  %v11919_v33 = vld [vmem:[%s15168_s1 + $0x1a8] sm:$0xff]  }
  0x85   : > { %v656_v54 = vsel %vm12342_vm2, %v651_v40, %v655_v12  ;;  %v9482_v46 = vcombine.low %v3062_v34, %v3065_v50  ;;  %v664_v52 = vor.u32 %v663_v43, %v660_v24  ;;  %v9451_v56 = vrot.slane %v9435_v39, 9  ;;  %10718 = vmatprep.subr.bf16.mxu0 %v11911_v31  ;;  %v12727_v30 = vld [vmem:[%s12278_s16 + $0xac] sm:$0xf] }
  0x86   : > { %v9178_v58 = vcombine.low %v646_v45, %v656_v54  ;;  %v674_v59 = vor.u32 %v673_v51, %v669_v44  ;;  %v679_v60 = vrot.slane %v677_v53, 5  ;;  %v3068_v25 = vrot.slane %v12460_v20, 5  ;;  %v9437_v54 = vld [vmem:[%s12278_s16 + $0x54] sm:$0xe] }
  0x87   : > { %10685 = vmatmul.mubr.bf16.gmra.mrb[4].mxu0 %v9482_v46  ;;  %v665_v7 = vrot.slane %v664_v52, 4  ;;  %v3071_v0 = vrot.slane %v12468_v29, 5  ;;  %v682_v42 = vshrl.u32 %v12690_v32, 16  ;;  %v685_v2 = vshll.u32 %v12690_v32, 16  ;;  %v11923_v46 = vld [vmem:[%s15168_s1 + $0x1b0] sm:$0xff]  }
  0x88   : > { %10461 = vmatmul.mubr.bf16.gmra.mrb[20].mxu1 %v9178_v58  ;;  %v675_v8 = vrot.slane %v674_v59, 4  ;;  %v3069_v11 = vsel %vm12588_vm5, %v9451_v56, %v3068_v25  ;;  %v3070_v12 = vrot.slane %v3068_v25, 4  ;;  %v691_v13 = vshll.u32 %v12699_v49, 16  ;;  %10719 = vmatpush3.bf16.msra.mxu0 %v11911_v31 }
  0x89   : > { %v670_v20 = vsel %vm12342_vm2, %v665_v7, %v669_v44  ;;  %v684_v14 = vrot.slane %v682_v42, 4  ;;  %v687_v29 = vrot.slane %v685_v2, 5  ;;  %v695_v9 = vshrl.u32 %v12699_v49, 16  ;;  %10720 = vmatprep.subr.bf16.mxu0 %v11915_v57  ;;  %v364_v44 = vld [vmem:[%s12278_s16 + $0xb0] sm:$0x1] }
  0x8a   : > { %v680_v37 = vsel %vm12342_vm2, %v675_v8, %v679_v60  ;;  %v3072_v63 = vsel %vm12588_vm5, %v3070_v12, %v3071_v0  ;;  %v693_v19 = vrot.slane %v691_v13, 5  ;;  %v701_v27 = vshll.u32 %v363_v62, 16  ;;  %v12747_v42 = vld [vmem:[%s12278_s16 + $0xb4] sm:$0xf]  ;;  %v12752_v13 = vld [vmem:[%s12278_s16 + $0xb8] sm:$0xf] }
  0x8b   : > { %v9179_v31 = vcombine.low %v670_v20, %v680_v37  ;;  %v9483_v35 = vcombine.low %v3069_v11, %v3072_v63  ;;  %v688_v34 = vor.u32 %v687_v29, %v684_v14  ;;  %v697_v47 = vrot.slane %v695_v9, 4  ;;  %v365_v20 = vld [vmem:[%s12278_s16 + $0xbc] sm:$0x1] }
  0x8c   : > { %v703_v39 = vrot.slane %v701_v27, 5  ;;  %v9452_v40 = vrot.slane %v9436_v16, 9  ;;  %v3075_v24 = vrot.slane %v12495_v15, 5  ;;  %v3078_v43 = vrot.slane %v12501_v23, 5  ;;  %10721 = vmatpush3.bf16.msra.mxu0 %v11915_v57  ;;  %v11927_v14 = vld [vmem:[%s15168_s1 + $0x1b8] sm:$0xff]  }
  0x8d   : > { %10464 = vmatprep.mubr.bf16.mxu1 %v9179_v31  ;;  %10688 = vmatprep.mubr.bf16.mxu0 %v9483_v35  ;;  %v689_v45 = vrot.slane %v688_v34, 4  ;;  %v698_v50 = vor.u32 %v697_v47, %v693_v19  ;;  %v706_v51 = vshrl.u32 %v12724_v28, 16  ;;  %v709_v53 = vshll.u32 %v12724_v28, 16  ;;  %v9438_v31 = vld [vmem:[%s12278_s16 + $0x60] sm:$0xe] }
  0x8e   : > { %v3076_v15 = vsel %vm12588_vm5, %v9452_v40, %v3075_v24  ;;  %v3077_v23 = vrot.slane %v3075_v24, 4  ;;  %v715_v52 = vshll.u32 %v12727_v30, 16  ;;  %v719_v56 = vshrl.u32 %v12727_v30, 16  ;;  %10722 = vmatprep.subr.bf16.mxu0 %v11919_v33  ;;  %v9368_v40 = vld [vmem:[%s12278_s16 + $0x70] sm:$0xf] }
  0x8f   : > { %v694_v57 = vsel %vm12342_vm2, %v689_v45, %v693_v19  ;;  %v699_v58 = vrot.slane %v698_v50, 4  ;;  %v708_v59 = vrot.slane %v706_v51, 4  ;;  %v711_v60 = vrot.slane %v709_v53, 5  ;;  %v12774_v45 = vld [vmem:[%s15168_s1 + $0x1c0] sm:$0xff]  }
  0x90   : > { %v3079_v25 = vsel %vm12588_vm5, %v3077_v23, %v3078_v43  ;;  %v717_v62 = vrot.slane %v715_v52, 5  ;;  %v721_v7 = vrot.slane %v719_v56, 4  ;;  %v725_v0 = vshll.u32 %v364_v44, 16  ;;  %10723 = vmatpush3.bf16.msra.mxu0 %v11919_v33  ;;  %v9439_v44 = vld [vmem:[%s12278_s16 + $0x6c] sm:$0xe] }
  0x91   : > { %v704_v2 = vsel %vm12342_vm2, %v699_v58, %v703_v39  ;;  %v9484_v8 = vcombine.low %v3076_v15, %v3079_v25  ;;  %v712_v11 = vor.u32 %v711_v60, %v708_v59  ;;  %v9453_v12 = vrot.slane %v9437_v54, 9  ;;  %10724 = vmatprep.subr.bf16.mxu0 %v11923_v46  ;;  %v9369_v56 = vld [vmem:[%s12278_s16 + $0x74] sm:$0x1]  ;;  %v9440_v25 = vld [vmem:[%s12278_s16 + $0x78] sm:$0xe] }
  0x92   : > { %v9180_v29 = vcombine.low %v694_v57, %v704_v2  ;;  %v722_v9 = vor.u32 %v721_v7, %v717_v62  ;;  %v727_v16 = vrot.slane %v725_v0, 5  ;;  %v3082_v33 = vrot.slane %v12526_v1, 5 }
  0x93   : > { %10689 = vmatmul.mubr.bf16.gmra.mrb[8].mxu0 %v9484_v8  ;;  %v713_v37 = vrot.slane %v712_v11, 4  ;;  %v3085_v63 = vrot.slane %v12538_v21, 5  ;;  %v730_v19 = vshrl.u32 %v12747_v42, 16  ;;  %v733_v27 = vshll.u32 %v12747_v42, 16 }
  0x94   : > { %10465 = vmatmul.mubr.bf16.gmra.mrb[24].mxu1 %v9180_v29  ;;  %v723_v35 = vrot.slane %v722_v9, 4  ;;  %v3083_v34 = vsel %vm12588_vm5, %v9453_v12, %v3082_v33  ;;  %v3084_v47 = vrot.slane %v3082_v33, 4  ;;  %v739_v39 = vshll.u32 %v12752_v13, 16  ;;  %10725 = vmatpush3.bf16.msra.mxu0 %v11923_v46  ;;  %v12787_v12 = vld [vmem:[%s12278_s16 + $0x7c] sm:$0xf] }
  0x95   : > { %v718_v1 = vsel %vm12342_vm2, %v713_v37, %v717_v62  ;;  %v732_v21 = vrot.slane %v730_v19, 4  ;;  %v735_v24 = vrot.slane %v733_v27, 5  ;;  %v743_v43 = vshrl.u32 %v12752_v13, 16  ;;  %10726 = vmatprep.subr.bf16.mxu0 %v11927_v14  ;;  %v11996_v37 = vld [vmem:[%s12278_s16] sm:$0xf] }
  0x96   : > { %v728_v50 = vsel %vm12342_vm2, %v723_v35, %v727_v16  ;;  %v3086_v51 = vsel %vm12588_vm5, %v3084_v47, %v3085_v63  ;;  %v741_v53 = vrot.slane %v739_v39, 5  ;;  %v749_v54 = vshll.u32 %v365_v20, 16  ;;  %v9374_v16 = vld [vmem:[%s12278_s16 + $0x88] sm:$0xf]  ;;  %v12802_v63 = vld [vmem:[%s12278_s16 + $0x4] sm:$0xf] }
  0x97   : > { %v9181_v46 = vcombine.low %v718_v1, %v728_v50  ;;  %v9485_v15 = vcombine.low %v3083_v34, %v3086_v51  ;;  %v736_v23 = vor.u32 %v735_v24, %v732_v21  ;;  %v745_v52 = vrot.slane %v743_v43, 4  ;;  %v9375_v27 = vld [vmem:[%s12278_s16 + $0x8c] sm:$0x1]  ;;  %v9378_v24 = vld [vmem:[%s12278_s16 + $0x98] sm:$0x1] }
  0x98   : > { %v751_v57 = vrot.slane %v749_v54, 5  ;;  %v9454_v58 = vrot.slane %v9438_v31, 9  ;;  %v3089_v59 = vrot.slane %v12553_v61, 5  ;;  %v3092_v60 = vrot.slane %v12562_v18, 5  ;;  %10727 = vmatpush3.bf16.msra.mxu0 %v11927_v14  ;;  %v12790_v18 = vld [vmem:[%s12278_s16 + $0x80] sm:$0x1] }
  0x99   : > { %10468 = vmatprep.mubr.bf16.mxu1 %v9181_v46  ;;  %10692 = vmatprep.mubr.bf16.mxu0 %v9485_v15  ;;  %v737_v62 = vrot.slane %v736_v23, 4  ;;  %v746_v7 = vor.u32 %v745_v52, %v741_v53  ;;  %v9455_v0 = vrot.slane %v9439_v44, 9  ;;  %v3096_v2 = vrot.slane %v9368_v40, 5  ;;  %v9441_v31 = vld [vmem:[%s12278_s16 + $0x84] sm:$0xe] }
  0x9a   : > { %v3090_v8 = vsel %vm12588_vm5, %v9454_v58, %v3089_v59  ;;  %v3091_v11 = vrot.slane %v3089_v59, 4  ;;  %v3099_v61 = vrot.slane %v9369_v56, 5  ;;  %10760 = vmatprep.subr.bf16.mxu0 %v12774_v45  ;;  %v9191_v19 = vcombine.low %v11996_v37, %v12802_v63  ;;  %v9377_v40 = vld [vmem:[%s12278_s16 + $0x94] sm:$0xf]  ;;  %v9442_v43 = vld [vmem:[%s12278_s16 + $0x90] sm:$0xe] }
  0x9b   : > { %v742_v20 = vsel %vm12342_vm2, %v737_v62, %v741_v53  ;;  %v747_v14 = vrot.slane %v746_v7, 4  ;;  %v3097_v29 = vsel %vm12588_vm5, %v9455_v0, %v3096_v2  ;;  %v3098_v9 = vrot.slane %v3096_v2, 4  ;;  %v9443_v51 = vld [vmem:[%s12278_s16 + $0x9c] sm:$0xe]  ;;  %v9380_v15 = vld [vmem:[%s12278_s16 + $0xa0] sm:$0xf] }
  0x9c   : > { %v3093_v33 = vsel %vm12588_vm5, %v3091_v11, %v3092_v60  ;;  %v9456_v39 = vrot.slane %v9440_v25, 9  ;;  %v3103_v44 = vrot.slane %v12787_v12, 5  ;;  %v3106_v50 = vrot.slane %v12790_v18, 5  ;;  %v9381_v23 = vld [vmem:[%s12278_s16 + $0xa4] sm:$0x1] }
  0x9d   : > { %v752_v35 = vsel %vm12342_vm2, %v747_v14, %v751_v57  ;;  %v9486_v34 = vcombine.low %v3090_v8, %v3093_v33  ;;  %v3100_v47 = vsel %vm12588_vm5, %v3098_v9, %v3099_v61  ;;  %v9457_v53 = vrot.slane %v9441_v31, 9  ;;  %v9383_v60 = vld [vmem:[%s12278_s16 + $0xac] sm:$0xf]  ;;  %v12826_v62 = vld [vmem:[%s12278_s16 + $0x10] sm:$0xf] }
  0x9e   : > { %v9182_v1 = vcombine.low %v742_v20, %v752_v35  ;;  %v9487_v21 = vcombine.low %v3097_v29, %v3100_v47  ;;  %v3110_v54 = vrot.slane %v9374_v16, 5  ;;  %v3113_v46 = vrot.slane %v9375_v27, 5  ;;  %v11998_v25 = vld [vmem:[%s12278_s16 + $0xc] sm:$0xf]  ;;  %v12000_v9 = vld [vmem:[%s12278_s16 + $0x18] sm:$0xf] }
  0x9f   : > { %10693 = vmatmul.mubr.bf16.gmra.mrb[12].mxu0 %v9486_v34  ;;  %v3104_v52 = vsel %vm12588_vm5, %v9456_v39, %v3103_v44  ;;  %v3105_v56 = vrot.slane %v3103_v44, 4  ;;  %v3117_v59 = vrot.slane %v9377_v40, 5  ;;  %v9192_v7 = vcombine.low %v11998_v25, %v12826_v62  ;;  %v11918_v20 = vld [vmem:[%s15168_s1 + $0x88] sm:$0xff]   ;;  %v12838_v16 = vld [vmem:[%s12278_s16 + $0x1c] sm:$0xf] }
  0xa0   : > { %10469 = vmatmul.mubr.bf16.gmra.mrb[28].mxu1 %v9182_v1  ;;  %10696 = vmatprep.mubr.bf16.mxu0 %v9487_v21  ;;  %v3111_v57 = vsel %vm12588_vm5, %v9457_v53, %v3110_v54  ;;  %v3112_v58 = vrot.slane %v3110_v54, 4  ;;  %v9458_v2 = vrot.slane %v9442_v43, 9  ;;  %v3120_v8 = vrot.slane %v9378_v24, 5  ;;  %v9384_v31 = vld [vmem:[%s12278_s16 + $0xb0] sm:$0x1] }
  0xa1   : > { %10488 = vmatprep.mubr.bf16.mxu1 %v9191_v19  ;;  %v3107_v0 = vsel %vm12588_vm5, %v3105_v56, %v3106_v50  ;;  %v3119_v14 = vrot.slane %v3117_v59, 4  ;;  %v9459_v29 = vrot.slane %v9443_v51, 9  ;;  %v9193_v33 = vcombine.low %v12000_v9, %v12838_v16  ;;  %v9444_v35 = vld [vmem:[%s12278_s16 + $0xa8] sm:$0xe]  ;;  %v9386_v34 = vld [vmem:[%s12278_s16 + $0xb8] sm:$0xf] }
  0xa2   : > { %v9488_v11 = vcombine.low %v3104_v52, %v3107_v0  ;;  %v3114_v61 = vsel %vm12588_vm5, %v3112_v58, %v3113_v46  ;;  %v3124_v19 = vrot.slane %v9380_v15, 5  ;;  %v3127_v27 = vrot.slane %v9381_v23, 5  ;;  %v9387_v21 = vld [vmem:[%s12278_s16 + $0xbc] sm:$0x1]  ;;  %v9445_v24 = vld [vmem:[%s12278_s16 + $0xb4] sm:$0xe] }
  0xa3   : > { %v9489_v37 = vcombine.low %v3111_v57, %v3114_v61  ;;  %v3131_v39 = vrot.slane %v9383_v60, 5  ;;  %v3118_v40 = vsel %vm12588_vm5, %v9458_v2, %v3117_v59  ;;  %v3121_v1 = vsel %vm12588_vm5, %v3119_v14, %v3120_v8  ;;  %v11922_v51 = vld [vmem:[%s15168_s1 + $0x90] sm:$0xff]   ;;  %v9389_v54 = vld [vmem:[%s12278_s16 + $0xc4] sm:$0xf]  ;;  %v12861_v52 = vld [vmem:[%s12278_s16 + $0x28] sm:$0xf] }
  0xa4   : > { %v3126_v47 = vrot.slane %v3124_v19, 4  ;;  %v3125_v43 = vsel %vm12588_vm5, %v9459_v29, %v3124_v19  ;;  %v3138_v50 = vrot.slane %v9386_v34, 5  ;;  %v9460_v53 = vrot.slane %v9444_v35, 9  ;;  %v12002_v23 = vld [vmem:[%s12278_s16 + $0x24] sm:$0xf]  ;;  %v11926_v2 = vld [vmem:[%s15168_s1 + $0x98] sm:$0xff]  }
  0xa5   : > { %v9490_v46 = vcombine.low %v3118_v40, %v3121_v1  ;;  %v3133_v15 = vrot.slane %v3131_v39, 4  ;;  %v9194_v56 = vcombine.low %v12002_v23, %v12861_v52  ;;  %v12004_v58 = vld [vmem:[%s12278_s16 + $0x30] sm:$0xf]  ;;  %v12866_v59 = vld [vmem:[%s12278_s16 + $0x34] sm:$0xf]  ;;  %v9461_v25 = vrot.slane %v9445_v24, 9 }
  0xa6   : > { %v3128_v44 = vsel %vm12588_vm5, %v3126_v47, %v3127_v27  ;;  %v9195_v60 = vcombine.low %v12004_v58, %v12866_v59  ;;  %v3141_v0 = vrot.slane %v9387_v21, 5  ;;  %v9446_v8 = vld [vmem:[%s12278_s16 + $0xc0] sm:$0xe]  ;;  %v3132_v61 = vsel %vm12588_vm5, %v9460_v53, %v3131_v39  ;;  %v9390_v9 = vld [vmem:[%s12278_s16 + $0xc8] sm:$0x1]  ;;  %v11929_v23 = vld [vmem:[%s12278_s16 + $0x18] sm:$0xff]  }
  0xa7   : > { %10697 = vmatmul.mubr.bf16.gmra.mrb[16].mxu0 %v9488_v11  ;;  %v9491_v57 = vcombine.low %v3125_v43, %v3128_v44  ;;  %v3145_v11 = vrot.slane %v9389_v54, 5  ;;  %v3139_v14 = vsel %vm12588_vm5, %v9461_v25, %v3138_v50  ;;  %v9462_v19 = vrot.slane %v9446_v8, 9  ;;  %v12006_v27 = vld [vmem:[%s12278_s16 + $0x3c] sm:$0xf]  ;;  %v12008_v40 = vld [vmem:[%s12278_s16 + $0x48] sm:$0xf] }
  0xa8   : > { %10489 = vmatmul.mubr.bf16.vlgmr.msra.gmra.mrb[0].mxu1 %v9192_v7  ;;  %10700 = vmatprep.mubr.bf16.mxu0 %v9489_v37  ;;  %v3140_v7 = vrot.slane %v3138_v50, 4  ;;  %v3148_v39 = vrot.slane %v9390_v9, 5  ;;  %v12892_v1 = vld [vmem:[%s12278_s16 + $0x4c] sm:$0xf]  ;;  %v11943_v50 = vld [vmem:[%s15168_s1 + $0xb0] sm:$0xff]   ;;  %v2498_v53 = vshrl.u32 %v12787_v12, 16 }
  0xa9   : > { %10521 = vmatpush3.bf16.msra.mxu1 %v12512_v5  ;;  %10492 = vmatprep.mubr.bf16.mxu1 %v9193_v33  ;;  %v3134_v5 = vrot.slane %v9384_v31, 5  ;;  %v11931_v33 = vld [vmem:[%s15168_s1 + $0xa0] sm:$0xff]   ;;  %v3147_v47 = vrot.slane %v3145_v11, 4  ;;  %v9197_v21 = vcombine.low %v12008_v40, %v12892_v1  ;;  %v11937_v24 = vld [vmem:[%s15168_s1 + $0xa8] sm:$0xff]   ;;  %v3146_v43 = vsel %vm12588_vm5, %v9462_v19, %v3145_v11  ;;  %v11935_v19 = vld [vmem:[%s12278_s16 + $0x30] sm:$0xff]  }
  0xaa   : > { %10522 = vmatprep.subr.bf16.mxu1 %v11918_v20  ;;  %v3142_v29 = vsel %vm12588_vm5, %v3140_v7, %v3141_v0  ;;  %v12887_v31 = vld [vmem:[%s12278_s16 + $0x40] sm:$0xf]  ;;  %v12920_v58 = vrot.slane %v2498_v53, 4  ;;  %v11932_v7 = vld [vmem:[%s12278_s16 + $0x24] sm:$0xff]   ;;  %v1408_v8 = vrot.slane %v12826_v62, 5  ;;  %v2504_v9 = vshll.u32 %v12790_v18, 16 }
  0xab   : > { %v9196_v35 = vcombine.low %v12006_v27, %v12887_v31  ;;  %v9493_v34 = vcombine.low %v3139_v14, %v3142_v29  ;;  %v3149_v44 = vsel %vm12588_vm5, %v3147_v47, %v3148_v39  ;;  %v1348_v0 = vld [vmem:[%s12278_s16] sm:$0xe]  ;;  %v1349_v11 = vld [vmem:[%s12278_s16 + $0xc] sm:$0xe]  ;;  %v1415_v14 = vrot.slane %v12838_v16, 5 }
  0xac   : > { %v9494_v54 = vcombine.low %v3146_v43, %v3149_v44  ;;  %v1351_v62 = vld [vmem:[%s12278_s16 + $0x24] sm:$0xe]  ;;  %v9202_v16 = vcombine.low %v12640_v17, %v12648_v41  ;;  %v9203_v27 = vcombine.low %v12669_v3, %v12672_v4  ;;  %v9215_v18 = vrot.slane %v1348_v0, 9  ;;  %v12014_v39 = vld [vmem:[%s12278_s16 + $0x20] sm:$0x1]  ;;  %v11944_v3 = vld [vmem:[%s12278_s16 + $0x54] sm:$0xff]  }
  0xad   : > { %10523 = vmatpush3.bf16.msra.mxu1 %v11918_v20  ;;  %v3135_v20 = vsel %vm12588_vm5, %v3133_v15, %v3134_v5  ;;  %v12909_v15 = vld [vmem:[%s12278_s16 + $0x58] sm:$0xf]  ;;  %v1417_v47 = vrot.slane %v1415_v14, 4  ;;  %v1418_v40 = vrot.slane %v12014_v39, 5  ;;  %v12015_v44 = vld [vmem:[%s12278_s16 + $0x2c] sm:$0x1] }
  0xae   : > { %10524 = vmatprep.subr.bf16.mxu1 %v11922_v51  ;;  %v9492_v37 = vcombine.low %v3132_v61, %v3135_v20  ;;  %v12935_v61 = vld [vmem:[%s15168_s1 + $0xc0] sm:$0xff]   ;;  %v1350_v20 = vld [vmem:[%s12278_s16 + $0x18] sm:$0xe]  ;;  %v12018_v39 = vld [vmem:[%s12278_s16 + $0x50] sm:$0x1]  ;;  %v1450_v17 = vrot.slane %v12909_v15, 5 }
  0xaf   : > { %10701 = vmatmul.mubr.bf16.gmra.mrb[20].mxu0 %v9490_v46  ;;  %v12010_v46 = vld [vmem:[%s12278_s16 + $0x54] sm:$0xf]  ;;  %v13058_v41 = vld [vmem:[%s12278_s16 + $0x64] sm:$0xf] }
  0xb0   : > { %10493 = vmatmul.mubr.bf16.gmra.mrb[4].mxu1 %v9194_v56  ;;  %10704 = vmatprep.mubr.bf16.mxu0 %v9491_v57  ;;  %v9198_v5 = vcombine.low %v12010_v46, %v12909_v15  ;;  %v9199_v56 = vcombine.low %v12566_v26, %v12569_v36  ;;  %v11949_v57 = vld [vmem:[%s15168_s1 + $0xb8] sm:$0xff]   ;;  %v12013_v26 = vld [vmem:[%s12278_s16 + $0x14] sm:$0x1]  ;;  %v11947_v4 = vld [vmem:[%s12278_s16 + $0x60] sm:$0xff]  }
  0xb1   : > { %10496 = vmatprep.mubr.bf16.mxu1 %v9195_v60  ;;  %10525 = vmatpush3.bf16.msra.mxu1 %v11922_v51  ;;  %v2494_v51 = vshll.u32 %v12787_v12, 16  ;;  %v12923_v60 = vld [vmem:[%s12278_s16 + $0x8] sm:$0x1]  ;;  %v1411_v36 = vrot.slane %v12013_v26, 5 }
  0xb2   : > { %10526 = vmatprep.subr.bf16.mxu1 %v11926_v2  ;;  %v1404_v25 = vrot.slane %v12923_v60, 5 }
  0xb3   : > { %v12918_v12 = vrot.slane %v2494_v51, 5 }
  0xb5   : > { %10527 = vmatpush3.bf16.msra.mxu1 %v11926_v2  ;;  %v1401_v2 = vrot.slane %v12802_v63, 5  ;;  %v9200_v63 = vcombine.low %v12584_v6, %v12596_v22  ;;  %v9216_v22 = vrot.slane %v1349_v11, 9  ;;  %v9575_v11 = vld [vmem:[%s12278_s16 + $0x18] sm:$0xf] }
  0xb6   : > { %10528 = vmatprep.subr.bf16.mxu1 %v11931_v33 }
  0xb7   : > { %10705 = vmatmul.mubr.bf16.gmra.mrb[24].mxu0 %v9492_v37  ;;  %v9201_v37 = vcombine.low %v12607_v48, %v12618_v55  ;;  %v1403_v6 = vrot.slane %v1401_v2, 4  ;;  %v11939_v48 = vld [vmem:[%s15168_s1 + $0x1c8] sm:$0xff]   ;;  %v9217_v55 = vrot.slane %v1350_v20, 9  ;;  %v12978_v60 = vsel %vm12588_vm5, %v9215_v18, %v1401_v2  ;;  %v9576_v20 = vld [vmem:[%s12278_s16 + $0x1c] sm:$0xf] }
  0xb8   : > { %10497 = vmatmul.mubr.bf16.gmra.mrb[8].mxu1 %v9196_v35  ;;  %10708 = vmatprep.mubr.bf16.mxu0 %v9493_v34  ;;  %v1429_v35 = vrot.slane %v12866_v59, 5  ;;  %v1410_v34 = vrot.slane %v1408_v8, 4  ;;  %v9218_v59 = vrot.slane %v1351_v62, 9  ;;  %v1443_v2 = vrot.slane %v12892_v1, 5  ;;  %v11941_v1 = vld [vmem:[%s12278_s16 + $0x48] sm:$0xff]  }
  0xb9   : > { %10500 = vmatprep.mubr.bf16.mxu1 %v9197_v21  ;;  %10529 = vmatpush3.bf16.msra.mxu1 %v11931_v33  ;;  %v1422_v33 = vrot.slane %v12861_v52, 5  ;;  %v1352_v52 = vld [vmem:[%s12278_s16 + $0x30] sm:$0xe]  ;;  %v9204_v21 = vcombine.low %v12690_v32, %v12699_v49  ;;  %v12986_v26 = vsel %vm12588_vm5, %v1403_v6, %v1404_v25  ;;  %v12994_v0 = vsel %vm12588_vm5, %v9217_v55, %v1415_v14  ;;  %v1354_v14 = vld [vmem:[%s12278_s16 + $0x48] sm:$0xe] }
  0xba   : > { %10530 = vmatprep.subr.bf16.mxu1 %v11937_v24  ;;  %v9219_v51 = vrot.slane %v1352_v52, 9  ;;  %v1431_v53 = vrot.slane %v1429_v35, 4  ;;  %v3908_v6 = vshrl.u32 %v9575_v11, 16  ;;  %v3921_v52 = vshrl.u32 %v9576_v20, 16  ;;  %v11950_v49 = vld [vmem:[%s12278_s16 + $0x6c] sm:$0xff]  }
  0xbb   : > { %v1424_v43 = vrot.slane %v1422_v33, 4  ;;  %v13006_v25 = vsel %vm12588_vm5, %v9218_v59, %v1422_v33  ;;  %v12017_v33 = vld [vmem:[%s12278_s16 + $0x44] sm:$0x1]  ;;  %v9221_v55 = vrot.slane %v1354_v14, 9  ;;  %v9579_v14 = vld [vmem:[%s12278_s16 + $0x28] sm:$0xf] }
  0xbc   : > { %v13016_v62 = vsel %vm12588_vm5, %v9219_v51, %v1429_v35  ;;  %v1439_v18 = vrot.slane %v12017_v33, 5  ;;  %v9577_v51 = vld [vmem:[%s12278_s16 + $0x20] sm:$0x1]  ;;  %v1356_v33 = vld [vmem:[%s12278_s16 + $0x60] sm:$0xe] }
  0xbd   : > { %10531 = vmatpush3.bf16.msra.mxu1 %v11937_v24  ;;  %v9205_v24 = vcombine.low %v12724_v28, %v12727_v30 }
  0xbe   : > { %10532 = vmatprep.subr.bf16.mxu1 %v11943_v50 }
  0xbf   : > { %10709 = vmatmul.mubr.bf16.gmra.mrb[28].mxu0 %v9494_v54  ;;  %v12016_v54 = vld [vmem:[%s12278_s16 + $0x38] sm:$0x1] }
  0xc0   : > { %10501 = vmatmul.mubr.bf16.gmra.mrb[12].mxu1 %v9198_v5  ;;  %10728 = vmatprep.mubr.bf16.mxu0 %v11929_v23  ;;  %v1432_v46 = vrot.slane %v12016_v54, 5  ;;  %v1353_v5 = vld [vmem:[%s12278_s16 + $0x3c] sm:$0xe]  ;;  %v1436_v23 = vrot.slane %v12887_v31, 5  ;;  %v12982_v31 = vsel %vm12588_vm5, %v9216_v22, %v1408_v8  ;;  %v3911_v22 = vshll.u32 %v9575_v11, 16  ;;  %v11955_v54 = vld [vmem:[%s15168_s1 + $0x1e0] sm:$0xff]  }
  0xc1   : > { %10504 = vmatprep.mubr.bf16.mxu1 %v9199_v56  ;;  %10533 = vmatpush3.bf16.msra.mxu1 %v11943_v50  ;;  %v1425_v50 = vrot.slane %v12015_v44, 5  ;;  %v12969_v56 = vrot.slane %v2504_v9, 5  ;;  %v11938_v8 = vld [vmem:[%s12278_s16 + $0x3c] sm:$0xff]   ;;  %v13002_v9 = vsel %vm12588_vm5, %v1417_v47, %v1418_v40  ;;  %v1445_v47 = vrot.slane %v1443_v2, 4  ;;  %v9581_v44 = vld [vmem:[%s12278_s16 + $0x30] sm:$0xf] }
  0xc2   : > { %10534 = vmatprep.subr.bf16.mxu1 %v11949_v57  ;;  %v1446_v40 = vrot.slane %v12018_v39, 5  ;;  %v3910_v11 = vrot.slane %v3908_v6, 4 }
  0xc3   : > { %15193 = vst [vmem:[#allocation9_spill] sm:$0xff] %v12969_v56 }
  0xc5   : > { %10535 = vmatpush3.bf16.msra.mxu1 %v11949_v57  ;;  %v11945_v57 = vld [vmem:[%s15168_s1 + $0x1d0] sm:$0xff]  }
  0xc6   : > { %10568 = vmatprep.subr.bf16.mxu1 %v12935_v61 }
  0xc7   : > { %10729 = vmatmul.mubr.bf16.vlgmr.msra.gmra.mrb[0].mxu0 %v11932_v7  ;;  %v12990_v7 = vsel %vm12588_vm5, %v1410_v34, %v1411_v36  ;;  %v13010_v36 = vsel %vm12588_vm5, %v1424_v43, %v1425_v50  ;;  %v3917_v34 = vshll.u32 %v9576_v20, 16  ;;  %v3913_v20 = vrot.slane %v3911_v22, 5  ;;  %v1357_v22 = vld [vmem:[%s12278_s16 + $0x6c] sm:$0xe] }
  0xc8   : > { %10505 = vmatmul.mubr.bf16.gmra.mrb[16].mxu1 %v9200_v63  ;;  %10761 = vmatpush3.bf16.msra.mxu0 %v12774_v45  ;;  %v9220_v63 = vrot.slane %v1353_v5, 9  ;;  %v9224_v59 = vrot.slane %v1357_v22, 9 }
  0xc9   : > { %10508 = vmatprep.mubr.bf16.mxu1 %v9201_v37  ;;  %10732 = vmatprep.mubr.bf16.mxu0 %v11935_v19  ;;  %v13020_v37 = vsel %vm12588_vm5, %v1431_v53, %v1432_v46  ;;  %v1438_v19 = vrot.slane %v1436_v23, 4  ;;  %v9578_v53 = vld [vmem:[%s12278_s16 + $0x24] sm:$0xf]  ;;  %v3945_v46 = vshrl.u32 %v9579_v14, 16 }
  0xca   : > { %10762 = vmatprep.subr.bf16.mxu0 %v11939_v48  ;;  %v13037_v50 = vsel %vm12588_vm5, %v9220_v63, %v1436_v23  ;;  %v13054_v23 = vld [vmem:[%s12278_s16 + $0x54] sm:$0xe]  ;;  %v3923_v63 = vrot.slane %v3921_v52, 4  ;;  %v3932_v39 = vshrl.u32 %v9578_v53, 16  ;;  %v3935_v29 = vshll.u32 %v9578_v53, 16 }
  0xcb   : > { %v13051_v5 = vsel %vm12588_vm5, %v1438_v19, %v1439_v18  ;;  %v3927_v18 = vshll.u32 %v9577_v51, 16  ;;  %v9222_v6 = vrot.slane %v13054_v23, 9  ;;  %v11959_v51 = vld [vmem:[%s15168_s1 + $0x1e8] sm:$0xff]   ;;  %v1452_v53 = vrot.slane %v1450_v17, 4 }
  0xcc   : > { %10763 = vmatpush3.bf16.msra.mxu0 %v11939_v48  ;;  %v11951_v48 = vld [vmem:[%s15168_s1 + $0x1d8] sm:$0xff]   ;;  %v3914_v23 = vor.u32 %v3913_v20, %v3910_v11  ;;  %v3934_v35 = vrot.slane %v3932_v39, 4  ;;  %v3937_v45 = vrot.slane %v3935_v29, 5  ;;  %v12023_v11 = vld [vmem:[%s12278_s16 + $0x74] sm:$0x1]  ;;  %v3947_v29 = vrot.slane %v3945_v46, 4 }
  0xcd   : > { %10764 = vmatprep.subr.bf16.mxu0 %v11945_v57  ;;  %v13092_v43 = vrot.slane %v3927_v18, 5  ;;  %v1467_v20 = vrot.slane %v12023_v11, 5  ;;  %v3956_v39 = vshrl.u32 %v9581_v44, 16  ;;  %v13117_v28 = vsel %vm12588_vm5, %v9222_v6, %v1450_v17 }
  0xce   : > { %v3915_v22 = vrot.slane %v3914_v23, 4 }
  0xcf   : > { %10733 = vmatmul.mubr.bf16.gmra.mrb[4].mxu0 %v11938_v8  ;;  %v13064_v8 = vrot.slane %v3917_v34, 5  ;;  %v12021_v34 = vld [vmem:[%s12278_s16 + $0x70] sm:$0xf] }
  0xd0   : > { %10509 = vmatmul.mubr.bf16.gmra.mrb[20].mxu1 %v9202_v16  ;;  %10736 = vmatprep.mubr.bf16.mxu0 %v11941_v1  ;;  %v1457_v16 = vrot.slane %v13058_v41, 5  ;;  %v12020_v1 = vld [vmem:[%s12278_s16 + $0x5c] sm:$0x1]  ;;  %v1464_v52 = vrot.slane %v12021_v34, 5 }
  0xd1   : > { %10512 = vmatprep.mubr.bf16.mxu1 %v9203_v27  ;;  %10765 = vmatpush3.bf16.msra.mxu0 %v11945_v57  ;;  %v1453_v19 = vrot.slane %v12020_v1, 5  ;;  %v13073_v27 = vsel %vm12588_vm5, %v9221_v55, %v1443_v2  ;;  %v13077_v57 = vsel %vm12588_vm5, %v1445_v47, %v1446_v40  ;;  %v12022_v2 = vld [vmem:[%s12278_s16 + $0x68] sm:$0x1]  ;;  %v3941_v1 = vshll.u32 %v9579_v14, 16  ;;  %v11967_v41 = vld [vmem:[%s15168_s1 + $0x1f8] sm:$0xff]  }
  0xd2   : > { %10766 = vmatprep.subr.bf16.mxu0 %v11951_v48  ;;  %v1460_v55 = vrot.slane %v12022_v2, 5  ;;  %v9223_v47 = vrot.slane %v1356_v33, 9  ;;  %v1459_v40 = vrot.slane %v1457_v16, 4  ;;  %v3924_v34 = vor.u32 %v3923_v63, %v13064_v8  ;;  %v9582_v2 = vld [vmem:[%s12278_s16 + $0x34] sm:$0xf] }
  0xd3   : > { %v1466_v33 = vrot.slane %v1464_v52, 4  ;;  %v9580_v63 = vld [vmem:[%s12278_s16 + $0x2c] sm:$0x1]  ;;  %v13104_v18 = vrot.slane %v3941_v1, 5  ;;  %v3965_v14 = vshll.u32 %v9582_v2, 16  ;;  %v3969_v32 = vshrl.u32 %v9582_v2, 16 }
  0xd4   : > { %v3925_v11 = vrot.slane %v3924_v34, 4  ;;  %v13121_v30 = vsel %vm12588_vm5, %v1452_v53, %v1453_v19  ;;  %v13128_v46 = vsel %vm12588_vm5, %v9223_v47, %v1457_v16  ;;  %v13132_v15 = vsel %vm12588_vm5, %v1459_v40, %v1460_v55  ;;  %v1358_v19 = vld [vmem:[%s12278_s16 + $0x78] sm:$0xe] }
  0xd5   : > { %10767 = vmatpush3.bf16.msra.mxu0 %v11951_v48  ;;  %v13136_v17 = vsel %vm12588_vm5, %v9224_v59, %v1464_v52  ;;  %v13146_v16 = vsel %vm12588_vm5, %v1466_v33, %v1467_v20  ;;  %v3948_v6 = vor.u32 %v3947_v29, %v13104_v18  ;;  %v3958_v53 = vrot.slane %v3956_v39, 4  ;;  %v9584_v59 = vld [vmem:[%s12278_s16 + $0x3c] sm:$0xf]  ;;  %v9585_v52 = vld [vmem:[%s12278_s16 + $0x40] sm:$0xf] }
  0xd6   : > { %10768 = vmatprep.subr.bf16.mxu0 %v11955_v54  ;;  %v3920_v1 = vsel %vm12342_vm2, %v3915_v22, %v13064_v8  ;;  %v3930_v47 = vsel %vm12342_vm2, %v3925_v11, %v13092_v43  ;;  %v13157_v40 = vrot.slane %v3965_v14, 5  ;;  %v3971_v23 = vrot.slane %v3969_v32, 4  ;;  %v12025_v20 = vld [vmem:[%s12278_s16 + $0x80] sm:$0x1]  ;;  %v13316_v48 = vld [vmem:[%s12278_s16 + $0x68] sm:$0x1] }
  0xd7   : > { %10737 = vmatmul.mubr.bf16.gmra.mrb[8].mxu0 %v11944_v3  ;;  %v3959_v3 = vshll.u32 %v9581_v44, 16  ;;  %v3951_v44 = vshll.u32 %v9580_v63, 16  ;;  %v9225_v33 = vrot.slane %v1358_v19, 9  ;;  %v1359_v63 = vld [vmem:[%s12278_s16 + $0x84] sm:$0xe]  ;;  %v3980_v29 = vshrl.u32 %v9584_v59, 16 }
  0xd8   : > { %10513 = vmatmul.mubr.bf16.gmra.mrb[24].mxu1 %v9204_v21  ;;  %10740 = vmatprep.mubr.bf16.mxu0 %v11947_v4  ;;  %v11963_v21 = vld [vmem:[%s15168_s1 + $0x1f0] sm:$0xff]   ;;  %v12024_v4 = vld [vmem:[%s12278_s16 + $0x7c] sm:$0xf]  ;;  %v3983_v8 = vshll.u32 %v9584_v59, 16  ;;  %v3989_v39 = vshll.u32 %v9585_v52, 16  ;;  %v15194_v43 = vcombine.low %v12747_v42, %v12752_v13  ;;  %v13168_v14 = vrot.slane %v3948_v6, 4 }
  0xd9   : > { %10516 = vmatprep.mubr.bf16.mxu1 %v9205_v24  ;;  %10769 = vmatpush3.bf16.msra.mxu0 %v11955_v54  ;;  %v3938_v24 = vor.u32 %v3937_v45, %v3934_v35  ;;  %v11952_v54 = vld [vmem:[%s12278_s16 + $0x78] sm:$0xff]   ;;  %v1471_v45 = vrot.slane %v12024_v4, 5  ;;  %v3961_v55 = vrot.slane %v3959_v3, 5  ;;  %v13161_v2 = vrot.slane %v3951_v44, 5  ;;  %v13173_v22 = vld [vmem:[%s15168_s1 + $0x200] sm:$0xff]   ;;  %15202 = vst [vmem:[#allocation12_spill] sm:$0xff] %v13316_v48 }
  0xda   : > { %10770 = vmatprep.subr.bf16.mxu0 %v11959_v51  ;;  %v9583_v35 = vld [vmem:[%s12278_s16 + $0x38] sm:$0x1]  ;;  %v3993_v3 = vshrl.u32 %v9585_v52, 16  ;;  %v11954_v44 = vld [vmem:[%s12278_s16 + $0x84] sm:$0xff]   ;;  %v3972_v13 = vor.u32 %v3971_v23, %v13157_v40  ;;  %v3985_v59 = vrot.slane %v3983_v8, 5  ;;  %v13195_v52 = vrot.slane %v3989_v39, 5 }
  0xdb   : > { %v13159_v34 = vrot.slane %v3938_v24, 4  ;;  %v1473_v11 = vrot.slane %v1471_v45, 4  ;;  %v3962_v32 = vor.u32 %v3961_v55, %v3958_v53  ;;  %v15195_v24 = vcombine.low %v12978_v60, %v12986_v26  ;;  %v12026_v19 = vld [vmem:[%s12278_s16 + $0x88] sm:$0xf]  ;;  %v9586_v6 = vld [vmem:[%s12278_s16 + $0x44] sm:$0x1] }
  0xdc   : > { %v1478_v4 = vrot.slane %v12026_v19, 5  ;;  %v13186_v60 = vcombine.low %v3920_v1, %v3930_v47  ;;  %v9587_v53 = vld [vmem:[%s12278_s16 + $0x48] sm:$0xf]  ;;  %v3982_v55 = vrot.slane %v3980_v29, 4  ;;  %v3995_v23 = vrot.slane %v3993_v3, 4 }
  0xdd   : > { %10771 = vmatpush3.bf16.msra.mxu0 %v11959_v51  ;;  %v1474_v51 = vrot.slane %v12025_v20, 5  ;;  %v11956_v20 = vld [vmem:[%s12278_s16 + $0x90] sm:$0xff]   ;;  %v3944_v1 = vsel %vm12342_vm2, %v13159_v34, %v13104_v18  ;;  %v3963_v47 = vrot.slane %v3962_v32, 4  ;;  %v3954_v29 = vsel %vm12342_vm2, %v13168_v14, %v13161_v2  ;;  %v13217_v34 = vld [vmem:[%s12278_s16 + $0x58] sm:$0xf]  ;;  %v11957_v32 = vld [vmem:[%s15168_s1 + $0xc8] sm:$0xff]  }
  0xde   : > { %10772 = vmatprep.subr.bf16.mxu0 %v11963_v21  ;;  %v3973_v39 = vrot.slane %v3972_v13, 4  ;;  %v1480_v3 = vrot.slane %v1478_v4, 4  ;;  %v9590_v18 = vld [vmem:[%s12278_s16 + $0x54] sm:$0xf]  ;;  %v3999_v2 = vshll.u32 %v9586_v6, 16  ;;  %v4004_v14 = vshrl.u32 %v9587_v53, 16 }
  0xdf   : > { %10741 = vmatmul.mubr.bf16.gmra.mrb[12].mxu0 %v11950_v49  ;;  %v3975_v49 = vshll.u32 %v9583_v35, 16  ;;  %v13213_v8 = vsel %vm12588_vm5, %v1473_v11, %v1474_v51  ;;  %v4007_v51 = vshll.u32 %v9587_v53, 16  ;;  %v3986_v11 = vor.u32 %v3985_v59, %v3982_v55  ;;  %v11958_v55 = vld [vmem:[%s12278_s16 + $0x9c] sm:$0xff]   ;;  %v12032_v42 = vld [vmem:[%s12278_s16 + $0xac] sm:$0xf] }
  0xe0   : > { %10517 = vmatmul.mubr.bf16.gmra.mrb[28].mxu1 %v15194_v43  ;;  %10744 = vmatprep.mubr.bf16.mxu0 %v11952_v54  ;;  %v9226_v54 = vrot.slane %v1359_v63, 9  ;;  %v12027_v43 = vld [vmem:[%s12278_s16 + $0x8c] sm:$0x1]  ;;  %v4037_v6 = vshll.u32 %v13217_v34, 16  ;;  %v15197_v53 = vcombine.low %v12994_v0, %v13002_v9  ;;  %v13253_v0 = vld [vmem:[%s12278_s16 + $0x50] sm:$0x1] }
  0xe1   : > { %10536 = vmatprep.mubr.bf16.mxu1 %v15195_v24  ;;  %10773 = vmatpush3.bf16.msra.mxu0 %v11963_v21  ;;  %v13192_v21 = vsel %vm12588_vm5, %v9225_v33, %v1471_v45  ;;  %v3977_v63 = vrot.slane %v3975_v49, 5  ;;  %v1481_v24 = vrot.slane %v12027_v43, 5  ;;  %v1360_v45 = vld [vmem:[%s12278_s16 + $0x90] sm:$0xe]  ;;  %v13205_v33 = vld [vmem:[%s12278_s16 + $0x4c] sm:$0xf]  ;;  %v3996_v49 = vor.u32 %v3995_v23, %v13195_v52 }
  0xe2   : > { %10774 = vmatprep.subr.bf16.mxu0 %v11967_v41  ;;  %v4013_v13 = vshll.u32 %v13205_v33, 16  ;;  %v4017_v19 = vshrl.u32 %v13205_v33, 16  ;;  %v15196_v43 = vcombine.low %v12982_v31, %v12990_v7  ;;  %v11961_v31 = vld [vmem:[%s15168_s1 + $0xd0] sm:$0xff]   ;;  %v3968_v7 = vsel %vm12342_vm2, %v3963_v47, %v13157_v40  ;;  %v11960_v9 = vld [vmem:[%s12278_s16 + $0xa8] sm:$0xff]   ;;  %v13260_v40 = vld [vmem:[%s12278_s16 + $0x5c] sm:$0x1] }
  0xe3   : > { %v3978_v59 = vsel %vm12342_vm2, %v3973_v39, %v3977_v63  ;;  %v9227_v23 = vrot.slane %v1360_v45, 9  ;;  %v4009_v26 = vrot.slane %v4007_v51, 5  ;;  %15198 = vst [vmem:[#allocation10_spill] sm:$0xff] %v13260_v40  ;;  %v3987_v47 = vrot.slane %v3986_v11, 4 }
  0xe4   : > { %v3997_v63 = vrot.slane %v3996_v49, 4  ;;  %v13262_v39 = vrot.slane %v4013_v13, 5  ;;  %v13264_v35 = vrot.slane %v4037_v6, 5  ;;  %v13269_v51 = vcombine.low %v3944_v1, %v3954_v29  ;;  %v9593_v29 = vld [vmem:[%s12278_s16 + $0x60] sm:$0xf] }
  0xe5   : > { %10775 = vmatpush3.bf16.msra.mxu0 %v11967_v41  ;;  %v13225_v41 = vsel %vm12588_vm5, %v9226_v54, %v1478_v4  ;;  %v4028_v54 = vshrl.u32 %v9590_v18, 16  ;;  %v4031_v4 = vshll.u32 %v9590_v18, 16  ;;  %v12028_v18 = vld [vmem:[%s12278_s16 + $0x94] sm:$0xf]  ;;  %v13273_v49 = vcombine.low %v3968_v7, %v3978_v59 }
  0xe6   : > { %10808 = vmatprep.subr.bf16.mxu0 %v13173_v22  ;;  %v4023_v1 = vshll.u32 %v13253_v0, 16  ;;  %v3992_v7 = vsel %vm12342_vm2, %v3987_v47, %v13195_v52  ;;  %v15201_v47 = vcombine.low %v13016_v62, %v13020_v37 }
  0xe7   : > { %10745 = vmatmul.mubr.bf16.gmra.mrb[16].mxu0 %v11954_v44  ;;  %v4041_v44 = vshrl.u32 %v13217_v34, 16  ;;  %v4030_v45 = vrot.slane %v4028_v54, 4  ;;  %v12029_v54 = vld [vmem:[%s12278_s16 + $0x98] sm:$0x1] }
  0xe8   : > { %10537 = vmatmul.mubr.bf16.vlgmr.msra.gmra.mrb[0].mxu1 %v15196_v43  ;;  %10748 = vmatprep.mubr.bf16.mxu0 %v11956_v20  ;;  %v13256_v20 = vrot.slane %v3999_v2, 5  ;;  %v1485_v43 = vrot.slane %v12028_v18, 5  ;;  %v12030_v18 = vld [vmem:[%s12278_s16 + $0xa0] sm:$0xf]  ;;  %v4025_v37 = vrot.slane %v4023_v1, 5 }
  0xe9   : > { %10569 = vmatpush3.bf16.msra.mxu1 %v12935_v61  ;;  %10540 = vmatprep.mubr.bf16.mxu1 %v15197_v53  ;;  %v13250_v61 = vsel %vm12588_vm5, %v1480_v3, %v1481_v24  ;;  %v4006_v53 = vrot.slane %v4004_v14, 4  ;;  %v4019_v24 = vrot.slane %v4017_v19, 4  ;;  %v4033_v3 = vrot.slane %v4031_v4, 5  ;;  %v11965_v14 = vld [vmem:[%s15168_s1 + $0xd8] sm:$0xff]  }
  0xea   : > { %10570 = vmatprep.subr.bf16.mxu1 %v11957_v32  ;;  %v4043_v2 = vrot.slane %v4041_v44, 4  ;;  %v1361_v19 = vld [vmem:[%s12278_s16 + $0x9c] sm:$0xe]  ;;  %v1488_v4 = vrot.slane %v12029_v54, 5  ;;  %v13286_v44 = vld [vmem:[%s12278_s16 + $0x64] sm:$0xf] }
  0xeb   : > { %v4010_v6 = vor.u32 %v4009_v26, %v4006_v53  ;;  %15199 = vst [vmem:[#allocation11_spill] sm:$0xff] %v13286_v44  ;;  %v4020_v59 = vor.u32 %v4019_v24, %v13262_v39  ;;  %v1492_v13 = vrot.slane %v12030_v18, 5  ;;  %v15200_v26 = vcombine.low %v13006_v25, %v13010_v36  ;;  %v11962_v24 = vld [vmem:[%s12278_s16 + $0xb4] sm:$0xff]   ;;  %v11968_v25 = vld [vmem:[%s15168_s1 + $0xe0] sm:$0xff]   ;;  %v9596_v18 = vld [vmem:[%s12278_s16 + $0x6c] sm:$0xf] }
  0xec   : > { %v1487_v53 = vrot.slane %v1485_v43, 4  ;;  %v4034_v54 = vor.u32 %v4033_v3, %v4030_v45  ;;  %v4044_v52 = vor.u32 %v4043_v2, %v13264_v35  ;;  %v4052_v36 = vshrl.u32 %v9593_v29, 16  ;;  %v12031_v3 = vld [vmem:[%s12278_s16 + $0xa4] sm:$0x1] }
  0xed   : > { %10571 = vmatpush3.bf16.msra.mxu1 %v11957_v32  ;;  %v13280_v32 = vsel %vm12588_vm5, %v9227_v23, %v1485_v43  ;;  %v4047_v23 = vshll.u32 %v13260_v40, 16  ;;  %v4065_v43 = vshrl.u32 %v13286_v44, 16  ;;  %v4011_v62 = vrot.slane %v4010_v6, 4  ;;  %v13455_v40 = vld [vmem:[%s12278_s16 + $0x98] sm:$0x1] }
  0xee   : > { %10572 = vmatprep.subr.bf16.mxu1 %v11961_v31  ;;  %v9228_v45 = vrot.slane %v1361_v19, 9  ;;  %v1495_v2 = vrot.slane %v12031_v3, 5  ;;  %v4035_v6 = vrot.slane %v4034_v54, 4  ;;  %v4045_v19 = vrot.slane %v4044_v52, 4  ;;  %15215 = vst [vmem:[#allocation21_spill] sm:$0xff] %v13455_v40 }
  0xef   : > { %10749 = vmatmul.mubr.bf16.gmra.mrb[20].mxu0 %v11958_v55  ;;  %v4002_v55 = vsel %vm12342_vm2, %v3997_v63, %v13256_v20  ;;  %v4061_v20 = vshll.u32 %v13286_v44, 16  ;;  %v11964_v63 = vld [vmem:[%s12278_s16 + $0xc0] sm:$0xff]   ;;  %v4049_v11 = vrot.slane %v4047_v23, 5  ;;  %v13322_v44 = vsel %vm12588_vm5, %v1487_v53, %v1488_v4 }
  0xf0   : > { %10541 = vmatmul.mubr.bf16.gmra.mrb[4].mxu1 %v15200_v26  ;;  %10752 = vmatprep.mubr.bf16.mxu0 %v11960_v9  ;;  %v4055_v9 = vshll.u32 %v9593_v29, 16  ;;  %v4021_v26 = vrot.slane %v4020_v59, 4  ;;  %v1499_v29 = vrot.slane %v12032_v42, 5  ;;  %v13318_v56 = vcombine.low %v3992_v7, %v4002_v55  ;;  %v11970_v42 = vld [vmem:[%s15168_s1 + $0xe8] sm:$0xff]  }
  0xf1   : > { %10544 = vmatprep.mubr.bf16.mxu1 %v15201_v47  ;;  %10573 = vmatpush3.bf16.msra.mxu1 %v11961_v31  ;;  %v1362_v31 = vld [vmem:[%s12278_s16 + $0xa8] sm:$0xe]  ;;  %v1494_v47 = vrot.slane %v1492_v13, 4  ;;  %v4054_v1 = vrot.slane %v4052_v36, 4  ;;  %v13324_v59 = vrot.slane %v4061_v20, 5  ;;  %v4067_v23 = vrot.slane %v4065_v43, 4 }
  0xf2   : > { %10574 = vmatprep.subr.bf16.mxu1 %v11965_v14  ;;  %v4057_v3 = vrot.slane %v4055_v9, 5  ;;  %v4016_v4 = vsel %vm12342_vm2, %v4011_v62, %v13262_v39  ;;  %v13334_v7 = vsel %vm12588_vm5, %v9228_v45, %v1492_v13  ;;  %v4076_v55 = vshrl.u32 %v9596_v18, 16  ;;  %v12033_v39 = vld [vmem:[%s12278_s16 + $0xb0] sm:$0x1]  ;;  %v1363_v20 = vld [vmem:[%s12278_s16 + $0xb4] sm:$0xe] }
  0xf3   : > { %v4079_v53 = vshll.u32 %v9596_v18, 16  ;;  %v4026_v54 = vsel %vm12342_vm2, %v4021_v26, %v4025_v37  ;;  %v13343_v52 = vsel %vm12588_vm5, %v1494_v47, %v1495_v2  ;;  %v9229_v36 = vrot.slane %v1362_v31, 9  ;;  %v13365_v31 = vld [vmem:[%s12278_s16 + $0x74] sm:$0x1]  ;;  %v12034_v26 = vld [vmem:[%s12278_s16 + $0xb8] sm:$0xf] }
  0xf4   : > { %v1502_v9 = vrot.slane %v12033_v39, 5  ;;  %v15204_v13 = vcombine.low %v13037_v50, %v13051_v5  ;;  %v4040_v43 = vsel %vm12342_vm2, %v4035_v6, %v13264_v35  ;;  %v4050_v62 = vsel %vm12342_vm2, %v4045_v19, %v4049_v11  ;;  %v11966_v5 = vld [vmem:[%s12278_s16 + $0xcc] sm:$0xff]   ;;  %15206 = vst [vmem:[#allocation14_spill] sm:$0xff] %v13365_v31  ;;  %v9602_v39 = vld [vmem:[%s12278_s16 + $0x84] sm:$0xf] }
  0xf5   : > { %10575 = vmatpush3.bf16.msra.mxu1 %v11965_v14  ;;  %v13337_v14 = vld [vmem:[%s12278_s16 + $0x70] sm:$0xf]  ;;  %v1501_v37 = vrot.slane %v1499_v29, 4  ;;  %v4071_v45 = vshll.u32 %v13316_v48, 16  ;;  %v15205_v50 = vcombine.low %v13073_v27, %v13077_v57  ;;  %v4068_v2 = vor.u32 %v4067_v23, %v13324_v59  ;;  %v13382_v23 = vld [vmem:[%s12278_s16 + $0x7c] sm:$0xf] }
  0xf6   : > { %10576 = vmatprep.subr.bf16.mxu1 %v11968_v25  ;;  %15203 = vst [vmem:[#allocation13_spill] sm:$0xff] %v13337_v14  ;;  %v4085_v35 = vshll.u32 %v13337_v14, 16  ;;  %v4089_v11 = vshrl.u32 %v13337_v14, 16  ;;  %v9230_v18 = vrot.slane %v1363_v20, 9  ;;  %v1506_v47 = vrot.slane %v12034_v26, 5  ;;  %15207 = vst [vmem:[#allocation15_spill] sm:$0xff] %v13382_v23 }
  0xf7   : > { %10753 = vmatmul.mubr.bf16.gmra.mrb[24].mxu0 %v11962_v24  ;;  %v11972_v24 = vld [vmem:[%s15168_s1 + $0xf0] sm:$0xff]   ;;  %v4078_v27 = vrot.slane %v4076_v55, 4  ;;  %v4081_v57 = vrot.slane %v4079_v53, 5  ;;  %v13373_v19 = vcombine.low %v4016_v4, %v4026_v54  ;;  %v13385_v20 = vcombine.low %v4040_v43, %v4050_v62  ;;  %v12035_v4 = vld [vmem:[%s12278_s16 + $0xbc] sm:$0x1] }
  0xf8   : > { %10545 = vmatmul.mubr.bf16.gmra.mrb[8].mxu1 %v15204_v13  ;;  %10756 = vmatprep.mubr.bf16.mxu0 %v11964_v63  ;;  %v4058_v63 = vor.u32 %v4057_v3, %v4054_v1  ;;  %v13379_v3 = vsel %vm12588_vm5, %v9229_v36, %v1499_v29  ;;  %v13389_v55 = vsel %vm12588_vm5, %v1501_v37, %v1502_v9  ;;  %v13391_v53 = vrot.slane %v4071_v45, 5  ;;  %v11974_v13 = vld [vmem:[%s15168_s1 + $0xf8] sm:$0xff]   ;;  %v13398_v29 = vld [vmem:[%s12278_s16 + $0x88] sm:$0xf] }
  0xf9   : > { %10548 = vmatprep.mubr.bf16.mxu1 %v15205_v50  ;;  %10577 = vmatpush3.bf16.msra.mxu1 %v11968_v25  ;;  %v9599_v25 = vld [vmem:[%s12278_s16 + $0x78] sm:$0xf]  ;;  %v1509_v54 = vrot.slane %v12035_v4, 5  ;;  %15208 = vst [vmem:[#allocation16_spill] sm:$0xff] %v13398_v29  ;;  %v13402_v43 = vrot.slane %v4068_v2, 4  ;;  %v13404_v62 = vrot.slane %v4085_v35, 5  ;;  %v13408_v37 = vsel %vm12588_vm5, %v9230_v18, %v1506_v47 }
  0xfa   : > { %10578 = vmatprep.subr.bf16.mxu1 %v11970_v42  ;;  %v13400_v36 = vrot.slane %v4058_v63, 4  ;;  %v4091_v9 = vrot.slane %v4089_v11, 4  ;;  %v1508_v45 = vrot.slane %v1506_v47, 4  ;;  %v4082_v50 = vor.u32 %v4081_v57, %v4078_v27  ;;  %v9605_v4 = vld [vmem:[%s12278_s16 + $0x90] sm:$0xf] }
  0xfb   : > { %v4095_v26 = vshll.u32 %v13365_v31, 16  ;;  %v4103_v1 = vshll.u32 %v9599_v25, 16  ;;  %v4109_v63 = vshll.u32 %v13382_v23, 16  ;;  %v4113_v2 = vshrl.u32 %v13382_v23, 16  ;;  %v13415_v35 = vld [vmem:[%s12278_s16 + $0x94] sm:$0xf] }
  0xfc   : > { %15209 = vst [vmem:[#allocation17_spill] sm:$0xff] %v13415_v35  ;;  %v15210_v11 = vcombine.low %v13117_v28, %v13121_v30  ;;  %v4124_v18 = vshrl.u32 %v9602_v39, 16  ;;  %v4127_v47 = vshll.u32 %v9602_v39, 16  ;;  %v4137_v27 = vshrl.u32 %v13398_v29, 16  ;;  %v9608_v39 = vld [vmem:[%s12278_s16 + $0x9c] sm:$0xf] }
  0xfd   : > { %10579 = vmatpush3.bf16.msra.mxu1 %v11970_v42  ;;  %v4100_v42 = vshrl.u32 %v9599_v25, 16  ;;  %v15211_v57 = vcombine.low %v13128_v46, %v13132_v15  ;;  %v4092_v30 = vor.u32 %v4091_v9, %v13404_v62  ;;  %v4151_v25 = vshll.u32 %v9605_v4, 16  ;;  %v13437_v46 = vld [vmem:[%s12278_s16 + $0x80] sm:$0x1] }
  0xfe   : > { %10580 = vmatprep.subr.bf16.mxu1 %v11972_v24  ;;  %v13434_v6 = vrot.slane %v4095_v26, 5  ;;  %15212 = vst [vmem:[#allocation18_spill] sm:$0xff] %v13437_v46  ;;  %v4157_v15 = vshll.u32 %v13415_v35, 16  ;;  %v4105_v28 = vrot.slane %v4103_v1, 5  ;;  %v4115_v9 = vrot.slane %v4113_v2, 4 }
  0xff   : > { %10757 = vmatmul.mubr.bf16.gmra.mrb[28].mxu0 %v11966_v5  ;;  %v4133_v5 = vshll.u32 %v13398_v29, 16  ;;  %v13441_v29 = vrot.slane %v4109_v63, 5  ;;  %v13447_v23 = vld [vmem:[%s12278_s16 + $0xa0] sm:$0xf]  ;;  %v4126_v26 = vrot.slane %v4124_v18, 4  ;;  %v4129_v31 = vrot.slane %v4127_v47, 5 }
 0x100   : > { %10549 = vmatmul.mubr.bf16.gmra.mrb[12].mxu1 %v15210_v11  ;;  %10776 = vmatprep.mubr.bf16.mxu0 %v13186_v60  ;;  %v4148_v60 = vshrl.u32 %v9605_v4, 16  ;;  %v13432_v11 = vrot.slane %v4082_v50, 4  ;;  %v13444_v4 = vld [vmem:[%s12278_s16 + $0x8c] sm:$0x1]  ;;  %15214 = vst [vmem:[#allocation20_spill] sm:$0xff] %v13447_v23  ;;  %v4139_v48 = vrot.slane %v4137_v27, 4  ;;  %v13464_v63 = vsel %vm12588_vm5, %v1508_v45, %v1509_v54 }
 0x101   : > { %10552 = vmatprep.mubr.bf16.mxu1 %v15211_v57  ;;  %10581 = vmatpush3.bf16.msra.mxu1 %v11972_v24  ;;  %v4161_v24 = vshrl.u32 %v13415_v35, 16  ;;  %v4102_v57 = vrot.slane %v4100_v42, 4  ;;  %15213 = vst [vmem:[#allocation19_spill] sm:$0xff] %v13444_v4  ;;  %v11971_v50 = vld [vmem:[%s15168_s1 + $0x208] sm:$0xff]   ;;  %v13452_v14 = vrot.slane %v4133_v5, 5  ;;  %v4153_v35 = vrot.slane %v4151_v25, 5 }
 0x102   : > { %10582 = vmatprep.subr.bf16.mxu1 %v11974_v13  ;;  %v9611_v42 = vld [vmem:[%s12278_s16 + $0xa8] sm:$0xf]  ;;  %v4150_v2 = vrot.slane %v4148_v60, 4  ;;  %v13469_v18 = vld [vmem:[%s15168_s1 + $0x100] sm:$0xff]   ;;  %v13472_v47 = vrot.slane %v4157_v15, 5  ;;  %v4172_v27 = vshrl.u32 %v9608_v39, 16  ;;  %v15217_v25 = vcombine.low %v13136_v17, %v13146_v16 }
 0x103   : > { %15216 = vst [vmem:[#allocation22_spill] sm:$0xff] %v13469_v18  ;;  %v4163_v5 = vrot.slane %v4161_v24, 4  ;;  %v4175_v1 = vshll.u32 %v9608_v39, 16  ;;  %v13475_v54 = vrot.slane %v4092_v30, 4  ;;  %v4181_v45 = vshll.u32 %v13447_v23, 16  ;;  %v11973_v17 = vld [vmem:[%s15168_s1 + $0x210] sm:$0xff]  }
 0x104   : > { %v4185_v60 = vshrl.u32 %v13447_v23, 16  ;;  %v4106_v15 = vor.u32 %v4105_v28, %v4102_v57  ;;  %v4116_v39 = vor.u32 %v4115_v9, %v13441_v29  ;;  %v4130_v24 = vor.u32 %v4129_v31, %v4126_v26  ;;  %v13487_v30 = vld [vmem:[%s12278_s16 + $0xac] sm:$0xf]  ;;  %v13500_v26 = vld [vmem:[%s12278_s16 + $0xa4] sm:$0x1] }
 0x105   : > { %10583 = vmatpush3.bf16.msra.mxu1 %v11974_v13  ;;  %v4119_v13 = vshll.u32 %v13437_v46, 16  ;;  %15218 = vst [vmem:[#allocation23_spill] sm:$0xff] %v13487_v30  ;;  %v4140_v16 = vor.u32 %v4139_v48, %v13452_v14  ;;  %v4196_v28 = vshrl.u32 %v9611_v42, 16  ;;  %v4199_v31 = vshll.u32 %v9611_v42, 16 }
 0x106   : > { %11288 = vmatprep.subr.bf16.mxu1 %v13469_v18  ;;  %v15219_v18 = vcombine.low %v13192_v21, %v13213_v8  ;;  %v4154_v57 = vor.u32 %v4153_v35, %v4150_v2  ;;  %v4164_v9 = vor.u32 %v4163_v5, %v13472_v47  ;;  %v4174_v21 = vrot.slane %v4172_v27, 4 }
 0x107   : > { %10777 = vmatmul.mubr.bf16.vlgmr.msra.gmra.mrb[0].mxu0 %v13269_v51  ;;  %v4143_v51 = vshll.u32 %v13444_v4, 16  ;;  %v4177_v8 = vrot.slane %v4175_v1, 5  ;;  %v4209_v23 = vshrl.u32 %v13487_v30, 16  ;;  %v4107_v48 = vrot.slane %v4106_v15, 4  ;;  %v11975_v1 = vld [vmem:[%s15168_s1 + $0x218] sm:$0xff]  }
 0x108   : > { %10553 = vmatmul.mubr.bf16.gmra.mrb[16].mxu1 %v15217_v25  ;;  %10809 = vmatpush3.bf16.msra.mxu0 %v13173_v22  ;;  %v4167_v22 = vshll.u32 %v13455_v40, 16  ;;  %v4205_v25 = vshll.u32 %v13487_v30, 16  ;;  %v4117_v40 = vrot.slane %v4116_v39, 4  ;;  %v4121_v4 = vrot.slane %v4119_v13, 5 }
 0x109   : > { %10556 = vmatprep.mubr.bf16.mxu1 %v15219_v18  ;;  %10780 = vmatprep.mubr.bf16.mxu0 %v13273_v49  ;;  %v13502_v18 = vrot.slane %v4181_v45, 5  ;;  %v4187_v49 = vrot.slane %v4185_v60, 4  ;;  %v4145_v42 = vrot.slane %v4143_v51, 5  ;;  %v4131_v35 = vrot.slane %v4130_v24, 4 }
 0x10a   : > { %10810 = vmatprep.subr.bf16.mxu0 %v11971_v50  ;;  %v4141_v2 = vrot.slane %v4140_v16, 4  ;;  %v4198_v5 = vrot.slane %v4196_v28, 4  ;;  %v4201_v46 = vrot.slane %v4199_v31, 5  ;;  %v4155_v27 = vrot.slane %v4154_v57, 4  ;;  %v13568_v28 = vld [vmem:[%s12278_s16 + $0xbc] sm:$0x1] }
 0x10b   : > { %v4169_v45 = vrot.slane %v4167_v22, 5  ;;  %v4178_v60 = vor.u32 %v4177_v8, %v4174_v21  ;;  %v4191_v30 = vshll.u32 %v13500_v26, 16  ;;  %v4188_v13 = vor.u32 %v4187_v49, %v13502_v18  ;;  %v13535_v22 = vld [vmem:[%s12278_s16 + $0xb0] sm:$0x1] }
 0x10c   : > { %10811 = vmatpush3.bf16.msra.mxu0 %v11971_v50  ;;  %v4165_v50 = vrot.slane %v4164_v9, 4  ;;  %v13512_v15 = vrot.slane %v4205_v25, 5  ;;  %v4211_v39 = vrot.slane %v4209_v23, 4  ;;  %v15220_v24 = vor.u32 %v12920_v58, %v12918_v12 }
 0x10d   : > { %10812 = vmatprep.subr.bf16.mxu0 %v11973_v17  ;;  %v15221_v16 = vcombine.low %v13225_v41, %v13250_v61  ;;  %v4098_v23 = vsel %vm12342_vm2, %v13475_v54, %v13434_v6  ;;  %v4112_v58 = vsel %vm12342_vm2, %v4107_v48, %v13441_v29  ;;  %v15222_v41 = vcombine.low %v13280_v32, %v13322_v44  ;;  %v11978_v32 = vld [vmem:[%s15168_s1 + $0x220] sm:$0xff]  }
 0x10e   : > { %v13517_v51 = vrot.slane %v15220_v24, 4  ;;  %v4122_v61 = vsel %vm12342_vm2, %v4117_v40, %v4121_v4  ;;  %v4202_v6 = vor.u32 %v4201_v46, %v4198_v5  ;;  %v4146_v29 = vsel %vm12342_vm2, %v4141_v2, %v4145_v42  ;;  %v9667_v42 = vld [vmem:[%s12278_s16 + $0x48] sm:$0xe] }
 0x10f   : > { %10781 = vmatmul.mubr.bf16.gmra.mrb[4].mxu0 %v13318_v56  ;;  %v4088_v56 = vsel %vm12342_vm2, %v13432_v11, %v13404_v62  ;;  %v9614_v62 = vld [vmem:[%s12278_s16 + $0xb4] sm:$0xf]  ;;  %v13547_v11 = vld [vmem:[%s12278_s16 + $0xb8] sm:$0xf]  ;;  %v4160_v40 = vsel %vm12342_vm2, %v4155_v27, %v13472_v47  ;;  %v13557_v44 = vrot.slane %v4178_v60, 4  ;;  %v13559_v4 = vrot.slane %v4191_v30, 5 }
 0x110   : > { %10557 = vmatmul.mubr.bf16.gmra.mrb[20].mxu1 %v15221_v16  ;;  %10784 = vmatprep.mubr.bf16.mxu0 %v13373_v19  ;;  %v4136_v19 = vsel %vm12342_vm2, %v4131_v35, %v13452_v14  ;;  %v4170_v14 = vsel %vm12342_vm2, %v4165_v50, %v4169_v45  ;;  %v13563_v46 = vrot.slane %v4188_v13, 4  ;;  %v4212_v54 = vor.u32 %v4211_v39, %v13512_v15  ;;  %v9668_v27 = vld [vmem:[%s12278_s16 + $0x54] sm:$0xe] }
 0x111   : > { %10560 = vmatprep.mubr.bf16.mxu1 %v15222_v41  ;;  %10813 = vmatpush3.bf16.msra.mxu0 %v11973_v17  ;;  %v4215_v17 = vshll.u32 %v13535_v22, 16  ;;  %v15223_v47 = vsel %vm12342_vm2, %v13402_v43, %v13391_v53  ;;  %v15224_v30 = vsel %vm12342_vm2, %v13400_v36, %v13324_v59  ;;  %v4220_v57 = vshrl.u32 %v9614_v62, 16 }
 0x112   : > { %10814 = vmatprep.subr.bf16.mxu0 %v11975_v1  ;;  %v9645_v31 = vcombine.low %v15224_v30, %v15223_v47  ;;  %v4223_v9 = vshll.u32 %v9614_v62, 16  ;;  %v4229_v21 = vshll.u32 %v13547_v11, 16  ;;  %v9261_v8 = vcombine.low %v13379_v3, %v13389_v55  ;;  %v11981_v3 = vld [vmem:[%s15168_s1 + $0x228] sm:$0xff]   ;;  %v9617_v55 = vld [vmem:[%s12278_s16 + $0xc0] sm:$0xf] }
 0x113   : > { %v9262_v49 = vcombine.low %v13408_v37, %v13464_v63  ;;  %v9646_v25 = vcombine.low %v4088_v56, %v4098_v23  ;;  %v13585_v53 = vrot.slane %v4202_v6, 4  ;;  %v9647_v43 = vcombine.low %v4112_v58, %v4122_v61  ;;  %v15228_v30 = vld [vmem:[#allocation12_spill] sm:$0xff] }
 0x114   : > { %v13587_v59 = vcombine.low %v4136_v19, %v4146_v29  ;;  %v13589_v36 = vcombine.low %v4160_v40, %v4170_v14  ;;  %v4184_v48 = vsel %vm12342_vm2, %v13557_v44, %v13502_v18  ;;  %v4194_v35 = vsel %vm12342_vm2, %v13563_v46, %v13559_v4  ;;  %v9670_v29 = vld [vmem:[%s12278_s16 + $0x6c] sm:$0xe]  ;;  %v15226_v40 = vld [vmem:[#allocation10_spill] sm:$0xff] }
 0x115   : > { %10815 = vmatpush3.bf16.msra.mxu0 %v11975_v1  ;;  %v13605_v2 = vrot.slane %v4212_v54, 4  ;;  %v13607_v5 = vrot.slane %v4215_v17, 5  ;;  %v4233_v1 = vshrl.u32 %v13547_v11, 16  ;;  %v15225_v45 = vcombine.low %v13334_v7, %v13343_v52  ;;  %v11984_v7 = vld [vmem:[%s15168_s1 + $0x230] sm:$0xff]   ;;  %v13629_v52 = vld [vmem:[%s12278_s16 + $0xc4] sm:$0xf] }
 0x116   : > { %10816 = vmatprep.subr.bf16.mxu0 %v11978_v32  ;;  %v13614_v60 = vrot.slane %v4220_v57, 4  ;;  %v13618_v50 = vrot.slane %v4229_v21, 5  ;;  %v4239_v13 = vshll.u32 %v13568_v28, 16  ;;  %v4208_v39 = vsel %vm12342_vm2, %v13585_v53, %v13512_v15  ;;  %v9669_v15 = vld [vmem:[%s12278_s16 + $0x60] sm:$0xe]  ;;  %v11976_v14 = vld [vmem:[%s12278_s16 + $0xc] sm:$0xff]  }
 0x117   : > { %10785 = vmatmul.mubr.bf16.gmra.mrb[8].mxu0 %v13385_v20  ;;  %v13616_v20 = vrot.slane %v4223_v9, 5  ;;  %v4244_v24 = vshrl.u32 %v9617_v55, 16  ;;  %v9683_v16 = vrot.slane %v9667_v42, 9  ;;  %v4707_v56 = vrot.slane %v13205_v33, 5  ;;  %v15227_v17 = vld [vmem:[#allocation11_spill] sm:$0xff]  ;;  %v11987_v57 = vld [vmem:[%s15168_s1 + $0x238] sm:$0xff]  }
 0x118   : > { %10561 = vmatmul.mubr.bf16.gmra.mrb[24].mxu1 %v15225_v45  ;;  %10788 = vmatprep.mubr.bf16.mxu0 %v9645_v31  ;;  %v4247_v23 = vshll.u32 %v9617_v55, 16  ;;  %v4710_v58 = vrot.slane %v13253_v0, 5  ;;  %v9684_v41 = vrot.slane %v9668_v27, 9  ;;  %v4714_v61 = vrot.slane %v13217_v34, 5  ;;  %v15229_v53 = vld [vmem:[#allocation13_spill] sm:$0xff] }
 0x119   : > { %10564 = vmatprep.mubr.bf16.mxu1 %v9261_v8  ;;  %10817 = vmatpush3.bf16.msra.mxu0 %v11978_v32  ;;  %v4218_v19 = vsel %vm12342_vm2, %v13605_v2, %v13607_v5  ;;  %v13639_v6 = vrot.slane %v4233_v1, 4  ;;  %v13643_v62 = vsel %vm12588_vm5, %v9683_v16, %v4707_v56  ;;  %v4709_v33 = vrot.slane %v4707_v56, 4  ;;  %v15230_v5 = vld [vmem:[#allocation14_spill] sm:$0xff]  ;;  %v13680_v27 = vld [vmem:[%s12278_s16 + $0xc8] sm:$0x1] }
 0x11a   : > { %10818 = vmatprep.subr.bf16.mxu0 %v11981_v3  ;;  %v4253_v32 = vshll.u32 %v13629_v52, 16  ;;  %v13649_v0 = vsel %vm12588_vm5, %v9684_v41, %v4714_v61  ;;  %v4716_v34 = vrot.slane %v4714_v61, 4  ;;  %v4717_v4 = vrot.slane %v15226_v40, 5  ;;  %v11977_v41 = vld [vmem:[%s12278_s16 + $0x18] sm:$0xff]   ;;  %v11979_v40 = vld [vmem:[%s12278_s16 + $0x24] sm:$0xff]  }
 0x11b   : > { %v13655_v46 = vsel %vm12588_vm5, %v4709_v33, %v4710_v58  ;;  %v9685_v54 = vrot.slane %v9669_v15, 9  ;;  %v4721_v47 = vrot.slane %v15227_v17, 5  ;;  %v4724_v31 = vrot.slane %v15228_v30, 5 }
 0x11c   : > { %v9715_v9 = vcombine.low %v13643_v62, %v13655_v46  ;;  %v13666_v21 = vsel %vm12588_vm5, %v4716_v34, %v4717_v4  ;;  %v9686_v8 = vrot.slane %v9670_v29, 9  ;;  %v4731_v1 = vrot.slane %v15230_v5, 5  ;;  %v15232_v29 = vld [vmem:[#allocation18_spill] sm:$0xff]  ;;  %v9376_v62 = vld [vmem:[%s12278_s16 + $0x90] sm:$0xf]  ;;  %v11993_v46 = vld [vmem:[%s12278_s16 + $0xa8] sm:$0xff]  }
 0x11d   : > { %10819 = vmatpush3.bf16.msra.mxu0 %v11981_v3  ;;  %v4728_v3 = vrot.slane %v15229_v53, 5  ;;  %v9716_v55 = vcombine.low %v13649_v0, %v13666_v21  ;;  %v13673_v42 = vsel %vm12588_vm5, %v9685_v54, %v4721_v47  ;;  %v4723_v2 = vrot.slane %v4721_v47, 4  ;;  %v15233_v54 = vld [vmem:[#allocation9_spill] sm:$0xff]  ;;  %v12057_v0 = vld [vmem:[%s12278_s16 + $0x8c] sm:$0x1] }
 0x11e   : > { %10820 = vmatprep.subr.bf16.mxu0 %v11984_v7  ;;  %v13682_v45 = vrot.slane %v4244_v24, 4  ;;  %v13695_v37 = vcombine.low %v4184_v48, %v4194_v35  ;;  %v4226_v63 = vor.u32 %v13616_v20, %v13614_v60  ;;  %v9671_v24 = vld [vmem:[%s12278_s16 + $0x78] sm:$0xe]  ;;  %v13707_v58 = vrot.slane %v4239_v13, 5  ;;  %v9620_v13 = vld [vmem:[%s12278_s16 + $0xcc] sm:$0xf] }
 0x11f   : > { %10789 = vmatmul.mubr.bf16.gmra.mrb[12].mxu0 %v9646_v25  ;;  %v13684_v25 = vrot.slane %v4247_v23, 5  ;;  %v13688_v16 = vsel %vm12588_vm5, %v9686_v8, %v4728_v3  ;;  %v4730_v56 = vrot.slane %v4728_v3, 4  ;;  %v13705_v23 = vcombine.low %v4208_v39, %v4218_v19  ;;  %v9370_v48 = vld [vmem:[%s12278_s16 + $0x78] sm:$0xf]  ;;  %v15231_v19 = vld [vmem:[#allocation15_spill] sm:$0xff] }
 0x120   : > { %10565 = vmatmul.mubr.bf16.gmra.mrb[28].mxu1 %v9262_v49  ;;  %10792 = vmatprep.mubr.bf16.mxu0 %v9647_v43  ;;  %v4257_v49 = vshrl.u32 %v13629_v52, 16  ;;  %v13702_v43 = vsel %vm12588_vm5, %v4723_v2, %v4724_v31  ;;  %v4236_v35 = vor.u32 %v13639_v6, %v13618_v50  ;;  %v13718_v60 = vrot.slane %v4253_v32, 5  ;;  %v13732_v32 = vld [vmem:[%s12278_s16 + $0xd0] sm:$0xf] }
 0x121   : > { %10584 = vmatprep.mubr.bf16.mxu1 %v11976_v14  ;;  %10821 = vmatpush3.bf16.msra.mxu0 %v11984_v7  ;;  %v9717_v18 = vcombine.low %v13673_v42, %v13702_v43  ;;  %v13713_v44 = vsel %vm12588_vm5, %v4730_v56, %v4731_v1  ;;  %v4263_v20 = vshll.u32 %v13680_v27, 16  ;;  %v9672_v7 = vld [vmem:[%s12278_s16 + $0x84] sm:$0xe]  ;;  %v4250_v61 = vor.u32 %v13684_v25, %v13682_v45  ;;  %v15234_v2 = vld [vmem:[#allocation16_spill] sm:$0xff] }
 0x122   : > { %10822 = vmatprep.subr.bf16.mxu0 %v11987_v57  ;;  %v9718_v39 = vcombine.low %v13688_v16, %v13713_v44  ;;  %v9687_v15 = vrot.slane %v9671_v24, 9  ;;  %v4735_v33 = vrot.slane %v15231_v19, 5  ;;  %v4738_v34 = vrot.slane %v15232_v29, 5  ;;  %v15235_v25 = vld [vmem:[#allocation19_spill] sm:$0xff] }
 0x123   : > { %v4259_v6 = vrot.slane %v4257_v49, 4  ;;  %v2485_v4 = vshrl.u32 %v9370_v48, 16  ;;  %v2488_v14 = vshll.u32 %v9370_v48, 16  ;;  %v2507_v17 = vsel %vm12342_vm2, %v13517_v51, %v15233_v54 }
 0x124   : > { %v4268_v47 = vshrl.u32 %v9620_v13, 16  ;;  %v13740_v30 = vsel %vm12588_vm5, %v9687_v15, %v4735_v33  ;;  %v4737_v31 = vrot.slane %v4735_v33, 4  ;;  %v9688_v8 = vrot.slane %v9672_v7, 9  ;;  %v12037_v7 = vld [vmem:[%s15168_s1 + $0x108] sm:$0xff]  }
 0x125   : > { %10823 = vmatpush3.bf16.msra.mxu0 %v11987_v57  ;;  %v4271_v53 = vshll.u32 %v9620_v13, 16  ;;  %v2487_v3 = vrot.slane %v2485_v4, 4  ;;  %v2490_v57 = vrot.slane %v2488_v14, 5  ;;  %v4742_v5 = vrot.slane %v15234_v2, 5  ;;  %v9673_v13 = vld [vmem:[%s12278_s16 + $0x90] sm:$0xe] }
 0x126   : > { %v4277_v51 = vshll.u32 %v13732_v32, 16  ;;  %v4281_v1 = vshrl.u32 %v13732_v32, 16  ;;  %v13749_v45 = vsel %vm12588_vm5, %v4737_v31, %v4738_v34  ;;  %v4745_v56 = vrot.slane %v15235_v25, 5  ;;  %v11980_v4 = vld [vmem:[%s12278_s16 + $0x30] sm:$0xff]  }
 0x127   : > { %10793 = vmatmul.mubr.bf16.gmra.mrb[16].mxu0 %v13587_v59  ;;  %v15236_v59 = vld [vmem:[#allocation22_spill] sm:$0xff]  ;;  %v4260_v49 = vor.u32 %v4259_v6, %v13718_v60  ;;  %v2491_v24 = vor.u32 %v2490_v57, %v2487_v3  ;;  %v4744_v48 = vrot.slane %v4742_v5, 4  ;;  %v4237_v15 = vrot.slane %v4236_v35, 4  ;;  %v13770_v14 = vld [vmem:[%s12278_s16 + $0xd4] sm:$0x1] }
 0x128   : > { %10585 = vmatmul.mubr.bf16.vlgmr.msra.gmra.mrb[0].mxu1 %v11977_v41  ;;  %10796 = vmatprep.mubr.bf16.mxu0 %v13589_v36  ;;  %v9719_v36 = vcombine.low %v13740_v30, %v13749_v45  ;;  %v4227_v41 = vrot.slane %v4226_v63, 4  ;;  %v4265_v19 = vrot.slane %v4263_v20, 5  ;;  %v13762_v33 = vsel %vm12588_vm5, %v9688_v8, %v4742_v5  ;;  %v11982_v20 = vld [vmem:[%s12278_s16 + $0x3c] sm:$0xff]   ;;  %v15237_v3 = vld [vmem:[#allocation17_spill] sm:$0xff] }
 0x129   : > { %11296 = vmatpush3.bf16.msra.mxu1 %v15236_v59  ;;  %10588 = vmatprep.mubr.bf16.mxu1 %v11979_v40  ;;  %v4270_v29 = vrot.slane %v4268_v47, 4  ;;  %v4273_v34 = vrot.slane %v4271_v53, 5  ;;  %v2492_v40 = vrot.slane %v2491_v24, 4  ;;  %v13766_v6 = vsel %vm12588_vm5, %v4744_v48, %v4745_v56  ;;  %v12038_v2 = vld [vmem:[%s15168_s1 + $0x110] sm:$0xff]   ;;  %v12039_v48 = vld [vmem:[%s12278_s16 + $0x1c] sm:$0xf] }
 0x12a   : > { %11289 = vmatprep.subr.bf16.mxu1 %v12037_v7  ;;  %v13772_v54 = vrot.slane %v4277_v51, 5  ;;  %v4283_v31 = vrot.slane %v4281_v1, 4  ;;  %v9720_v63 = vcombine.low %v13762_v33, %v13766_v6  ;;  %v9689_v35 = vrot.slane %v9673_v13, 9 }
 0x12b   : > { %v4251_v8 = vrot.slane %v4250_v61, 4  ;;  %v4261_v47 = vrot.slane %v4260_v49, 4  ;;  %v2497_v53 = vsel %vm12342_vm2, %v2492_v40, %v12918_v12  ;;  %v4749_v57 = vrot.slane %v15237_v3, 5  ;;  %v15238_v12 = vld [vmem:[#allocation21_spill] sm:$0xff]  ;;  %v11983_v40 = vld [vmem:[%s12278_s16 + $0x48] sm:$0xff]  }
 0x12c   : > { %v4232_v5 = vsel %vm12342_vm2, %v4227_v41, %v13618_v50  ;;  %v4242_v61 = vsel %vm12342_vm2, %v4237_v15, %v13707_v58  ;;  %v13790_v51 = vcombine.low %v2497_v53, %v2507_v17  ;;  %v4752_v1 = vrot.slane %v15238_v12, 5  ;;  %v9663_v58 = vld [vmem:[%s12278_s16 + $0x18] sm:$0xe]  ;;  %v9674_v17 = vld [vmem:[%s12278_s16 + $0x9c] sm:$0xe] }
 0x12d   : > { %11297 = vmatpush3.bf16.msra.mxu1 %v12037_v7  ;;  %v4274_v25 = vor.u32 %v4273_v34, %v4270_v29  ;;  %v4287_v56 = vshll.u32 %v13770_v14, 16  ;;  %v13797_v59 = vsel %vm12588_vm5, %v9689_v35, %v4749_v57  ;;  %v4751_v49 = vrot.slane %v4749_v57, 4  ;;  %v12040_v41 = vld [vmem:[%s15168_s1 + $0x118] sm:$0xff]   ;;  %v15239_v35 = vld [vmem:[#allocation20_spill] sm:$0xff]  ;;  %v12041_v3 = vld [vmem:[%s12278_s16 + $0x20] sm:$0x1] }
 0x12e   : > { %11290 = vmatprep.subr.bf16.mxu1 %v12038_v2  ;;  %v4284_v50 = vor.u32 %v4283_v31, %v13772_v54  ;;  %v4266_v24 = vsel %vm12342_vm2, %v4261_v47, %v4265_v19  ;;  %v4679_v13 = vrot.slane %v12039_v48, 5  ;;  %v9652_v7 = vcombine.low %v4232_v5, %v4242_v61  ;;  %v11985_v47 = vld [vmem:[%s12278_s16 + $0x54] sm:$0xff]   ;;  %v9675_v12 = vld [vmem:[%s12278_s16 + $0xa8] sm:$0xe] }
 0x12f   : > { %10797 = vmatmul.mubr.bf16.gmra.mrb[20].mxu0 %v13695_v37  ;;  %v4256_v37 = vsel %vm12342_vm2, %v4251_v8, %v13718_v60  ;;  %v4275_v15 = vrot.slane %v4274_v25, 4  ;;  %v4289_v29 = vrot.slane %v4287_v56, 5  ;;  %v9679_v19 = vrot.slane %v9663_v58, 9  ;;  %v9664_v56 = vld [vmem:[%s12278_s16 + $0x24] sm:$0xe] }
 0x130   : > { %10589 = vmatmul.mubr.bf16.gmra.mrb[4].mxu1 %v11980_v4  ;;  %10800 = vmatprep.mubr.bf16.mxu0 %v13705_v23  ;;  %v13811_v23 = vsel %vm12588_vm5, %v4751_v49, %v4752_v1  ;;  %v9690_v34 = vrot.slane %v9674_v17, 9  ;;  %v9653_v4 = vcombine.low %v4256_v37, %v4266_v24  ;;  %v4285_v31 = vrot.slane %v4284_v50, 4  ;;  %v12043_v49 = vld [vmem:[%s12278_s16 + $0x28] sm:$0xf]  ;;  %v12044_v37 = vld [vmem:[%s12278_s16 + $0x34] sm:$0xf] }
 0x131   : > { %10592 = vmatprep.mubr.bf16.mxu1 %v11982_v20  ;;  %11298 = vmatpush3.bf16.msra.mxu1 %v12038_v2  ;;  %v9721_v60 = vcombine.low %v13797_v59, %v13811_v23  ;;  %v4756_v20 = vrot.slane %v15239_v35, 5  ;;  %v4759_v8 = vrot.slane %v13500_v26, 5  ;;  %v4681_v53 = vrot.slane %v4679_v13, 4  ;;  %v12042_v2 = vld [vmem:[%s15168_s1 + $0x120] sm:$0xff]  }
 0x132   : > { %11291 = vmatprep.subr.bf16.mxu1 %v12040_v41  ;;  %v4682_v57 = vrot.slane %v12041_v3, 5  ;;  %v4680_v26 = vsel %vm12588_vm5, %v9679_v19, %v4679_v13  ;;  %v4280_v1 = vsel %vm12342_vm2, %v4275_v15, %v13772_v54  ;;  %v4290_v25 = vsel %vm12342_vm2, %v4285_v31, %v4289_v29  ;;  %v9665_v13 = vld [vmem:[%s12278_s16 + $0x30] sm:$0xe]  ;;  %v11986_v31 = vld [vmem:[%s12278_s16 + $0x60] sm:$0xff]  }
 0x133   : > { %v13828_v5 = vsel %vm12588_vm5, %v9690_v34, %v4756_v20  ;;  %v4758_v61 = vrot.slane %v4756_v20, 4  ;;  %v4686_v50 = vrot.slane %v12043_v49, 5  ;;  %v4693_v24 = vrot.slane %v12044_v37, 5  ;;  %v12046_v34 = vld [vmem:[%s12278_s16 + $0x2c] sm:$0x1] }
 0x134   : > { %v4683_v17 = vsel %vm12588_vm5, %v4681_v53, %v4682_v57  ;;  %v9691_v48 = vrot.slane %v9675_v12, 9  ;;  %v9654_v29 = vcombine.low %v4280_v1, %v4290_v25  ;;  %v9680_v19 = vrot.slane %v9664_v56, 9  ;;  %v11988_v53 = vld [vmem:[%s12278_s16 + $0x6c] sm:$0xff]   ;;  %v9676_v12 = vld [vmem:[%s12278_s16 + $0xb4] sm:$0xe] }
 0x135   : > { %11299 = vmatpush3.bf16.msra.mxu1 %v12040_v41  ;;  %v13842_v58 = vsel %vm12588_vm5, %v4758_v61, %v4759_v8  ;;  %v15240_v41 = vld [vmem:[#allocation23_spill] sm:$0xff]  ;;  %v9711_v35 = vcombine.low %v4680_v26, %v4683_v17  ;;  %v4688_v20 = vrot.slane %v4686_v50, 4  ;;  %v9681_v3 = vrot.slane %v9665_v13, 9  ;;  %v9666_v1 = vld [vmem:[%s12278_s16 + $0x3c] sm:$0xe] }
 0x136   : > { %11292 = vmatprep.subr.bf16.mxu1 %v12042_v2  ;;  %v9722_v54 = vcombine.low %v13828_v5, %v13842_v58  ;;  %v4763_v15 = vrot.slane %v15240_v41, 5  ;;  %v4695_v57 = vrot.slane %v4693_v24, 4  ;;  %v12048_v25 = vld [vmem:[%s12278_s16 + $0x40] sm:$0xf]  ;;  %v4687_v49 = vsel %vm12588_vm5, %v9680_v19, %v4686_v50  ;;  %v12050_v19 = vld [vmem:[%s12278_s16 + $0x44] sm:$0x1] }
 0x137   : > { %10801 = vmatmul.mubr.bf16.gmra.mrb[24].mxu0 %v9652_v7  ;;  %v12045_v7 = vld [vmem:[%s15168_s1 + $0x128] sm:$0xff]   ;;  %v4700_v56 = vrot.slane %v12048_v25, 5  ;;  %v4770_v13 = vrot.slane %v13547_v11, 5  ;;  %v4694_v50 = vsel %vm12588_vm5, %v9681_v3, %v4693_v24  ;;  %v12051_v11 = vld [vmem:[%s15168_s1 + $0x138] sm:$0xff]   ;;  %v9677_v24 = vld [vmem:[%s12278_s16 + $0xc0] sm:$0xe] }
 0x138   : > { %10593 = vmatmul.mubr.bf16.gmra.mrb[8].mxu1 %v11983_v40  ;;  %10804 = vmatprep.mubr.bf16.mxu0 %v9653_v4  ;;  %v4689_v40 = vrot.slane %v12046_v34, 5  ;;  %v4766_v4 = vrot.slane %v13535_v22, 5  ;;  %v13859_v8 = vsel %vm12588_vm5, %v9691_v48, %v4763_v15  ;;  %v12049_v22 = vld [vmem:[%s15168_s1 + $0x130] sm:$0xff]   ;;  %v9692_v48 = vrot.slane %v9676_v12, 9 }
 0x139   : > { %10596 = vmatprep.mubr.bf16.mxu1 %v11985_v47  ;;  %11300 = vmatpush3.bf16.msra.mxu1 %v12042_v2  ;;  %v4765_v47 = vrot.slane %v4763_v15, 4  ;;  %v12047_v2 = vld [vmem:[%s12278_s16 + $0x38] sm:$0x1]  ;;  %v9682_v15 = vrot.slane %v9666_v1, 9  ;;  %v4703_v34 = vrot.slane %v12050_v19, 5  ;;  %v4777_v12 = vrot.slane %v13629_v52, 5 }
 0x13a   : > { %11293 = vmatprep.subr.bf16.mxu1 %v12045_v7  ;;  %v4696_v61 = vrot.slane %v12047_v2, 5  ;;  %v4690_v37 = vsel %vm12588_vm5, %v4688_v20, %v4689_v40  ;;  %v4772_v40 = vrot.slane %v4770_v13, 4  ;;  %v9367_v20 = vld [vmem:[%s12278_s16 + $0x6c] sm:$0xf]  ;;  %v11991_v19 = vld [vmem:[%s12278_s16 + $0x90] sm:$0xff]   ;;  %v2528_v21 = vshll.u32 %v12057_v0, 16 }
 0x13b   : > { %v13871_v26 = vsel %vm12588_vm5, %v4765_v47, %v4766_v4  ;;  %v9712_v4 = vcombine.low %v4687_v49, %v4690_v37  ;;  %v4701_v2 = vsel %vm12588_vm5, %v9682_v15, %v4700_v56  ;;  %v2461_v1 = vshrl.u32 %v9367_v20, 16  ;;  %v9678_v52 = vld [vmem:[%s12278_s16 + $0xcc] sm:$0xe] }
 0x13c   : > { %v9723_v17 = vcombine.low %v13859_v8, %v13871_v26  ;;  %v4697_v41 = vsel %vm12588_vm5, %v4695_v57, %v4696_v61  ;;  %v9693_v57 = vrot.slane %v9677_v24, 9  ;;  %v2464_v25 = vshll.u32 %v9367_v20, 16 }
 0x13d   : > { %11301 = vmatpush3.bf16.msra.mxu1 %v12045_v7  ;;  %v4773_v7 = vrot.slane %v13568_v28, 5  ;;  %v13891_v28 = vsel %vm12588_vm5, %v9692_v48, %v4770_v13  ;;  %v4780_v37 = vrot.slane %v13680_v27, 5  ;;  %v4779_v13 = vrot.slane %v4777_v12, 4 }
 0x13e   : > { %11294 = vmatprep.subr.bf16.mxu1 %v12049_v22  ;;  %v2466_v27 = vrot.slane %v2464_v25, 5  ;;  %v4787_v24 = vrot.slane %v13770_v14, 5 }
 0x13f   : > { %10805 = vmatmul.mubr.bf16.gmra.mrb[28].mxu0 %v9654_v29  ;;  %v4702_v29 = vrot.slane %v4700_v56, 4  ;;  %v13898_v47 = vsel %vm12588_vm5, %v4772_v40, %v4773_v7  ;;  %v13912_v56 = vsel %vm12588_vm5, %v9693_v57, %v4777_v12  ;;  %v4784_v40 = vrot.slane %v13732_v32, 5  ;;  %v12053_v57 = vld [vmem:[%s12278_s16 + $0x74] sm:$0x1] }
 0x140   : > { %10597 = vmatmul.mubr.bf16.gmra.mrb[12].mxu1 %v11986_v31  ;;  %10824 = vmatprep.mubr.bf16.mxu0 %v9711_v35  ;;  %v11989_v31 = vld [vmem:[%s12278_s16 + $0x78] sm:$0xff]   ;;  %v9713_v35 = vcombine.low %v4694_v50, %v4697_v41  ;;  %v9724_v3 = vcombine.low %v13891_v28, %v13898_v47  ;;  %v13917_v50 = vsel %vm12588_vm5, %v4779_v13, %v4780_v37  ;;  %v2463_v41 = vrot.slane %v2461_v1, 4  ;;  %v12054_v1 = vld [vmem:[%s12278_s16 + $0x88] sm:$0xf] }
 0x141   : > { %10600 = vmatprep.mubr.bf16.mxu1 %v11988_v53  ;;  %11302 = vmatpush3.bf16.msra.mxu1 %v12049_v22  ;;  %v11990_v53 = vld [vmem:[%s12278_s16 + $0x84] sm:$0xff]   ;;  %v4704_v61 = vsel %vm12588_vm5, %v4702_v29, %v4703_v34  ;;  %v12052_v22 = vld [vmem:[%s12278_s16 + $0x70] sm:$0xf]  ;;  %v9725_v29 = vcombine.low %v13912_v56, %v13917_v50  ;;  %v4786_v20 = vrot.slane %v4784_v40, 4  ;;  %v2518_v25 = vshll.u32 %v12054_v1, 16 }
 0x142   : > { %11295 = vmatprep.subr.bf16.mxu1 %v12051_v11  ;;  %v2470_v49 = vshll.u32 %v12052_v22, 16  ;;  %v2474_v48 = vshrl.u32 %v12052_v22, 16  ;;  %v9714_v7 = vcombine.low %v4701_v2, %v4704_v61  ;;  %v2480_v2 = vshll.u32 %v12053_v57, 16 }
 0x143   : > { %v13939_v12 = vsel %vm12588_vm5, %v4786_v20, %v4787_v24  ;;  %v2522_v22 = vshrl.u32 %v12054_v1, 16  ;;  %v12056_v20 = vld [vmem:[%s12278_s16 + $0xa0] sm:$0xf] }
 0x144   : > { %v13919_v15 = vrot.slane %v2470_v49, 5  ;;  %v2476_v34 = vrot.slane %v2474_v48, 4  ;;  %v2570_v57 = vshrl.u32 %v12056_v20, 16 }
 0x145   : > { %11303 = vmatpush3.bf16.msra.mxu1 %v12051_v11  ;;  %v9694_v11 = vrot.slane %v9678_v52, 9 }
 0x146   : > { %v2477_v32 = vor.u32 %v2476_v34, %v13919_v15  ;;  %v2536_v34 = vshll.u32 %v9376_v62, 16 }
 0x147   : > { %10825 = vmatmul.mubr.bf16.vlgmr.msra.gmra.mrb[0].mxu0 %v9712_v4  ;;  %v11992_v4 = vld [vmem:[%s12278_s16 + $0x9c] sm:$0xff]  }
 0x148   : > { %10601 = vmatmul.mubr.bf16.gmra.mrb[16].mxu1 %v11989_v31  ;;  %10828 = vmatprep.mubr.bf16.mxu0 %v9713_v35  ;;  %v9373_v31 = vld [vmem:[%s12278_s16 + $0x84] sm:$0xf]  ;;  %v13930_v35 = vsel %vm12588_vm5, %v9694_v11, %v4784_v40  ;;  %v2478_v48 = vrot.slane %v2477_v32, 4  ;;  %v12055_v11 = vld [vmem:[%s12278_s16 + $0x94] sm:$0xf]  ;;  %v2538_v1 = vrot.slane %v2536_v34, 5 }
 0x149   : > { %10604 = vmatprep.mubr.bf16.mxu1 %v11990_v53  ;;  %v2467_v53 = vor.u32 %v2466_v27, %v2463_v41  ;;  %v2509_v14 = vshrl.u32 %v9373_v31, 16  ;;  %v2512_v61 = vshll.u32 %v9373_v31, 16  ;;  %v9726_v49 = vcombine.low %v13930_v35, %v13939_v12 }
 0x14a   : > { %v13948_v41 = vrot.slane %v2518_v25, 5  ;;  %v2524_v27 = vrot.slane %v2522_v22, 4  ;;  %v2542_v40 = vshll.u32 %v12055_v11, 16  ;;  %v2546_v24 = vshrl.u32 %v12055_v11, 16  ;;  %v12059_v11 = vld [vmem:[%s12278_s16 + $0xa4] sm:$0x1] }
 0x14b   : > { %v2468_v37 = vrot.slane %v2467_v53, 4  ;;  %v2511_v13 = vrot.slane %v2509_v14, 4  ;;  %v2514_v52 = vrot.slane %v2512_v61, 5  ;;  %v2566_v53 = vshll.u32 %v12056_v20, 16  ;;  %v12060_v20 = vld [vmem:[%s12278_s16 + $0xac] sm:$0xf] }
 0x14c   : > { %v2525_v14 = vor.u32 %v2524_v27, %v13948_v41  ;;  %v13965_v42 = vrot.slane %v2542_v40, 5  ;;  %v2548_v43 = vrot.slane %v2546_v24, 4  ;;  %v2572_v22 = vrot.slane %v2570_v57, 4  ;;  %v9385_v24 = vld [vmem:[%s12278_s16 + $0xb4] sm:$0xf] }
 0x14d   : > { %v2576_v40 = vshll.u32 %v12059_v11, 16  ;;  %v2594_v16 = vshrl.u32 %v12060_v20, 16  ;;  %v2608_v0 = vshll.u32 %v9385_v24, 16 }
 0x14e   : > { %v2549_v27 = vor.u32 %v2548_v43, %v13965_v42 }
 0x14f   : > { %10829 = vmatmul.mubr.bf16.gmra.mrb[4].mxu0 %v9714_v7  ;;  %v9379_v7 = vld [vmem:[%s12278_s16 + $0x9c] sm:$0xf] }
 0x150   : > { %10605 = vmatmul.mubr.bf16.gmra.mrb[20].mxu1 %v11991_v19  ;;  %10832 = vmatprep.mubr.bf16.mxu0 %v9715_v9  ;;  %v2482_v9 = vrot.slane %v2480_v2, 5  ;;  %v2533_v19 = vshrl.u32 %v9376_v62, 16  ;;  %v2560_v31 = vshll.u32 %v9379_v7, 16  ;;  %v2473_v2 = vsel %vm12342_vm2, %v2468_v37, %v13919_v15  ;;  %v11995_v62 = vld [vmem:[%s12278_s16 + $0xc0] sm:$0xff]  }
 0x151   : > { %10608 = vmatprep.mubr.bf16.mxu1 %v11992_v4  ;;  %v2557_v4 = vshrl.u32 %v9379_v7, 16  ;;  %v13967_v15 = vrot.slane %v2566_v53, 5  ;;  %v2590_v53 = vshll.u32 %v12060_v20, 16 }
 0x152   : > { %v2483_v32 = vsel %vm12342_vm2, %v2478_v48, %v2482_v9  ;;  %v2535_v61 = vrot.slane %v2533_v19, 4  ;;  %v2562_v25 = vrot.slane %v2560_v31, 5  ;;  %v2530_v9 = vrot.slane %v2528_v21, 5  ;;  %v12061_v21 = vld [vmem:[%s12278_s16 + $0xb8] sm:$0xf] }
 0x153   : > { %v2526_v48 = vrot.slane %v2525_v14, 4  ;;  %v2573_v34 = vor.u32 %v2572_v22, %v13967_v15  ;;  %v2614_v30 = vshll.u32 %v12061_v21, 16  ;;  %v2618_v45 = vshrl.u32 %v12061_v21, 16 }
 0x155   : > { %v2574_v14 = vrot.slane %v2573_v34, 4 }
 0x157   : > { %10833 = vmatmul.mubr.bf16.gmra.mrb[8].mxu0 %v9716_v55  ;;  %v2515_v55 = vor.u32 %v2514_v52, %v2511_v13  ;;  %v2539_v13 = vor.u32 %v2538_v1, %v2535_v61  ;;  %v12058_v52 = vld [vmem:[%s12278_s16 + $0x98] sm:$0x1]  ;;  %v2578_v61 = vrot.slane %v2576_v40, 5 }
 0x158   : > { %10609 = vmatmul.mubr.bf16.gmra.mrb[24].mxu1 %v11993_v46  ;;  %10836 = vmatprep.mubr.bf16.mxu0 %v9717_v18  ;;  %v2559_v18 = vrot.slane %v2557_v4, 4  ;;  %v9415_v46 = vcombine.low %v2473_v2, %v2483_v32  ;;  %v2552_v7 = vshll.u32 %v12058_v52, 16  ;;  %v2605_v32 = vshrl.u32 %v9385_v24, 16 }
 0x159   : > { %10612 = vmatprep.mubr.bf16.mxu1 %v11994_v10  ;;  %v2516_v37 = vrot.slane %v2515_v55, 4  ;;  %v9382_v10 = vld [vmem:[%s12278_s16 + $0xa8] sm:$0xf]  ;;  %v2540_v57 = vrot.slane %v2539_v13, 4  ;;  %v2579_v33 = vsel %vm12342_vm2, %v2574_v14, %v2578_v61 }
 0x15a   : > { %v2563_v19 = vor.u32 %v2562_v25, %v2559_v18  ;;  %v2581_v4 = vshrl.u32 %v9382_v10, 16  ;;  %v2584_v31 = vshll.u32 %v9382_v10, 16  ;;  %v2554_v2 = vrot.slane %v2552_v7, 5 }
 0x15b   : > { %v2521_v44 = vsel %vm12342_vm2, %v2516_v37, %v13948_v41  ;;  %v2592_v18 = vrot.slane %v2590_v53, 5  ;;  %v2596_v25 = vrot.slane %v2594_v16, 4  ;;  %v2607_v22 = vrot.slane %v2605_v32, 4  ;;  %v9388_v37 = vld [vmem:[%s12278_s16 + $0xc0] sm:$0xf] }
 0x15c   : > { %v2564_v55 = vrot.slane %v2563_v19, 4  ;;  %v2583_v1 = vrot.slane %v2581_v4, 4  ;;  %v2586_v43 = vrot.slane %v2584_v31, 5  ;;  %v2629_v10 = vshrl.u32 %v9388_v37, 16  ;;  %v12063_v19 = vld [vmem:[%s12278_s16 + $0xc4] sm:$0xf] }
 0x15d   : > { %v2638_v34 = vshll.u32 %v12063_v19, 16 }
 0x15e   : > { %v2569_v52 = vsel %vm12342_vm2, %v2564_v55, %v13967_v15  ;;  %v2587_v6 = vor.u32 %v2586_v43, %v2583_v1  ;;  %v2642_v15 = vshrl.u32 %v12063_v19, 16  ;;  %v2631_v20 = vrot.slane %v2629_v10, 4 }
 0x15f   : > { %10837 = vmatmul.mubr.bf16.gmra.mrb[12].mxu0 %v9718_v39  ;;  %v2531_v39 = vsel %vm12342_vm2, %v2526_v48, %v2530_v9  ;;  %v2620_v9 = vrot.slane %v2618_v45, 4  ;;  %v2545_v48 = vsel %vm12342_vm2, %v2540_v57, %v13965_v42  ;;  %v12062_v42 = vld [vmem:[%s12278_s16 + $0xb0] sm:$0x1]  ;;  %v9419_v59 = vcombine.low %v2569_v52, %v2579_v33  ;;  %v12065_v45 = vld [vmem:[%s12278_s16 + $0xc8] sm:$0x1] }
 0x160   : > { %10613 = vmatmul.mubr.bf16.gmra.mrb[28].mxu1 %v11995_v62  ;;  %10840 = vmatprep.mubr.bf16.mxu0 %v9719_v36  ;;  %v2550_v36 = vrot.slane %v2549_v27, 4  ;;  %v9417_v41 = vcombine.low %v2521_v44, %v2531_v39  ;;  %v2610_v62 = vrot.slane %v2608_v0, 5  ;;  %v2600_v7 = vshll.u32 %v12062_v42, 16 }
 0x161   : > { %10648 = vmatprep.mubr.bf16.mxu1 %v9415_v46  ;;  %v2616_v46 = vrot.slane %v2614_v30, 5  ;;  %v2632_v27 = vshll.u32 %v9388_v37, 16  ;;  %v2588_v23 = vrot.slane %v2587_v6, 4  ;;  %v2640_v16 = vrot.slane %v2638_v34, 5 }
 0x162   : > { %v2555_v13 = vsel %vm12342_vm2, %v2550_v36, %v2554_v2  ;;  %v2611_v11 = vor.u32 %v2610_v62, %v2607_v22  ;;  %v2602_v31 = vrot.slane %v2600_v7, 5  ;;  %v2644_v44 = vrot.slane %v2642_v15, 4 }
 0x163   : > { %v2621_v40 = vor.u32 %v2620_v9, %v2616_v46  ;;  %v9418_v4 = vcombine.low %v2545_v48, %v2555_v13  ;;  %v2634_v53 = vrot.slane %v2632_v27, 5  ;;  %v2593_v32 = vsel %vm12342_vm2, %v2588_v23, %v2592_v18 }
 0x164   : > { %v2612_v39 = vrot.slane %v2611_v11, 4  ;;  %v2645_v30 = vor.u32 %v2644_v44, %v2640_v16  ;;  %v2648_v36 = vshll.u32 %v12065_v45, 16 }
 0x165   : > { %v2622_v57 = vrot.slane %v2621_v40, 4  ;;  %v2635_v21 = vor.u32 %v2634_v53, %v2631_v20 }
 0x166   : > { %v2617_v5 = vsel %vm12342_vm2, %v2612_v39, %v2616_v46  ;;  %v2650_v55 = vrot.slane %v2648_v36, 5 }
 0x167   : > { %10841 = vmatmul.mubr.bf16.gmra.mrb[16].mxu0 %v9720_v63  ;;  %v2597_v63 = vor.u32 %v2596_v25, %v2592_v18  ;;  %v2636_v26 = vrot.slane %v2635_v21, 4 }
 0x168   : > { %10649 = vmatmul.mubr.bf16.vlgmr.msra.gmra.mrb[16].mxu1 %v13790_v51  ;;  %10844 = vmatprep.mubr.bf16.mxu0 %v9721_v60  ;;  %v12064_v51 = vld [vmem:[%s12278_s16 + $0xbc] sm:$0x1] }
 0x169   : > { %10652 = vmatprep.mubr.bf16.mxu1 %v9417_v41  ;;  %v2624_v24 = vshll.u32 %v12064_v51, 16  ;;  %v2598_v60 = vrot.slane %v2597_v63, 4  ;;  %v2641_v14 = vsel %vm12342_vm2, %v2636_v26, %v2640_v16 }
 0x16b   : > { %v2626_v2 = vrot.slane %v2624_v24, 5  ;;  %v2603_v0 = vsel %vm12342_vm2, %v2598_v60, %v2602_v31 }
 0x16d   : > { %v2627_v58 = vsel %vm12342_vm2, %v2622_v57, %v2626_v2 }
 0x16e   : > { %v9421_v8 = vcombine.low %v2617_v5, %v2627_v58 }
 0x16f   : > { %10845 = vmatmul.mubr.bf16.gmra.mrb[20].mxu0 %v9722_v54  ;;  %v9420_v54 = vcombine.low %v2593_v32, %v2603_v0 }
 0x170   : > { %10653 = vmatmul.mubr.bf16.gmra.mrb[20].mxu1 %v9418_v4  ;;  %10848 = vmatprep.mubr.bf16.mxu0 %v9723_v17  ;;  %v2646_v17 = vrot.slane %v2645_v30, 4 }
 0x171   : > { %10656 = vmatprep.mubr.bf16.mxu1 %v9419_v59 }
 0x172   : > { %v2651_v61 = vsel %vm12342_vm2, %v2646_v17, %v2650_v55 }
 0x173   : > { %v9422_v1 = vcombine.low %v2641_v14, %v2651_v61 }
 0x177   : > { %10849 = vmatmul.mubr.bf16.gmra.mrb[24].mxu0 %v9724_v3 }
 0x178   : > { %10657 = vmatmul.mubr.bf16.gmra.mrb[24].mxu1 %v9420_v54  ;;  %10852 = vmatprep.mubr.bf16.mxu0 %v9725_v29 }
 0x179   : > { %10660 = vmatprep.mubr.bf16.mxu1 %v9421_v8 }
 0x17f   : > { %10853 = vmatmul.mubr.bf16.gmra.mrb[28].mxu0 %v9726_v49 }
 0x180   : > { %10661 = vmatmul.mubr.bf16.gmra.mrb[28].mxu1 %v9422_v1 }
 0x1fb   : > { %v10586_v28 = vpop.f32.mrb[0].mxu1 }
 0x1fc   : > { %v2061_v47 = vpop.f32.mrb[1].mxu1 }
 0x1fd   : > { %v10587_v3 = vpop.f32.mrb[2].mxu1 }
 0x1fe   : > { %v2064_v43 = vpop.f32.mrb[3].mxu1 }
 0x203   : > { %v10590_v56 = vpop.f32.mrb[4].mxu1 }
 0x204   : > { %v2077_v50 = vpop.f32.mrb[5].mxu1 }
 0x205   : > { %v10591_v29 = vpop.f32.mrb[6].mxu1 }
 0x206   : > { %v2080_v18 = vpop.f32.mrb[7].mxu1 }
 0x20b   : > { %v10594_v25 = vpop.f32.mrb[8].mxu1 }
 0x20c   : > { %v2093_v41 = vpop.f32.mrb[9].mxu1 }
 0x20d   : > { %v10595_v22 = vpop.f32.mrb[10].mxu1 }
 0x20e   : > { %v14038_v38 = vpop.f32.mrb[11].mxu1 }
 0x213   : > { %v14040_v62 = vpop.f32.mrb[12].mxu1 }
 0x214   : > { %v14042_v46 = vpop.f32.mrb[13].mxu1 }
 0x215   : > { %v14044_v35 = vpop.f32.mrb[14].mxu1 }
 0x216   : > { %v14046_v12 = vpop.f32.mrb[15].mxu1 }
 0x21a   : > { %v10826_v49 = vpop.f32.mrb[0].mxu0 }
 0x21b   : > { %v11304_v9 = vadd.f32 %v10826_v49, %v10586_v28  ;;  %v4952_v37 = vpop.f32.mrb[1].mxu0 }
 0x21c   : > { %v11305_v48 = vadd.f32 %v4952_v37, %v2061_v47  ;;  %v10827_v13 = vpop.f32.mrb[2].mxu0 }
 0x21d   : > { %5115 = vst [vmem:[%s14049_s8 + $0x10] sm:$0xff] %v11304_v9  ;;  %v11306_v52 = vadd.f32 %v10827_v13, %v10587_v3  ;;  %v4955_v33 = vpop.f32.mrb[3].mxu0  ;;  %v5188_v10 = vmul.f32 %v11304_v9, %v11304_v9 }
 0x21e   : > { %5113 = vst [vmem:[%s14049_s8] sm:$0xff] %v11305_v48  ;;  %v11307_v6 = vadd.f32 %v4955_v33, %v2064_v43  ;;  %v5186_v63 = vmul.f32 %v11305_v48, %v11305_v48 }
 0x21f   : > { %5116 = vst [vmem:[%s14049_s8 + $0x18] sm:$0xff] %v11306_v52  ;;  %v5189_v40 = vmul.f32 %v11306_v52, %v11306_v52 }
 0x220   : > { %5114 = vst [vmem:[%s14049_s8 + $0x8] sm:$0xff] %v11307_v6  ;;  %v5146_v42 = vadd.f32 %v11307_v6, %v11305_v48  ;;  %v5187_v7 = vmul.f32 %v11307_v6, %v11307_v6 }
 0x222   : > { %v5147_v27 = vadd.f32 %v11304_v9, %v5146_v42  ;;  %v5218_v19 = vadd.f32 %v5187_v7, %v5186_v63  ;;  %v10830_v34 = vpop.f32.mrb[4].mxu0 }
 0x223   : > { %v11308_v15 = vadd.f32 %v10830_v34, %v10590_v56  ;;  %v4968_v11 = vpop.f32.mrb[5].mxu0 }
 0x224   : > { %v5219_v51 = vadd.f32 %v5218_v19, %v5188_v10  ;;  %v11309_v24 = vadd.f32 %v4968_v11, %v2077_v50  ;;  %v5148_v4 = vadd.f32 %v11306_v52, %v5147_v27  ;;  %v10831_v59 = vpop.f32.mrb[6].mxu0 }
 0x225   : > { %5119 = vst [vmem:[%s14049_s8 + $0x30] sm:$0xff] %v11308_v15  ;;  %v11310_v23 = vadd.f32 %v10831_v59, %v10591_v29  ;;  %v4971_v60 = vpop.f32.mrb[7].mxu0  ;;  %v5192_v2 = vmul.f32 %v11308_v15, %v11308_v15 }
 0x226   : > { %5117 = vst [vmem:[%s14049_s8 + $0x20] sm:$0xff] %v11309_v24  ;;  %v5149_v31 = vadd.f32 %v11309_v24, %v5148_v4  ;;  %v5190_v20 = vmul.f32 %v11309_v24, %v11309_v24  ;;  %v5220_v53 = vadd.f32 %v5219_v51, %v5189_v40  ;;  %v11311_v16 = vadd.f32 %v4971_v60, %v2080_v18 }
 0x227   : > { %5120 = vst [vmem:[%s14049_s8 + $0x38] sm:$0xff] %v11310_v23  ;;  %v5193_v36 = vmul.f32 %v11310_v23, %v11310_v23 }
 0x228   : > { %v5221_v44 = vadd.f32 %v5220_v53, %v5190_v20  ;;  %5118 = vst [vmem:[%s14049_s8 + $0x28] sm:$0xff] %v11311_v16  ;;  %v5150_v39 = vadd.f32 %v11311_v16, %v5149_v31  ;;  %v5191_v57 = vmul.f32 %v11311_v16, %v11311_v16 }
 0x22a   : > { %v5151_v32 = vadd.f32 %v11308_v15, %v5150_v39  ;;  %v5222_v0 = vadd.f32 %v5221_v44, %v5191_v57  ;;  %v10834_v21 = vpop.f32.mrb[8].mxu0 }
 0x22b   : > { %v11312_v30 = vadd.f32 %v10834_v21, %v10594_v25  ;;  %v4984_v45 = vpop.f32.mrb[9].mxu0 }
 0x22c   : > { %v5223_v5 = vadd.f32 %v5222_v0, %v5192_v2  ;;  %v11313_v58 = vadd.f32 %v4984_v45, %v2093_v41  ;;  %v5152_v54 = vadd.f32 %v11310_v23, %v5151_v32  ;;  %v10835_v8 = vpop.f32.mrb[10].mxu0 }
 0x22d   : > { %5123 = vst [vmem:[%s14049_s8 + $0x50] sm:$0xff] %v11312_v30  ;;  %v11314_v26 = vadd.f32 %v10835_v8, %v10595_v22  ;;  %v4987_v17 = vpop.f32.mrb[11].mxu0  ;;  %v5196_v43 = vmul.f32 %v11312_v30, %v11312_v30 }
 0x22e   : > { %5121 = vst [vmem:[%s14049_s8 + $0x40] sm:$0xff] %v11313_v58  ;;  %v5153_v55 = vadd.f32 %v11313_v58, %v5152_v54  ;;  %v5194_v14 = vmul.f32 %v11313_v58, %v11313_v58  ;;  %v5224_v61 = vadd.f32 %v5223_v5, %v5193_v36  ;;  %v11315_v1 = vadd.f32 %v4987_v17, %v14038_v38 }
 0x22f   : > { %5124 = vst [vmem:[%s14049_s8 + $0x58] sm:$0xff] %v11314_v26  ;;  %v5197_v41 = vmul.f32 %v11314_v26, %v11314_v26 }
 0x230   : > { %v5225_v28 = vadd.f32 %v5224_v61, %v5194_v14  ;;  %5122 = vst [vmem:[%s14049_s8 + $0x48] sm:$0xff] %v11315_v1  ;;  %v5154_v47 = vadd.f32 %v11315_v1, %v5153_v55  ;;  %v5195_v3 = vmul.f32 %v11315_v1, %v11315_v1 }
 0x232   : > { %v5155_v56 = vadd.f32 %v11312_v30, %v5154_v47  ;;  %v5226_v50 = vadd.f32 %v5225_v28, %v5195_v3  ;;  %v10838_v29 = vpop.f32.mrb[12].mxu0 }
 0x233   : > { %v11316_v18 = vadd.f32 %v10838_v29, %v14040_v62  ;;  %v5000_v25 = vpop.f32.mrb[13].mxu0 }
 0x234   : > { %v5227_v22 = vadd.f32 %v5226_v50, %v5196_v43  ;;  %v11317_v38 = vadd.f32 %v5000_v25, %v14042_v46  ;;  %v5156_v49 = vadd.f32 %v11314_v26, %v5155_v56  ;;  %v10839_v9 = vpop.f32.mrb[14].mxu0 }
 0x235   : > { %5127 = vst [vmem:[%s14049_s8 + $0x70] sm:$0xff] %v11316_v18  ;;  %v11318_v37 = vadd.f32 %v10839_v9, %v14044_v35  ;;  %v5003_v48 = vpop.f32.mrb[15].mxu0  ;;  %v5200_v7 = vmul.f32 %v11316_v18, %v11316_v18 }
 0x236   : > { %5125 = vst [vmem:[%s14049_s8 + $0x60] sm:$0xff] %v11317_v38  ;;  %v5157_v13 = vadd.f32 %v11317_v38, %v5156_v49  ;;  %v5198_v52 = vmul.f32 %v11317_v38, %v11317_v38  ;;  %v5228_v33 = vadd.f32 %v5227_v22, %v5197_v41  ;;  %v11319_v6 = vadd.f32 %v5003_v48, %v14046_v12 }
 0x237   : > { %5128 = vst [vmem:[%s14049_s8 + $0x78] sm:$0xff] %v11318_v37  ;;  %v5201_v34 = vmul.f32 %v11318_v37, %v11318_v37 }
 0x238   : > { %v5229_v62 = vadd.f32 %v5228_v33, %v5198_v52  ;;  %5126 = vst [vmem:[%s14049_s8 + $0x68] sm:$0xff] %v11319_v6  ;;  %v5158_v63 = vadd.f32 %v11319_v6, %v5157_v13  ;;  %v5199_v42 = vmul.f32 %v11319_v6, %v11319_v6 }
 0x23a   : > { %v5159_v46 = vadd.f32 %v11316_v18, %v5158_v63  ;;  %v5230_v10 = vadd.f32 %v5229_v62, %v5199_v42  ;;  %v10842_v27 = vpop.f32.mrb[16].mxu0 }
 0x23b   : > { %v10650_v19 = vpop.f32.mrb[16].mxu1  ;;  %v5016_v35 = vpop.f32.mrb[17].mxu0 }
 0x23c   : > { %v5231_v15 = vadd.f32 %v5230_v10, %v5200_v7  ;;  %v11320_v11 = vadd.f32 %v10842_v27, %v10650_v19  ;;  %v2879_v40 = vpop.f32.mrb[17].mxu1  ;;  %v5160_v12 = vadd.f32 %v11318_v37, %v5159_v46  ;;  %v10843_v51 = vpop.f32.mrb[18].mxu0 }
 0x23d   : > { %v11321_v24 = vadd.f32 %v5016_v35, %v2879_v40  ;;  %v10651_v4 = vpop.f32.mrb[18].mxu1  ;;  %v5019_v59 = vpop.f32.mrb[19].mxu0 }
 0x23e   : > { %5131 = vst [vmem:[%s14049_s8 + $0x90] sm:$0xff] %v11320_v11  ;;  %v5232_v23 = vadd.f32 %v5231_v15, %v5201_v34  ;;  %v11322_v60 = vadd.f32 %v10843_v51, %v10651_v4  ;;  %v2882_v31 = vpop.f32.mrb[19].mxu1  ;;  %v5204_v32 = vmul.f32 %v11320_v11, %v11320_v11 }
 0x23f   : > { %5129 = vst [vmem:[%s14049_s8 + $0x80] sm:$0xff] %v11321_v24  ;;  %v5161_v20 = vadd.f32 %v11321_v24, %v5160_v12  ;;  %v5202_v53 = vmul.f32 %v11321_v24, %v11321_v24  ;;  %v11323_v16 = vadd.f32 %v5019_v59, %v2882_v31 }
 0x240   : > { %5132 = vst [vmem:[%s14049_s8 + $0x98] sm:$0xff] %v11322_v60  ;;  %v5205_v54 = vmul.f32 %v11322_v60, %v11322_v60 }
 0x241   : > { %v5233_v44 = vadd.f32 %v5232_v23, %v5202_v53  ;;  %5130 = vst [vmem:[%s14049_s8 + $0x88] sm:$0xff] %v11323_v16  ;;  %v5162_v39 = vadd.f32 %v11323_v16, %v5161_v20  ;;  %v5203_v57 = vmul.f32 %v11323_v16, %v11323_v16 }
 0x242   : > { %v10846_v2 = vpop.f32.mrb[20].mxu0 }
 0x243   : > { %v5163_v0 = vadd.f32 %v11320_v11, %v5162_v39  ;;  %v5234_v21 = vadd.f32 %v5233_v44, %v5203_v57  ;;  %v10654_v30 = vpop.f32.mrb[20].mxu1  ;;  %v5032_v45 = vpop.f32.mrb[21].mxu0 }
 0x244   : > { %v11324_v36 = vadd.f32 %v10846_v2, %v10654_v30  ;;  %v2895_v5 = vpop.f32.mrb[21].mxu1  ;;  %v10847_v58 = vpop.f32.mrb[22].mxu0 }
 0x245   : > { %v5235_v8 = vadd.f32 %v5234_v21, %v5204_v32  ;;  %v11325_v26 = vadd.f32 %v5032_v45, %v2895_v5  ;;  %v5164_v17 = vadd.f32 %v11322_v60, %v5163_v0  ;;  %v10655_v55 = vpop.f32.mrb[22].mxu1  ;;  %v5035_v14 = vpop.f32.mrb[23].mxu0 }
 0x246   : > { %5135 = vst [vmem:[%s14049_s8 + $0xb0] sm:$0xff] %v11324_v36  ;;  %v11326_v61 = vadd.f32 %v10847_v58, %v10655_v55  ;;  %v2898_v1 = vpop.f32.mrb[23].mxu1  ;;  %v5208_v25 = vmul.f32 %v11324_v36, %v11324_v36 }
 0x247   : > { %5133 = vst [vmem:[%s14049_s8 + $0xa0] sm:$0xff] %v11325_v26  ;;  %v5165_v28 = vadd.f32 %v11325_v26, %v5164_v17  ;;  %v5206_v47 = vmul.f32 %v11325_v26, %v11325_v26  ;;  %v5236_v3 = vadd.f32 %v5235_v8, %v5205_v54  ;;  %v11327_v43 = vadd.f32 %v5035_v14, %v2898_v1 }
 0x248   : > { %5136 = vst [vmem:[%s14049_s8 + $0xb8] sm:$0xff] %v11326_v61  ;;  %v5209_v13 = vmul.f32 %v11326_v61, %v11326_v61 }
 0x249   : > { %v5237_v56 = vadd.f32 %v5236_v3, %v5206_v47  ;;  %5134 = vst [vmem:[%s14049_s8 + $0xa8] sm:$0xff] %v11327_v43  ;;  %v5166_v50 = vadd.f32 %v11327_v43, %v5165_v28  ;;  %v5207_v29 = vmul.f32 %v11327_v43, %v11327_v43 }
 0x24a   : > { %v10850_v18 = vpop.f32.mrb[24].mxu0 }
 0x24b   : > { %v5167_v41 = vadd.f32 %v11324_v36, %v5166_v50  ;;  %v5238_v22 = vadd.f32 %v5237_v56, %v5207_v29  ;;  %v10658_v38 = vpop.f32.mrb[24].mxu1  ;;  %v5048_v49 = vpop.f32.mrb[25].mxu0 }
 0x24c   : > { %v11328_v9 = vadd.f32 %v10850_v18, %v10658_v38  ;;  %v2911_v37 = vpop.f32.mrb[25].mxu1  ;;  %v10851_v48 = vpop.f32.mrb[26].mxu0  ;;  %v5145_v18 = vld [vmem:[#allocation5] sm:$0x1] }
 0x24d   : > { %v5239_v52 = vadd.f32 %v5238_v22, %v5208_v25  ;;  %v11329_v33 = vadd.f32 %v5048_v49, %v2911_v37  ;;  %v5168_v6 = vadd.f32 %v11326_v61, %v5167_v41  ;;  %v10659_v62 = vpop.f32.mrb[26].mxu1  ;;  %v5051_v63 = vpop.f32.mrb[27].mxu0  ;;  %v5185_v22 = vld [vmem:[#allocation6] sm:$0x1] }
 0x24e   : > { %5139 = vst [vmem:[%s14049_s8 + $0xd0] sm:$0xff] %v11328_v9  ;;  %v11330_v42 = vadd.f32 %v10851_v48, %v10659_v62  ;;  %v2914_v7 = vpop.f32.mrb[27].mxu1  ;;  %v5212_v40 = vmul.f32 %v11328_v9, %v11328_v9 }
 0x24f   : > { %5137 = vst [vmem:[%s14049_s8 + $0xc0] sm:$0xff] %v11329_v33  ;;  %v5169_v46 = vadd.f32 %v11329_v33, %v5168_v6  ;;  %v5210_v10 = vmul.f32 %v11329_v33, %v11329_v33  ;;  %v5240_v27 = vadd.f32 %v5239_v52, %v5209_v13  ;;  %v11331_v19 = vadd.f32 %v5051_v63, %v2914_v7 }
 0x250   : > { %5140 = vst [vmem:[%s14049_s8 + $0xd8] sm:$0xff] %v11330_v42  ;;  %v5213_v31 = vmul.f32 %v11330_v42, %v11330_v42 }
 0x251   : > { %v5241_v35 = vadd.f32 %v5240_v27, %v5210_v10  ;;  %5138 = vst [vmem:[%s14049_s8 + $0xc8] sm:$0xff] %v11331_v19  ;;  %v5170_v34 = vadd.f32 %v11331_v19, %v5169_v46  ;;  %v5211_v15 = vmul.f32 %v11331_v19, %v11331_v19 }
 0x252   : > { %v10854_v11 = vpop.f32.mrb[28].mxu0 }
 0x253   : > { %v5171_v12 = vadd.f32 %v11328_v9, %v5170_v34  ;;  %v5242_v51 = vadd.f32 %v5241_v35, %v5211_v15  ;;  %v10662_v24 = vpop.f32.mrb[28].mxu1  ;;  %v5064_v4 = vpop.f32.mrb[29].mxu0 }
 0x254   : > { %v11332_v59 = vadd.f32 %v10854_v11, %v10662_v24  ;;  %v2927_v23 = vpop.f32.mrb[29].mxu1  ;;  %v10855_v60 = vpop.f32.mrb[30].mxu0 }
 0x255   : > { %v5243_v20 = vadd.f32 %v5242_v51, %v5212_v40  ;;  %v11333_v53 = vadd.f32 %v5064_v4, %v2927_v23  ;;  %v5172_v16 = vadd.f32 %v11330_v42, %v5171_v12  ;;  %v10663_v44 = vpop.f32.mrb[30].mxu1  ;;  %v5067_v39 = vpop.f32.mrb[31].mxu0 }
 0x256   : > { %5143 = vst [vmem:[%s14049_s8 + $0xf0] sm:$0xff] %v11332_v59  ;;  %v11334_v57 = vadd.f32 %v10855_v60, %v10663_v44  ;;  %v2930_v2 = vpop.f32.mrb[31].mxu1  ;;  %v5216_v58 = vmul.f32 %v11332_v59, %v11332_v59 }
 0x257   : > { %5141 = vst [vmem:[%s14049_s8 + $0xe0] sm:$0xff] %v11333_v53  ;;  %v5173_v32 = vadd.f32 %v11333_v53, %v5172_v16  ;;  %v5214_v0 = vmul.f32 %v11333_v53, %v11333_v53  ;;  %v5244_v21 = vadd.f32 %v5243_v20, %v5213_v31  ;;  %v11335_v30 = vadd.f32 %v5067_v39, %v2930_v2 }
 0x258   : > { %5144 = vst [vmem:[%s14049_s8 + $0xf8] sm:$0xff] %v11334_v57  ;;  %v5217_v26 = vmul.f32 %v11334_v57, %v11334_v57 }
 0x259   : > { %v5245_v45 = vadd.f32 %v5244_v21, %v5214_v0  ;;  %5142 = vst [vmem:[%s14049_s8 + $0xe8] sm:$0xff] %v11335_v30  ;;  %v5174_v36 = vadd.f32 %v11335_v30, %v5173_v32  ;;  %v5215_v5 = vmul.f32 %v11335_v30, %v11335_v30 }
 0x25b   : > { %v5175_v54 = vadd.f32 %v11332_v59, %v5174_v36  ;;  %v5246_v8 = vadd.f32 %v5245_v45, %v5215_v5 }
 0x25d   : > { %v5176_v17 = vadd.f32 %v11334_v57, %v5175_v54  ;;  %v5247_v55 = vadd.f32 %v5246_v8, %v5216_v58 }
 0x25f   : > { %v5177_v14 = vrot.slane %v5176_v17, 4  ;;  %v5248_v61 = vadd.f32 %v5247_v55, %v5217_v26 }
 0x261   : > { %v5178_v1 = vadd.f32 %v5177_v14, %v5176_v17  ;;  %v5249_v28 = vrot.slane %v5248_v61, 4 }
 0x263   : > { %v5179_v47 = vrot.slane %v5178_v1, 2  ;;  %v5250_v3 = vadd.f32 %v5249_v28, %v5248_v61 }
 0x265   : > { %v5180_v43 = vadd.f32 %v5179_v47, %v5178_v1  ;;  %v5251_v56 = vrot.slane %v5250_v3, 2 }
 0x267   : > { %v5181_v50 = vrot.slane %v5180_v43, 1  ;;  %v5252_v29 = vadd.f32 %v5251_v56, %v5250_v3 }
 0x269   : > { %v5182_v25 = vadd.f32 %v5181_v50, %v5180_v43  ;;  %v5253_v41 = vrot.slane %v5252_v29, 1 }
 0x26b   : > { %v5183_v38 = vadd.f32 %v5182_v25, %v5145_v18  ;;  %v5254_v49 = vadd.f32 %v5253_v41, %v5252_v29 }
 0x26d   : > { %5184 = vst [vmem:[#allocation5] sm:$0x1] %v5183_v38  ;;  %v5255_v9 = vadd.f32 %v5254_v49, %v5185_v22 }
 0x26f   : > { %5256 = vst [vmem:[#allocation6] sm:$0x1] %v5255_v9 }
 0x270 PF: > { %p9736_p8 = scmp.ne.s32.totalorder %s12177_s25, 1 }
 0x271   : > { %p9737_p9 = scmp.ne.s32.totalorder (!%p9736_p8), %s12173_s24, 0 }
 0x272   : > { %5260 = sbr.rel (%p9736_p8) target bundleno = 1200 (0x4b0), region = 60 }
 0x279   : > { %5264 = sbr.rel (%p9737_p9) target bundleno = 640 (0x280), region = 64  ;;  %v12192_v37 = vmov (!%p9737_p9), 0.0  }
 0x27a   : > { %5265 = vst [vmem:[#allocation7] sm:$0x1] (!%p9737_p9), %v12192_v37  ;;  %5266 = vst [vmem:[#allocation8] sm:$0x1] (!%p9737_p9), %v12192_v37 }
 0x280 PF: > { %v12066_v48 = vld [vmem:[%s15169_s2 + $0x40] sm:$0xff]   ;;  %v12193_v52 = vmov 0.0   ;;  %v12068_v33 = vld [vmem:[%s15169_s2 + $0x48] sm:$0xff]   ;;  %v12070_v62 = vld [vmem:[%s15169_s2 + $0x50] sm:$0xff]   ;;  %v5315_v53 = vlaneseq  ;;  %s9738_s17 = sshll.u32 %s12173_s24, 8 }
 0x281   : > { %v12067_v13 = vld [vmem:[%s15169_s2 + $0x100] sm:$0xff]   ;;  %5422 = vst [vmem:[#allocation4] sm:$0xff] %v12193_v52  ;;  %5423 = vst [vmem:[#allocation4 + $0x8] sm:$0xff] %v12193_v52  ;;  %10856 = vmatprep.subr.bf16.mxu1 %v12066_v48  ;;  %v12069_v6 = vld [vmem:[%s15169_s2 + $0x108] sm:$0xff]   ;;  %s14159_s8 = scalar_lea.vmem [#allocation2], %s9738_s17  ;;  %s14823_s20 = scalar_lea.vmem [#allocation3], %s9738_s17 }
 0x282   : > { %5424 = vst [vmem:[#allocation4 + $0x10] sm:$0x3] %v12193_v52  ;;  %5425 = vst [vmem:[#allocation4 + $0x18] sm:$0xff] %v12193_v52  ;;  %11048 = vmatprep.subr.bf16.mxu0 %v12067_v13  ;;  %10857 = vmatpush3.bf16.msra.mxu1 %v12066_v48  ;;  %v12071_v63 = vld [vmem:[%s15169_s2 + $0x110] sm:$0xff]   ;;  %v12072_v42 = vld [vmem:[%s15169_s2 + $0x58] sm:$0xff]   ;;  %v5316_v39 = vshrl.u32 %v5315_v53, 7 }
 0x283   : > { %5426 = vst [vmem:[#allocation4 + $0x20] sm:$0xff] %v12193_v52  ;;  %5427 = vst [vmem:[#allocation4 + $0x28] sm:$0x3] %v12193_v52  ;;  %11049 = vmatpush3.bf16.msra.mxu0 %v12067_v13  ;;  %10858 = vmatprep.subr.bf16.mxu1 %v12068_v33  ;;  %v12073_v7 = vld [vmem:[%s15169_s2 + $0x118] sm:$0xff]   ;;  %v12074_v46 = vld [vmem:[%s15169_s2 + $0x60] sm:$0xff]  }
 0x284   : > { %5428 = vst [vmem:[#allocation4 + $0x30] sm:$0xff] %v12193_v52  ;;  %5429 = vst [vmem:[#allocation4 + $0x38] sm:$0xff] %v12193_v52  ;;  %11050 = vmatprep.subr.bf16.mxu0 %v12069_v6  ;;  %v12075_v10 = vld [vmem:[%s15169_s2 + $0x120] sm:$0xff]   ;;  %v12076_v27 = vld [vmem:[%s15169_s2 + $0x68] sm:$0xff]   ;;  %v5317_v2 = vsub.s32 0, %v5316_v39 }
 0x285   : > { %5430 = vst [vmem:[#allocation4 + $0x40] sm:$0x3] %v12193_v52  ;;  %5431 = vst [vmem:[#allocation4 + $0x48] sm:$0xff] %v12193_v52  ;;  %v5267_v34 = vld [vmem:[#allocation5] sm:$0x1]  ;;  %v12077_v15 = vld [vmem:[%s15169_s2 + $0x128] sm:$0xff]  }
 0x286   : > { %5432 = vst [vmem:[#allocation4 + $0x50] sm:$0xff] %v12193_v52  ;;  %5433 = vst [vmem:[#allocation4 + $0x58] sm:$0x3] %v12193_v52  ;;  %10859 = vmatpush3.bf16.msra.mxu1 %v12068_v33  ;;  %v5268_v40 = vmul.f32 0.001953125, %v5267_v34  ;;  %v5269_v12 = vld [vmem:[#allocation6] sm:$0x1] }
 0x287   : > { %5434 = vst [vmem:[#allocation4 + $0x60] sm:$0xff] %v12193_v52  ;;  %5435 = vst [vmem:[#allocation4 + $0x68] sm:$0xff] %v12193_v52  ;;  %11051 = vmatpush3.bf16.msra.mxu0 %v12069_v6  ;;  %10860 = vmatprep.subr.bf16.mxu1 %v12070_v62  ;;  %v5270_v51 = vmul.f32 0.001953125, %v5269_v12  ;;  %v12078_v4 = vld [vmem:[%s15169_s2 + $0x70] sm:$0xff]   ;;  %v12080_v31 = vld [vmem:[%s15169_s2 + $0x78] sm:$0xff]  }
 0x288   : > { %5436 = vst [vmem:[#allocation4 + $0x70] sm:$0x3] %v12193_v52  ;;  %5437 = vst [vmem:[#allocation4 + $0x78] sm:$0xff] %v12193_v52  ;;  %11052 = vmatprep.subr.bf16.mxu0 %v12071_v63  ;;  %v5573_v19 = vld [vmem:[#allocation4 + $0x1] sm:$0xff]  ;;  %v5271_v24 = vmul.f32 %v5268_v40, %v5268_v40  ;;  %v12079_v59 = vld [vmem:[%s15169_s2 + $0x130] sm:$0xff]  }
 0x289   : > { %5438 = vst [vmem:[#allocation4 + $0x80] sm:$0xff] %v12193_v52  ;;  %5439 = vst [vmem:[#allocation4 + $0x88] sm:$0x3] %v12193_v52  ;;  %v5574_v35 = vld [vmem:[#allocation4 + $0x9] sm:$0xff]  ;;  %v12081_v20 = vld [vmem:[%s15169_s2 + $0x138] sm:$0xff]  }
 0x28a   : > { %5440 = vst [vmem:[#allocation4 + $0x90] sm:$0xff] %v12193_v52  ;;  %5441 = vst [vmem:[#allocation4 + $0x98] sm:$0xff] %v12193_v52  ;;  %10861 = vmatpush3.bf16.msra.mxu1 %v12070_v62  ;;  %v5605_v11 = vpack.c.bf16 %v5574_v35, %v5573_v19  ;;  %v5272_v23 = vsub.f32 %v5270_v51, %v5271_v24  ;;  %v14141_v16 = vld [vmem:[%s15169_s2] sm:$0xff]   ;;  %v5283_v30 = vld [vmem:[%s14159_s8 + $0x8] sm:$0xff] }
 0x28b   : > { %5442 = vst [vmem:[#allocation4 + $0xa0] sm:$0x3] %v12193_v52  ;;  %5443 = vst [vmem:[#allocation4 + $0xa8] sm:$0xff] %v12193_v52  ;;  %11053 = vmatpush3.bf16.msra.mxu0 %v12071_v63  ;;  %10862 = vmatprep.subr.bf16.mxu1 %v12072_v42  ;;  %v14147_v44 = vld [vmem:[%s15169_s2 + $0x140] sm:$0xff]   ;;  %v5284_v45 = vld [vmem:[%s14159_s8 + $0x10] sm:$0xff] }
 0x28c   : > { %5444 = vst [vmem:[#allocation4 + $0xb0] sm:$0xff] %v12193_v52  ;;  %5445 = vst [vmem:[#allocation4 + $0xb8] sm:$0x3] %v12193_v52  ;;  %11054 = vmatprep.subr.bf16.mxu0 %v12073_v7  ;;  %10872 = vmatprep.mubr.bf16.mxu1 %v5605_v11  ;;  %v5274_v60 = vadd.f32 1e-05, %v5272_v23  ;;  %v5282_v21 = vld [vmem:[%s14159_s8] sm:$0xff] }
 0x28d   : > { %5446 = vst [vmem:[#allocation4 + $0xc0] sm:$0xff] %v12193_v52  ;;  %5447 = vst [vmem:[#allocation4 + $0xc8] sm:$0xff] %v12193_v52  ;;  %v5273_v57 = vld [vmem:[%s15170_s3] sm:$0x1]  ;;  %v5285_v5 = vld [vmem:[%s14159_s8 + $0x18] sm:$0xff] }
 0x28e   : > { %5448 = vst [vmem:[#allocation4 + $0xd0] sm:$0x3] %v12193_v52  ;;  %5449 = vst [vmem:[#allocation4 + $0xd8] sm:$0xff] %v12193_v52  ;;  %10863 = vmatpush3.bf16.msra.mxu1 %v12072_v42  ;;  %12138 = vrsqrt.f32 %v5274_v60  ;;  %v5277_v0 = vld [vmem:[%s15171_s4] sm:$0x1]  ;;  %v5287_v54 = vld [vmem:[%s14159_s8 + $0x28] sm:$0xff] }
 0x28f   : > { %5450 = vst [vmem:[#allocation4 + $0xe0] sm:$0xff] %v12193_v52  ;;  %5451 = vst [vmem:[#allocation4 + $0xe8] sm:$0x3] %v12193_v52  ;;  %11055 = vmatpush3.bf16.msra.mxu0 %v12073_v7  ;;  %10864 = vmatprep.subr.bf16.mxu1 %v12074_v46  ;;  %v5286_v58 = vld [vmem:[%s14159_s8 + $0x20] sm:$0xff]  ;;  %v5288_v8 = vld [vmem:[%s14159_s8 + $0x30] sm:$0xff] }
 0x290   : > { %5452 = vst [vmem:[#allocation4 + $0xf0] sm:$0xff] %v12193_v52  ;;  %5453 = vst [vmem:[#allocation4 + $0xf8] sm:$0xff] %v12193_v52  ;;  %11056 = vmatprep.subr.bf16.mxu0 %v12075_v10  ;;  %v5289_v26 = vld [vmem:[%s14159_s8 + $0x38] sm:$0xff]  ;;  %v5290_v14 = vld [vmem:[%s14159_s8 + $0x40] sm:$0xff] }
 0x291   : > { %5454 = vst [vmem:[#allocation4 + $0x100] sm:$0x3] %v12193_v52  ;;  %5455 = vst [vmem:[#allocation4 + $0x108] sm:$0xff] %v12193_v52  ;;  %v5291_v61 = vld [vmem:[%s14159_s8 + $0x48] sm:$0xff]  ;;  %v5292_v1 = vld [vmem:[%s14159_s8 + $0x50] sm:$0xff] }
 0x292   : > { %5456 = vst [vmem:[#allocation4 + $0x110] sm:$0xff] %v12193_v52  ;;  %5457 = vst [vmem:[#allocation4 + $0x118] sm:$0x3] %v12193_v52  ;;  %10865 = vmatpush3.bf16.msra.mxu1 %v12074_v46  ;;  %v5293_v28 = vld [vmem:[%s14159_s8 + $0x58] sm:$0xff]  ;;  %v5294_v47 = vld [vmem:[%s14159_s8 + $0x60] sm:$0xff] }
 0x293   : > { %5458 = vst [vmem:[#allocation4 + $0x120] sm:$0xff] %v12193_v52  ;;  %5459 = vst [vmem:[#allocation4 + $0x128] sm:$0xff] %v12193_v52  ;;  %11057 = vmatpush3.bf16.msra.mxu0 %v12075_v10  ;;  %10866 = vmatprep.subr.bf16.mxu1 %v12076_v27  ;;  %v5295_v29 = vld [vmem:[%s14159_s8 + $0x68] sm:$0xff]  ;;  %v5296_v11 = vld [vmem:[%s14159_s8 + $0x70] sm:$0xff] }
 0x294   : > { %5460 = vst [vmem:[#allocation4 + $0x130] sm:$0x3] %v12193_v52  ;;  %5461 = vst [vmem:[#allocation4 + $0x138] sm:$0xff] %v12193_v52  ;;  %11058 = vmatprep.subr.bf16.mxu0 %v12077_v15  ;;  %v14208_v12 = vld [vmem:[%s15169_s2 + $0x148] sm:$0xff]  }
 0x295   : > { %5462 = vst [vmem:[#allocation4 + $0x140] sm:$0xff] %v12193_v52  ;;  %5463 = vst [vmem:[#allocation4 + $0x148] sm:$0x3] %v12193_v52 }
 0x296   : > { %5464 = vst [vmem:[#allocation4 + $0x150] sm:$0xff] %v12193_v52  ;;  %5465 = vst [vmem:[#allocation4 + $0x158] sm:$0xff] %v12193_v52  ;;  %10867 = vmatpush3.bf16.msra.mxu1 %v12076_v27 }
 0x297   : > { %5466 = vst [vmem:[#allocation4 + $0x160] sm:$0x3] %v12193_v52  ;;  %5467 = vst [vmem:[#allocation4 + $0x168] sm:$0xff] %v12193_v52  ;;  %11059 = vmatpush3.bf16.msra.mxu0 %v12077_v15  ;;  %10868 = vmatprep.subr.bf16.mxu1 %v12078_v4 }
 0x298   : > { %5468 = vst [vmem:[#allocation4 + $0x170] sm:$0xff] %v12193_v52  ;;  %5469 = vst [vmem:[#allocation4 + $0x178] sm:$0x3] %v12193_v52  ;;  %11060 = vmatprep.subr.bf16.mxu0 %v12079_v59  ;;  %v12139_v32 = vpop.eup %12138 }
 0x299   : > { %5470 = vst [vmem:[#allocation4 + $0x180] sm:$0xff] %v12193_v52  ;;  %5471 = vst [vmem:[#allocation4 + $0x188] sm:$0xff] %v12193_v52  ;;  %v5276_v36 = vmul.f32 %v12139_v32, %v5273_v57  ;;  %v5298_v32 = vld [vmem:[%s14159_s8 + $0x80] sm:$0xff] }
 0x29a   : > { %5472 = vst [vmem:[#allocation4 + $0x190] sm:$0x3] %v12193_v52  ;;  %5473 = vst [vmem:[#allocation4 + $0x198] sm:$0xff] %v12193_v52  ;;  %10869 = vmatpush3.bf16.msra.mxu1 %v12078_v4  ;;  %v12085_v4 = vld [vmem:[%s15169_s2 + $0x8] sm:$0xff]  }
 0x29b   : > { %5474 = vst [vmem:[#allocation4 + $0x1a0] sm:$0xff] %v12193_v52  ;;  %5475 = vst [vmem:[#allocation4 + $0x1a8] sm:$0x3] %v12193_v52  ;;  %11061 = vmatpush3.bf16.msra.mxu0 %v12079_v59  ;;  %10870 = vmatprep.subr.bf16.mxu1 %v12080_v31  ;;  %v5278_v17 = vmul.f32 %v5276_v36, %v5268_v40  ;;  %v14169_v55 = vrot.slane %v5276_v36, %v5317_v2  ;;  %v5297_v40 = vld [vmem:[%s14159_s8 + $0x78] sm:$0xff] }
 0x29c   : > { %11062 = vmatprep.subr.bf16.mxu0 %v12081_v20 }
 0x29d   : > { %v5279_v3 = vsub.f32 %v5277_v0, %v5278_v17  ;;  %v5320_v43 = vmul.f32 %v14169_v55, %v5282_v21  ;;  %v5321_v56 = vmul.f32 %v14169_v55, %v5283_v30  ;;  %v5322_v50 = vmul.f32 %v14169_v55, %v5284_v45  ;;  %v14228_v30 = vld [vmem:[%s15169_s2 + $0x10] sm:$0xff]  }
 0x29e   : > { %10871 = vmatpush3.bf16.msra.mxu1 %v12080_v31  ;;  %v5323_v18 = vmul.f32 %v14169_v55, %v5285_v5  ;;  %v5324_v25 = vmul.f32 %v14169_v55, %v5286_v58  ;;  %v5325_v41 = vmul.f32 %v14169_v55, %v5287_v54  ;;  %v5326_v22 = vmul.f32 %v14169_v55, %v5288_v8  ;;  %v5299_v5 = vld [vmem:[%s14159_s8 + $0x88] sm:$0xff]  ;;  %v5300_v58 = vld [vmem:[%s14159_s8 + $0x90] sm:$0xff] }
 0x29f   : > { %11063 = vmatpush3.bf16.msra.mxu0 %v12081_v20  ;;  %10904 = vmatprep.subr.bf16.mxu1 %v14141_v16  ;;  %v14184_v38 = vrot.slane %v5279_v3, %v5317_v2  ;;  %v5327_v49 = vmul.f32 %v14169_v55, %v5289_v26  ;;  %v5328_v9 = vmul.f32 %v14169_v55, %v5290_v14  ;;  %v12086_v54 = vld [vmem:[%s15169_s2 + $0x150] sm:$0xff]  }
 0x2a0   : > { %11096 = vmatprep.subr.bf16.mxu0 %v14147_v44  ;;  %v5329_v37 = vmul.f32 %v14169_v55, %v5291_v61  ;;  %v5330_v48 = vmul.f32 %v14169_v55, %v5292_v1  ;;  %v5331_v13 = vmul.f32 %v14169_v55, %v5293_v28  ;;  %v5332_v52 = vmul.f32 %v14169_v55, %v5294_v47  ;;  %v5301_v28 = vld [vmem:[%s14159_s8 + $0x98] sm:$0xff]  ;;  %v5302_v47 = vld [vmem:[%s14159_s8 + $0xa0] sm:$0xff] }
 0x2a1   : > { %v5333_v33 = vmul.f32 %v14169_v55, %v5295_v29  ;;  %v5358_v6 = vadd.f32 %v14184_v38, %v5320_v43  ;;  %v5359_v62 = vadd.f32 %v14184_v38, %v5321_v56  ;;  %v5360_v63 = vadd.f32 %v14184_v38, %v5322_v50 }
 0x2a2   : > { %v5361_v42 = vadd.f32 %v14184_v38, %v5323_v18  ;;  %v5362_v7 = vadd.f32 %v14184_v38, %v5324_v25  ;;  %v5363_v46 = vadd.f32 %v14184_v38, %v5325_v41  ;;  %v14200_v10 = vadd.f32 %v14184_v38, %v5326_v22  ;;  %v5303_v18 = vld [vmem:[%s14159_s8 + $0xa8] sm:$0xff] }
 0x2a3   : > { %v5365_v27 = vadd.f32 %v14184_v38, %v5327_v49  ;;  %v5390_v19 = vmax.f32 %v5358_v6, 0.0  ;;  %v5391_v35 = vmax.f32 %v5359_v62, 0.0  ;;  %v5392_v34 = vmax.f32 %v5360_v63, 0.0  ;;  %v5305_v63 = vld [vmem:[%s14159_s8 + $0xb8] sm:$0xff] }
 0x2a4   : > { %v5393_v15 = vmax.f32 %v5361_v42, 0.0  ;;  %v5394_v51 = vmax.f32 %v5362_v7, 0.0  ;;  %v5395_v24 = vmax.f32 %v5363_v46, 0.0  ;;  %v5396_v59 = vmax.f32 %v14200_v10, 0.0  ;;  %v5306_v42 = vld [vmem:[%s14159_s8 + $0xc0] sm:$0xff]  ;;  %v12091_v7 = vld [vmem:[%s15169_s2 + $0x18] sm:$0xff]  }
 0x2a5   : > { %v5397_v23 = vmax.f32 %v5365_v27, 0.0  ;;  %5477 = vst [vmem:[#allocation4 + $0x19] sm:$0xff] %v5390_v19  ;;  %5478 = vst [vmem:[#allocation4 + $0x21] sm:$0xff] %v5391_v35  ;;  %v5606_v60 = vpack.c.bf16 %v5391_v35, %v5390_v19  ;;  %v5366_v20 = vadd.f32 %v14184_v38, %v5328_v9  ;;  %v5367_v53 = vadd.f32 %v14184_v38, %v5329_v37  ;;  %v5307_v19 = vld [vmem:[%s14159_s8 + $0xc8] sm:$0xff] }
 0x2a6   : > { %5479 = vst [vmem:[#allocation4 + $0x31] sm:$0xff] %v5392_v34  ;;  %5480 = vst [vmem:[#allocation4 + $0x39] sm:$0xff] %v5393_v15  ;;  %v6701_v31 = vpack.c.bf16 %v5393_v15, %v5392_v34  ;;  %v14216_v39 = vpack.c.bf16 %v5395_v24, %v5394_v51  ;;  %v14219_v57 = vadd.f32 %v14184_v38, %v5330_v48 }
 0x2a7   : > { %5481 = vst [vmem:[#allocation4 + $0x49] sm:$0xff] %v5394_v51  ;;  %5482 = vst [vmem:[#allocation4 + $0x51] sm:$0xff] %v5395_v24  ;;  %v14222_v2 = vadd.f32 %v14184_v38, %v5331_v13  ;;  %10873 = vmatmul.mubr.bf16.vlgmr.msra.gmra.mrb[0].mxu1 %v5606_v60  ;;  %11064 = vmatprep.mubr.bf16.mxu0 %v5606_v60  ;;  %v5398_v0 = vmax.f32 %v5366_v20, 0.0  ;;  %v5399_v21 = vmax.f32 %v5367_v53, 0.0  ;;  %v5308_v51 = vld [vmem:[%s14159_s8 + $0xd0] sm:$0xff]  ;;  %v12089_v24 = vld [vmem:[%s15169_s2 + $0x160] sm:$0xff]  }
 0x2a8   : > { %5483 = vst [vmem:[#allocation4 + $0x61] sm:$0xff] %v5396_v59  ;;  %5484 = vst [vmem:[#allocation4 + $0x69] sm:$0xff] %v5397_v23  ;;  %v14231_v45 = vadd.f32 %v14184_v38, %v5332_v52  ;;  %v14234_v36 = vadd.f32 %v14184_v38, %v5333_v33  ;;  %10905 = vmatpush3.bf16.msra.mxu1 %v14141_v16  ;;  %11065 = vmatmul.mubr.bf16.vlgmr.msra.gmra.mrb[0].mxu0 %v6701_v31  ;;  %v5400_v8 = vmax.f32 %v14219_v57, 0.0  ;;  %v5304_v52 = vld [vmem:[%s14159_s8 + $0xb0] sm:$0xff]  ;;  %v12087_v33 = vld [vmem:[%s15169_s2 + $0x158] sm:$0xff]  }
 0x2a9   : > { %v5401_v26 = vmax.f32 %v14222_v2, 0.0  ;;  %v5334_v17 = vmul.f32 %v14169_v55, %v5296_v11  ;;  %v5335_v14 = vmul.f32 %v14169_v55, %v5297_v40  ;;  %11097 = vmatpush3.bf16.msra.mxu0 %v14147_v44  ;;  %10876 = vmatprep.mubr.bf16.mxu1 %v6701_v31  ;;  %5485 = vst [vmem:[#allocation4 + $0x79] sm:$0xff] %v5398_v0  ;;  %5486 = vst [vmem:[#allocation4 + $0x81] sm:$0xff] %v5399_v21  ;;  %v5309_v60 = vld [vmem:[%s14159_s8 + $0xd8] sm:$0xff]  ;;  %v5310_v31 = vld [vmem:[%s14159_s8 + $0xe0] sm:$0xff] }
 0x2aa   : > { %v5402_v16 = vmax.f32 %v14231_v45, 0.0  ;;  %v5403_v61 = vmax.f32 %v14234_v36, 0.0  ;;  %v5336_v1 = vmul.f32 %v14169_v55, %v5298_v32  ;;  %11098 = vmatprep.subr.bf16.mxu0 %v14208_v12  ;;  %10906 = vmatprep.subr.bf16.mxu1 %v12085_v4  ;;  %5487 = vst [vmem:[#allocation4 + $0x91] sm:$0xff] %v5400_v8  ;;  %v6703_v43 = vpack.c.bf16 %v5397_v23, %v5396_v59  ;;  %v12094_v53 = vld [vmem:[%s15169_s2 + $0x20] sm:$0xff]  }
 0x2ab   : > { %5488 = vst [vmem:[#allocation4 + $0x99] sm:$0xff] %v5401_v26  ;;  %v14258_v44 = vadd.f32 %v14184_v38, %v5334_v17  ;;  %v14261_v3 = vadd.f32 %v14184_v38, %v5335_v14  ;;  %11068 = vmatprep.mubr.bf16.mxu0 %v14216_v39  ;;  %v5337_v56 = vmul.f32 %v14169_v55, %v5299_v5  ;;  %v12096_v14 = vld [vmem:[%s15169_s2 + $0x28] sm:$0xff]  }
 0x2ac   : > { %5489 = vst [vmem:[#allocation4 + $0xa9] sm:$0xff] %v5402_v16  ;;  %5490 = vst [vmem:[#allocation4 + $0xb1] sm:$0xff] %v5403_v61  ;;  %v14270_v50 = vadd.f32 %v14184_v38, %v5336_v1  ;;  %v5338_v29 = vmul.f32 %v14169_v55, %v5300_v58  ;;  %10907 = vmatpush3.bf16.msra.mxu1 %v12085_v4  ;;  %v5339_v22 = vmul.f32 %v14169_v55, %v5301_v28 }
 0x2ad   : > { %v5404_v25 = vmax.f32 %v14258_v44, 0.0  ;;  %v5405_v41 = vmax.f32 %v14261_v3, 0.0  ;;  %v5340_v49 = vmul.f32 %v14169_v55, %v5302_v47  ;;  %11099 = vmatpush3.bf16.msra.mxu0 %v14208_v12  ;;  %v14279_v9 = vpack.c.bf16 %v5399_v21, %v5398_v0  ;;  %10908 = vmatprep.subr.bf16.mxu1 %v14228_v30  ;;  %v5311_v0 = vld [vmem:[%s14159_s8 + $0xe8] sm:$0xff]  ;;  %v12092_v47 = vld [vmem:[%s15169_s2 + $0x170] sm:$0xff]   ;;  %v12100_v3 = vld [vmem:[%s15169_s2 + $0x38] sm:$0xff]  }
 0x2ae   : > { %v14283_v37 = vadd.f32 %v14184_v38, %v5337_v56  ;;  %v5406_v48 = vmax.f32 %v14270_v50, 0.0  ;;  %v14287_v13 = vadd.f32 %v14184_v38, %v5338_v29  ;;  %11100 = vmatprep.subr.bf16.mxu0 %v12086_v54  ;;  %v14298_v6 = vadd.f32 %v14184_v38, %v5339_v22 }
 0x2af   : > { %5491 = vst [vmem:[#allocation4 + $0xc1] sm:$0xff] %v5404_v25  ;;  %5492 = vst [vmem:[#allocation4 + $0xc9] sm:$0xff] %v5405_v41  ;;  %v5341_v62 = vmul.f32 %v14169_v55, %v5303_v18  ;;  %10877 = vmatmul.mubr.bf16.gmra.mrb[4].mxu1 %v14216_v39  ;;  %v14312_v27 = vadd.f32 %v14184_v38, %v5340_v49  ;;  %v5342_v15 = vmul.f32 %v14169_v55, %v5304_v52  ;;  %v6975_v18 = vld [vmem:[#allocation4 + $0x22] sm:$0xff]  ;;  %v5312_v49 = vld [vmem:[%s14159_s8 + $0xf0] sm:$0xff] }
 0x2b0   : > { %v5407_v46 = vmax.f32 %v14283_v37, 0.0  ;;  %5493 = vst [vmem:[#allocation4 + $0xd9] sm:$0xff] %v5406_v48  ;;  %v5408_v10 = vmax.f32 %v14287_v13, 0.0  ;;  %11069 = vmatmul.mubr.bf16.gmra.mrb[4].mxu0 %v6703_v43  ;;  %10880 = vmatprep.mubr.bf16.mxu1 %v6703_v43  ;;  %v5409_v35 = vmax.f32 %v14298_v6, 0.0  ;;  %v5343_v40 = vmul.f32 %v14169_v55, %v5305_v63  ;;  %v6974_v43 = vld [vmem:[#allocation4 + $0x1a] sm:$0xff]  ;;  %v12098_v52 = vld [vmem:[%s15169_s2 + $0x30] sm:$0xff]  }
 0x2b1   : > { %v14317_v34 = vadd.f32 %v14184_v38, %v5341_v62  ;;  %11101 = vmatpush3.bf16.msra.mxu0 %v12086_v54  ;;  %11072 = vmatprep.mubr.bf16.mxu0 %v14279_v9  ;;  %v5410_v11 = vmax.f32 %v14312_v27, 0.0  ;;  %v5344_v12 = vmul.f32 %v14169_v55, %v5306_v42  ;;  %v14337_v59 = vadd.f32 %v14184_v38, %v5342_v15  ;;  %v12090_v54 = vld [vmem:[%s15169_s2 + $0x168] sm:$0xff]   ;;  %v6982_v6 = vld [vmem:[#allocation4 + $0x7a] sm:$0xff] }
 0x2b2   : > { %5494 = vst [vmem:[#allocation4 + $0xe1] sm:$0xff] %v5407_v46  ;;  %5495 = vst [vmem:[#allocation4 + $0xf1] sm:$0xff] %v5408_v10  ;;  %11102 = vmatprep.subr.bf16.mxu0 %v12087_v33  ;;  %10909 = vmatpush3.bf16.msra.mxu1 %v14228_v30  ;;  %v5345_v23 = vmul.f32 %v14169_v55, %v5307_v19  ;;  %v6705_v20 = vpack.c.bf16 %v5401_v26, %v5400_v8  ;;  %v6977_v19 = vld [vmem:[#allocation4 + $0x3a] sm:$0xff]  ;;  %v12097_v37 = vld [vmem:[%s15169_s2 + $0x188] sm:$0xff]  }
 0x2b3   : > { %5496 = vst [vmem:[#allocation4 + $0xf9] sm:$0xff] %v5409_v35  ;;  %v5411_v4 = vmax.f32 %v14317_v34, 0.0  ;;  %10910 = vmatprep.subr.bf16.mxu1 %v12091_v7  ;;  %5497 = vst [vmem:[#allocation4 + $0x109] sm:$0xff] %v5410_v11  ;;  %v14352_v39 = vadd.f32 %v14184_v38, %v5343_v40  ;;  %v14355_v32 = vadd.f32 %v14184_v38, %v5344_v12  ;;  %v5412_v2 = vmax.f32 %v14337_v59, 0.0  ;;  %v12095_v40 = vld [vmem:[%s15169_s2 + $0x180] sm:$0xff]   ;;  %v6978_v12 = vld [vmem:[#allocation4 + $0x4a] sm:$0xff] }
 0x2b4   : > { %v5612_v57 = vpack.c.bf16 %v5403_v61, %v5402_v16  ;;  %v14366_v21 = vadd.f32 %v14184_v38, %v5345_v23  ;;  %v5346_v30 = vmul.f32 %v14169_v55, %v5308_v51  ;;  %v5347_v45 = vmul.f32 %v14169_v55, %v5309_v60  ;;  %v6979_v51 = vld [vmem:[#allocation4 + $0x52] sm:$0xff]  ;;  %v6981_v13 = vld [vmem:[#allocation4 + $0x6a] sm:$0xff]  ;;  %v6985_v34 = vld [vmem:[#allocation4 + $0x9a] sm:$0xff] }
 0x2b5   : > { %5498 = vst [vmem:[#allocation4 + $0x111] sm:$0xff] %v5411_v4  ;;  %11103 = vmatpush3.bf16.msra.mxu0 %v12087_v33  ;;  %v5413_v5 = vmax.f32 %v14352_v39, 0.0  ;;  %v5414_v58 = vmax.f32 %v14355_v32, 0.0  ;;  %v5348_v36 = vmul.f32 %v14169_v55, %v5310_v31  ;;  %5499 = vst [vmem:[#allocation4 + $0x121] sm:$0xff] %v5412_v2  ;;  %v5349_v17 = vmul.f32 %v14169_v55, %v5311_v0  ;;  %v12101_v0 = vld [vmem:[%s15169_s2 + $0x198] sm:$0xff]  }
 0x2b6   : > { %11104 = vmatprep.subr.bf16.mxu0 %v12089_v24  ;;  %10911 = vmatpush3.bf16.msra.mxu1 %v12091_v7  ;;  %v5415_v8 = vmax.f32 %v14366_v21, 0.0  ;;  %v14380_v26 = vadd.f32 %v14184_v38, %v5346_v30  ;;  %v14392_v16 = vadd.f32 %v14184_v38, %v5347_v45  ;;  %v6707_v33 = vpack.c.bf16 %v5405_v41, %v5404_v25  ;;  %v12093_v7 = vld [vmem:[%s15169_s2 + $0x178] sm:$0xff]   ;;  %v6988_v32 = vld [vmem:[#allocation4 + $0xc2] sm:$0xff]  ;;  %v12107_v21 = vld [vmem:[%s15169_s2 + $0x1b0] sm:$0xff]  }
 0x2b7   : > { %10881 = vmatmul.mubr.bf16.gmra.mrb[8].mxu1 %v14279_v9  ;;  %10912 = vmatprep.subr.bf16.mxu1 %v12094_v53  ;;  %5500 = vst [vmem:[#allocation4 + $0x129] sm:$0xff] %v5413_v5  ;;  %5501 = vst [vmem:[#allocation4 + $0x139] sm:$0xff] %v5414_v58  ;;  %v14395_v61 = vadd.f32 %v14184_v38, %v5348_v36  ;;  %v14401_v28 = vadd.f32 %v14184_v38, %v5349_v17  ;;  %v5313_v9 = vld [vmem:[%s14159_s8 + $0xf8] sm:$0xff] }
 0x2b8   : > { %11073 = vmatmul.mubr.bf16.gmra.mrb[8].mxu0 %v6705_v20  ;;  %10884 = vmatprep.mubr.bf16.mxu1 %v6705_v20  ;;  %5502 = vst [vmem:[#allocation4 + $0x141] sm:$0xff] %v5415_v8  ;;  %v5416_v1 = vmax.f32 %v14380_v26, 0.0  ;;  %v5417_v56 = vmax.f32 %v14392_v16, 0.0  ;;  %v5350_v62 = vmul.f32 %v14169_v55, %v5312_v49  ;;  %v14427_v63 = vpack.c.bf16 %v6975_v18, %v6974_v43  ;;  %v6984_v27 = vld [vmem:[#allocation4 + $0x92] sm:$0xff]  ;;  %v12140_v26 = vld [vmem:[#allocation4] sm:$0xff] }
 0x2b9   : > { %11105 = vmatpush3.bf16.msra.mxu0 %v12089_v24  ;;  %11076 = vmatprep.mubr.bf16.mxu0 %v5612_v57  ;;  %v5418_v29 = vmax.f32 %v14395_v61, 0.0  ;;  %v5419_v22 = vmax.f32 %v14401_v28, 0.0  ;;  %v5351_v42 = vmul.f32 %v14169_v55, %v5313_v9  ;;  %v6976_v55 = vld [vmem:[#allocation4 + $0x32] sm:$0xff]  ;;  %v14457_v24 = vld [vmem:[%s15169_s2 + $0x80] sm:$0xff]   ;;  %v5615_v60 = vpack.c.bf16 %v5409_v35, %v5408_v10 }
 0x2ba   : > { %11106 = vmatprep.subr.bf16.mxu0 %v12090_v54  ;;  %10913 = vmatpush3.bf16.msra.mxu1 %v12094_v53  ;;  %5503 = vst [vmem:[#allocation4 + $0x151] sm:$0xff] %v5416_v1  ;;  %5504 = vst [vmem:[#allocation4 + $0x159] sm:$0xff] %v5417_v56  ;;  %v14434_v44 = vadd.f32 %v14184_v38, %v5350_v62  ;;  %v14461_v23 = vpack.c.bf16 %v6977_v19, %v6976_v55  ;;  %v12099_v10 = vld [vmem:[%s15169_s2 + $0x190] sm:$0xff]   ;;  %v6990_v45 = vld [vmem:[#allocation4 + $0xda] sm:$0xff] }
 0x2bb   : > { %10914 = vmatprep.subr.bf16.mxu1 %v12096_v14  ;;  %5505 = vst [vmem:[#allocation4 + $0x169] sm:$0xff] %v5418_v29  ;;  %5506 = vst [vmem:[#allocation4 + $0x171] sm:$0xff] %v5419_v22  ;;  %v14440_v25 = vadd.f32 %v14184_v38, %v5351_v42  ;;  %v5614_v38 = vpack.c.bf16 %v5407_v46, %v5406_v48  ;;  %v14467_v50 = vpack.c.bf16 %v6979_v51, %v6978_v12  ;;  %v6980_v48 = vld [vmem:[#allocation4 + $0x62] sm:$0xff]  ;;  %v6987_v59 = vld [vmem:[#allocation4 + $0xb2] sm:$0xff] }
 0x2bc   : > { %v5420_v41 = vmax.f32 %v14434_v44, 0.0  ;;  %v6983_v46 = vld [vmem:[#allocation4 + $0x82] sm:$0xff]  ;;  %v5616_v35 = vpack.c.bf16 %v5411_v4, %v5410_v11  ;;  %v14482_v31 = vpack.c.bf16 %v6981_v13, %v6980_v48  ;;  %v5617_v20 = vpack.c.bf16 %v5413_v5, %v5412_v2  ;;  %v6986_v4 = vld [vmem:[#allocation4 + $0xaa] sm:$0xff]  ;;  %v5511_v16 = vld [vmem:[#allocation4 + $0x18] sm:$0xff] }
 0x2bd   : > { %11107 = vmatpush3.bf16.msra.mxu0 %v12090_v54  ;;  %v5421_v15 = vmax.f32 %v14440_v25, 0.0  ;;  %v14488_v53 = vpack.c.bf16 %v6983_v46, %v6982_v6  ;;  %v12103_v11 = vld [vmem:[%s15169_s2 + $0x1a0] sm:$0xff]   ;;  %v5618_v39 = vpack.c.bf16 %v5415_v8, %v5414_v58  ;;  %v5619_v2 = vpack.c.bf16 %v5417_v56, %v5416_v1  ;;  %v12105_v5 = vld [vmem:[%s15169_s2 + $0x1a8] sm:$0xff]   ;;  %v12109_v1 = vld [vmem:[%s15169_s2 + $0x1b8] sm:$0xff]  }
 0x2be   : > { %11108 = vmatprep.subr.bf16.mxu0 %v12092_v47  ;;  %10915 = vmatpush3.bf16.msra.mxu1 %v12096_v14  ;;  %5507 = vst [vmem:[#allocation4 + $0x181] sm:$0xff] %v5420_v41  ;;  %v14508_v30 = vpack.c.bf16 %v6987_v59, %v6986_v4  ;;  %v6989_v58 = vld [vmem:[#allocation4 + $0xca] sm:$0xff]  ;;  %v6991_v36 = vld [vmem:[#allocation4 + $0xe2] sm:$0xff]  ;;  %v5620_v54 = vpack.c.bf16 %v5419_v22, %v5418_v29  ;;  %v6992_v61 = vld [vmem:[#allocation4 + $0xf2] sm:$0xff] }
 0x2bf   : > { %10885 = vmatmul.mubr.bf16.gmra.mrb[12].mxu1 %v5612_v57  ;;  %10916 = vmatprep.subr.bf16.mxu1 %v12098_v52  ;;  %5508 = vst [vmem:[#allocation4 + $0x189] sm:$0xff] %v5421_v15  ;;  %v14502_v57 = vpack.c.bf16 %v6985_v34, %v6984_v27  ;;  %v14522_v8 = vpack.c.bf16 %v6989_v58, %v6988_v32  ;;  %v6993_v28 = vld [vmem:[#allocation4 + $0xfa] sm:$0xff]  ;;  %v5513_v43 = vld [vmem:[#allocation4 + $0x30] sm:$0xff]  ;;  %v6996_v19 = vld [vmem:[#allocation4 + $0x122] sm:$0xff] }
 0x2c0   : > { %11077 = vmatmul.mubr.bf16.gmra.mrb[12].mxu0 %v6707_v33  ;;  %10888 = vmatprep.mubr.bf16.mxu1 %v6707_v33  ;;  %v14524_v17 = vpack.c.bf16 %v12140_v26, %v12140_v26  ;;  %v14526_v14 = vpack.c.bf16 %v6991_v36, %v6990_v45  ;;  %v5514_v56 = vld [vmem:[#allocation4 + $0x38] sm:$0xff]  ;;  %v6994_v29 = vld [vmem:[#allocation4 + $0x10a] sm:$0xff]  ;;  %v14537_v22 = vld [vmem:[%s15169_s2 + $0x1c0] sm:$0xff]   ;;  %v14541_v9 = vpack.c.bf16 %v6993_v28, %v6992_v61 }
 0x2c1   : > { %11109 = vmatpush3.bf16.msra.mxu0 %v12092_v47  ;;  %11112 = vmatprep.mubr.bf16.mxu0 %v14427_v63  ;;  %v5512_v47 = vld [vmem:[#allocation4 + $0x20] sm:$0xff]  ;;  %v6995_v18 = vld [vmem:[#allocation4 + $0x112] sm:$0xff]  ;;  %v12104_v33 = vld [vmem:[%s15169_s2 + $0x88] sm:$0xff]   ;;  %v14603_v61 = vpack.c.bf16 %v5421_v15, %v5420_v41 }
 0x2c2   : > { %11110 = vmatprep.subr.bf16.mxu0 %v12093_v7  ;;  %10917 = vmatpush3.bf16.msra.mxu1 %v12098_v52  ;;  %v14539_v49 = vpack.c.bf16 %v5512_v47, %v5511_v16  ;;  %v14543_v52 = vpack.c.bf16 %v5514_v56, %v5513_v43  ;;  %v14548_v62 = vpack.c.bf16 %v6995_v18, %v6994_v29  ;;  %v12106_v42 = vld [vmem:[%s15169_s2 + $0x90] sm:$0xff]   ;;  %v5517_v55 = vld [vmem:[#allocation4 + $0x60] sm:$0xff]  ;;  %v5518_v12 = vld [vmem:[#allocation4 + $0x68] sm:$0xff] }
 0x2c3   : > { %10918 = vmatprep.subr.bf16.mxu1 %v12100_v3  ;;  %v6998_v51 = vld [vmem:[#allocation4 + $0x13a] sm:$0xff]  ;;  %v7002_v27 = vld [vmem:[#allocation4 + $0x16a] sm:$0xff]  ;;  %v7003_v34 = vld [vmem:[#allocation4 + $0x172] sm:$0xff] }
 0x2c4   : > { %v12108_v13 = vld [vmem:[%s15169_s2 + $0x98] sm:$0xff]   ;;  %v5520_v46 = vld [vmem:[#allocation4 + $0x80] sm:$0xff]  ;;  %v5523_v32 = vld [vmem:[#allocation4 + $0xa8] sm:$0xff] }
 0x2c5   : > { %11111 = vmatpush3.bf16.msra.mxu0 %v12093_v7  ;;  %v5515_v7 = vld [vmem:[#allocation4 + $0x48] sm:$0xff]  ;;  %v5519_v6 = vld [vmem:[#allocation4 + $0x78] sm:$0xff]  ;;  %v5525_v58 = vld [vmem:[#allocation4 + $0xc0] sm:$0xff] }
 0x2c6   : > { %11144 = vmatprep.subr.bf16.mxu0 %v12095_v40  ;;  %10919 = vmatpush3.bf16.msra.mxu1 %v12100_v3  ;;  %v5516_v3 = vld [vmem:[#allocation4 + $0x50] sm:$0xff]  ;;  %v14577_v4 = vpack.c.bf16 %v5520_v46, %v5519_v6  ;;  %v7004_v45 = vld [vmem:[#allocation4 + $0x182] sm:$0xff]  ;;  %v12116_v28 = vld [vmem:[%s15169_s2 + $0xb8] sm:$0xff]  }
 0x2c7   : > { %10889 = vmatmul.mubr.bf16.gmra.mrb[16].mxu1 %v5614_v38  ;;  %10952 = vmatprep.subr.bf16.mxu1 %v14457_v24  ;;  %v6999_v38 = vld [vmem:[#allocation4 + $0x142] sm:$0xff]  ;;  %v7005_v36 = vld [vmem:[#allocation4 + $0x18a] sm:$0xff]  ;;  %v5527_v43 = vld [vmem:[#allocation4 + $0xd8] sm:$0xff] }
 0x2c8   : > { %11113 = vmatmul.mubr.bf16.vlgmr.msra.gmra.mrb[0].mxu0 %v14461_v23  ;;  %10892 = vmatprep.mubr.bf16.mxu1 %v5615_v60  ;;  %v14559_v60 = vpack.c.bf16 %v5516_v3, %v5515_v7  ;;  %v14565_v48 = vpack.c.bf16 %v6999_v38, %v6998_v51  ;;  %v12114_v26 = vld [vmem:[%s15169_s2 + $0xb0] sm:$0xff]   ;;  %v5528_v56 = vld [vmem:[#allocation4 + $0xe0] sm:$0xff]  ;;  %v5530_v44 = vld [vmem:[#allocation4 + $0xf8] sm:$0xff] }
 0x2c9   : > { %11145 = vmatpush3.bf16.msra.mxu0 %v12095_v40  ;;  %11116 = vmatprep.mubr.bf16.mxu0 %v14467_v50  ;;  %v6997_v40 = vld [vmem:[#allocation4 + $0x12a] sm:$0xff]  ;;  %v14614_v25 = vld [vmem:[%s15169_s2 + $0xc0] sm:$0xff]   ;;  %v14616_v41 = vpack.c.bf16 %v5528_v56, %v5527_v43 }
 0x2ca   : > { %11146 = vmatprep.subr.bf16.mxu0 %v12097_v37  ;;  %v5529_v29 = vld [vmem:[#allocation4 + $0xf0] sm:$0xff]  ;;  %v12113_v18 = vld [vmem:[%s15169_s2 + $0x1c8] sm:$0xff]   ;;  %v5533_v7 = vld [vmem:[#allocation4 + $0x120] sm:$0xff] }
 0x2cb   : > { %v14618_v15 = vpack.c.bf16 %v5530_v44, %v5529_v29  ;;  %v5534_v3 = vld [vmem:[#allocation4 + $0x128] sm:$0xff]  ;;  %v5536_v51 = vld [vmem:[#allocation4 + $0x140] sm:$0xff]  ;;  %v5537_v38 = vld [vmem:[#allocation4 + $0x150] sm:$0xff] }
 0x2cc   : > { %v12119_v6 = vld [vmem:[%s15169_s2 + $0x1e0] sm:$0xff]   ;;  %v12130_v43 = vld [vmem:[%s15169_s2 + $0xf0] sm:$0xff]  }
 0x2cd   : > { %11147 = vmatpush3.bf16.msra.mxu0 %v12097_v37  ;;  %v14561_v37 = vpack.c.bf16 %v6997_v40, %v6996_v19  ;;  %v14634_v40 = vpack.c.bf16 %v5534_v3, %v5533_v7  ;;  %v7590_v29 = vld [vmem:[#allocation4 + $0x51] sm:$0xff]  ;;  %v7591_v44 = vld [vmem:[#allocation4 + $0x61] sm:$0xff]  ;;  %v7596_v3 = vld [vmem:[#allocation4 + $0x99] sm:$0xff] }
 0x2ce   : > { %11148 = vmatprep.subr.bf16.mxu0 %v12099_v10  ;;  %v7595_v7 = vld [vmem:[#allocation4 + $0x91] sm:$0xff] }
 0x2cf   : > { %10893 = vmatmul.mubr.bf16.gmra.mrb[20].mxu1 %v5616_v35  ;;  %v7000_v35 = vld [vmem:[#allocation4 + $0x152] sm:$0xff] }
 0x2d0   : > { %11117 = vmatmul.mubr.bf16.gmra.mrb[4].mxu0 %v14482_v31  ;;  %10896 = vmatprep.mubr.bf16.mxu1 %v5617_v20  ;;  %v7001_v20 = vld [vmem:[#allocation4 + $0x15a] sm:$0xff] }
 0x2d1   : > { %11120 = vmatprep.mubr.bf16.mxu0 %v14488_v53  ;;  %11149 = vmatpush3.bf16.msra.mxu0 %v12099_v10  ;;  %v5521_v10 = vld [vmem:[#allocation4 + $0x90] sm:$0xff]  ;;  %v14579_v59 = vpack.c.bf16 %v7001_v20, %v7000_v35  ;;  %v12121_v35 = vld [vmem:[%s15169_s2 + $0x1e8] sm:$0xff]  }
 0x2d2   : > { %11150 = vmatprep.subr.bf16.mxu0 %v12101_v0  ;;  %v5539_v20 = vld [vmem:[#allocation4 + $0x168] sm:$0xff] }
 0x2d5   : > { %11151 = vmatpush3.bf16.msra.mxu0 %v12101_v0  ;;  %v5522_v0 = vld [vmem:[#allocation4 + $0x98] sm:$0xff] }
 0x2d6   : > { %11152 = vmatprep.subr.bf16.mxu0 %v12103_v11 }
 0x2d7   : > { %10897 = vmatmul.mubr.bf16.gmra.mrb[24].mxu1 %v5618_v39  ;;  %v14581_v39 = vpack.c.bf16 %v5522_v0, %v5521_v10  ;;  %v5540_v0 = vld [vmem:[#allocation4 + $0x170] sm:$0xff] }
 0x2d8   : > { %11121 = vmatmul.mubr.bf16.gmra.mrb[8].mxu0 %v14502_v57  ;;  %10900 = vmatprep.mubr.bf16.mxu1 %v5619_v2  ;;  %v14583_v2 = vpack.c.bf16 %v7003_v34, %v7002_v27  ;;  %v6056_v27 = vld [vmem:[#allocation4 + $0x2] sm:$0xff]  ;;  %v6057_v34 = vld [vmem:[#allocation4 + $0xa] sm:$0xff] }
 0x2d9   : > { %11124 = vmatprep.mubr.bf16.mxu0 %v14508_v30  ;;  %11153 = vmatpush3.bf16.msra.mxu0 %v12103_v11  ;;  %v12110_v11 = vld [vmem:[%s15169_s2 + $0xa0] sm:$0xff]  }
 0x2da   : > { %11154 = vmatprep.subr.bf16.mxu0 %v12105_v5 }
 0x2dd   : > { %11155 = vmatpush3.bf16.msra.mxu0 %v12105_v5  ;;  %v12112_v5 = vld [vmem:[%s15169_s2 + $0xa8] sm:$0xff]  }
 0x2de   : > { %11156 = vmatprep.subr.bf16.mxu0 %v12107_v21 }
 0x2df   : > { %10901 = vmatmul.mubr.bf16.gmra.mrb[28].mxu1 %v5620_v54  ;;  %v5526_v54 = vld [vmem:[#allocation4 + $0xc8] sm:$0xff] }
 0x2e0   : > { %11125 = vmatmul.mubr.bf16.gmra.mrb[12].mxu0 %v14522_v8  ;;  %10920 = vmatprep.mubr.bf16.mxu1 %v14524_v17  ;;  %v14597_v47 = vpack.c.bf16 %v5526_v54, %v5525_v58  ;;  %v12127_v58 = vld [vmem:[%s15169_s2 + $0x200] sm:$0xff]   ;;  %v12124_v54 = vld [vmem:[%s15169_s2 + $0xd8] sm:$0xff]  }
 0x2e1   : > { %11128 = vmatprep.mubr.bf16.mxu0 %v14526_v14  ;;  %11157 = vmatpush3.bf16.msra.mxu0 %v12107_v21  ;;  %v5524_v21 = vld [vmem:[#allocation4 + $0xb0] sm:$0xff] }
 0x2e2   : > { %11158 = vmatprep.subr.bf16.mxu0 %v12109_v1  ;;  %v14595_v16 = vpack.c.bf16 %v5524_v21, %v5523_v32  ;;  %v6088_v32 = vpack.c.bf16 %v6057_v34, %v6056_v27  ;;  %v12125_v21 = vld [vmem:[%s15169_s2 + $0x1f8] sm:$0xff]  }
 0x2e3   : > { %v7603_v27 = vld [vmem:[#allocation4 + $0xf1] sm:$0xff]  ;;  %v7604_v34 = vld [vmem:[#allocation4 + $0xf9] sm:$0xff] }
 0x2e5   : > { %11159 = vmatpush3.bf16.msra.mxu0 %v12109_v1  ;;  %v7021_v1 = vpack.c.bf16 %v7005_v36, %v7004_v45  ;;  %v12120_v45 = vld [vmem:[%s15169_s2 + $0xc8] sm:$0xff]   ;;  %v12122_v36 = vld [vmem:[%s15169_s2 + $0xd0] sm:$0xff]  }
 0x2e6   : > { %11192 = vmatprep.subr.bf16.mxu0 %v14537_v22 }
 0x2e7   : > { %10921 = vmatmul.mubr.bf16.vlgmr.msra.gmra.mrb[0].mxu1 %v14539_v49 }
 0x2e8   : > { %10953 = vmatpush3.bf16.msra.mxu1 %v14457_v24  ;;  %11129 = vmatmul.mubr.bf16.gmra.mrb[16].mxu0 %v14541_v9  ;;  %v14563_v24 = vpack.c.bf16 %v5518_v12, %v5517_v55  ;;  %v12115_v55 = vld [vmem:[%s15169_s2 + $0x1d0] sm:$0xff]   ;;  %v12117_v12 = vld [vmem:[%s15169_s2 + $0x1d8] sm:$0xff]  }
 0x2e9   : > { %10924 = vmatprep.mubr.bf16.mxu1 %v14543_v52  ;;  %10954 = vmatprep.subr.bf16.mxu1 %v12104_v33 }
 0x2ea   : > { %11132 = vmatprep.mubr.bf16.mxu0 %v14548_v62 }
 0x2ec   : > { %10955 = vmatpush3.bf16.msra.mxu1 %v12104_v33  ;;  %v5531_v33 = vld [vmem:[#allocation4 + $0x108] sm:$0xff] }
 0x2ed   : > { %10956 = vmatprep.subr.bf16.mxu1 %v12106_v42 }
 0x2ef   : > { %10925 = vmatmul.mubr.bf16.gmra.mrb[4].mxu1 %v14559_v60 }
 0x2f0   : > { %11133 = vmatmul.mubr.bf16.gmra.mrb[20].mxu0 %v14561_v37  ;;  %10928 = vmatprep.mubr.bf16.mxu1 %v14563_v24 }
 0x2f1   : > { %11136 = vmatprep.mubr.bf16.mxu0 %v14565_v48  ;;  %10957 = vmatpush3.bf16.msra.mxu1 %v12106_v42  ;;  %v5532_v42 = vld [vmem:[#allocation4 + $0x110] sm:$0xff] }
 0x2f2   : > { %10958 = vmatprep.subr.bf16.mxu1 %v12108_v13  ;;  %v14632_v19 = vpack.c.bf16 %v5532_v42, %v5531_v33  ;;  %v12129_v42 = vld [vmem:[%s15169_s2 + $0x208] sm:$0xff]  }
 0x2f5   : > { %10959 = vmatpush3.bf16.msra.mxu1 %v12108_v13  ;;  %v5538_v13 = vld [vmem:[#allocation4 + $0x158] sm:$0xff] }
 0x2f6   : > { %10960 = vmatprep.subr.bf16.mxu1 %v12110_v11  ;;  %v14648_v10 = vpack.c.bf16 %v5538_v13, %v5537_v38  ;;  %v7599_v38 = vld [vmem:[#allocation4 + $0xc1] sm:$0xff]  ;;  %v7600_v13 = vld [vmem:[#allocation4 + $0xc9] sm:$0xff] }
 0x2f7   : > { %10929 = vmatmul.mubr.bf16.gmra.mrb[8].mxu1 %v14577_v4 }
 0x2f8   : > { %11137 = vmatmul.mubr.bf16.gmra.mrb[24].mxu0 %v14579_v59  ;;  %10932 = vmatprep.mubr.bf16.mxu1 %v14581_v39 }
 0x2f9   : > { %11140 = vmatprep.mubr.bf16.mxu0 %v14583_v2  ;;  %10961 = vmatpush3.bf16.msra.mxu1 %v12110_v11  ;;  %v12123_v11 = vld [vmem:[%s15169_s2 + $0x1f0] sm:$0xff]  }
 0x2fa   : > { %10962 = vmatprep.subr.bf16.mxu1 %v12112_v5 }
 0x2fd   : > { %10963 = vmatpush3.bf16.msra.mxu1 %v12112_v5  ;;  %v14660_v5 = vpack.c.bf16 %v5540_v0, %v5539_v20  ;;  %v7625_v20 = vpack.c.bf16 %v7600_v13, %v7599_v38  ;;  %v7602_v0 = vld [vmem:[#allocation4 + $0xe1] sm:$0xff] }
 0x2fe   : > { %10964 = vmatprep.subr.bf16.mxu1 %v12114_v26 }
 0x2ff   : > { %10933 = vmatmul.mubr.bf16.gmra.mrb[12].mxu1 %v14595_v16 }
 0x300   : > { %11141 = vmatmul.mubr.bf16.gmra.mrb[28].mxu0 %v7021_v1  ;;  %10936 = vmatprep.mubr.bf16.mxu1 %v14597_v47 }
 0x301   : > { %11160 = vmatprep.mubr.bf16.mxu0 %v14543_v52  ;;  %10965 = vmatpush3.bf16.msra.mxu1 %v12114_v26  ;;  %v12126_v26 = vld [vmem:[%s15169_s2 + $0xe0] sm:$0xff]  }
 0x302   : > { %10966 = vmatprep.subr.bf16.mxu1 %v12116_v28 }
 0x305   : > { %10967 = vmatpush3.bf16.msra.mxu1 %v12116_v28  ;;  %v7588_v28 = vld [vmem:[#allocation4 + $0x39] sm:$0xff] }
 0x306   : > { %11000 = vmatprep.subr.bf16.mxu1 %v14614_v25 }
 0x307   : > { %10937 = vmatmul.mubr.bf16.gmra.mrb[16].mxu1 %v14616_v41 }
 0x308   : > { %11161 = vmatmul.mubr.bf16.vlgmr.msra.gmra.mrb[0].mxu0 %v14559_v60  ;;  %10940 = vmatprep.mubr.bf16.mxu1 %v14618_v15 }
 0x309   : > { %11193 = vmatpush3.bf16.msra.mxu0 %v14537_v22  ;;  %11164 = vmatprep.mubr.bf16.mxu0 %v14563_v24  ;;  %v5535_v22 = vld [vmem:[#allocation4 + $0x138] sm:$0xff] }
 0x30a   : > { %11194 = vmatprep.subr.bf16.mxu0 %v12113_v18  ;;  %v14646_v46 = vpack.c.bf16 %v5536_v51, %v5535_v22  ;;  %v7623_v22 = vpack.c.bf16 %v7596_v3, %v7595_v7  ;;  %v7598_v51 = vld [vmem:[#allocation4 + $0xb1] sm:$0xff] }
 0x30b   : > { %v7901_v3 = vld [vmem:[#allocation4 + $0x92] sm:$0xff] }
 0x30d   : > { %11195 = vmatpush3.bf16.msra.mxu0 %v12113_v18 }
 0x30e   : > { %11196 = vmatprep.subr.bf16.mxu0 %v12115_v55 }
 0x30f   : > { %10941 = vmatmul.mubr.bf16.gmra.mrb[20].mxu1 %v14632_v19 }
 0x310   : > { %11165 = vmatmul.mubr.bf16.gmra.mrb[4].mxu0 %v14577_v4  ;;  %10944 = vmatprep.mubr.bf16.mxu1 %v14634_v40 }
 0x311   : > { %11168 = vmatprep.mubr.bf16.mxu0 %v14581_v39  ;;  %11197 = vmatpush3.bf16.msra.mxu0 %v12115_v55  ;;  %v12131_v55 = vld [vmem:[%s15169_s2 + $0x210] sm:$0xff]  }
 0x312   : > { %11198 = vmatprep.subr.bf16.mxu0 %v12117_v12 }
 0x315   : > { %11199 = vmatpush3.bf16.msra.mxu0 %v12117_v12 }
 0x316   : > { %11200 = vmatprep.subr.bf16.mxu0 %v12119_v6 }
 0x317   : > { %10945 = vmatmul.mubr.bf16.gmra.mrb[24].mxu1 %v14646_v46 }
 0x318   : > { %11169 = vmatmul.mubr.bf16.gmra.mrb[8].mxu0 %v14595_v16  ;;  %10948 = vmatprep.mubr.bf16.mxu1 %v14648_v10 }
 0x319   : > { %11172 = vmatprep.mubr.bf16.mxu0 %v14597_v47  ;;  %11201 = vmatpush3.bf16.msra.mxu0 %v12119_v6  ;;  %v12134_v6 = vld [vmem:[%s15169_s2 + $0x220] sm:$0xff]  }
 0x31a   : > { %11202 = vmatprep.subr.bf16.mxu0 %v12121_v35 }
 0x31d   : > { %11203 = vmatpush3.bf16.msra.mxu0 %v12121_v35 }
 0x31e   : > { %11204 = vmatprep.subr.bf16.mxu0 %v12123_v11 }
 0x31f   : > { %10949 = vmatmul.mubr.bf16.gmra.mrb[28].mxu1 %v14660_v5 }
 0x320   : > { %11173 = vmatmul.mubr.bf16.gmra.mrb[12].mxu0 %v14616_v41  ;;  %10968 = vmatprep.mubr.bf16.mxu1 %v6088_v32 }
 0x321   : > { %11176 = vmatprep.mubr.bf16.mxu0 %v14618_v15  ;;  %11205 = vmatpush3.bf16.msra.mxu0 %v12123_v11  ;;  %v12136_v11 = vld [vmem:[%s15169_s2 + $0x230] sm:$0xff]  }
 0x322   : > { %11206 = vmatprep.subr.bf16.mxu0 %v12125_v21 }
 0x325   : > { %11207 = vmatpush3.bf16.msra.mxu0 %v12125_v21  ;;  %v14742_v21 = vpack.c.bf16 %v7604_v34, %v7603_v27 }
 0x326   : > { %11240 = vmatprep.subr.bf16.mxu0 %v12127_v58 }
 0x327   : > { %10969 = vmatmul.mubr.bf16.vlgmr.msra.gmra.mrb[0].mxu1 %v14427_v63  ;;  %v7309_v63 = vld [vmem:[#allocation4 + $0x180] sm:$0xff] }
 0x328   : > { %11001 = vmatpush3.bf16.msra.mxu1 %v14614_v25  ;;  %11177 = vmatmul.mubr.bf16.gmra.mrb[16].mxu0 %v14632_v19  ;;  %v7592_v25 = vld [vmem:[#allocation4 + $0x69] sm:$0xff] }
 0x329   : > { %10972 = vmatprep.mubr.bf16.mxu1 %v14461_v23  ;;  %11002 = vmatprep.subr.bf16.mxu1 %v12120_v45  ;;  %v7310_v23 = vld [vmem:[#allocation4 + $0x188] sm:$0xff]  ;;  %v7621_v33 = vpack.c.bf16 %v7592_v25, %v7591_v44  ;;  %v7894_v44 = vld [vmem:[#allocation4 + $0x3a] sm:$0xff] }
 0x32a   : > { %11180 = vmatprep.mubr.bf16.mxu0 %v14634_v40  ;;  %v14692_v1 = vpack.c.bf16 %v7310_v23, %v7309_v63  ;;  %v7610_v23 = vld [vmem:[#allocation4 + $0x141] sm:$0xff] }
 0x32b   : > { %v12146_v25 = vld [vmem:[%s15169_s2 + $0x128] sm:$0xff]  }
 0x32c   : > { %11003 = vmatpush3.bf16.msra.mxu1 %v12120_v45  ;;  %v7607_v45 = vld [vmem:[#allocation4 + $0x121] sm:$0xff] }
 0x32d   : > { %11004 = vmatprep.subr.bf16.mxu1 %v12122_v36 }
 0x32f   : > { %10973 = vmatmul.mubr.bf16.gmra.mrb[4].mxu1 %v14467_v50  ;;  %v12128_v50 = vld [vmem:[%s15169_s2 + $0xe8] sm:$0xff]  }
 0x330   : > { %11181 = vmatmul.mubr.bf16.gmra.mrb[20].mxu0 %v14646_v46  ;;  %10976 = vmatprep.mubr.bf16.mxu1 %v14482_v31  ;;  %v7587_v31 = vld [vmem:[#allocation4 + $0x31] sm:$0xff] }
 0x331   : > { %11184 = vmatprep.mubr.bf16.mxu0 %v14648_v10  ;;  %11005 = vmatpush3.bf16.msra.mxu1 %v12122_v36  ;;  %v7619_v56 = vpack.c.bf16 %v7588_v28, %v7587_v31  ;;  %v7608_v36 = vld [vmem:[#allocation4 + $0x129] sm:$0xff] }
 0x332   : > { %11006 = vmatprep.subr.bf16.mxu1 %v12124_v54  ;;  %v14753_v63 = vpack.c.bf16 %v7608_v36, %v7607_v45  ;;  %v7613_v28 = vld [vmem:[#allocation4 + $0x169] sm:$0xff]  ;;  %v7920_v45 = vld [vmem:[#allocation4 + $0x172] sm:$0xff] }
 0x333   : > { %v7921_v36 = vld [vmem:[#allocation4 + $0x182] sm:$0xff] }
 0x335   : > { %11007 = vmatpush3.bf16.msra.mxu1 %v12124_v54 }
 0x336   : > { %11008 = vmatprep.subr.bf16.mxu1 %v12126_v26 }
 0x337   : > { %10977 = vmatmul.mubr.bf16.gmra.mrb[8].mxu1 %v14488_v53  ;;  %v12132_v53 = vld [vmem:[%s15169_s2 + $0xf8] sm:$0xff]  }
 0x338   : > { %11185 = vmatmul.mubr.bf16.gmra.mrb[24].mxu0 %v14660_v5  ;;  %10980 = vmatprep.mubr.bf16.mxu1 %v14502_v57  ;;  %v7589_v57 = vld [vmem:[#allocation4 + $0x49] sm:$0xff] }
 0x339   : > { %11188 = vmatprep.mubr.bf16.mxu0 %v14692_v1  ;;  %11009 = vmatpush3.bf16.msra.mxu1 %v12126_v26  ;;  %v7620_v18 = vpack.c.bf16 %v7590_v29, %v7589_v57  ;;  %v7611_v26 = vld [vmem:[#allocation4 + $0x151] sm:$0xff]  ;;  %v7618_v57 = vld [vmem:[#allocation4 + $0x1a1] sm:$0xff] }
 0x33a   : > { %11010 = vmatprep.subr.bf16.mxu1 %v12128_v50  ;;  %v7893_v29 = vld [vmem:[#allocation4 + $0x32] sm:$0xff] }
 0x33d   : > { %11011 = vmatpush3.bf16.msra.mxu1 %v12128_v50  ;;  %v7612_v50 = vld [vmem:[#allocation4 + $0x159] sm:$0xff] }
 0x33e   : > { %11012 = vmatprep.subr.bf16.mxu1 %v12130_v43 }
 0x33f   : > { %10981 = vmatmul.mubr.bf16.gmra.mrb[12].mxu1 %v14508_v30  ;;  %v14716_v30 = vld [vmem:[%s15169_s2 + $0x100] sm:$0xff]  }
 0x340   : > { %11189 = vmatmul.mubr.bf16.gmra.mrb[28].mxu0 %v14524_v17  ;;  %10984 = vmatprep.mubr.bf16.mxu1 %v14522_v8  ;;  %v7593_v8 = vld [vmem:[#allocation4 + $0x79] sm:$0xff]  ;;  %v7594_v17 = vld [vmem:[#allocation4 + $0x81] sm:$0xff] }
 0x341   : > { %11208 = vmatprep.mubr.bf16.mxu0 %v7619_v56  ;;  %11013 = vmatpush3.bf16.msra.mxu1 %v12130_v43  ;;  %v7622_v12 = vpack.c.bf16 %v7594_v17, %v7593_v8  ;;  %v7614_v43 = vld [vmem:[#allocation4 + $0x171] sm:$0xff] }
 0x342   : > { %11014 = vmatprep.subr.bf16.mxu1 %v12132_v53  ;;  %v12144_v56 = vld [vmem:[%s15169_s2 + $0x118] sm:$0xff]  }
 0x343   : > { %v12148_v8 = vld [vmem:[%s15169_s2 + $0x138] sm:$0xff]  }
 0x345   : > { %11015 = vmatpush3.bf16.msra.mxu1 %v12132_v53  ;;  %v14777_v53 = vpack.c.bf16 %v7614_v43, %v7613_v28 }
 0x346   : > { %11560 = vmatprep.subr.bf16.mxu1 %v14716_v30 }
 0x347   : > { %10985 = vmatmul.mubr.bf16.gmra.mrb[16].mxu1 %v14526_v14  ;;  %v12133_v14 = vld [vmem:[%s15169_s2 + $0x218] sm:$0xff]  }
 0x348   : > { %11209 = vmatmul.mubr.bf16.vlgmr.msra.gmra.mrb[0].mxu0 %v7620_v18  ;;  %10988 = vmatprep.mubr.bf16.mxu1 %v14541_v9  ;;  %v7597_v9 = vld [vmem:[#allocation4 + $0xa9] sm:$0xff] }
 0x349   : > { %11241 = vmatpush3.bf16.msra.mxu0 %v12127_v58  ;;  %11212 = vmatprep.mubr.bf16.mxu0 %v7621_v33  ;;  %v7624_v35 = vpack.c.bf16 %v7598_v51, %v7597_v9  ;;  %v7606_v58 = vld [vmem:[#allocation4 + $0x111] sm:$0xff]  ;;  %v7925_v33 = vpack.c.bf16 %v7894_v44, %v7893_v29  ;;  %v7905_v51 = vld [vmem:[#allocation4 + $0xc2] sm:$0xff] }
 0x34a   : > { %11242 = vmatprep.subr.bf16.mxu0 %v12129_v42  ;;  %v7904_v9 = vld [vmem:[#allocation4 + $0xb2] sm:$0xff] }
 0x34d   : > { %11243 = vmatpush3.bf16.msra.mxu0 %v12129_v42  ;;  %v7897_v42 = vld [vmem:[#allocation4 + $0x62] sm:$0xff] }
 0x34e   : > { %11244 = vmatprep.subr.bf16.mxu0 %v12131_v55 }
 0x34f   : > { %10989 = vmatmul.mubr.bf16.gmra.mrb[20].mxu1 %v14548_v62  ;;  %v12135_v62 = vld [vmem:[%s15169_s2 + $0x228] sm:$0xff]  }
 0x350   : > { %11213 = vmatmul.mubr.bf16.gmra.mrb[4].mxu0 %v7622_v12  ;;  %10992 = vmatprep.mubr.bf16.mxu1 %v14561_v37  ;;  %v7601_v37 = vld [vmem:[#allocation4 + $0xd9] sm:$0xff] }
 0x351   : > { %11216 = vmatprep.mubr.bf16.mxu0 %v7623_v22  ;;  %11245 = vmatpush3.bf16.msra.mxu0 %v12131_v55  ;;  %v14740_v32 = vpack.c.bf16 %v7602_v0, %v7601_v37  ;;  %v7902_v55 = vld [vmem:[#allocation4 + $0x9a] sm:$0xff]  ;;  %v7912_v37 = vld [vmem:[#allocation4 + $0x112] sm:$0xff]  ;;  %v7913_v0 = vld [vmem:[#allocation4 + $0x122] sm:$0xff] }
 0x352   : > { %11246 = vmatprep.subr.bf16.mxu0 %v12133_v14  ;;  %v7929_v22 = vpack.c.bf16 %v7902_v55, %v7901_v3 }
 0x355   : > { %11247 = vmatpush3.bf16.msra.mxu0 %v12133_v14  ;;  %v7903_v14 = vld [vmem:[#allocation4 + $0xaa] sm:$0xff] }
 0x356   : > { %11248 = vmatprep.subr.bf16.mxu0 %v12134_v6  ;;  %v7930_v38 = vpack.c.bf16 %v7904_v9, %v7903_v14 }
 0x357   : > { %10993 = vmatmul.mubr.bf16.gmra.mrb[24].mxu1 %v14565_v48  ;;  %v12137_v48 = vld [vmem:[%s15169_s2 + $0x238] sm:$0xff]  }
 0x358   : > { %11217 = vmatmul.mubr.bf16.gmra.mrb[8].mxu0 %v7624_v35  ;;  %10996 = vmatprep.mubr.bf16.mxu1 %v14579_v59  ;;  %v7605_v59 = vld [vmem:[#allocation4 + $0x109] sm:$0xff]  ;;  %v7909_v35 = vld [vmem:[#allocation4 + $0xf2] sm:$0xff] }
 0x359   : > { %11220 = vmatprep.mubr.bf16.mxu0 %v7625_v20  ;;  %11249 = vmatpush3.bf16.msra.mxu0 %v12134_v6  ;;  %v14751_v54 = vpack.c.bf16 %v7606_v58, %v7605_v59  ;;  %v7908_v6 = vld [vmem:[#allocation4 + $0xe2] sm:$0xff] }
 0x35a   : > { %11250 = vmatprep.subr.bf16.mxu0 %v12135_v62 }
 0x35d   : > { %11251 = vmatpush3.bf16.msra.mxu0 %v12135_v62 }
 0x35e   : > { %11252 = vmatprep.subr.bf16.mxu0 %v12136_v11 }
 0x35f   : > { %10997 = vmatmul.mubr.bf16.gmra.mrb[28].mxu1 %v14583_v2  ;;  %v7609_v2 = vld [vmem:[#allocation4 + $0x139] sm:$0xff] }
 0x360   : > { %11221 = vmatmul.mubr.bf16.gmra.mrb[12].mxu0 %v14740_v32  ;;  %11016 = vmatprep.mubr.bf16.mxu1 %v14539_v49  ;;  %v12142_v49 = vld [vmem:[%s15169_s2 + $0x108] sm:$0xff]   ;;  %v14763_v31 = vpack.c.bf16 %v7610_v23, %v7609_v2 }
 0x361   : > { %11224 = vmatprep.mubr.bf16.mxu0 %v14742_v21  ;;  %11253 = vmatpush3.bf16.msra.mxu0 %v12136_v11  ;;  %v7916_v11 = vld [vmem:[#allocation4 + $0x142] sm:$0xff] }
 0x362   : > { %11254 = vmatprep.subr.bf16.mxu0 %v12137_v48  ;;  %v6699_v23 = vld [vmem:[#allocation4 + $0x189] sm:$0xff] }
 0x365   : > { %11255 = vmatpush3.bf16.msra.mxu0 %v12137_v48  ;;  %v7917_v48 = vld [vmem:[#allocation4 + $0x152] sm:$0xff] }
 0x367   : > { %11017 = vmatmul.mubr.bf16.vlgmr.msra.gmra.mrb[0].mxu1 %v14543_v52  ;;  %v12143_v52 = vld [vmem:[%s15169_s2 + $0x110] sm:$0xff]  }
 0x368   : > { %11568 = vmatpush3.bf16.msra.mxu1 %v14716_v30  ;;  %11225 = vmatmul.mubr.bf16.gmra.mrb[16].mxu0 %v14751_v54  ;;  %v7898_v30 = vld [vmem:[#allocation4 + $0x6a] sm:$0xff] }
 0x369   : > { %11020 = vmatprep.mubr.bf16.mxu1 %v14559_v60  ;;  %11561 = vmatprep.subr.bf16.mxu1 %v12142_v49  ;;  %v14768_v60 = vpack.c.bf16 %v7612_v50, %v7611_v26  ;;  %v7927_v7 = vpack.c.bf16 %v7898_v30, %v7897_v42  ;;  %v7923_v26 = vld [vmem:[#allocation4 + $0x19a] sm:$0xff] }
 0x36a   : > { %11228 = vmatprep.mubr.bf16.mxu0 %v14753_v63 }
 0x36c   : > { %11569 = vmatpush3.bf16.msra.mxu1 %v12142_v49 }
 0x36d   : > { %11562 = vmatprep.subr.bf16.mxu1 %v12143_v52 }
 0x36f   : > { %11021 = vmatmul.mubr.bf16.gmra.mrb[4].mxu1 %v14563_v24  ;;  %v12145_v24 = vld [vmem:[%s15169_s2 + $0x120] sm:$0xff]  }
 0x370   : > { %11229 = vmatmul.mubr.bf16.gmra.mrb[20].mxu0 %v14763_v31  ;;  %11024 = vmatprep.mubr.bf16.mxu1 %v14577_v4  ;;  %v7617_v4 = vld [vmem:[#allocation4 + $0x199] sm:$0xff] }
 0x371   : > { %11232 = vmatprep.mubr.bf16.mxu0 %v14768_v60  ;;  %11570 = vmatpush3.bf16.msra.mxu1 %v12143_v52  ;;  %v7634_v18 = vpack.c.bf16 %v7618_v57, %v7617_v4 }
 0x372   : > { %11563 = vmatprep.subr.bf16.mxu1 %v12144_v56 }
 0x375   : > { %11571 = vmatpush3.bf16.msra.mxu1 %v12144_v56 }
 0x376   : > { %11564 = vmatprep.subr.bf16.mxu1 %v12145_v24 }
 0x377   : > { %11025 = vmatmul.mubr.bf16.gmra.mrb[8].mxu1 %v14581_v39  ;;  %v12147_v39 = vld [vmem:[%s15169_s2 + $0x130] sm:$0xff]  }
 0x378   : > { %11233 = vmatmul.mubr.bf16.gmra.mrb[24].mxu0 %v14777_v53  ;;  %11028 = vmatprep.mubr.bf16.mxu1 %v14595_v16  ;;  %v7895_v16 = vld [vmem:[#allocation4 + $0x4a] sm:$0xff] }
 0x379   : > { %11236 = vmatprep.mubr.bf16.mxu0 %v14603_v61  ;;  %11572 = vmatpush3.bf16.msra.mxu1 %v12145_v24  ;;  %v7896_v61 = vld [vmem:[#allocation4 + $0x52] sm:$0xff] }
 0x37a   : > { %11565 = vmatprep.subr.bf16.mxu1 %v12146_v25  ;;  %v7926_v17 = vpack.c.bf16 %v7896_v61, %v7895_v16 }
 0x37d   : > { %11573 = vmatpush3.bf16.msra.mxu1 %v12146_v25 }
 0x37e   : > { %11566 = vmatprep.subr.bf16.mxu1 %v12147_v39 }
 0x37f   : > { %11029 = vmatmul.mubr.bf16.gmra.mrb[12].mxu1 %v14597_v47  ;;  %v7899_v47 = vld [vmem:[#allocation4 + $0x7a] sm:$0xff] }
 0x380   : > { %11237 = vmatmul.mubr.bf16.gmra.mrb[28].mxu0 %v7634_v18  ;;  %11032 = vmatprep.mubr.bf16.mxu1 %v14616_v41  ;;  %v7900_v41 = vld [vmem:[#allocation4 + $0x82] sm:$0xff] }
 0x381   : > { %11256 = vmatprep.mubr.bf16.mxu0 %v7925_v33  ;;  %11574 = vmatpush3.bf16.msra.mxu1 %v12147_v39  ;;  %v7928_v12 = vpack.c.bf16 %v7900_v41, %v7899_v47 }
 0x382   : > { %11567 = vmatprep.subr.bf16.mxu1 %v12148_v8 }
 0x385   : > { %11575 = vmatpush3.bf16.msra.mxu1 %v12148_v8 }
 0x387   : > { %11033 = vmatmul.mubr.bf16.gmra.mrb[16].mxu1 %v14618_v15  ;;  %v7906_v15 = vld [vmem:[#allocation4 + $0xca] sm:$0xff] }
 0x388   : > { %11257 = vmatmul.mubr.bf16.vlgmr.msra.gmra.mrb[0].mxu0 %v7926_v17  ;;  %11036 = vmatprep.mubr.bf16.mxu1 %v14632_v19  ;;  %v7931_v13 = vpack.c.bf16 %v7906_v15, %v7905_v51  ;;  %v7907_v19 = vld [vmem:[#allocation4 + $0xda] sm:$0xff] }
 0x389   : > { %11260 = vmatprep.mubr.bf16.mxu0 %v7927_v7  ;;  %v7932_v20 = vpack.c.bf16 %v7908_v6, %v7907_v19 }
 0x38f   : > { %11037 = vmatmul.mubr.bf16.gmra.mrb[20].mxu1 %v14634_v40  ;;  %v7910_v40 = vld [vmem:[#allocation4 + $0xfa] sm:$0xff] }
 0x390   : > { %11261 = vmatmul.mubr.bf16.gmra.mrb[4].mxu0 %v7928_v12  ;;  %11040 = vmatprep.mubr.bf16.mxu1 %v14646_v46  ;;  %v7933_v62 = vpack.c.bf16 %v7910_v40, %v7909_v35  ;;  %v7911_v46 = vld [vmem:[#allocation4 + $0x10a] sm:$0xff] }
 0x391   : > { %11264 = vmatprep.mubr.bf16.mxu0 %v7929_v22  ;;  %v7934_v27 = vpack.c.bf16 %v7912_v37, %v7911_v46 }
 0x397   : > { %11041 = vmatmul.mubr.bf16.gmra.mrb[24].mxu1 %v14648_v10  ;;  %v7914_v10 = vld [vmem:[#allocation4 + $0x12a] sm:$0xff] }
 0x398   : > { %11265 = vmatmul.mubr.bf16.gmra.mrb[8].mxu0 %v7930_v38  ;;  %11044 = vmatprep.mubr.bf16.mxu1 %v14660_v5  ;;  %v7935_v34 = vpack.c.bf16 %v7914_v10, %v7913_v0  ;;  %v7915_v5 = vld [vmem:[#allocation4 + $0x13a] sm:$0xff] }
 0x399   : > { %11268 = vmatprep.mubr.bf16.mxu0 %v7931_v13  ;;  %v7936_v59 = vpack.c.bf16 %v7916_v11, %v7915_v5 }
 0x39f   : > { %11045 = vmatmul.mubr.bf16.gmra.mrb[28].mxu1 %v14692_v1  ;;  %v7918_v1 = vld [vmem:[#allocation4 + $0x15a] sm:$0xff] }
 0x3a0   : > { %11269 = vmatmul.mubr.bf16.gmra.mrb[12].mxu0 %v7932_v20  ;;  %11080 = vmatprep.mubr.bf16.mxu1 %v14740_v32  ;;  %v7937_v58 = vpack.c.bf16 %v7918_v1, %v7917_v48  ;;  %v7919_v32 = vld [vmem:[#allocation4 + $0x16a] sm:$0xff] }
 0x3a1   : > { %11272 = vmatprep.mubr.bf16.mxu0 %v7933_v62  ;;  %v7938_v49 = vpack.c.bf16 %v7920_v45, %v7919_v32 }
 0x3a7   : > { %11081 = vmatmul.mubr.bf16.vlgmr.msra.gmra.mrb[16].mxu1 %v14742_v21  ;;  %v7922_v21 = vld [vmem:[#allocation4 + $0x18a] sm:$0xff] }
 0x3a8   : > { %11273 = vmatmul.mubr.bf16.gmra.mrb[16].mxu0 %v7934_v27  ;;  %11084 = vmatprep.mubr.bf16.mxu1 %v14751_v54  ;;  %v7939_v2 = vpack.c.bf16 %v7922_v21, %v7921_v36  ;;  %v6698_v54 = vld [vmem:[#allocation4 + $0x181] sm:$0xff] }
 0x3a9   : > { %11276 = vmatprep.mubr.bf16.mxu0 %v7935_v34  ;;  %v6715_v50 = vpack.c.bf16 %v6699_v23, %v6698_v54 }
 0x3af   : > { %11085 = vmatmul.mubr.bf16.gmra.mrb[20].mxu1 %v14753_v63  ;;  %v7924_v63 = vld [vmem:[#allocation4 + $0x1a2] sm:$0xff] }
 0x3b0   : > { %11277 = vmatmul.mubr.bf16.gmra.mrb[20].mxu0 %v7936_v59  ;;  %11088 = vmatprep.mubr.bf16.mxu1 %v14763_v31  ;;  %v7940_v52 = vpack.c.bf16 %v7924_v63, %v7923_v26 }
 0x3b1   : > { %11280 = vmatprep.mubr.bf16.mxu0 %v7937_v58 }
 0x3b7   : > { %11089 = vmatmul.mubr.bf16.gmra.mrb[24].mxu1 %v14768_v60 }
 0x3b8   : > { %11281 = vmatmul.mubr.bf16.gmra.mrb[24].mxu0 %v7938_v49  ;;  %11092 = vmatprep.mubr.bf16.mxu1 %v14777_v53 }
 0x3b9   : > { %11284 = vmatprep.mubr.bf16.mxu0 %v7939_v2 }
 0x3bf   : > { %11093 = vmatmul.mubr.bf16.gmra.mrb[28].mxu1 %v6715_v50 }
 0x3c0   : > { %11285 = vmatmul.mubr.bf16.gmra.mrb[28].mxu0 %v7940_v52 }
 0x43a   : > { %v11018_v31 = vpop.f32.mrb[0].mxu1 }
 0x43b   : > { %v6509_v28 = vpop.f32.mrb[1].mxu1 }
 0x43c   : > { %v11019_v43 = vpop.f32.mrb[2].mxu1 }
 0x43d   : > { %v6512_v56 = vpop.f32.mrb[3].mxu1 }
 0x442   : > { %v11022_v24 = vpop.f32.mrb[4].mxu1 }
 0x443   : > { %v6525_v4 = vpop.f32.mrb[5].mxu1 }
 0x444   : > { %v11023_v60 = vpop.f32.mrb[6].mxu1 }
 0x445   : > { %v6528_v57 = vpop.f32.mrb[7].mxu1 }
 0x44a   : > { %v11026_v29 = vpop.f32.mrb[8].mxu1 }
 0x44b   : > { %v6541_v53 = vpop.f32.mrb[9].mxu1 }
 0x44c   : > { %v11027_v44 = vpop.f32.mrb[10].mxu1 }
 0x44d   : > { %v14811_v25 = vpop.f32.mrb[11].mxu1 }
 0x452   : > { %v14813_v18 = vpop.f32.mrb[12].mxu1 }
 0x453   : > { %v14815_v33 = vpop.f32.mrb[13].mxu1 }
 0x454   : > { %v14817_v39 = vpop.f32.mrb[14].mxu1 }
 0x455   : > { %v14819_v16 = vpop.f32.mrb[15].mxu1 }
 0x45b   : > { %v11258_v61 = vpop.f32.mrb[0].mxu0 }
 0x45c   : > { %v11576_v42 = vadd.f32 %v11258_v61, %v11018_v31  ;;  %v8040_v30 = vpop.f32.mrb[1].mxu0 }
 0x45d   : > { %v11577_v8 = vadd.f32 %v8040_v30, %v6509_v28  ;;  %v11259_v17 = vpop.f32.mrb[2].mxu0 }
 0x45e   : > { %8202 = vst [vmem:[%s14823_s20 + $0x10] sm:$0xff] %v11576_v42  ;;  %v11578_v7 = vadd.f32 %v11259_v17, %v11019_v43  ;;  %v8043_v47 = vpop.f32.mrb[3].mxu0  ;;  %v8275_v22 = vmul.f32 %v11576_v42, %v11576_v42 }
 0x45f   : > { %8200 = vst [vmem:[%s14823_s20] sm:$0xff] %v11577_v8  ;;  %v11579_v41 = vadd.f32 %v8043_v47, %v6512_v56  ;;  %v8273_v3 = vmul.f32 %v11577_v8, %v11577_v8 }
 0x460   : > { %8203 = vst [vmem:[%s14823_s20 + $0x18] sm:$0xff] %v11578_v7  ;;  %v8276_v13 = vmul.f32 %v11578_v7, %v11578_v7 }
 0x461   : > { %8201 = vst [vmem:[%s14823_s20 + $0x8] sm:$0xff] %v11579_v41  ;;  %v8233_v55 = vadd.f32 %v11579_v41, %v11577_v8  ;;  %v8274_v12 = vmul.f32 %v11579_v41, %v11579_v41 }
 0x463   : > { %v8234_v14 = vadd.f32 %v11576_v42, %v8233_v55  ;;  %v8305_v9 = vadd.f32 %v8274_v12, %v8273_v3  ;;  %v11262_v51 = vpop.f32.mrb[4].mxu0 }
 0x464   : > { %v11580_v15 = vadd.f32 %v11262_v51, %v11022_v24  ;;  %v8056_v38 = vpop.f32.mrb[5].mxu0 }
 0x465   : > { %v8306_v19 = vadd.f32 %v8305_v9, %v8275_v22  ;;  %v11581_v6 = vadd.f32 %v8056_v38, %v6525_v4  ;;  %v8235_v35 = vadd.f32 %v11578_v7, %v8234_v14  ;;  %v11263_v40 = vpop.f32.mrb[6].mxu0 }
 0x466   : > { %8206 = vst [vmem:[%s14823_s20 + $0x30] sm:$0xff] %v11580_v15  ;;  %v11582_v20 = vadd.f32 %v11263_v40, %v11023_v60  ;;  %v8059_v62 = vpop.f32.mrb[7].mxu0  ;;  %v8279_v11 = vmul.f32 %v11580_v15, %v11580_v15 }
 0x467   : > { %8204 = vst [vmem:[%s14823_s20 + $0x20] sm:$0xff] %v11581_v6  ;;  %v8236_v46 = vadd.f32 %v11581_v6, %v8235_v35  ;;  %v8277_v37 = vmul.f32 %v11581_v6, %v11581_v6  ;;  %v8307_v0 = vadd.f32 %v8306_v19, %v8276_v13  ;;  %v11583_v10 = vadd.f32 %v8059_v62, %v6528_v57 }
 0x468   : > { %8207 = vst [vmem:[%s14823_s20 + $0x38] sm:$0xff] %v11582_v20  ;;  %v8280_v45 = vmul.f32 %v11582_v20, %v11582_v20 }
 0x469   : > { %v8308_v27 = vadd.f32 %v8307_v0, %v8277_v37  ;;  %8205 = vst [vmem:[%s14823_s20 + $0x28] sm:$0xff] %v11583_v10  ;;  %v8237_v34 = vadd.f32 %v11583_v10, %v8236_v46  ;;  %v8278_v5 = vmul.f32 %v11583_v10, %v11583_v10 }
 0x46b   : > { %v8238_v48 = vadd.f32 %v11580_v15, %v8237_v34  ;;  %v8309_v1 = vadd.f32 %v8308_v27, %v8278_v5  ;;  %v11266_v59 = vpop.f32.mrb[8].mxu0 }
 0x46c   : > { %v11584_v58 = vadd.f32 %v11266_v59, %v11026_v29  ;;  %v8072_v32 = vpop.f32.mrb[9].mxu0 }
 0x46d   : > { %v8310_v36 = vadd.f32 %v8309_v1, %v8279_v11  ;;  %v11585_v21 = vadd.f32 %v8072_v32, %v6541_v53  ;;  %v8239_v49 = vadd.f32 %v11582_v20, %v8238_v48  ;;  %v11267_v2 = vpop.f32.mrb[10].mxu0 }
 0x46e   : > { %8210 = vst [vmem:[%s14823_s20 + $0x50] sm:$0xff] %v11584_v58  ;;  %v11586_v54 = vadd.f32 %v11267_v2, %v11027_v44  ;;  %v8075_v23 = vpop.f32.mrb[11].mxu0  ;;  %v8283_v56 = vmul.f32 %v11584_v58, %v11584_v58 }
 0x46f   : > { %8208 = vst [vmem:[%s14823_s20 + $0x40] sm:$0xff] %v11585_v21  ;;  %v8240_v26 = vadd.f32 %v11585_v21, %v8239_v49  ;;  %v8281_v63 = vmul.f32 %v11585_v21, %v11585_v21  ;;  %v8311_v50 = vadd.f32 %v8310_v36, %v8280_v45  ;;  %v11587_v52 = vadd.f32 %v8075_v23, %v14811_v25 }
 0x470   : > { %8211 = vst [vmem:[%s14823_s20 + $0x58] sm:$0xff] %v11586_v54  ;;  %v8284_v53 = vmul.f32 %v11586_v54, %v11586_v54 }
 0x471   : > { %v8312_v31 = vadd.f32 %v8311_v50, %v8281_v63  ;;  %8209 = vst [vmem:[%s14823_s20 + $0x48] sm:$0xff] %v11587_v52  ;;  %v8241_v28 = vadd.f32 %v11587_v52, %v8240_v26  ;;  %v8282_v43 = vmul.f32 %v11587_v52, %v11587_v52 }
 0x473   : > { %v8242_v24 = vadd.f32 %v11584_v58, %v8241_v28  ;;  %v8313_v4 = vadd.f32 %v8312_v31, %v8282_v43  ;;  %v11270_v60 = vpop.f32.mrb[12].mxu0 }
 0x474   : > { %v11588_v57 = vadd.f32 %v11270_v60, %v14813_v18  ;;  %v8088_v29 = vpop.f32.mrb[13].mxu0 }
 0x475   : > { %v8314_v44 = vadd.f32 %v8313_v4, %v8283_v56  ;;  %v11589_v25 = vadd.f32 %v8088_v29, %v14815_v33  ;;  %v8243_v61 = vadd.f32 %v11586_v54, %v8242_v24  ;;  %v11271_v42 = vpop.f32.mrb[14].mxu0 }
 0x476   : > { %8214 = vst [vmem:[%s14823_s20 + $0x70] sm:$0xff] %v11588_v57  ;;  %v11590_v30 = vadd.f32 %v11271_v42, %v14817_v39  ;;  %v8091_v8 = vpop.f32.mrb[15].mxu0  ;;  %v8287_v33 = vmul.f32 %v11588_v57, %v11588_v57 }
 0x477   : > { %8212 = vst [vmem:[%s14823_s20 + $0x60] sm:$0xff] %v11589_v25  ;;  %v8244_v17 = vadd.f32 %v11589_v25, %v8243_v61  ;;  %v8285_v7 = vmul.f32 %v11589_v25, %v11589_v25  ;;  %v8315_v47 = vadd.f32 %v8314_v44, %v8284_v53  ;;  %v11591_v41 = vadd.f32 %v8091_v8, %v14819_v16 }
 0x478   : > { %8215 = vst [vmem:[%s14823_s20 + $0x78] sm:$0xff] %v11590_v30  ;;  %v8288_v13 = vmul.f32 %v11590_v30, %v11590_v30 }
 0x479   : > { %v8316_v18 = vadd.f32 %v8315_v47, %v8285_v7  ;;  %8213 = vst [vmem:[%s14823_s20 + $0x68] sm:$0xff] %v11591_v41  ;;  %v8245_v3 = vadd.f32 %v11591_v41, %v8244_v17  ;;  %v8286_v55 = vmul.f32 %v11591_v41, %v11591_v41 }
 0x47a   : > { %v11082_v12 = vpop.f32.mrb[16].mxu1 }
 0x47b   : > { %v8246_v22 = vadd.f32 %v11588_v57, %v8245_v3  ;;  %v8317_v14 = vadd.f32 %v8316_v18, %v8286_v55  ;;  %v6879_v9 = vpop.f32.mrb[17].mxu1  ;;  %v11274_v39 = vpop.f32.mrb[16].mxu0 }
 0x47c   : > { %v11592_v51 = vadd.f32 %v11274_v39, %v11082_v12  ;;  %v11083_v15 = vpop.f32.mrb[18].mxu1  ;;  %v8104_v38 = vpop.f32.mrb[17].mxu0 }
 0x47d   : > { %v8318_v16 = vadd.f32 %v8317_v14, %v8287_v33  ;;  %v11593_v19 = vadd.f32 %v8104_v38, %v6879_v9  ;;  %v8247_v6 = vadd.f32 %v11590_v30, %v8246_v22  ;;  %v6882_v35 = vpop.f32.mrb[19].mxu1  ;;  %v11275_v40 = vpop.f32.mrb[18].mxu0 }
 0x47e   : > { %8218 = vst [vmem:[%s14823_s20 + $0x90] sm:$0xff] %v11592_v51  ;;  %v11594_v20 = vadd.f32 %v11275_v40, %v11083_v15  ;;  %v8107_v62 = vpop.f32.mrb[19].mxu0  ;;  %v8291_v48 = vmul.f32 %v11592_v51, %v11592_v51 }
 0x47f   : > { %8216 = vst [vmem:[%s14823_s20 + $0x80] sm:$0xff] %v11593_v19  ;;  %v8248_v46 = vadd.f32 %v11593_v19, %v8247_v6  ;;  %v8289_v37 = vmul.f32 %v11593_v19, %v11593_v19  ;;  %v8319_v0 = vadd.f32 %v8318_v16, %v8288_v13  ;;  %v11595_v10 = vadd.f32 %v8107_v62, %v6882_v35 }
 0x480   : > { %8219 = vst [vmem:[%s14823_s20 + $0x98] sm:$0xff] %v11594_v20  ;;  %v8292_v49 = vmul.f32 %v11594_v20, %v11594_v20 }
 0x481   : > { %v8320_v27 = vadd.f32 %v8319_v0, %v8289_v37  ;;  %8217 = vst [vmem:[%s14823_s20 + $0x88] sm:$0xff] %v11595_v10  ;;  %v8249_v34 = vadd.f32 %v11595_v10, %v8248_v46  ;;  %v8290_v5 = vmul.f32 %v11595_v10, %v11595_v10 }
 0x482   : > { %v11086_v11 = vpop.f32.mrb[20].mxu1 }
 0x483   : > { %v8250_v1 = vadd.f32 %v11592_v51, %v8249_v34  ;;  %v8321_v59 = vadd.f32 %v8320_v27, %v8290_v5  ;;  %v6895_v58 = vpop.f32.mrb[21].mxu1  ;;  %v11278_v32 = vpop.f32.mrb[20].mxu0 }
 0x484   : > { %v11596_v45 = vadd.f32 %v11278_v32, %v11086_v11  ;;  %v11087_v36 = vpop.f32.mrb[22].mxu1  ;;  %v8120_v21 = vpop.f32.mrb[21].mxu0 }
 0x485   : > { %v8322_v2 = vadd.f32 %v8321_v59, %v8291_v48  ;;  %v11597_v54 = vadd.f32 %v8120_v21, %v6895_v58  ;;  %v8251_v23 = vadd.f32 %v11594_v20, %v8250_v1  ;;  %v6898_v26 = vpop.f32.mrb[23].mxu1  ;;  %v11279_v63 = vpop.f32.mrb[22].mxu0 }
 0x486   : > { %8222 = vst [vmem:[%s14823_s20 + $0xb0] sm:$0xff] %v11596_v45  ;;  %v11598_v50 = vadd.f32 %v11279_v63, %v11087_v36  ;;  %v8123_v52 = vpop.f32.mrb[23].mxu0  ;;  %v8295_v29 = vmul.f32 %v11596_v45, %v11596_v45 }
 0x487   : > { %8220 = vst [vmem:[%s14823_s20 + $0xa0] sm:$0xff] %v11597_v54  ;;  %v8252_v31 = vadd.f32 %v11597_v54, %v8251_v23  ;;  %v8293_v28 = vmul.f32 %v11597_v54, %v11597_v54  ;;  %v8323_v43 = vadd.f32 %v8322_v2, %v8292_v49  ;;  %v11599_v56 = vadd.f32 %v8123_v52, %v6898_v26 }
 0x488   : > { %8223 = vst [vmem:[%s14823_s20 + $0xb8] sm:$0xff] %v11598_v50  ;;  %v8296_v17 = vmul.f32 %v11598_v50, %v11598_v50 }
 0x489   : > { %v8324_v24 = vadd.f32 %v8323_v43, %v8293_v28  ;;  %8221 = vst [vmem:[%s14823_s20 + $0xa8] sm:$0xff] %v11599_v56  ;;  %v8253_v4 = vadd.f32 %v11599_v56, %v8252_v31  ;;  %v8294_v60 = vmul.f32 %v11599_v56, %v11599_v56 }
 0x48a   : > { %v11090_v57 = vpop.f32.mrb[24].mxu1 }
 0x48b   : > { %v8254_v53 = vadd.f32 %v11596_v45, %v8253_v4  ;;  %v8325_v44 = vadd.f32 %v8324_v24, %v8294_v60  ;;  %v6911_v25 = vpop.f32.mrb[25].mxu1  ;;  %v11282_v61 = vpop.f32.mrb[24].mxu0 }
 0x48c   : > { %v11600_v42 = vadd.f32 %v11282_v61, %v11090_v57  ;;  %v11091_v30 = vpop.f32.mrb[26].mxu1  ;;  %v8136_v8 = vpop.f32.mrb[25].mxu0  ;;  %v8232_v57 = vld [vmem:[#allocation7] sm:$0x1] }
 0x48d   : > { %v8326_v7 = vadd.f32 %v8325_v44, %v8295_v29  ;;  %v11601_v47 = vadd.f32 %v8136_v8, %v6911_v25  ;;  %v8255_v41 = vadd.f32 %v11598_v50, %v8254_v53  ;;  %v6914_v18 = vpop.f32.mrb[27].mxu1  ;;  %v11283_v3 = vpop.f32.mrb[26].mxu0  ;;  %v8272_v44 = vld [vmem:[#allocation8] sm:$0x1] }
 0x48e   : > { %8226 = vst [vmem:[%s14823_s20 + $0xd0] sm:$0xff] %v11600_v42  ;;  %v11602_v55 = vadd.f32 %v11283_v3, %v11091_v30  ;;  %v8139_v12 = vpop.f32.mrb[27].mxu0  ;;  %v8299_v13 = vmul.f32 %v11600_v42, %v11600_v42 }
 0x48f   : > { %8224 = vst [vmem:[%s14823_s20 + $0xc0] sm:$0xff] %v11601_v47  ;;  %v8256_v33 = vadd.f32 %v11601_v47, %v8255_v41  ;;  %v8297_v22 = vmul.f32 %v11601_v47, %v11601_v47  ;;  %v8327_v14 = vadd.f32 %v8326_v7, %v8296_v17  ;;  %v11603_v9 = vadd.f32 %v8139_v12, %v6914_v18 }
 0x490   : > { %8227 = vst [vmem:[%s14823_s20 + $0xd8] sm:$0xff] %v11602_v55  ;;  %v8300_v46 = vmul.f32 %v11602_v55, %v11602_v55 }
 0x491   : > { %v8328_v39 = vadd.f32 %v8327_v14, %v8297_v22  ;;  %8225 = vst [vmem:[%s14823_s20 + $0xc8] sm:$0xff] %v11603_v9  ;;  %v8257_v51 = vadd.f32 %v11603_v9, %v8256_v33  ;;  %v8298_v15 = vmul.f32 %v11603_v9, %v11603_v9 }
 0x492   : > { %v11094_v38 = vpop.f32.mrb[28].mxu1 }
 0x493   : > { %v8258_v16 = vadd.f32 %v11600_v42, %v8257_v51  ;;  %v8329_v19 = vadd.f32 %v8328_v39, %v8298_v15  ;;  %v6927_v6 = vpop.f32.mrb[29].mxu1  ;;  %v11286_v35 = vpop.f32.mrb[28].mxu0 }
 0x494   : > { %v11604_v40 = vadd.f32 %v11286_v35, %v11094_v38  ;;  %v11095_v20 = vpop.f32.mrb[30].mxu1  ;;  %v8152_v62 = vpop.f32.mrb[29].mxu0 }
 0x495   : > { %v8330_v37 = vadd.f32 %v8329_v19, %v8299_v13  ;;  %v11605_v0 = vadd.f32 %v8152_v62, %v6927_v6  ;;  %v8259_v10 = vadd.f32 %v11602_v55, %v8258_v16  ;;  %v6930_v27 = vpop.f32.mrb[31].mxu1  ;;  %v11287_v34 = vpop.f32.mrb[30].mxu0 }
 0x496   : > { %8230 = vst [vmem:[%s14823_s20 + $0xf0] sm:$0xff] %v11604_v40  ;;  %v11606_v5 = vadd.f32 %v11287_v34, %v11095_v20  ;;  %v8155_v11 = vpop.f32.mrb[31].mxu0  ;;  %v8303_v21 = vmul.f32 %v11604_v40, %v11604_v40 }
 0x497   : > { %8228 = vst [vmem:[%s14823_s20 + $0xe0] sm:$0xff] %v11605_v0  ;;  %v8260_v48 = vadd.f32 %v11605_v0, %v8259_v10  ;;  %v8301_v1 = vmul.f32 %v11605_v0, %v11605_v0  ;;  %v8331_v59 = vadd.f32 %v8330_v37, %v8300_v46  ;;  %v11607_v58 = vadd.f32 %v8155_v11, %v6930_v27 }
 0x498   : > { %8231 = vst [vmem:[%s14823_s20 + $0xf8] sm:$0xff] %v11606_v5  ;;  %v8304_v54 = vmul.f32 %v11606_v5, %v11606_v5 }
 0x499   : > { %v8332_v32 = vadd.f32 %v8331_v59, %v8301_v1  ;;  %8229 = vst [vmem:[%s14823_s20 + $0xe8] sm:$0xff] %v11607_v58  ;;  %v8261_v45 = vadd.f32 %v11607_v58, %v8260_v48  ;;  %v8302_v36 = vmul.f32 %v11607_v58, %v11607_v58 }
 0x49b   : > { %v8262_v49 = vadd.f32 %v11604_v40, %v8261_v45  ;;  %v8333_v2 = vadd.f32 %v8332_v32, %v8302_v36 }
 0x49d   : > { %v8263_v23 = vadd.f32 %v11606_v5, %v8262_v49  ;;  %v8334_v26 = vadd.f32 %v8333_v2, %v8303_v21 }
 0x49f   : > { %v8264_v63 = vrot.slane %v8263_v23, 4  ;;  %v8335_v50 = vadd.f32 %v8334_v26, %v8304_v54 }
 0x4a1   : > { %v8265_v52 = vadd.f32 %v8264_v63, %v8263_v23  ;;  %v8336_v31 = vrot.slane %v8335_v50, 4 }
 0x4a3   : > { %v8266_v28 = vrot.slane %v8265_v52, 2  ;;  %v8337_v43 = vadd.f32 %v8336_v31, %v8335_v50 }
 0x4a5   : > { %v8267_v56 = vadd.f32 %v8266_v28, %v8265_v52  ;;  %v8338_v24 = vrot.slane %v8337_v43, 2 }
 0x4a7   : > { %v8268_v4 = vrot.slane %v8267_v56, 1  ;;  %v8339_v60 = vadd.f32 %v8338_v24, %v8337_v43 }
 0x4a9   : > { %v8269_v29 = vadd.f32 %v8268_v4, %v8267_v56  ;;  %v8340_v53 = vrot.slane %v8339_v60, 1 }
 0x4ab   : > { %v8270_v25 = vadd.f32 %v8269_v29, %v8232_v57  ;;  %v8341_v61 = vadd.f32 %v8340_v53, %v8339_v60 }
 0x4ad   : > { %8271 = vst [vmem:[#allocation7] sm:$0x1] %v8270_v25  ;;  %v8342_v42 = vadd.f32 %v8341_v61, %v8272_v44 }
 0x4af   : > { %8343 = vst [vmem:[#allocation8] sm:$0x1] %v8342_v42 }
 0x4b0 PF: > { %p9939_p10 = scmp.ne.s32.totalorder %s12177_s25, 2 }
 0x4b1   : > { %v8896_v17 = vlaneseq (!%p9939_p10)  ;;  %v9940_v41 = vld [vmem:[%s12278_s16 + $0xc] sm:$0xf] (!%p9939_p10)  ;;  %v9941_v18 = vld [vmem:[%s12278_s16 + $0x10] sm:$0xf] (!%p9939_p10)  ;;  %vm8410_vm6 = vsmask.f32 (!%p9939_p10), 3328 }
 0x4b2   : > { %8347 = sbr.rel (%p9939_p10) target bundleno = 1320 (0x528), region = 68  ;;  %vm8411_vm7 = vsmask.f32 (!%p9939_p10), 7440  ;;  %v8414_v55 = vshrl.u32 (!%p9939_p10), %v9940_v41, 16  ;;  %v8417_v12 = vshll.u32 (!%p9939_p10), %v9940_v41, 16  ;;  %v8423_v33 = vshll.u32 (!%p9939_p10), %v9941_v18, 16 }
 0x4b3   : > { %v9942_v22 = vld [vmem:[%s12278_s16 + $0x14] sm:$0x1] (!%p9939_p10)  ;;  %v8427_v14 = vshrl.u32 (!%p9939_p10), %v9941_v18, 16  ;;  %v14870_v9 = vshrl.u32 (!%p9939_p10), %v8896_v17, 7  ;;  %v9943_v51 = vld [vmem:[%s12278_s16 + $0x18] sm:$0xf] (!%p9939_p10)  ;;  %vm14878_vm8 = vmor (!%p9939_p10), %vm8410_vm6, %vm8411_vm7 }
 0x4b4   : > { %v8348_v30 = vld [vmem:[#allocation7] sm:$0x1] (!%p9939_p10)  ;;  %v8433_v39 = vshll.u32 (!%p9939_p10), %v9942_v22, 16  ;;  %v8416_v38 = vrot.slane (!%p9939_p10), %v8414_v55, 4  ;;  %v8419_v13 = vrot.slane (!%p9939_p10), %v8417_v12, 5  ;;  %v8425_v16 = vrot.slane (!%p9939_p10), %v8423_v33, 5 }
 0x4b5   : > { %v14863_v7 = vmul.f32 (!%p9939_p10), 0.001953125, %v8348_v30  ;;  %v8898_v19 = vsub.s32 (!%p9939_p10), 0, %v14870_v9  ;;  %v8429_v6 = vrot.slane (!%p9939_p10), %v8427_v14, 4  ;;  %v9944_v40 = vld [vmem:[%s12278_s16 + $0x1c] sm:$0xf] (!%p9939_p10)  ;;  %v8438_v20 = vshrl.u32 (!%p9939_p10), %v9943_v51, 16 }
 0x4b6   : > { %v8350_v8 = vld [vmem:[#allocation8] sm:$0x1] (!%p9939_p10)  ;;  %v8435_v35 = vrot.slane (!%p9939_p10), %v8433_v39, 5  ;;  %v8420_v46 = vor.u32 (!%p9939_p10), %v8419_v13, %v8416_v38  ;;  %v8441_v37 = vshll.u32 (!%p9939_p10), %v9943_v51, 16  ;;  %v8447_v0 = vshll.u32 (!%p9939_p10), %v9944_v40, 16  ;;  %s9988_s25 = sshll.u32 (!%p9939_p10), %s12173_s24, 8 }
 0x4b7   : > { %v8351_v47 = vmul.f32 (!%p9939_p10), 0.001953125, %v8350_v8  ;;  %v8352_v3 = vmul.f32 (!%p9939_p10), %v14863_v7, %v14863_v7  ;;  %v9945_v10 = vld [vmem:[%s12278_s16 + $0x20] sm:$0x1] (!%p9939_p10)  ;;  %v8430_v34 = vor.u32 (!%p9939_p10), %v8429_v6, %v8425_v16  ;;  %v8440_v5 = vrot.slane (!%p9939_p10), %v8438_v20, 4  ;;  %v9946_v1 = vld [vmem:[%s12278_s16 + $0x24] sm:$0xf] (!%p9939_p10) }
 0x4b8   : > { %v8451_v11 = vshrl.u32 (!%p9939_p10), %v9944_v40, 16  ;;  %v8457_v48 = vshll.u32 (!%p9939_p10), %v9945_v10, 16  ;;  %v8421_v59 = vrot.slane (!%p9939_p10), %v8420_v46, 4  ;;  %v8443_v58 = vrot.slane (!%p9939_p10), %v8441_v37, 5  ;;  %v9947_v45 = vld [vmem:[%s12278_s16 + $0x28] sm:$0xf] (!%p9939_p10) }
 0x4b9   : > { %v8353_v15 = vsub.f32 %v8351_v47, %v8352_v3  ;;  %v8449_v32 = vrot.slane %v8447_v0, 5  ;;  %v8431_v36 = vrot.slane %v8430_v34, 4  ;;  %v8462_v2 = vshrl.u32 %v9946_v1, 16  ;;  %v9948_v50 = vld [vmem:[%s12278_s16 + $0x2c] sm:$0x1]  ;;  %s14916_s8 = scalar_lea.vmem [#allocation3], %s9988_s25 }
 0x4ba   : > { %v8453_v21 = vrot.slane %v8451_v11, 4  ;;  %v8459_v49 = vrot.slane %v8457_v48, 5  ;;  %v8426_v54 = vsel %vm14878_vm8, %v8421_v59, %v8425_v16  ;;  %v8444_v23 = vor.u32 %v8443_v58, %v8440_v5  ;;  %v9949_v52 = vld [vmem:[%s12278_s16 + $0x30] sm:$0xf]  ;;  %v9950_v24 = vld [vmem:[%s12278_s16 + $0x34] sm:$0xf] }
 0x4bb   : > { %v8355_v62 = vadd.f32 1e-05, %v8353_v15  ;;  %v8465_v26 = vshll.u32 %v9946_v1, 16  ;;  %v8471_v63 = vshll.u32 %v9947_v45, 16  ;;  %v14888_v31 = vunpack.c.l.bf16 %v8426_v54  ;;  %v9951_v47 = vld [vmem:[%s12278_s16 + $0x38] sm:$0x1] }
 0x4bc   : > { %v8436_v28 = vsel %vm14878_vm8, %v8431_v36, %v8435_v35  ;;  %v8454_v43 = vor.u32 %v8453_v21, %v8449_v32  ;;  %v8464_v56 = vrot.slane %v8462_v2, 4  ;;  %v8445_v60 = vrot.slane %v8444_v23, 4  ;;  %v9952_v12 = vld [vmem:[%s12278_s16 + $0x3c] sm:$0xf]  ;;  %v8354_v33 = vld [vmem:[%s15172_s5] sm:$0x1] }
 0x4bd   : > { %12149 = vrsqrt.f32 %v8355_v62  ;;  %v14893_v4 = vunpack.c.l.bf16 %v8436_v28  ;;  %v8467_v57 = vrot.slane %v8465_v26, 5  ;;  %v8473_v29 = vrot.slane %v8471_v63, 5  ;;  %v8358_v35 = vld [vmem:[%s15173_s6] sm:$0x1]  ;;  %v8864_v48 = vld [vmem:[%s14916_s8 + $0x8] sm:$0xff]  ;;  %v8865_v1 = vld [vmem:[%s14916_s8 + $0x10] sm:$0xff] }
 0x4be   : > { %v8455_v53 = vrot.slane %v8454_v43, 4  ;;  %v8475_v44 = vshrl.u32 %v9947_v45, 16  ;;  %v8481_v25 = vshll.u32 %v9948_v50, 16  ;;  %v8486_v61 = vshrl.u32 %v9949_v52, 16  ;;  %v8863_v0 = vld [vmem:[%s14916_s8] sm:$0xff]  ;;  %v8868_v23 = vld [vmem:[%s14916_s8 + $0x28] sm:$0xff] }
 0x4bf   : > { %v8450_v42 = vsel %vm14878_vm8, %v8445_v60, %v8449_v32  ;;  %v8468_v30 = vor.u32 %v8467_v57, %v8464_v56  ;;  %v8489_v8 = vshll.u32 %v9949_v52, 16  ;;  %v8495_v17 = vshll.u32 %v9950_v24, 16  ;;  %v14920_v11 = vld [vmem:[%s12278_s16 + $0x40] sm:$0xf]  ;;  %v8869_v52 = vld [vmem:[%s14916_s8 + $0x30] sm:$0xff]  ;;  %v8870_v28 = vld [vmem:[%s14916_s8 + $0x38] sm:$0xff] }
 0x4c0   : > { %v14899_v41 = vunpack.c.l.bf16 %v8450_v42  ;;  %v8460_v18 = vsel %vm14878_vm8, %v8455_v53, %v8459_v49  ;;  %v8477_v3 = vrot.slane %v8475_v44, 4  ;;  %v8483_v55 = vrot.slane %v8481_v25, 5  ;;  %v8866_v49 = vld [vmem:[%s14916_s8 + $0x18] sm:$0xff]  ;;  %v8867_v2 = vld [vmem:[%s14916_s8 + $0x20] sm:$0xff] }
 0x4c1   : > { %v14907_v22 = vunpack.c.l.bf16 %v8460_v18  ;;  %v8469_v14 = vrot.slane %v8468_v30, 4  ;;  %v8488_v39 = vrot.slane %v8486_v61, 4  ;;  %v8491_v51 = vrot.slane %v8489_v8, 5 }
 0x4c2   : > { %v8478_v15 = vor.u32 %v8477_v3, %v8473_v29  ;;  %v8497_v38 = vrot.slane %v8495_v17, 5  ;;  %v8499_v13 = vshrl.u32 %v9950_v24, 16  ;;  %v8505_v16 = vshll.u32 %v9951_v47, 16 }
 0x4c3   : > { %v8474_v40 = vsel %vm14878_vm8, %v8469_v14, %v8473_v29  ;;  %v8492_v20 = vor.u32 %v8491_v51, %v8488_v39  ;;  %v8510_v62 = vshrl.u32 %v9952_v12, 16  ;;  %v8513_v46 = vshll.u32 %v9952_v12, 16  ;;  %v8871_v29 = vld [vmem:[%s14916_s8 + $0x40] sm:$0xff] }
 0x4c4   : > { %v8833_v10 = vunpack.c.l.bf16 %v8474_v40  ;;  %v8479_v34 = vrot.slane %v8478_v15, 4  ;;  %v8501_v5 = vrot.slane %v8499_v13, 4  ;;  %v8507_v58 = vrot.slane %v8505_v16, 5 }
 0x4c5   : > { %v8493_v59 = vrot.slane %v8492_v20, 4  ;;  %v8512_v32 = vrot.slane %v8510_v62, 4  ;;  %v8515_v45 = vrot.slane %v8513_v46, 5  ;;  %v8523_v3 = vshrl.u32 %v14920_v11, 16  ;;  %v9954_v46 = vld [vmem:[%s12278_s16 + $0x44] sm:$0x1] }
 0x4c6   : > { %v8484_v54 = vsel %vm14878_vm8, %v8479_v34, %v8483_v55  ;;  %v8502_v26 = vor.u32 %v8501_v5, %v8497_v38 }
 0x4c7   : > { %v12150_v6 = vpop.eup %12149  ;;  %v8834_v63 = vunpack.c.l.bf16 %v8484_v54  ;;  %v8498_v50 = vsel %vm14878_vm8, %v8493_v59, %v8497_v38  ;;  %v8516_v43 = vor.u32 %v8515_v45, %v8512_v32  ;;  %v8529_v32 = vshll.u32 %v9954_v46, 16  ;;  %v8873_v54 = vld [vmem:[%s14916_s8 + $0x50] sm:$0xff] }
 0x4c8   : > { %v8357_v37 = vmul.f32 %v12150_v6, %v8354_v33  ;;  %v8835_v61 = vunpack.c.l.bf16 %v8498_v50  ;;  %v8503_v8 = vrot.slane %v8502_v26, 4 }
 0x4c9   : > { %v8517_v47 = vrot.slane %v8516_v43, 4  ;;  %v8531_v26 = vrot.slane %v8529_v32, 5 }
 0x4ca   : > { %v8359_v36 = vmul.f32 %v8357_v37, %v14863_v7  ;;  %v14927_v21 = vrot.slane %v8357_v37, %v8898_v19  ;;  %v8519_v7 = vshll.u32 %v14920_v11, 16  ;;  %v8508_v15 = vsel %vm14878_vm8, %v8503_v8, %v8507_v58  ;;  %v8872_v37 = vld [vmem:[%s14916_s8 + $0x48] sm:$0xff] }
 0x4cb   : > { %v8836_v62 = vunpack.c.l.bf16 %v8508_v15  ;;  %v8525_v58 = vrot.slane %v8523_v3, 4  ;;  %v9959_v3 = vld [vmem:[%s12278_s16 + $0x58] sm:$0xf] }
 0x4cc   : > { %v8360_v56 = vsub.f32 %v8358_v35, %v8359_v36  ;;  %v8901_v24 = vmul.f32 %v14927_v21, %v8863_v0  ;;  %v8902_v60 = vmul.f32 %v14927_v21, %v8864_v48  ;;  %v8903_v57 = vmul.f32 %v14927_v21, %v8865_v1  ;;  %v9956_v48 = vld [vmem:[%s12278_s16 + $0x4c] sm:$0xf] }
 0x4cd   : > { %v8904_v53 = vmul.f32 %v14927_v21, %v8866_v49  ;;  %v8905_v44 = vmul.f32 %v14927_v21, %v8867_v2  ;;  %v8906_v25 = vmul.f32 %v14927_v21, %v8868_v23  ;;  %v8907_v30 = vmul.f32 %v14927_v21, %v8869_v52  ;;  %v9957_v52 = vld [vmem:[%s12278_s16 + $0x50] sm:$0x1] }
 0x4ce   : > { %v14948_v42 = vrot.slane %v8360_v56, %v8898_v19  ;;  %v8908_v17 = vmul.f32 %v14927_v21, %v8870_v28  ;;  %v8521_v18 = vrot.slane %v8519_v7, 5  ;;  %v8909_v55 = vmul.f32 %v14927_v21, %v8871_v29  ;;  %v8874_v28 = vld [vmem:[%s14916_s8 + $0x58] sm:$0xff] }
 0x4cf   : > { %v8910_v49 = vmul.f32 %v14927_v21, %v8872_v37  ;;  %v8543_v50 = vshll.u32 %v9956_v48, 16  ;;  %v8912_v8 = vmul.f32 %v14927_v21, %v8874_v28  ;;  %v9963_v28 = vld [vmem:[%s12278_s16 + $0x68] sm:$0x1] }
 0x4d0   : > { %v8939_v12 = vadd.f32 %v14948_v42, %v8901_v24  ;;  %v8940_v33 = vadd.f32 %v14948_v42, %v8902_v60  ;;  %v8941_v9 = vadd.f32 %v14948_v42, %v8903_v57  ;;  %v8942_v19 = vadd.f32 %v14948_v42, %v8904_v53  ;;  %v9958_v60 = vld [vmem:[%s12278_s16 + $0x54] sm:$0xf] }
 0x4d1   : > { %v8943_v14 = vadd.f32 %v14948_v42, %v8905_v44  ;;  %v8944_v39 = vadd.f32 %v14948_v42, %v8906_v25  ;;  %v8945_v51 = vadd.f32 %v14948_v42, %v8907_v30  ;;  %v8946_v11 = vadd.f32 %v14948_v42, %v8908_v17 }
 0x4d2   : > { %v8971_v38 = vadd.f32 %v8939_v12, %v14888_v31  ;;  %v8972_v13 = vadd.f32 %v8940_v33, %v14893_v4  ;;  %v8973_v16 = vadd.f32 %v8941_v9, %v14899_v41  ;;  %v8974_v6 = vadd.f32 %v8942_v19, %v14907_v22  ;;  %v9955_v41 = vld [vmem:[%s12278_s16 + $0x48] sm:$0xf]  ;;  %v8875_v12 = vld [vmem:[%s14916_s8 + $0x60] sm:$0xff] }
 0x4d3   : > { %v8975_v35 = vadd.f32 %v8943_v14, %v8833_v10  ;;  %v8976_v40 = vadd.f32 %v8944_v39, %v8834_v63  ;;  %v8977_v20 = vadd.f32 %v8945_v51, %v8835_v61  ;;  %v8522_v1 = vsel %vm14878_vm8, %v8517_v47, %v8521_v18  ;;  %v9960_v39 = vld [vmem:[%s12278_s16 + $0x5c] sm:$0x1] }
 0x4d4   : > { %v9003_v0 = vmax.f32 %v8971_v38, 0.0  ;;  %v9004_v34 = vmax.f32 %v8972_v13, 0.0  ;;  %v9005_v31 = vmax.f32 %v8973_v16, 0.0  ;;  %v9006_v4 = vmax.f32 %v8974_v6, 0.0 }
 0x4d5   : > { %v9007_v22 = vmax.f32 %v8975_v35, 0.0  ;;  %v9008_v5 = vmax.f32 %v8976_v40, 0.0  ;;  %v9009_v10 = vmax.f32 %v8977_v20, 0.0  ;;  %v8947_v59 = vadd.f32 %v14948_v42, %v8909_v55 }
 0x4d6   : > { %9035 = vst [vmem:[%s12273_s13] sm:$0xff] %v9003_v0  ;;  %9036 = vst [vmem:[%s12273_s13 + $0x8] sm:$0xff] %v9004_v34  ;;  %v8978_v45 = vadd.f32 %v8946_v11, %v8836_v62  ;;  %v8837_v36 = vunpack.c.l.bf16 %v8522_v1  ;;  %v8534_v2 = vshrl.u32 %v9955_v41, 16  ;;  %v8526_v23 = vor.u32 %v8525_v58, %v8521_v18  ;;  %v8876_v0 = vld [vmem:[%s14916_s8 + $0x68] sm:$0xff]  ;;  %v9961_v34 = vld [vmem:[%s12278_s16 + $0x60] sm:$0xf] }
 0x4d7   : > { %9037 = vst [vmem:[%s12273_s13 + $0x10] sm:$0xff] %v9005_v31  ;;  %9038 = vst [vmem:[%s12273_s13 + $0x18] sm:$0xff] %v9006_v4  ;;  %v8537_v63 = vshll.u32 %v9955_v41, 16  ;;  %v8948_v56 = vadd.f32 %v14948_v42, %v8910_v49  ;;  %v8545_v53 = vrot.slane %v8543_v50, 5  ;;  %v8547_v44 = vshrl.u32 %v9956_v48, 16 }
 0x4d8   : > { %9039 = vst [vmem:[%s12273_s13 + $0x20] sm:$0xff] %v9007_v22  ;;  %9040 = vst [vmem:[%s12273_s13 + $0x28] sm:$0xff] %v9008_v5  ;;  %v9010_v43 = vmax.f32 %v8978_v45, 0.0  ;;  %v8979_v7 = vadd.f32 %v8947_v59, %v8837_v36  ;;  %v8536_v24 = vrot.slane %v8534_v2, 4  ;;  %v8527_v57 = vrot.slane %v8526_v23, 4  ;;  %v8877_v23 = vld [vmem:[%s14916_s8 + $0x70] sm:$0xff] }
 0x4d9   : > { %9041 = vst [vmem:[%s12273_s13 + $0x30] sm:$0xff] %v9009_v10  ;;  %v8539_v29 = vrot.slane %v8537_v63, 5  ;;  %v8911_v61 = vmul.f32 %v14927_v21, %v8873_v54  ;;  %v8553_v30 = vshll.u32 %v9957_v52, 16  ;;  %v8549_v18 = vrot.slane %v8547_v44, 4  ;;  %v9962_v5 = vld [vmem:[%s12278_s16 + $0x64] sm:$0xf] }
 0x4da   : > { %9042 = vst [vmem:[%s12273_s13 + $0x38] sm:$0xff] %v9010_v43  ;;  %v9011_v25 = vmax.f32 %v8979_v7, 0.0  ;;  %v8532_v17 = vsel %vm14878_vm8, %v8527_v57, %v8531_v26  ;;  %v8558_v55 = vshrl.u32 %v9958_v60, 16  ;;  %v8950_v14 = vadd.f32 %v14948_v42, %v8912_v8  ;;  %v8878_v43 = vld [vmem:[%s14916_s8 + $0x78] sm:$0xff] }
 0x4db   : > { %v8540_v47 = vor.u32 %v8539_v29, %v8536_v24  ;;  %v8838_v33 = vunpack.c.l.bf16 %v8532_v17  ;;  %v8949_v9 = vadd.f32 %v14948_v42, %v8911_v61  ;;  %v8555_v19 = vrot.slane %v8553_v30, 5 }
 0x4dc   : > { %9043 = vst [vmem:[%s12273_s13 + $0x40] sm:$0xff] %v9011_v25  ;;  %v8550_v15 = vor.u32 %v8549_v18, %v8545_v53  ;;  %v8560_v38 = vrot.slane %v8558_v55, 4  ;;  %v8561_v13 = vshll.u32 %v9958_v60, 16  ;;  %v8567_v6 = vshll.u32 %v9959_v3, 16  ;;  %v9964_v25 = vld [vmem:[%s12278_s16 + $0x6c] sm:$0xf] }
 0x4dd   : > { %v8541_v51 = vrot.slane %v8540_v47, 4  ;;  %v8980_v16 = vadd.f32 %v8948_v56, %v8838_v33  ;;  %v8571_v35 = vshrl.u32 %v9959_v3, 16  ;;  %v8913_v40 = vmul.f32 %v14927_v21, %v8875_v12  ;;  %v9965_v12 = vld [vmem:[%s12278_s16 + $0x70] sm:$0xf] }
 0x4de   : > { %v8551_v62 = vrot.slane %v8550_v15, 4  ;;  %v8563_v46 = vrot.slane %v8561_v13, 5  ;;  %v8577_v37 = vshll.u32 %v9960_v39, 16  ;;  %v8569_v41 = vrot.slane %v8567_v6, 5  ;;  %v8879_v13 = vld [vmem:[%s14916_s8 + $0x80] sm:$0xff] }
 0x4df   : > { %v8546_v20 = vsel %vm14878_vm8, %v8541_v51, %v8545_v53  ;;  %v9012_v31 = vmax.f32 %v8980_v16, 0.0  ;;  %v8951_v22 = vadd.f32 %v14948_v42, %v8913_v40  ;;  %v8573_v48 = vrot.slane %v8571_v35, 4  ;;  %v9966_v16 = vld [vmem:[%s12278_s16 + $0x74] sm:$0x1] }
 0x4e0   : > { %v8839_v4 = vunpack.c.l.bf16 %v8546_v20  ;;  %v8556_v10 = vsel %vm14878_vm8, %v8551_v62, %v8555_v19  ;;  %v8564_v11 = vor.u32 %v8563_v46, %v8560_v38  ;;  %v8579_v1 = vrot.slane %v8577_v37, 5  ;;  %v8880_v62 = vld [vmem:[%s14916_s8 + $0x88] sm:$0xff] }
 0x4e1   : > { %9044 = vst [vmem:[%s12273_s13 + $0x48] sm:$0xff] %v9012_v31  ;;  %v8840_v58 = vunpack.c.l.bf16 %v8556_v10  ;;  %v8914_v32 = vmul.f32 %v14927_v21, %v8876_v0  ;;  %v8582_v45 = vshrl.u32 %v9961_v34, 16  ;;  %v8574_v49 = vor.u32 %v8573_v48, %v8569_v41 }
 0x4e2   : > { %v8981_v59 = vadd.f32 %v8949_v9, %v8839_v4  ;;  %v8565_v36 = vrot.slane %v8564_v11, 4  ;;  %v8585_v2 = vshll.u32 %v9961_v34, 16  ;;  %v8591_v54 = vshll.u32 %v9962_v5, 16 }
 0x4e3   : > { %v8982_v63 = vadd.f32 %v8950_v14, %v8840_v58  ;;  %v8952_v50 = vadd.f32 %v14948_v42, %v8914_v32  ;;  %v8584_v52 = vrot.slane %v8582_v45, 4  ;;  %v8575_v56 = vrot.slane %v8574_v49, 4  ;;  %v8881_v49 = vld [vmem:[%s14916_s8 + $0x90] sm:$0xff] }
 0x4e4   : > { %v9013_v26 = vmax.f32 %v8981_v59, 0.0  ;;  %v8570_v7 = vsel %vm14878_vm8, %v8565_v36, %v8569_v41  ;;  %v8587_v24 = vrot.slane %v8585_v2, 5  ;;  %v8593_v60 = vrot.slane %v8591_v54, 5  ;;  %v9968_v59 = vld [vmem:[%s12278_s16 + $0x7c] sm:$0xf] }
 0x4e5   : > { %v9014_v57 = vmax.f32 %v8982_v63, 0.0  ;;  %v8841_v29 = vunpack.c.l.bf16 %v8570_v7  ;;  %v8595_v53 = vshrl.u32 %v9962_v5, 16  ;;  %v8915_v44 = vmul.f32 %v14927_v21, %v8877_v23  ;;  %v9967_v5 = vld [vmem:[%s12278_s16 + $0x78] sm:$0xf] }
 0x4e6   : > { %9045 = vst [vmem:[%s12273_s13 + $0x50] sm:$0xff] %v9013_v26  ;;  %v8580_v61 = vsel %vm14878_vm8, %v8575_v56, %v8579_v1  ;;  %v8588_v30 = vor.u32 %v8587_v24, %v8584_v52  ;;  %v8601_v8 = vshll.u32 %v9963_v28, 16  ;;  %v8916_v17 = vmul.f32 %v14927_v21, %v8878_v43 }
 0x4e7   : > { %9046 = vst [vmem:[%s12273_s13 + $0x58] sm:$0xff] %v9014_v57  ;;  %v8983_v47 = vadd.f32 %v8951_v22, %v8841_v29  ;;  %v8842_v18 = vunpack.c.l.bf16 %v8580_v61  ;;  %v8953_v3 = vadd.f32 %v14948_v42, %v8915_v44  ;;  %v8597_v55 = vrot.slane %v8595_v53, 4  ;;  %v8882_v57 = vld [vmem:[%s14916_s8 + $0x98] sm:$0xff]  ;;  %v9970_v61 = vld [vmem:[%s12278_s16 + $0x84] sm:$0xf] }
 0x4e8   : > { %v8589_v33 = vrot.slane %v8588_v30, 4  ;;  %v8603_v9 = vrot.slane %v8601_v8, 5  ;;  %v8954_v19 = vadd.f32 %v14948_v42, %v8916_v17  ;;  %v8606_v14 = vshrl.u32 %v9964_v25, 16 }
 0x4e9   : > { %v9015_v39 = vmax.f32 %v8983_v47, 0.0  ;;  %v8984_v51 = vadd.f32 %v8952_v50, %v8842_v18  ;;  %v8598_v15 = vor.u32 %v8597_v55, %v8593_v60  ;;  %v8609_v38 = vshll.u32 %v9964_v25, 16 }
 0x4ea   : > { %v8594_v6 = vsel %vm14878_vm8, %v8589_v33, %v8593_v60  ;;  %v8608_v35 = vrot.slane %v8606_v14, 4  ;;  %v8615_v40 = vshll.u32 %v9965_v12, 16  ;;  %v8619_v20 = vshrl.u32 %v9965_v12, 16  ;;  %v9969_v60 = vld [vmem:[%s12278_s16 + $0x80] sm:$0x1] }
 0x4eb   : > { %9047 = vst [vmem:[%s12273_s13 + $0x60] sm:$0xff] %v9015_v39  ;;  %v9016_v46 = vmax.f32 %v8984_v51, 0.0  ;;  %v8843_v37 = vunpack.c.l.bf16 %v8594_v6  ;;  %v8599_v0 = vrot.slane %v8598_v15, 4  ;;  %v8611_v34 = vrot.slane %v8609_v38, 5  ;;  %v8883_v51 = vld [vmem:[%s14916_s8 + $0xa0] sm:$0xff] }
 0x4ec   : > { %v8617_v31 = vrot.slane %v8615_v40, 5  ;;  %v8917_v4 = vmul.f32 %v14927_v21, %v8879_v13  ;;  %v8621_v41 = vrot.slane %v8619_v20, 4  ;;  %v8625_v22 = vshll.u32 %v9966_v16, 16  ;;  %v9972_v6 = vld [vmem:[%s12278_s16 + $0x8c] sm:$0x1] }
 0x4ed   : > { %9048 = vst [vmem:[%s12273_s13 + $0x68] sm:$0xff] %v9016_v46  ;;  %v8985_v10 = vadd.f32 %v8953_v3, %v8843_v37  ;;  %v8604_v11 = vsel %vm14878_vm8, %v8599_v0, %v8603_v9  ;;  %v8612_v48 = vor.u32 %v8611_v34, %v8608_v35  ;;  %v8918_v1 = vmul.f32 %v14927_v21, %v8880_v62 }
 0x4ee   : > { %v8844_v58 = vunpack.c.l.bf16 %v8604_v11  ;;  %v8955_v32 = vadd.f32 %v14948_v42, %v8917_v4  ;;  %v8622_v45 = vor.u32 %v8621_v41, %v8617_v31  ;;  %v8627_v36 = vrot.slane %v8625_v22, 5 }
 0x4ef   : > { %v9017_v2 = vmax.f32 %v8985_v10, 0.0  ;;  %v8613_v54 = vrot.slane %v8612_v48, 4  ;;  %v8956_v23 = vadd.f32 %v14948_v42, %v8918_v1  ;;  %v8630_v26 = vshrl.u32 %v9967_v5, 16  ;;  %v9973_v10 = vld [vmem:[%s12278_s16 + $0x90] sm:$0xf] }
 0x4f0   : > { %v8986_v63 = vadd.f32 %v8954_v19, %v8844_v58  ;;  %v8623_v50 = vrot.slane %v8622_v45, 4  ;;  %v8633_v52 = vshll.u32 %v9967_v5, 16  ;;  %v8639_v28 = vshll.u32 %v9968_v59, 16  ;;  %v9971_v19 = vld [vmem:[%s12278_s16 + $0x88] sm:$0xf] }
 0x4f1   : > { %9049 = vst [vmem:[%s12273_s13 + $0x70] sm:$0xff] %v9017_v2  ;;  %v8618_v43 = vsel %vm14878_vm8, %v8613_v54, %v8617_v31  ;;  %v8632_v7 = vrot.slane %v8630_v26, 4  ;;  %v8643_v56 = vshrl.u32 %v9968_v59, 16  ;;  %v8919_v24 = vmul.f32 %v14927_v21, %v8881_v49  ;;  %v8884_v31 = vld [vmem:[%s14916_s8 + $0xa8] sm:$0xff]  ;;  %v9974_v58 = vld [vmem:[%s12278_s16 + $0x94] sm:$0xf] }
 0x4f2   : > { %v9018_v29 = vmax.f32 %v8986_v63, 0.0  ;;  %v8845_v53 = vunpack.c.l.bf16 %v8618_v43  ;;  %v8628_v44 = vsel %vm14878_vm8, %v8623_v50, %v8627_v36  ;;  %v8635_v25 = vrot.slane %v8633_v52, 5  ;;  %v8885_v63 = vld [vmem:[%s14916_s8 + $0xb0] sm:$0xff] }
 0x4f3   : > { %v8846_v30 = vunpack.c.l.bf16 %v8628_v44  ;;  %v8641_v8 = vrot.slane %v8639_v28, 5  ;;  %v8957_v17 = vadd.f32 %v14948_v42, %v8919_v24  ;;  %v8645_v47 = vrot.slane %v8643_v56, 4  ;;  %v8886_v56 = vld [vmem:[%s14916_s8 + $0xb8] sm:$0xff] }
 0x4f4   : > { %9050 = vst [vmem:[%s12273_s13 + $0x78] sm:$0xff] %v9018_v29  ;;  %v8987_v18 = vadd.f32 %v8955_v32, %v8845_v53  ;;  %v8636_v3 = vor.u32 %v8635_v25, %v8632_v7  ;;  %v8649_v55 = vshll.u32 %v9969_v60, 16  ;;  %v8920_v12 = vmul.f32 %v14927_v21, %v8882_v57  ;;  %v9975_v7 = vld [vmem:[%s12278_s16 + $0x98] sm:$0x1] }
 0x4f5   : > { %v8988_v33 = vadd.f32 %v8956_v23, %v8846_v30  ;;  %v8646_v9 = vor.u32 %v8645_v47, %v8641_v8  ;;  %v8654_v14 = vshrl.u32 %v9970_v61, 16  ;;  %v8657_v39 = vshll.u32 %v9970_v61, 16  ;;  %v9976_v30 = vld [vmem:[%s12278_s16 + $0x9c] sm:$0xf] }
 0x4f6   : > { %v9019_v15 = vmax.f32 %v8987_v18, 0.0  ;;  %v8637_v38 = vrot.slane %v8636_v3, 4  ;;  %v8651_v13 = vrot.slane %v8649_v55, 5  ;;  %v8958_v16 = vadd.f32 %v14948_v42, %v8920_v12 }
 0x4f7   : > { %v9020_v35 = vmax.f32 %v8988_v33, 0.0  ;;  %v8647_v40 = vrot.slane %v8646_v9, 4  ;;  %v8656_v20 = vrot.slane %v8654_v14, 4  ;;  %v8659_v62 = vrot.slane %v8657_v39, 5  ;;  %v9977_v9 = vld [vmem:[%s12278_s16 + $0xa0] sm:$0xf] }
 0x4f8   : > { %9051 = vst [vmem:[%s12273_s13 + $0x80] sm:$0xff] %v9019_v15  ;;  %v8642_v46 = vsel %vm14878_vm8, %v8637_v38, %v8641_v8  ;;  %v8663_v37 = vshll.u32 %v9971_v19, 16  ;;  %v8667_v0 = vshrl.u32 %v9971_v19, 16  ;;  %v8921_v34 = vmul.f32 %v14927_v21, %v8883_v51  ;;  %v8887_v19 = vld [vmem:[%s14916_s8 + $0xc0] sm:$0xff] }
 0x4f9   : > { %9052 = vst [vmem:[%s12273_s13 + $0x88] sm:$0xff] %v9020_v35  ;;  %v8847_v4 = vunpack.c.l.bf16 %v8642_v46  ;;  %v8652_v41 = vsel %vm14878_vm8, %v8647_v40, %v8651_v13  ;;  %v8660_v22 = vor.u32 %v8659_v62, %v8656_v20  ;;  %v8673_v5 = vshll.u32 %v9972_v6, 16  ;;  %v9978_v46 = vld [vmem:[%s12278_s16 + $0xa4] sm:$0x1] }
 0x4fa   : > { %v8848_v11 = vunpack.c.l.bf16 %v8652_v41  ;;  %v8665_v48 = vrot.slane %v8663_v37, 5  ;;  %v8959_v1 = vadd.f32 %v14948_v42, %v8921_v34  ;;  %v8669_v59 = vrot.slane %v8667_v0, 4  ;;  %v8888_v37 = vld [vmem:[%s14916_s8 + $0xc8] sm:$0xff] }
 0x4fb   : > { %v8989_v32 = vadd.f32 %v8957_v17, %v8847_v4  ;;  %v8661_v45 = vrot.slane %v8660_v22, 4  ;;  %v8675_v36 = vrot.slane %v8673_v5, 5  ;;  %v8922_v49 = vmul.f32 %v14927_v21, %v8884_v31  ;;  %v9979_v41 = vld [vmem:[%s12278_s16 + $0xa8] sm:$0xf] }
 0x4fc   : > { %v8990_v2 = vadd.f32 %v8958_v16, %v8848_v11  ;;  %v8670_v54 = vor.u32 %v8669_v59, %v8665_v48  ;;  %v8678_v23 = vshrl.u32 %v9973_v10, 16  ;;  %v8681_v26 = vshll.u32 %v9973_v10, 16 }
 0x4fd   : > { %v9021_v50 = vmax.f32 %v8989_v32, 0.0  ;;  %v8666_v52 = vsel %vm14878_vm8, %v8661_v45, %v8665_v48  ;;  %v8960_v28 = vadd.f32 %v14948_v42, %v8922_v49  ;;  %v8687_v43 = vshll.u32 %v9974_v58, 16  ;;  %v9980_v49 = vld [vmem:[%s12278_s16 + $0xac] sm:$0xf] }
 0x4fe   : > { %v9022_v24 = vmax.f32 %v8990_v2, 0.0  ;;  %v8849_v60 = vunpack.c.l.bf16 %v8666_v52  ;;  %v8671_v57 = vrot.slane %v8670_v54, 4  ;;  %v8680_v29 = vrot.slane %v8678_v23, 4 }
 0x4ff   : > { %9053 = vst [vmem:[%s12273_s13 + $0x90] sm:$0xff] %v9021_v50  ;;  %v8683_v53 = vrot.slane %v8681_v26, 5  ;;  %v8689_v44 = vrot.slane %v8687_v43, 5  ;;  %v8691_v25 = vshrl.u32 %v9974_v58, 16  ;;  %v8923_v61 = vmul.f32 %v14927_v21, %v8885_v63  ;;  %v8889_v50 = vld [vmem:[%s14916_s8 + $0xd0] sm:$0xff] }
 0x500   : > { %9054 = vst [vmem:[%s12273_s13 + $0x98] sm:$0xff] %v9022_v24  ;;  %v8991_v8 = vadd.f32 %v8959_v1, %v8849_v60  ;;  %v8676_v17 = vsel %vm14878_vm8, %v8671_v57, %v8675_v36  ;;  %v8697_v47 = vshll.u32 %v9975_v7, 16  ;;  %v8924_v18 = vmul.f32 %v14927_v21, %v8886_v56 }
 0x501   : > { %v8850_v3 = vunpack.c.l.bf16 %v8676_v17  ;;  %v8684_v55 = vor.u32 %v8683_v53, %v8680_v29  ;;  %v8961_v12 = vadd.f32 %v14948_v42, %v8923_v61  ;;  %v8693_v33 = vrot.slane %v8691_v25, 4  ;;  %v9981_v29 = vld [vmem:[%s12278_s16 + $0xb0] sm:$0x1]  ;;  %v8890_v53 = vld [vmem:[%s14916_s8 + $0xd8] sm:$0xff] }
 0x502   : > { %v9023_v14 = vmax.f32 %v8991_v8, 0.0  ;;  %v8699_v39 = vrot.slane %v8697_v47, 5  ;;  %v8962_v51 = vadd.f32 %v14948_v42, %v8924_v18  ;;  %v8702_v15 = vshrl.u32 %v9976_v30, 16  ;;  %v9982_v8 = vld [vmem:[%s12278_s16 + $0xb4] sm:$0xf] }
 0x503   : > { %v8992_v38 = vadd.f32 %v8960_v28, %v8850_v3  ;;  %v8685_v13 = vrot.slane %v8684_v55, 4  ;;  %v8694_v16 = vor.u32 %v8693_v33, %v8689_v44  ;;  %v8705_v6 = vshll.u32 %v9976_v30, 16 }
 0x504   : > { %9055 = vst [vmem:[%s12273_s13 + $0xa0] sm:$0xff] %v9023_v14  ;;  %v8704_v35 = vrot.slane %v8702_v15, 4  ;;  %v8711_v40 = vshll.u32 %v9977_v9, 16  ;;  %v8715_v20 = vshrl.u32 %v9977_v9, 16  ;;  %v8925_v62 = vmul.f32 %v14927_v21, %v8887_v19 }
 0x505   : > { %v9024_v0 = vmax.f32 %v8992_v38, 0.0  ;;  %v8690_v34 = vsel %vm14878_vm8, %v8685_v13, %v8689_v44  ;;  %v8695_v31 = vrot.slane %v8694_v16, 4  ;;  %v8707_v4 = vrot.slane %v8705_v6, 5 }
 0x506   : > { %v8851_v22 = vunpack.c.l.bf16 %v8690_v34  ;;  %v8713_v5 = vrot.slane %v8711_v40, 5  ;;  %v8963_v10 = vadd.f32 %v14948_v42, %v8925_v62  ;;  %v8717_v11 = vrot.slane %v8715_v20, 4  ;;  %v9984_v40 = vld [vmem:[%s12278_s16 + $0xbc] sm:$0x1] }
 0x507   : > { %9056 = vst [vmem:[%s12273_s13 + $0xa8] sm:$0xff] %v9024_v0  ;;  %v8700_v48 = vsel %vm14878_vm8, %v8695_v31, %v8699_v39  ;;  %v8708_v1 = vor.u32 %v8707_v4, %v8704_v35  ;;  %v8721_v59 = vshll.u32 %v9978_v46, 16  ;;  %v8926_v58 = vmul.f32 %v14927_v21, %v8888_v37  ;;  %v8891_v35 = vld [vmem:[%s14916_s8 + $0xe0] sm:$0xff] }
 0x508   : > { %v8993_v32 = vadd.f32 %v8961_v12, %v8851_v22  ;;  %v8852_v45 = vunpack.c.l.bf16 %v8700_v48  ;;  %v8718_v36 = vor.u32 %v8717_v11, %v8713_v5  ;;  %v8726_v2 = vshrl.u32 %v9979_v41, 16  ;;  %v9985_v11 = vld [vmem:[%s12278_s16 + $0xc0] sm:$0xf] }
 0x509   : > { %v8709_v54 = vrot.slane %v8708_v1, 4  ;;  %v8723_v23 = vrot.slane %v8721_v59, 5  ;;  %v8964_v26 = vadd.f32 %v14948_v42, %v8926_v58  ;;  %v8729_v63 = vshll.u32 %v9979_v41, 16  ;;  %v8892_v41 = vld [vmem:[%s14916_s8 + $0xe8] sm:$0xff] }
 0x50a   : > { %v9025_v52 = vmax.f32 %v8993_v32, 0.0  ;;  %v8994_v28 = vadd.f32 %v8962_v51, %v8852_v45  ;;  %v8719_v43 = vrot.slane %v8718_v36, 4  ;;  %v8728_v7 = vrot.slane %v8726_v2, 4  ;;  %v9983_v51 = vld [vmem:[%s12278_s16 + $0xb8] sm:$0xf] }
 0x50b   : > { %v8714_v56 = vsel %vm14878_vm8, %v8709_v54, %v8713_v5  ;;  %v8731_v24 = vrot.slane %v8729_v63, 5  ;;  %v8735_v60 = vshll.u32 %v9980_v49, 16  ;;  %v8739_v57 = vshrl.u32 %v9980_v49, 16  ;;  %v9986_v32 = vld [vmem:[%s12278_s16 + $0xc4] sm:$0xf] }
 0x50c   : > { %9057 = vst [vmem:[%s12273_s13 + $0xb0] sm:$0xff] %v9025_v52  ;;  %v9026_v44 = vmax.f32 %v8994_v28, 0.0  ;;  %v8853_v25 = vunpack.c.l.bf16 %v8714_v56  ;;  %v8724_v61 = vsel %vm14878_vm8, %v8719_v43, %v8723_v23  ;;  %v8927_v30 = vmul.f32 %v14927_v21, %v8889_v50  ;;  %v9987_v56 = vld [vmem:[%s12278_s16 + $0xc8] sm:$0x1] }
 0x50d   : > { %v8854_v17 = vunpack.c.l.bf16 %v8724_v61  ;;  %v8732_v47 = vor.u32 %v8731_v24, %v8728_v7  ;;  %v8737_v18 = vrot.slane %v8735_v60, 5  ;;  %v8741_v3 = vrot.slane %v8739_v57, 4  ;;  %v8893_v7 = vld [vmem:[%s14916_s8 + $0xf0] sm:$0xff] }
 0x50e   : > { %9058 = vst [vmem:[%s12273_s13 + $0xb8] sm:$0xff] %v9026_v44  ;;  %v8995_v55 = vadd.f32 %v8963_v10, %v8853_v25  ;;  %v8965_v12 = vadd.f32 %v14948_v42, %v8927_v30  ;;  %v8745_v33 = vshll.u32 %v9981_v29, 16  ;;  %v8928_v9 = vmul.f32 %v14927_v21, %v8890_v53  ;;  %v8894_v29 = vld [vmem:[%s14916_s8 + $0xf8] sm:$0xff] }
 0x50f   : > { %v8996_v19 = vadd.f32 %v8964_v26, %v8854_v17  ;;  %v8733_v14 = vrot.slane %v8732_v47, 4  ;;  %v8742_v39 = vor.u32 %v8741_v3, %v8737_v18  ;;  %v8750_v15 = vshrl.u32 %v9982_v8, 16 }
 0x510   : > { %v9027_v38 = vmax.f32 %v8995_v55, 0.0  ;;  %v8747_v13 = vrot.slane %v8745_v33, 5  ;;  %v8966_v16 = vadd.f32 %v14948_v42, %v8928_v9  ;;  %v8753_v6 = vshll.u32 %v9982_v8, 16 }
 0x511   : > { %v9028_v20 = vmax.f32 %v8996_v19, 0.0  ;;  %v8738_v62 = vsel %vm14878_vm8, %v8733_v14, %v8737_v18  ;;  %v8743_v46 = vrot.slane %v8742_v39, 4  ;;  %v8752_v37 = vrot.slane %v8750_v15, 4 }
 0x512   : > { %9059 = vst [vmem:[%s12273_s13 + $0xc0] sm:$0xff] %v9027_v38  ;;  %v8855_v0 = vunpack.c.l.bf16 %v8738_v62  ;;  %v8755_v34 = vrot.slane %v8753_v6, 5  ;;  %v8759_v31 = vshll.u32 %v9983_v51, 16  ;;  %v8763_v4 = vshrl.u32 %v9983_v51, 16 }
 0x513   : > { %9060 = vst [vmem:[%s12273_s13 + $0xc8] sm:$0xff] %v9028_v20  ;;  %v8748_v22 = vsel %vm14878_vm8, %v8743_v46, %v8747_v13  ;;  %v8929_v5 = vmul.f32 %v14927_v21, %v8891_v35  ;;  %v8769_v10 = vshll.u32 %v9984_v40, 16  ;;  %v8930_v2 = vmul.f32 %v14927_v21, %v8892_v41 }
 0x514   : > { %v8997_v48 = vadd.f32 %v8965_v12, %v8855_v0  ;;  %v8856_v1 = vunpack.c.l.bf16 %v8748_v22  ;;  %v8756_v59 = vor.u32 %v8755_v34, %v8752_v37  ;;  %v8761_v58 = vrot.slane %v8759_v31, 5 }
 0x515   : > { %v8967_v45 = vadd.f32 %v14948_v42, %v8929_v5  ;;  %v8765_v36 = vrot.slane %v8763_v4, 4  ;;  %v8771_v49 = vrot.slane %v8769_v10, 5  ;;  %v8774_v63 = vshrl.u32 %v9985_v11, 16 }
 0x516   : > { %v9029_v54 = vmax.f32 %v8997_v48, 0.0  ;;  %v8998_v23 = vadd.f32 %v8966_v16, %v8856_v1  ;;  %v8757_v26 = vrot.slane %v8756_v59, 4  ;;  %v8777_v52 = vshll.u32 %v9985_v11, 16 }
 0x517   : > { %v8766_v50 = vor.u32 %v8765_v36, %v8761_v58  ;;  %v8783_v28 = vshll.u32 %v9986_v32, 16  ;;  %v8787_v43 = vshrl.u32 %v9986_v32, 16  ;;  %v8776_v57 = vrot.slane %v8774_v63, 4 }
 0x518   : > { %9061 = vst [vmem:[%s12273_s13 + $0xd0] sm:$0xff] %v9029_v54  ;;  %v9030_v24 = vmax.f32 %v8998_v23, 0.0  ;;  %v8762_v60 = vsel %vm14878_vm8, %v8757_v26, %v8761_v58  ;;  %v8779_v25 = vrot.slane %v8777_v52, 5  ;;  %v8968_v30 = vadd.f32 %v14948_v42, %v8930_v2 }
 0x519   : > { %v8857_v53 = vunpack.c.l.bf16 %v8762_v60  ;;  %v8767_v44 = vrot.slane %v8766_v50, 4  ;;  %v8785_v61 = vrot.slane %v8783_v28, 5  ;;  %v8931_v8 = vmul.f32 %v14927_v21, %v8893_v7 }
 0x51a   : > { %9062 = vst [vmem:[%s12273_s13 + $0xd8] sm:$0xff] %v9030_v24  ;;  %v8789_v17 = vrot.slane %v8787_v43, 4  ;;  %v8793_v47 = vshll.u32 %v9987_v56, 16  ;;  %v8780_v55 = vor.u32 %v8779_v25, %v8776_v57  ;;  %v8932_v12 = vmul.f32 %v14927_v21, %v8894_v29 }
 0x51b   : > { %v8999_v18 = vadd.f32 %v8967_v45, %v8857_v53  ;;  %v8772_v3 = vsel %vm14878_vm8, %v8767_v44, %v8771_v49  ;;  %v8969_v15 = vadd.f32 %v14948_v42, %v8931_v8 }
 0x51c   : > { %v8858_v33 = vunpack.c.l.bf16 %v8772_v3  ;;  %v8790_v9 = vor.u32 %v8789_v17, %v8785_v61  ;;  %v8795_v19 = vrot.slane %v8793_v47, 5  ;;  %v8781_v39 = vrot.slane %v8780_v55, 4 }
 0x51d   : > { %v9031_v14 = vmax.f32 %v8999_v18, 0.0  ;;  %v8970_v16 = vadd.f32 %v14948_v42, %v8932_v12 }
 0x51e   : > { %v9000_v51 = vadd.f32 %v8968_v30, %v8858_v33  ;;  %v8791_v38 = vrot.slane %v8790_v9, 4  ;;  %v8786_v13 = vsel %vm14878_vm8, %v8781_v39, %v8785_v61 }
 0x51f   : > { %9063 = vst [vmem:[%s12273_s13 + $0xe0] sm:$0xff] %v9031_v14  ;;  %v8859_v21 = vunpack.c.l.bf16 %v8786_v13 }
 0x520   : > { %v9032_v6 = vmax.f32 %v9000_v51, 0.0  ;;  %v8796_v35 = vsel %vm14878_vm8, %v8791_v38, %v8795_v19 }
 0x521   : > { %v8860_v40 = vunpack.c.l.bf16 %v8796_v35  ;;  %v9001_v20 = vadd.f32 %v8969_v15, %v8859_v21 }
 0x522   : > { %9064 = vst [vmem:[%s12273_s13 + $0xe8] sm:$0xff] %v9032_v6 }
 0x523   : > { %v9002_v62 = vadd.f32 %v8970_v16, %v8860_v40  ;;  %v9033_v46 = vmax.f32 %v9001_v20, 0.0 }
 0x525   : > { %v9034_v37 = vmax.f32 %v9002_v62, 0.0  ;;  %9065 = vst [vmem:[%s12273_s13 + $0xf0] sm:$0xff] %v9033_v46 }
 0x527   : > { %9066 = vst [vmem:[%s12273_s13 + $0xf8] sm:$0xff] %v9034_v37 }
 0x528 PF: > { %s17_s28 = sadd.s32 1, %s12189_s28   ;;  %s15243_s24 = smov %s12181_s26 }
 0x529   : > { %p14_p11 = scmp.ge.s32.totalorder %s17_s28, 8   ;;  %s15244_s25 = smov %s12185_s27 }
 0x52a   : > { %s15245_s26 = smov %s15248_s29  ;;  %s15246_s27 = smov %s15252_s30 }
 0x52b   :  { %16 = sbr.rel (!%p14_p11) target bundleno = 3 (0x3), region = 123 }

</bundles_post_ra>
